<compile_context>
chip_gen: v7x
topology: tpu7x:2x2x1
jax: 0.10.0
libtpu: 0.0.40
codegen_flags: <defaults>
</compile_context>

<pallas_src>
import functools

import jax
import jax.numpy as jnp
from jax.experimental import pallas as pl
from jax.experimental.pallas import tpu as pltpu

FC_DIM = 2048
BN_EPS = 1e-5
LRELU_SLOPE = 0.02


def _bn_lrelu(x, gamma, beta):
    """Training-mode BatchNorm1d over the batch axis (biased variance, like
    torch), with the affine folded into one scale/shift, then LeakyReLU."""
    mean = jnp.mean(x, axis=0, keepdims=True)
    var = jnp.mean(jnp.square(x - mean), axis=0, keepdims=True)
    scale = gamma * jax.lax.rsqrt(var + BN_EPS)
    shift = beta - mean * scale
    y = x * scale + shift
    return jnp.where(y > 0, y, LRELU_SLOPE * y)


def inf_high_fc_kernel(z_ref,
                       w1_ref, g1_ref, be1_ref,
                       w2_ref, g2_ref, be2_ref,
                       w3_ref,
                       out_ref):
    # --- Layer 1 over the full hidden width (tiny; recomputed per grid step,
    # which is negligible vs. the layer-2 weight DMA) ---
    h1 = jnp.dot(z_ref[...].astype(jnp.bfloat16), w1_ref[...],
                 preferred_element_type=jnp.float32)
    h1 = _bn_lrelu(h1, g1_ref[...], be1_ref[...])

    # --- Layer 2: this grid step's slice of the hidden features.
    # BN stats are per-feature, so no cross-step/cross-core exchange needed. ---
    h2 = jnp.dot(h1.astype(jnp.bfloat16), w2_ref[...],
                 preferred_element_type=jnp.float32)
    h2 = _bn_lrelu(h2, g2_ref[...], be2_ref[...])

    # --- Layer 3: partial contribution from this hidden slice (matching rows
    # of w3). Partials are summed (+ b3) in the wrapper. ---
    out_ref[...] = jnp.dot(h2.astype(jnp.bfloat16), w3_ref[...],
                           preferred_element_type=jnp.float32)


@functools.partial(jax.jit, static_argnames=("batch_size", "num_splits"))
def inf_high_fc(z, params, *, batch_size, num_splits=2):
    # glue: z.view(batch_size, -1)
    z2d = z.reshape(batch_size, -1).astype(jnp.float32)
    (w1, b1, g1, be1, w2, b2, g2, be2, w3, b3) = params
    del b1, b2  # exactly cancelled by the train-mode BN mean subtraction
    nz = w1.shape[0]
    no = w3.shape[1]
    assert FC_DIM % num_splits == 0
    half = FC_DIM // num_splits
    B = batch_size

    flops = 2 * B * (nz * FC_DIM + FC_DIM * FC_DIM + FC_DIM * no)
    bytes_accessed = (
        (nz * FC_DIM + FC_DIM * FC_DIM + FC_DIM * no) * 2   # bf16 weights
        + 4 * FC_DIM * 4                                     # BN gamma/beta f32
        + B * nz * 4 + num_splits * B * no * 4)              # activations

    partials = pl.pallas_call(
        inf_high_fc_kernel,
        out_shape=jax.ShapeDtypeStruct((num_splits, B, no), jnp.float32),
        grid=(num_splits,),
        in_specs=[
            pl.BlockSpec((B, nz), lambda i: (0, 0)),           # z (full)
            pl.BlockSpec((nz, FC_DIM), lambda i: (0, 0)),      # w1 (full)
            pl.BlockSpec((1, FC_DIM), lambda i: (0, 0)),       # gamma1
            pl.BlockSpec((1, FC_DIM), lambda i: (0, 0)),       # beta1
            pl.BlockSpec((FC_DIM, half), lambda i: (0, i)),    # w2 column slice
            pl.BlockSpec((1, half), lambda i: (0, i)),         # gamma2 slice
            pl.BlockSpec((1, half), lambda i: (0, i)),         # beta2 slice
            pl.BlockSpec((half, no), lambda i: (i, 0)),        # w3 row slice
        ],
        out_specs=pl.BlockSpec((None, B, no), lambda i: (i, 0, 0)),
        compiler_params=pltpu.CompilerParams(
            dimension_semantics=("parallel",),
            vmem_limit_bytes=32 << 20,
        ),
        cost_estimate=pl.CostEstimate(
            flops=flops, transcendentals=0, bytes_accessed=bytes_accessed),
    )(z2d, w1, g1, be1, w2, g2, be2, w3)

    # Tiny (num_splits, B, no) reduction + output bias outside the kernel.
    return jnp.sum(partials, axis=0) + b3


def init_params(key, nz, no):
    """Deterministic synthetic parameters (shapes match the PyTorch module).
    Linear weights are pre-transposed to (in, out) and stored as bf16."""
    ks = jax.random.split(key, 6)

    def lin(k, fan_in, fan_out):
        kw, kb = jax.random.split(k)
        scale = 1.0 / jnp.sqrt(fan_in)
        w = jax.random.uniform(kw, (fan_in, fan_out), jnp.float32, -scale, scale)
        b = jax.random.uniform(kb, (1, fan_out), jnp.float32, -scale, scale)
        return w.astype(jnp.bfloat16), b  # weights streamed as bf16

    w1, b1 = lin(ks[0], nz, FC_DIM)
    w2, b2 = lin(ks[1], FC_DIM, FC_DIM)
    w3, b3 = lin(ks[2], FC_DIM, no)
    # BatchNorm affine params, slightly perturbed so the affine path is live.
    g1 = 1.0 + 0.01 * jax.random.normal(ks[3], (1, FC_DIM), jnp.float32)
    be1 = 0.01 * jax.random.normal(ks[4], (1, FC_DIM), jnp.float32)
    g2 = 1.0 + 0.01 * jax.random.normal(ks[5], (1, FC_DIM), jnp.float32)
    be2 = 0.01 * jax.random.normal(jax.random.fold_in(key, 7), (1, FC_DIM),
                                   jnp.float32)
    return (w1, b1, g1, be1, w2, b2, g2, be2, w3, b3)


def reference_forward(z, params, batch_size):
    """Pure-JAX f32 reference mirroring the PyTorch forward (train-mode BN),
    including the b1/b2 biases that the kernel drops (they cancel exactly)."""
    (w1, b1, g1, be1, w2, b2, g2, be2, w3, b3) = params
    hp = jax.lax.Precision.HIGHEST
    x = z.reshape(batch_size, -1).astype(jnp.float32)

    def bn_lrelu(x, gamma, beta):
        mean = jnp.mean(x, axis=0, keepdims=True)
        var = jnp.mean((x - mean) ** 2, axis=0, keepdims=True)
        y = (x - mean) * jax.lax.rsqrt(var + BN_EPS) * gamma + beta
        return jnp.where(y > 0, y, LRELU_SLOPE * y)

    h = jnp.dot(x, w1.astype(jnp.float32), precision=hp) + b1
    h = bn_lrelu(h, g1, be1)
    h = jnp.dot(h, w2.astype(jnp.float32), precision=hp) + b2
    h = bn_lrelu(h, g2, be2)
    return jnp.dot(h, w3.astype(jnp.float32), precision=hp) + b3


if __name__ == "__main__":
    batch_size = 8
    nz = 64
    no = 32

    key = jax.random.PRNGKey(0)
    k_z, k_p = jax.random.split(key)
    # Input z shaped like a latent tensor (B, nz, 1, 1); forward flattens it.
    z = jax.random.normal(k_z, (batch_size, nz, 1, 1), jnp.float32)
    params = init_params(k_p, nz, no)

    out = inf_high_fc(z, params, batch_size=batch_size)
    out = jax.block_until_ready(out)

    ref = reference_forward(z, params, batch_size)
    assert out.shape == (batch_size, no)
    # Weights are bf16 and the kernel feeds the MXU bf16 activations with f32
    # accumulation, so compare against the f32 reference at relaxed tolerance.
    assert jnp.allclose(out, ref, atol=2e-2, rtol=2e-2), "mismatch vs reference"
    print("KERNEL_OK")
</pallas_src>

<mosaic_0001>
module attributes {stable_mosaic.version = 11 : i64} {
  func.func @inf_high_fc_kernel(%arg0: i32, %arg1: memref<8x64xf32, #tpu.memory_space<vmem>>, %arg2: memref<64x2048xbf16, #tpu.memory_space<vmem>>, %arg3: memref<1x2048xf32, #tpu.memory_space<vmem>>, %arg4: memref<1x2048xf32, #tpu.memory_space<vmem>>, %arg5: memref<2048x1024xbf16, #tpu.memory_space<vmem>>, %arg6: memref<1x1024xf32, #tpu.memory_space<vmem>>, %arg7: memref<1x1024xf32, #tpu.memory_space<vmem>>, %arg8: memref<1024x32xbf16, #tpu.memory_space<vmem>>, %arg9: memref<1x8x32xf32, #tpu.memory_space<vmem>>) attributes {dimension_semantics = [#tpu.dimension_semantics<parallel>], iteration_bounds = array<i64: 2>, scalar_prefetch = 0 : i64, scratch_operands = 0 : i64, tpu.core_type = #tpu.core_type<tc>, window_params = [{pipeline_mode = #tpu.pipeline_mode<synchronous>, transform_indices = @transform_0, window_bounds = array<i64: 8, 64>}, {pipeline_mode = #tpu.pipeline_mode<synchronous>, transform_indices = @transform_1, window_bounds = array<i64: 64, 2048>}, {pipeline_mode = #tpu.pipeline_mode<synchronous>, transform_indices = @transform_2, window_bounds = array<i64: 1, 2048>}, {pipeline_mode = #tpu.pipeline_mode<synchronous>, transform_indices = @transform_3, window_bounds = array<i64: 1, 2048>}, {transform_indices = @transform_4, window_bounds = array<i64: 2048, 1024>}, {transform_indices = @transform_5, window_bounds = array<i64: 1, 1024>}, {transform_indices = @transform_6, window_bounds = array<i64: 1, 1024>}, {transform_indices = @transform_7, window_bounds = array<i64: 1024, 32>}, {transform_indices = @transform_8, window_bounds = array<i64: 1, 8, 32>}]} {
    %c0 = arith.constant 0 : index
    %c0_0 = arith.constant 0 : index
    %0 = vector.load %arg1[%c0, %c0_0] : memref<8x64xf32, #tpu.memory_space<vmem>>, vector<8x64xf32>
    %1 = arith.truncf %0 : vector<8x64xf32> to vector<8x64xbf16>
    %c0_1 = arith.constant 0 : index
    %c0_2 = arith.constant 0 : index
    %2 = vector.load %arg2[%c0_1, %c0_2] : memref<64x2048xbf16, #tpu.memory_space<vmem>>, vector<64x2048xbf16>
    %cst = arith.constant dense<0.000000e+00> : vector<8x2048xf32>
    %3 = tpu.matmul %1, %2, %cst {dimension_numbers = #tpu.dot_dimension_numbers<[1], [0], [0], [1], [0, 0, 1, 1], [], []>} : vector<8x64xbf16>, vector<64x2048xbf16>, vector<8x2048xf32> -> vector<8x2048xf32>
    %c0_3 = arith.constant 0 : index
    %c0_4 = arith.constant 0 : index
    %4 = vector.load %arg3[%c0_3, %c0_4] : memref<1x2048xf32, #tpu.memory_space<vmem>>, vector<1x2048xf32>
    %c0_5 = arith.constant 0 : index
    %c0_6 = arith.constant 0 : index
    %5 = vector.load %arg4[%c0_5, %c0_6] : memref<1x2048xf32, #tpu.memory_space<vmem>>, vector<1x2048xf32>
    %cst_7 = arith.constant dense<0.000000e+00> : vector<2048xf32>
    %6 = vector.multi_reduction <add>, %3, %cst_7 [0] : vector<8x2048xf32> to vector<2048xf32>
    %7 = vector.shape_cast %6 : vector<2048xf32> to vector<1x2048xf32>
    %cst_8 = arith.constant 8.000000e+00 : f32
    %8 = vector.broadcast %cst_8 : f32 to vector<1x2048xf32>
    %9 = arith.divf %7, %8 : vector<1x2048xf32>
    %10 = vector.broadcast %9 : vector<1x2048xf32> to vector<8x2048xf32>
    %11 = arith.subf %3, %10 : vector<8x2048xf32>
    %12 = arith.mulf %11, %11 : vector<8x2048xf32>
    %cst_9 = arith.constant dense<0.000000e+00> : vector<2048xf32>
    %13 = vector.multi_reduction <add>, %12, %cst_9 [0] : vector<8x2048xf32> to vector<2048xf32>
    %14 = vector.shape_cast %13 : vector<2048xf32> to vector<1x2048xf32>
    %cst_10 = arith.constant 8.000000e+00 : f32
    %15 = vector.broadcast %cst_10 : f32 to vector<1x2048xf32>
    %16 = arith.divf %14, %15 : vector<1x2048xf32>
    %cst_11 = arith.constant 9.99999974E-6 : f32
    %17 = vector.broadcast %cst_11 : f32 to vector<1x2048xf32>
    %18 = arith.addf %16, %17 : vector<1x2048xf32>
    %19 = math.rsqrt %18 : vector<1x2048xf32>
    %20 = arith.mulf %4, %19 : vector<1x2048xf32>
    %21 = arith.mulf %9, %20 : vector<1x2048xf32>
    %22 = arith.subf %5, %21 : vector<1x2048xf32>
    %23 = vector.broadcast %20 : vector<1x2048xf32> to vector<8x2048xf32>
    %24 = arith.mulf %3, %23 : vector<8x2048xf32>
    %25 = vector.broadcast %22 : vector<1x2048xf32> to vector<8x2048xf32>
    %26 = arith.addf %24, %25 : vector<8x2048xf32>
    %cst_12 = arith.constant 0.000000e+00 : f32
    %27 = vector.broadcast %cst_12 : f32 to vector<8x2048xf32>
    %28 = arith.cmpf ogt, %26, %27 : vector<8x2048xf32>
    %cst_13 = arith.constant 2.000000e-02 : f32
    %29 = vector.broadcast %cst_13 : f32 to vector<8x2048xf32>
    %30 = arith.mulf %29, %26 : vector<8x2048xf32>
    %31 = arith.select %28, %26, %30 : vector<8x2048xi1>, vector<8x2048xf32>
    %32 = arith.truncf %31 : vector<8x2048xf32> to vector<8x2048xbf16>
    %c0_14 = arith.constant 0 : index
    %c0_15 = arith.constant 0 : index
    %33 = vector.load %arg5[%c0_14, %c0_15] : memref<2048x1024xbf16, #tpu.memory_space<vmem>>, vector<2048x1024xbf16>
    %cst_16 = arith.constant dense<0.000000e+00> : vector<8x1024xf32>
    %34 = tpu.matmul %32, %33, %cst_16 {dimension_numbers = #tpu.dot_dimension_numbers<[1], [0], [0], [1], [0, 0, 1, 1], [], []>} : vector<8x2048xbf16>, vector<2048x1024xbf16>, vector<8x1024xf32> -> vector<8x1024xf32>
    %c0_17 = arith.constant 0 : index
    %c0_18 = arith.constant 0 : index
    %35 = vector.load %arg6[%c0_17, %c0_18] : memref<1x1024xf32, #tpu.memory_space<vmem>>, vector<1x1024xf32>
    %c0_19 = arith.constant 0 : index
    %c0_20 = arith.constant 0 : index
    %36 = vector.load %arg7[%c0_19, %c0_20] : memref<1x1024xf32, #tpu.memory_space<vmem>>, vector<1x1024xf32>
    %cst_21 = arith.constant dense<0.000000e+00> : vector<1024xf32>
    %37 = vector.multi_reduction <add>, %34, %cst_21 [0] : vector<8x1024xf32> to vector<1024xf32>
    %38 = vector.shape_cast %37 : vector<1024xf32> to vector<1x1024xf32>
    %cst_22 = arith.constant 8.000000e+00 : f32
    %39 = vector.broadcast %cst_22 : f32 to vector<1x1024xf32>
    %40 = arith.divf %38, %39 : vector<1x1024xf32>
    %41 = vector.broadcast %40 : vector<1x1024xf32> to vector<8x1024xf32>
    %42 = arith.subf %34, %41 : vector<8x1024xf32>
    %43 = arith.mulf %42, %42 : vector<8x1024xf32>
    %cst_23 = arith.constant dense<0.000000e+00> : vector<1024xf32>
    %44 = vector.multi_reduction <add>, %43, %cst_23 [0] : vector<8x1024xf32> to vector<1024xf32>
    %45 = vector.shape_cast %44 : vector<1024xf32> to vector<1x1024xf32>
    %cst_24 = arith.constant 8.000000e+00 : f32
    %46 = vector.broadcast %cst_24 : f32 to vector<1x1024xf32>
    %47 = arith.divf %45, %46 : vector<1x1024xf32>
    %cst_25 = arith.constant 9.99999974E-6 : f32
    %48 = vector.broadcast %cst_25 : f32 to vector<1x1024xf32>
    %49 = arith.addf %47, %48 : vector<1x1024xf32>
    %50 = math.rsqrt %49 : vector<1x1024xf32>
    %51 = arith.mulf %35, %50 : vector<1x1024xf32>
    %52 = arith.mulf %40, %51 : vector<1x1024xf32>
    %53 = arith.subf %36, %52 : vector<1x1024xf32>
    %54 = vector.broadcast %51 : vector<1x1024xf32> to vector<8x1024xf32>
    %55 = arith.mulf %34, %54 : vector<8x1024xf32>
    %56 = vector.broadcast %53 : vector<1x1024xf32> to vector<8x1024xf32>
    %57 = arith.addf %55, %56 : vector<8x1024xf32>
    %cst_26 = arith.constant 0.000000e+00 : f32
    %58 = vector.broadcast %cst_26 : f32 to vector<8x1024xf32>
    %59 = arith.cmpf ogt, %57, %58 : vector<8x1024xf32>
    %cst_27 = arith.constant 2.000000e-02 : f32
    %60 = vector.broadcast %cst_27 : f32 to vector<8x1024xf32>
    %61 = arith.mulf %60, %57 : vector<8x1024xf32>
    %62 = arith.select %59, %57, %61 : vector<8x1024xi1>, vector<8x1024xf32>
    %63 = arith.truncf %62 : vector<8x1024xf32> to vector<8x1024xbf16>
    %c0_28 = arith.constant 0 : index
    %c0_29 = arith.constant 0 : index
    %64 = vector.load %arg8[%c0_28, %c0_29] : memref<1024x32xbf16, #tpu.memory_space<vmem>>, vector<1024x32xbf16>
    %cst_30 = arith.constant dense<0.000000e+00> : vector<8x32xf32>
    %65 = tpu.matmul %63, %64, %cst_30 {dimension_numbers = #tpu.dot_dimension_numbers<[1], [0], [0], [1], [0, 0, 1, 1], [], []>} : vector<8x1024xbf16>, vector<1024x32xbf16>, vector<8x32xf32> -> vector<8x32xf32>
    %c0_31 = arith.constant 0 : index
    %c0_32 = arith.constant 0 : index
    %c0_33 = arith.constant 0 : index
    %66 = vector.load %arg9[%c0_31, %c0_32, %c0_33] : memref<1x8x32xf32, #tpu.memory_space<vmem>>, vector<1x8x32xf32>
    %67 = vector.shape_cast %66 : vector<1x8x32xf32> to vector<8x32xf32>
    %68 = vector.shape_cast %65 : vector<8x32xf32> to vector<1x8x32xf32>
    tpu.vector_store %arg9[%c0_31, %c0_32, %c0_33], %68 {strides = array<i32>} : memref<1x8x32xf32, #tpu.memory_space<vmem>>, vector<1x8x32xf32>,
    return
  }
  func.func @transform_0(%arg0: i32) -> (i32, i32) {
    %c0_i32 = arith.constant 0 : i32
    %c0_i32_0 = arith.constant 0 : i32
    %c0_i32_1 = arith.constant 0 : i32
    return %c0_i32, %c0_i32_0 : i32, i32
  }
  func.func @transform_1(%arg0: i32) -> (i32, i32) {
    %c0_i32 = arith.constant 0 : i32
    %c0_i32_0 = arith.constant 0 : i32
    %c0_i32_1 = arith.constant 0 : i32
    return %c0_i32, %c0_i32_0 : i32, i32
  }
  func.func @transform_2(%arg0: i32) -> (i32, i32) {
    %c0_i32 = arith.constant 0 : i32
    %c0_i32_0 = arith.constant 0 : i32
    %c0_i32_1 = arith.constant 0 : i32
    return %c0_i32, %c0_i32_0 : i32, i32
  }
  func.func @transform_3(%arg0: i32) -> (i32, i32) {
    %c0_i32 = arith.constant 0 : i32
    %c0_i32_0 = arith.constant 0 : i32
    %c0_i32_1 = arith.constant 0 : i32
    return %c0_i32, %c0_i32_0 : i32, i32
  }
  func.func @transform_4(%arg0: i32) -> (i32, i32) {
    %c0_i32 = arith.constant 0 : i32
    %c0_i32_0 = arith.constant 0 : i32
    return %c0_i32, %arg0 : i32, i32
  }
  func.func @transform_5(%arg0: i32) -> (i32, i32) {
    %c0_i32 = arith.constant 0 : i32
    %c0_i32_0 = arith.constant 0 : i32
    return %c0_i32, %arg0 : i32, i32
  }
  func.func @transform_6(%arg0: i32) -> (i32, i32) {
    %c0_i32 = arith.constant 0 : i32
    %c0_i32_0 = arith.constant 0 : i32
    return %c0_i32, %arg0 : i32, i32
  }
  func.func @transform_7(%arg0: i32) -> (i32, i32) {
    %c0_i32 = arith.constant 0 : i32
    %c0_i32_0 = arith.constant 0 : i32
    return %arg0, %c0_i32 : i32, i32
  }
  func.func @transform_8(%arg0: i32) -> (i32, i32, i32) {
    %c0_i32 = arith.constant 0 : i32
    %c0_i32_0 = arith.constant 0 : i32
    %c0_i32_1 = arith.constant 0 : i32
    return %arg0, %c0_i32, %c0_i32_0 : i32, i32, i32
  }
}

</mosaic_0001>

<bundles_post_ra>
// kernel: inf_high_fc.1
= control target key start
LH: loop header
LB: loop body
LE: loop exit
PB: predicated region body
PF: predicated region fallthrough
CT: control target
= control target key end

     0   :  { %s14669_s0 = inlined_call_operand.hbm [shape: f32[8,64], index: 0, kind: input, shape index: {}]   ;;  %s14670_s1 = inlined_call_operand.hbm [shape: bf16[64,2048], index: 1, kind: input, shape index: {}]   ;;  %s14671_s2 = inlined_call_operand.hbm [shape: f32[1,2048], index: 2, kind: input, shape index: {}]   ;;  %s14672_s3 = inlined_call_operand.hbm [shape: f32[1,2048], index: 3, kind: input, shape index: {}]   ;;  %s14673_s4 = inlined_call_operand.hbm [shape: bf16[2048,2048], index: 4, kind: input, shape index: {}]   ;;  %s14674_s5 = inlined_call_operand.hbm [shape: f32[1,2048], index: 5, kind: input, shape index: {}]   ;;  %s14675_s6 = inlined_call_operand.hbm [shape: f32[1,2048], index: 6, kind: input, shape index: {}]   ;;  %s14676_s7 = inlined_call_operand.vmem [shape: bf16[2048,32], index: 7, kind: input, shape index: {}]   ;;  %s14677_s8 = inlined_call_operand.vmem [shape: f32[2,8,32], index: 8, kind: output, shape index: {}]  }
   0x1   :  { %14706 = sst [smem:[#allocation30_spill]] %s14669_s0 }
   0x2   :  { %14707 = sst [smem:[#allocation31_spill]] %s14673_s4 }
   0x3   :  { %14708 = sst [smem:[#allocation32_spill]] %s14676_s7 }
   0x4   :  { %14709 = sst [smem:[#allocation33_spill]] %s14677_s8 }
   0x5   :  { %13 = vsyncpa [#allocation3], 0 }
   0x6   :  { %14 = vsyncpa [#allocation5], 0 }
   0x7   :  { %15 = vsyncpa [#allocation8], 0  ;;  %s12588_s27 = smov 0   ;;  %s12590_s28 = smov 0  }
   0x8   :  { %s12592_s29 = smov 0   ;;  %s12594_s30 = smov 0  }
   0x9 LB: > { %s12607_s9 = sadd.s32 4294967295, %s12528_s30   ;;  %s12610_s10 = sadd.s32 1, %s12528_s30   ;;  %s12528_s30 = sphi %s12594_s30, %s14766_s30   ;;  %s12524_s29 = sphi %s12592_s29, %s14770_s29   ;;  %s12520_s28 = sphi %s12590_s28, %s14769_s28   ;;  %s12516_s27 = sphi %s12588_s27, %s14768_s27  }
   0xa   : > { %14710 = sst [smem:[#allocation16_spill]] %s12610_s10  ;;  %s109_s11 = ssub.s32 %s12528_s30, %s12610_s10 }
   0xb   : > { %s112_s12 = sadd.s32 1, %s12524_s29  ;;  %p110_p0 = scmp.eq.s32.totalorder %s109_s11, 0 }
   0xc   : > { %p119_p1 = scmp.ne.s32.totalorder %s12524_s29, %s12520_s28  ;;  %p120_p2 = scmp.eq.s32.totalorder %s12528_s30, 0 }
   0xd   : > { %p125_p3 = scmp.ne.s32.totalorder %s12520_s28, %s12516_s27  ;;  %p14678_p5 = scmp.eq.s32.totalorder %s12607_s9, 0 }
   0xe   : > { %s12620_s13 = scalar_select %p110_p0, %s12524_s29, %s112_s12  }
   0xf   : > { %p12622_p4 = por %p120_p2, %p119_p1  ;;  %p10681_p6 = scmp.ge.s32.totalorder %s12528_s30, 1 }
  0x10   : > { %14711 = sst [smem:[#allocation17_spill]] %s12620_s13  ;;  %p240_p7 = scmp.lt.s32.totalorder %s12528_s30, 3 }
  0x11   : > { %p12631_p8 = por %p14678_p5, %p125_p3  ;;  %s12530_s17 = smov [#allocation2]  }
  0x12   : > { %p12635_p9 = pnand %p10681_p6, %p240_p7  ;;  %s253_s18 = sshll.u32 %s12530_s17, 4  ;;  %s254_s18 = int_to_ptr.vmem [resolvable:$true] %s253_s18 }
  0x13   : > { %s14713_s15 = scalar_select %p12631_p8, 1, 0 }
  0x14   : > { %s14715_s16 = scalar_select %p12635_p9, 1, 0 }
  0x15   : > { %14714 = sst [smem:[#allocation18_spill]] %s14713_s15  ;;  %p12094_p10 = pneg %p12635_p9 }
  0x16   : > { %p12121_p11 = scmp.lt.s32.totalorder %s12528_s30, 2  ;;  %s299_s20 = sand.u32 1, %s12528_s30  }
  0x17   : > { %p12644_p12 = pnand %p12094_p10, %p14678_p5  ;;  %s14686_s22 = sand.u32 1, %s12524_s29  }
  0x18   : > { %p12651_p13 = pnand %p12121_p11, %p12622_p4  ;;  %s14718_s0 = sld [smem:[#allocation30_spill]] }
  0x19   : > { %s14716_s19 = scalar_select %p12644_p12, 1, 0 }
  0x1a   : > { %s14717_s21 = scalar_select %p12651_p13, 1, 0 }
  0x1b   : > { %p12664_p1 = pneg %p12644_p12 }
  0x1d   : > { %s14719_s11 = scalar_select %p12664_p1, 1, 0 }
  0x1e   : > { %s12280_s25 = scalar_lea.hbm %s14718_s0, 128 }
  0x1f   : > { %p12281_p0 = scmp.ne.s32.totalorder %s14718_s0, %s12280_s25  ;;  %p12287_p4 = scmp.lt.u32.totalorder %s12280_s25, %s14718_s0 }
  0x21   : > { %p12283_p2 = pnand %p12664_p1, %p12281_p0 }
  0x23   : > { %p12284_p3 = pneg %p12283_p2 }
  0x25   : > { %p12289_p6 = pnand %p12287_p4, %p12284_p3 }
  0x27   : > { %12292 = shalt.err (!%p12289_p6)
}
  0x28   : > { %s12293_s17 = scalar_lea.vmem %s254_s18, 128  ;;  %p12301_p5 = scmp.lt.s32.totalorder %s254_s18, %s254_s18 }
  0x29   : > { %p12294_p7 = scmp.ne.s32.totalorder %s254_s18, %s12293_s17  ;;  %p12302_p8 = scmp.lt.s32.totalorder %s12293_s17, %s12293_s17 }
  0x2b   : > { %p12296_p10 = pnand %p12294_p7, %p12664_p1  ;;  %p12303_p9 = por %p12302_p8, %p12301_p5 }
  0x2d   : > { %p12297_p11 = pneg %p12296_p10 }
  0x2f   : > { %p12304_p13 = pnand %p12303_p9, %p12297_p11 }
  0x31   : > { %12307 = shalt.err (!%p12304_p13)
}
  0x32   : > { %12097 = dma.hbm_to_vmem [thread:$0]  (!%p12644_p12), %s14718_s0, 128, %s254_s18, [#allocation3]  }
  0x33   : > { %s10687_s25 = sshll.u32 %s14686_s22, 13  ;;  %s11869_s26 = sshll.u32 %s12528_s30, 9 }
  0x34   : > { %s14720_s4 = sld [smem:[#allocation31_spill]]  ;;  %s303_s17 = scalar_lea.vmem [#allocation9], %s10687_s25 }
  0x35   : > { %s310_s13 = sshll.u32 %s303_s17, 4  ;;  %s12690_s23 = scalar_lea.sflag [#allocation3], %s299_s20  ;;  %s12688_s13 = int_to_ptr.vmem [resolvable:$true] %s310_s13 }
  0x36   : > { %p14721_p8 = scmp.ne.s32.totalorder %s14717_s21, 0 }
  0x38   : > { %p12696_p9 = pneg %p14721_p8 }
  0x3a   : > { %s12686_s14 = scalar_lea.hbm %s14720_s4, %s11869_s26  ;;  %s12313_s25 = scalar_lea.hbm %s14720_s4, 262144 }
  0x3b   : > { %s12308_s24 = scalar_lea.hbm %s12686_s14, 131072  ;;  %p12314_p2 = scmp.lt.u32.totalorder %s12686_s14, %s14720_s4 }
  0x3c   : > { %p12309_p5 = scmp.ne.s32.totalorder %s12686_s14, %s12308_s24  ;;  %p12315_p3 = scmp.lt.u32.totalorder %s12313_s25, %s12308_s24 }
  0x3d   : > { %s14722_s18 = scalar_select %p12696_p9, 1, 0 }
  0x3e   : > { %p12311_p13 = pnand %p12696_p9, %p12309_p5  ;;  %p12316_p4 = por %p12315_p3, %p12314_p2 }
  0x3f   : > { %p12317_p6 = scmp.lt.u32.totalorder %s12308_s24, %s12686_s14 }
  0x40   : > { %p12312_p0 = pneg %p12311_p13 }
  0x41   : > { %p12318_p7 = por %p12317_p6, %p12316_p4 }
  0x43   : > { %p12319_p10 = pnand %p12318_p7, %p12312_p0 }
  0x45   : > { %12322 = shalt.err (!%p12319_p10)
}
  0x46   : > { %s12323_s20 = scalar_lea.vmem %s12688_s13, 131072  ;;  %s12531_s26 = smov [#allocation9]  }
  0x47   : > { %p12324_p11 = scmp.ne.s32.totalorder %s12688_s13, %s12323_s20  ;;  %s12328_s27 = sshll.u32 %s12531_s26, 4  ;;  %s12329_s27 = int_to_ptr.vmem [resolvable:$false] %s12328_s27 }
  0x48   : > { %s12330_s12 = scalar_lea.vmem %s12329_s27, 262144  ;;  %p12331_p12 = scmp.lt.s32.totalorder %s12688_s13, %s12329_s27 }
  0x49   : > { %p12326_p5 = pnand %p12324_p11, %p12696_p9  ;;  %p12332_p1 = scmp.lt.s32.totalorder %s12330_s12, %s12323_s20 }
  0x4b   : > { %p12327_p13 = pneg %p12326_p5  ;;  %p12333_p2 = por %p12332_p1, %p12331_p12 }
  0x4d   : > { %p12334_p3 = pnand %p12333_p2, %p12327_p13 }
  0x4f   : > { %12337 = shalt.err (!%p12334_p3)
}
  0x50   : > { %s12532_s24 = smov 1024   ;;  %s12533_s25 = smov 512  }
  0x51   : > { %s12534_s17 = smov 32   ;;  %s12535_s22 = smov [#allocation4]  }
  0x52   : > { %12110 = dma.hbm_to_vmem [thread:$0]  (!%p14721_p8), %s12686_s14, 131072, %s12688_s13, %s12690_s23, %s12532_s24, %s12533_s25, %s12534_s17  }
  0x53   : > { %s263_s26 = sshll.u32 %s12535_s22, 4  ;;  %s14723_s0 = sand.u32 1, %s12524_s29   ;;  %s264_s26 = int_to_ptr.vmem [resolvable:$true] %s263_s26 }
  0x54   : > { %s12722_s27 = sshll.u32 %s14723_s0, 3  ;;  %s12338_s4 = scalar_lea.hbm %s14670_s1, 8192 }
  0x55   : > { %p12339_p12 = scmp.ne.s32.totalorder %s14670_s1, %s12338_s4  ;;  %p14724_p1 = scmp.ne.s32.totalorder %s14719_s11, 0 }
  0x56   : > { %p12345_p6 = scmp.lt.u32.totalorder %s12338_s4, %s14670_s1 }
  0x57   : > { %p12341_p0 = pnand %p12339_p12, %p14724_p1 }
  0x59   : > { %p12342_p4 = pneg %p12341_p0 }
  0x5b   : > { %p12347_p7 = pnand %p12345_p6, %p12342_p4 }
  0x5d   : > { %12350 = shalt.err (!%p12347_p7)
}
  0x5e   : > { %s12351_s13 = scalar_lea.vmem %s264_s26, 8192  ;;  %p12359_p13 = scmp.lt.s32.totalorder %s264_s26, %s264_s26 }
  0x5f   : > { %p12352_p10 = scmp.ne.s32.totalorder %s264_s26, %s12351_s13  ;;  %p12360_p2 = scmp.lt.s32.totalorder %s12351_s13, %s12351_s13 }
  0x61   : > { %p12354_p11 = pnand %p12352_p10, %p14724_p1  ;;  %p12361_p3 = por %p12360_p2, %p12359_p13 }
  0x63   : > { %p12355_p5 = pneg %p12354_p11 }
  0x65   : > { %p12362_p8 = pnand %p12361_p3, %p12355_p5 }
  0x67   : > { %12365 = shalt.err (!%p12362_p8)
}
  0x68   : > { %s12536_s0 = smov 64   ;;  %p14725_p12 = scmp.ne.s32.totalorder %s14716_s19, 0 }
  0x69   : > { %s11870_s4 = sshll.u32 %s12528_s30, 7  ;;  %s324_s14 = scalar_lea.vmem [#allocation10], %s12722_s27 }
  0x6a   : > { %12100 = dma.hbm_to_vmem [thread:$0]  (!%p14725_p12), %s14670_s1, 8192, %s264_s26, [#allocation5], %s12532_s24, %s12532_s24, %s12536_s0  }
  0x6b   : > { %s12748_s22 = scalar_lea.hbm %s14674_s5, %s11870_s4  ;;  %s332_s25 = sshll.u32 %s324_s14, 4  ;;  %s333_s25 = int_to_ptr.vmem [resolvable:$true] %s332_s25 }
  0x6c   : > { %s12366_s17 = scalar_lea.hbm %s12748_s22, 128  ;;  %s12371_s20 = scalar_lea.hbm %s14674_s5, 256 }
  0x6d   : > { %p12367_p8 = scmp.ne.s32.totalorder %s12748_s22, %s12366_s17  ;;  %p12372_p6 = scmp.lt.u32.totalorder %s12748_s22, %s14674_s5 }
  0x6e   : > { %p12373_p7 = scmp.lt.u32.totalorder %s12371_s20, %s12366_s17  ;;  %p12375_p11 = scmp.lt.u32.totalorder %s12366_s17, %s12748_s22 }
  0x6f   : > { %p12369_p0 = pnand %p12367_p8, %p12696_p9 }
  0x70   : > { %p12374_p10 = por %p12373_p7, %p12372_p6 }
  0x71   : > { %p12370_p4 = pneg %p12369_p0 }
  0x72   : > { %p12376_p5 = por %p12375_p11, %p12374_p10 }
  0x74   : > { %p12377_p13 = pnand %p12376_p5, %p12370_p4 }
  0x76   : > { %12380 = shalt.err (!%p12377_p13)
}
  0x77   : > { %s12381_s0 = scalar_lea.vmem %s333_s25, 128  ;;  %s12537_s8 = smov [#allocation10]  }
  0x78   : > { %p12382_p2 = scmp.ne.s32.totalorder %s333_s25, %s12381_s0  ;;  %s12386_s10 = sshll.u32 %s12537_s8, 4  ;;  %s12387_s10 = int_to_ptr.vmem [resolvable:$false] %s12386_s10 }
  0x79   : > { %s12388_s7 = scalar_lea.vmem %s12387_s10, 256  ;;  %p12389_p0 = scmp.lt.s32.totalorder %s333_s25, %s12387_s10 }
  0x7a   : > { %p12384_p3 = pnand %p12382_p2, %p12696_p9  ;;  %p12390_p12 = scmp.lt.s32.totalorder %s12388_s7, %s12381_s0 }
  0x7c   : > { %p12385_p8 = pneg %p12384_p3  ;;  %p12391_p1 = por %p12390_p12, %p12389_p0 }
  0x7e   : > { %p12392_p6 = pnand %p12391_p1, %p12385_p8 }
  0x80   : > { %12395 = shalt.err (!%p12392_p6)
}
  0x81   : > { %p14726_p7 = scmp.ne.s32.totalorder %s14717_s21, 0  ;;  %s12538_s15 = smov [#allocation6]  }
  0x82   : > { %s277_s14 = sshll.u32 %s12538_s15, 4  ;;  %s12539_s17 = smov [#allocation7]   ;;  %s278_s14 = int_to_ptr.vmem [resolvable:$true] %s277_s14 }
  0x83   : > { %12113 = dma.hbm_to_vmem [thread:$0]  (!%p14726_p7), %s12748_s22, 128, %s333_s25, %s12690_s23  }
  0x84   : > { %s288_s24 = sshll.u32 %s12539_s17, 4  ;;  %s12396_s12 = scalar_lea.hbm %s14671_s2, 256  ;;  %s289_s24 = int_to_ptr.vmem [resolvable:$true] %s288_s24 }
  0x85   : > { %p12397_p1 = scmp.ne.s32.totalorder %s14671_s2, %s12396_s12  ;;  %p14727_p12 = scmp.ne.s32.totalorder %s14719_s11, 0 }
  0x86   : > { %p12403_p11 = scmp.lt.u32.totalorder %s12396_s12, %s14671_s2 }
  0x87   : > { %p12399_p4 = pnand %p12397_p1, %p14727_p12 }
  0x89   : > { %p12400_p10 = pneg %p12399_p4 }
  0x8b   : > { %p12405_p5 = pnand %p12403_p11, %p12400_p10 }
  0x8d   : > { %12408 = shalt.err (!%p12405_p5)
}
  0x8e   : > { %s12409_s22 = scalar_lea.vmem %s278_s14, 256  ;;  %p12417_p8 = scmp.lt.s32.totalorder %s278_s14, %s278_s14 }
  0x8f   : > { %p12410_p13 = scmp.ne.s32.totalorder %s278_s14, %s12409_s22  ;;  %p12418_p0 = scmp.lt.s32.totalorder %s12409_s22, %s12409_s22 }
  0x91   : > { %p12412_p2 = pnand %p12410_p13, %p14727_p12  ;;  %p12419_p6 = por %p12418_p0, %p12417_p8 }
  0x93   : > { %p12413_p3 = pneg %p12412_p2 }
  0x95   : > { %p12420_p7 = pnand %p12419_p6, %p12413_p3 }
  0x97   : > { %12423 = shalt.err (!%p12420_p7)
}
  0x98   : > { %p14728_p1 = scmp.ne.s32.totalorder %s14716_s19, 0  ;;  %s12424_s26 = scalar_lea.hbm %s14672_s3, 256 }
  0x99   : > { %p12425_p4 = scmp.ne.s32.totalorder %s14672_s3, %s12424_s26  ;;  %p12431_p7 = scmp.lt.u32.totalorder %s12424_s26, %s14672_s3 }
  0x9a   : > { %12103 = dma.hbm_to_vmem [thread:$0]  (!%p14728_p1), %s14671_s2, 256, %s278_s14, [#allocation5]  }
  0x9b   : > { %p12427_p10 = pnand %p12425_p4, %p14727_p12 }
  0x9d   : > { %p12428_p11 = pneg %p12427_p10 }
  0x9f   : > { %p12433_p5 = pnand %p12431_p7, %p12428_p11 }
  0xa1   : > { %12436 = shalt.err (!%p12433_p5)
}
  0xa2   : > { %s12437_s8 = scalar_lea.vmem %s289_s24, 256  ;;  %p12445_p8 = scmp.lt.s32.totalorder %s289_s24, %s289_s24 }
  0xa3   : > { %p12438_p13 = scmp.ne.s32.totalorder %s289_s24, %s12437_s8  ;;  %p12446_p0 = scmp.lt.s32.totalorder %s12437_s8, %s12437_s8 }
  0xa5   : > { %p12440_p2 = pnand %p12438_p13, %p14727_p12  ;;  %p12447_p6 = por %p12446_p0, %p12445_p8 }
  0xa7   : > { %p12441_p3 = pneg %p12440_p2 }
  0xa9   : > { %p12448_p9 = pnand %p12447_p6, %p12441_p3 }
  0xab   : > { %12451 = shalt.err (!%p12448_p9)
}
  0xac   : > { %12106 = dma.hbm_to_vmem [thread:$0]  (!%p14728_p1), %s14672_s3, 256, %s289_s24, [#allocation8]  }
  0xad   : > { %s12810_s11 = scalar_lea.hbm %s14675_s6, %s11870_s4  ;;  %s343_s7 = scalar_lea.vmem [#allocation11], %s12722_s27 }
  0xae   : > { %s351_s15 = sshll.u32 %s343_s7, 4  ;;  %s12452_s19 = scalar_lea.hbm %s12810_s11, 128  ;;  %s352_s15 = int_to_ptr.vmem [resolvable:$true] %s351_s15 }
  0xaf   : > { %p12453_p9 = scmp.ne.s32.totalorder %s12810_s11, %s12452_s19  ;;  %p14729_p12 = scmp.ne.s32.totalorder %s14722_s18, 0 }
  0xb0   : > { %s12457_s30 = scalar_lea.hbm %s14675_s6, 256  ;;  %p12458_p1 = scmp.lt.u32.totalorder %s12810_s11, %s14675_s6 }
  0xb1   : > { %p12455_p4 = pnand %p12453_p9, %p14729_p12  ;;  %p12459_p11 = scmp.lt.u32.totalorder %s12457_s30, %s12452_s19 }
  0xb2   : > { %p12461_p5 = scmp.lt.u32.totalorder %s12452_s19, %s12810_s11 }
  0xb3   : > { %p12456_p10 = pneg %p12455_p4  ;;  %p12460_p7 = por %p12459_p11, %p12458_p1 }
  0xb5   : > { %p12462_p13 = por %p12461_p5, %p12460_p7 }
  0xb7   : > { %p12463_p2 = pnand %p12462_p13, %p12456_p10 }
  0xb9   : > { %12466 = shalt.err (!%p12463_p2)
}
  0xba   : > { %s12467_s27 = scalar_lea.vmem %s352_s15, 128  ;;  %s12540_s4 = smov [#allocation11]  }
  0xbb   : > { %p12468_p3 = scmp.ne.s32.totalorder %s352_s15, %s12467_s27  ;;  %s12472_s12 = sshll.u32 %s12540_s4, 4  ;;  %s12473_s12 = int_to_ptr.vmem [resolvable:$false] %s12472_s12 }
  0xbc   : > { %s12474_s13 = scalar_lea.vmem %s12473_s12, 256  ;;  %p12475_p6 = scmp.lt.s32.totalorder %s352_s15, %s12473_s12 }
  0xbd   : > { %p12470_p8 = pnand %p12468_p3, %p14729_p12  ;;  %p12476_p9 = scmp.lt.s32.totalorder %s12474_s13, %s12467_s27 }
  0xbf   : > { %p12471_p0 = pneg %p12470_p8  ;;  %p12477_p4 = por %p12476_p9, %p12475_p6 }
  0xc1   : > { %p12478_p1 = pnand %p12477_p4, %p12471_p0 }
  0xc3   : > { %12481 = shalt.err (!%p12478_p1)
}
  0xc4   : > { %p14730_p11 = scmp.ne.s32.totalorder %s14717_s21, 0  ;;  %p14731_p10 = scmp.ne.s32.totalorder %s14715_s16, 0 }
  0xc6   : > { %12116 = dma.hbm_to_vmem [thread:$0]  (!%p14730_p11), %s12810_s11, 128, %s352_s15, %s12690_s23  }
  0xc7   : > { %369 = sbr.rel (%p14731_p10) target bundleno = 2072 (0x818), region = 52 }
  0xce   : > { %p14732_p12 = scmp.eq.s32.totalorder %s12607_s9, 0 }
  0xd0   : > { %12499 = dma.done.wait (%p14732_p12), [#allocation3], 128   ;;  %p14733_p7 = pmov %p14732_p12 }
  0xd2   : > { %12501 = vsyncadd (%p14733_p7), [#allocation3], 4294967168  ;;  %p14734_p5 = pmov %p14733_p7 }
  0xd4   : > { %12503 = dma.done.wait (%p14734_p5), [#allocation5], 8448   ;;  %p14735_p13 = pmov %p14734_p5 }
  0xd5   : > { %p14736_p2 = pmov %p14734_p5 }
  0xd6   : > { %12505 = vsyncadd (%p14735_p13), [#allocation5], 4294958848 }
  0xd7   : > { %12507 = dma.done.wait (%p14736_p2), [#allocation8], 256   ;;  %p14737_p3 = pmov %p14736_p2 }
  0xd8   : > { %s14738_s16 = sld [smem:[#allocation18_spill]]  ;;  %s387_s21 = sand.u32 1, %s12607_s9  }
  0xd9   : > { %12509 = vsyncadd (%p14737_p3), [#allocation8], 4294967040  ;;  %s389_s23 = sand.u32 1, %s12520_s28   ;;  %s388_s0 = scalar_lea.sflag [#allocation3], %s387_s21 }
  0xda   : > { %s10701_s18 = sshll.u32 %s389_s23, 13 }
  0xdb   : > { %s12849_s8 = scalar_lea.vmem [#allocation9], %s10701_s18 }
  0xde   : > { %p14739_p8 = scmp.ne.s32.totalorder %s14738_s16, 0 }
  0xe0   : > { %12511 = dma.done.wait (%p14739_p8), %s388_s0, 131328  }
  0xe1   : > { %12513 = vsyncadd (%p14739_p8), %s388_s0, 4294835968  ;;  %v12541_v0 = vmov 0   ;;  %v472_v1 = vld [vmem:[#allocation4] sm:$0xff]  ;;  %v473_v3 = vld [vmem:[#allocation4 + $0x8] sm:$0xff]  ;;  %vm856_vm0 = vcmask 523264   ;;  %s10704_s14 = sshll.u32 %s12607_s9, 7 }
  0xe2   : > { %892 = vmatprep.mubr.bf16.mxu0 %v12541_v0  ;;  %933 = vmatprep.mubr.bf16.mxu1 %v12541_v0  ;;  %v480_v2 = vld [vmem:[#allocation4 + $0x40] sm:$0xff]  ;;  %v481_v5 = vld [vmem:[#allocation4 + $0x48] sm:$0xff]  ;;  %v474_v31 = vld [vmem:[#allocation4 + $0x10] sm:$0xff]  ;;  %p460_p0 = scmp.lt.s32.totalorder %s10704_s14, 255  ;;  %s14764_s11 = sld [smem:[#allocation32_spill]] }
  0xe3   : > { %v10708_v4 = vcombine.high %v472_v1, %v480_v2  ;;  %v10707_v6 = vcombine.low %v472_v1, %v480_v2  ;;  %v488_v7 = vld [vmem:[#allocation4 + $0x80] sm:$0xff]  ;;  %v10710_v9 = vcombine.high %v473_v3, %v481_v5  ;;  %v10709_v10 = vcombine.low %v473_v3, %v481_v5  ;;  %v489_v12 = vld [vmem:[#allocation4 + $0x88] sm:$0xff]  ;;  %v482_v32 = vld [vmem:[#allocation4 + $0x50] sm:$0xff]  ;;  %s14563_s15 = sshll.u32 %s389_s23, 3  ;;  %p465_p6 = scmp.lt.s32.totalorder %s12607_s9, 1 }
  0xe4   : > { %v496_v8 = vld [vmem:[#allocation4 + $0xc0] sm:$0xff]  ;;  %v497_v13 = vld [vmem:[#allocation4 + $0xc8] sm:$0xff]  ;;  %v475_v33 = vld [vmem:[#allocation4 + $0x18] sm:$0xff]  ;;  %v10712_v38 = vcombine.high %v474_v31, %v482_v32  ;;  %v10711_v45 = vcombine.low %v474_v31, %v482_v32  ;;  %s14772_s14 = smov (!%p460_p0, %s10704_s14), 255  ;;  %s400_s19 = scalar_lea.vmem [#allocation10], %s14563_s15 }
  0xe5   : > { %v10724_v11 = vcombine.high %v488_v7, %v496_v8  ;;  %v504_v14 = vld [vmem:[#allocation4 + $0x100] sm:$0xff]  ;;  %860 = vmatprep.subr.bf16.mxu0 %v10708_v4  ;;  %v10726_v15 = vcombine.high %v489_v12, %v497_v13  ;;  %v505_v17 = vld [vmem:[#allocation4 + $0x108] sm:$0xff]  ;;  %901 = vmatprep.subr.bf16.mxu1 %v10710_v9  ;;  %v10723_v19 = vcombine.low %v488_v7, %v496_v8  ;;  %v483_v34 = vld [vmem:[#allocation4 + $0x58] sm:$0xff]  ;;  %s10705_s10 = sshll.u32 %s14772_s14, 2  ;;  %s409_s17 = scalar_lea.vmem [#allocation11], %s14563_s15 }
  0xe6   : > { %v512_v16 = vld [vmem:[#allocation4 + $0x140] sm:$0xff]  ;;  %v513_v18 = vld [vmem:[#allocation4 + $0x148] sm:$0xff]  ;;  %861 = vmatpush1.bf16.msra.mxu0 %v10707_v6  ;;  %902 = vmatpush1.bf16.msra.mxu1 %v10709_v10  ;;  %v10725_v20 = vcombine.low %v489_v12, %v497_v13  ;;  %v470_v36 = vld [vmem:[#allocation2] sm:$0xff]  ;;  %v10714_v39 = vcombine.high %v475_v33, %v483_v34  ;;  %v10713_v46 = vcombine.low %v475_v33, %v483_v34  ;;  %s14774_s9 = smov (!%p465_p6, %s12607_s9), 1  ;;  %s14765_s20 = sld [smem:[#allocation33_spill]] }
  0xe7   : > { %862 = vmatprep.subr.bf16.mxu0 %v10724_v11  ;;  %v10740_v21 = vcombine.high %v504_v14, %v512_v16  ;;  %903 = vmatprep.subr.bf16.mxu1 %v10726_v15  ;;  %v10742_v22 = vcombine.high %v505_v17, %v513_v18  ;;  %v520_v23 = vld [vmem:[#allocation4 + $0x180] sm:$0xff]  ;;  %v521_v25 = vld [vmem:[#allocation4 + $0x188] sm:$0xff]  ;;  %v10739_v27 = vcombine.low %v504_v14, %v512_v16  ;;  %v490_v40 = vld [vmem:[#allocation4 + $0x90] sm:$0xff]  ;;  %s10706_s24 = sshll.u32 %s14774_s9, 3 }
  0xe8   : > { %v528_v24 = vld [vmem:[#allocation4 + $0x1c0] sm:$0xff]  ;;  %v529_v26 = vld [vmem:[#allocation4 + $0x1c8] sm:$0xff]  ;;  %v10741_v28 = vcombine.low %v505_v17, %v513_v18  ;;  %v498_v41 = vld [vmem:[#allocation4 + $0xd0] sm:$0xff]  ;;  %v12857_v42 = vpack.c.bf16 %v470_v36, %v470_v36  ;;  %s14492_s7 = scalar_lea.vmem %s14764_s11, %s10705_s10 }
  0xe9   : > { %v10756_v29 = vcombine.high %v520_v23, %v528_v24  ;;  %v10758_v30 = vcombine.high %v521_v25, %v529_v26  ;;  %v10755_v35 = vcombine.low %v520_v23, %v528_v24  ;;  %v10757_v37 = vcombine.low %v521_v25, %v529_v26  ;;  %v491_v43 = vld [vmem:[#allocation4 + $0x98] sm:$0xff]  ;;  %v506_v49 = vld [vmem:[#allocation4 + $0x110] sm:$0xff]  ;;  %v476_v2 = vld [vmem:[#allocation4 + $0x20] sm:$0xff] }
  0xea   : > { %863 = vmatpush1.bf16.msra.mxu0 %v10723_v19  ;;  %904 = vmatpush1.bf16.msra.mxu1 %v10725_v20  ;;  %v499_v44 = vld [vmem:[#allocation4 + $0xd8] sm:$0xff]  ;;  %v10728_v47 = vcombine.high %v490_v40, %v498_v41  ;;  %v514_v50 = vld [vmem:[#allocation4 + $0x150] sm:$0xff]  ;;  %v10727_v53 = vcombine.low %v490_v40, %v498_v41  ;;  %v484_v3 = vld [vmem:[#allocation4 + $0x60] sm:$0xff] }
  0xeb   : > { %864 = vmatprep.subr.bf16.mxu0 %v10740_v21  ;;  %905 = vmatprep.subr.bf16.mxu1 %v10742_v22  ;;  %v10730_v48 = vcombine.high %v491_v43, %v499_v44  ;;  %v507_v51 = vld [vmem:[#allocation4 + $0x118] sm:$0xff]  ;;  %v10729_v54 = vcombine.low %v491_v43, %v499_v44  ;;  %v10744_v55 = vcombine.high %v506_v49, %v514_v50  ;;  %v522_v57 = vld [vmem:[#allocation4 + $0x190] sm:$0xff]  ;;  %v477_v4 = vld [vmem:[#allocation4 + $0x28] sm:$0xff] }
  0xec   : > { %v515_v52 = vld [vmem:[#allocation4 + $0x158] sm:$0xff]  ;;  %v530_v58 = vld [vmem:[#allocation4 + $0x1d0] sm:$0xff]  ;;  %v10743_v61 = vcombine.low %v506_v49, %v514_v50  ;;  %v485_v5 = vld [vmem:[#allocation4 + $0x68] sm:$0xff]  ;;  %v10716_v8 = vcombine.high %v476_v2, %v484_v3  ;;  %v10715_v14 = vcombine.low %v476_v2, %v484_v3  ;;  %s468_s27 = scalar_lea.vmem %s14765_s20, %s10706_s24 }
  0xed   : > { %v10746_v56 = vcombine.high %v507_v51, %v515_v52  ;;  %v523_v59 = vld [vmem:[#allocation4 + $0x198] sm:$0xff]  ;;  %v10745_v62 = vcombine.low %v507_v51, %v515_v52  ;;  %v10760_v63 = vcombine.high %v522_v57, %v530_v58  ;;  %v10759_v6 = vcombine.low %v522_v57, %v530_v58  ;;  %v492_v10 = vld [vmem:[#allocation4 + $0xa0] sm:$0xff]  ;;  %v493_v12 = vld [vmem:[#allocation4 + $0xa8] sm:$0xff] }
  0xee   : > { %865 = vmatpush1.bf16.msra.mxu0 %v10739_v27  ;;  %906 = vmatpush1.bf16.msra.mxu1 %v10741_v28  ;;  %v531_v60 = vld [vmem:[#allocation4 + $0x1d8] sm:$0xff]  ;;  %v10718_v9 = vcombine.high %v477_v4, %v485_v5  ;;  %v500_v11 = vld [vmem:[#allocation4 + $0xe0] sm:$0xff]  ;;  %v501_v13 = vld [vmem:[#allocation4 + $0xe8] sm:$0xff]  ;;  %v10717_v15 = vcombine.low %v477_v4, %v485_v5 }
  0xef   : > { %866 = vmatprep.subr.bf16.mxu0 %v10756_v29  ;;  %907 = vmatprep.subr.bf16.mxu1 %v10758_v30  ;;  %v10762_v1 = vcombine.high %v523_v59, %v531_v60  ;;  %v10761_v7 = vcombine.low %v523_v59, %v531_v60  ;;  %v10732_v16 = vcombine.high %v492_v10, %v500_v11  ;;  %v508_v18 = vld [vmem:[#allocation4 + $0x120] sm:$0xff]  ;;  %v509_v20 = vld [vmem:[#allocation4 + $0x128] sm:$0xff]  ;;  %v478_v34 = vld [vmem:[#allocation4 + $0x30] sm:$0xff] }
  0xf0   : > { %v10734_v17 = vcombine.high %v493_v12, %v501_v13  ;;  %v516_v19 = vld [vmem:[#allocation4 + $0x160] sm:$0xff]  ;;  %v517_v21 = vld [vmem:[#allocation4 + $0x168] sm:$0xff]  ;;  %v10731_v22 = vcombine.low %v492_v10, %v500_v11  ;;  %v10733_v23 = vcombine.low %v493_v12, %v501_v13  ;;  %v479_v36 = vld [vmem:[#allocation4 + $0x38] sm:$0xff] }
  0xf1   : > { %v10748_v24 = vcombine.high %v508_v18, %v516_v19  ;;  %v10750_v25 = vcombine.high %v509_v20, %v517_v21  ;;  %v524_v26 = vld [vmem:[#allocation4 + $0x1a0] sm:$0xff]  ;;  %v525_v28 = vld [vmem:[#allocation4 + $0x1a8] sm:$0xff]  ;;  %v10747_v30 = vcombine.low %v508_v18, %v516_v19  ;;  %v10749_v31 = vcombine.low %v509_v20, %v517_v21  ;;  %v494_v43 = vld [vmem:[#allocation4 + $0xb0] sm:$0xff] }
  0xf2   : > { %867 = vmatpush1.bf16.msra.mxu0 %v10755_v35  ;;  %908 = vmatpush1.bf16.msra.mxu1 %v10757_v37  ;;  %v532_v27 = vld [vmem:[#allocation4 + $0x1e0] sm:$0xff]  ;;  %v533_v29 = vld [vmem:[#allocation4 + $0x1e8] sm:$0xff]  ;;  %v486_v35 = vld [vmem:[#allocation4 + $0x70] sm:$0xff] }
  0xf3   : > { %942 = vmatprep.subr.bf16.mxu0 %v10712_v38  ;;  %983 = vmatprep.subr.bf16.mxu1 %v10714_v39  ;;  %v10764_v32 = vcombine.high %v524_v26, %v532_v27  ;;  %v10766_v33 = vcombine.high %v525_v28, %v533_v29  ;;  %v487_v37 = vld [vmem:[#allocation4 + $0x78] sm:$0xff]  ;;  %v10763_v38 = vcombine.low %v524_v26, %v532_v27  ;;  %v502_v44 = vld [vmem:[#allocation4 + $0xf0] sm:$0xff]  ;;  %v2001_v13 = vld [vmem:[%s12849_s8 + $0x40] sm:$0xff] }
  0xf4   : > { %v10765_v39 = vcombine.low %v525_v28, %v533_v29  ;;  %v10720_v40 = vcombine.high %v478_v34, %v486_v35  ;;  %v10722_v41 = vcombine.high %v479_v36, %v487_v37  ;;  %v10736_v49 = vcombine.high %v494_v43, %v502_v44  ;;  %v510_v51 = vld [vmem:[#allocation4 + $0x130] sm:$0xff]  ;;  %v2009_v20 = vld [vmem:[%s12849_s8 + $0x80] sm:$0xff] }
  0xf5   : > { %10771 = vmatmul.mubr.msk.bf16.vlgmr.msra.gmra.mrb[0].mxu0 %vm856_vm0, %v12857_v42  ;;  %10772 = vmatmul.mubr.msk.bf16.vlgmr.msra.gmra.mrb[0].mxu1 %vm856_vm0, %v12857_v42  ;;  %v518_v52 = vld [vmem:[#allocation4 + $0x170] sm:$0xff]  ;;  %v2013_v21 = vld [vmem:[%s12849_s8 + $0xa0] sm:$0xff] }
  0xf6   : > { %943 = vmatpush1.bf16.msra.mxu0 %v10711_v45  ;;  %984 = vmatpush1.bf16.msra.mxu1 %v10713_v46  ;;  %v495_v45 = vld [vmem:[#allocation4 + $0xb8] sm:$0xff]  ;;  %v10752_v57 = vcombine.high %v510_v51, %v518_v52  ;;  %v526_v59 = vld [vmem:[#allocation4 + $0x1b0] sm:$0xff]  ;;  %v2017_v28 = vld [vmem:[%s12849_s8 + $0xc0] sm:$0xff] }
  0xf7   : > { %944 = vmatprep.subr.bf16.mxu0 %v10728_v47  ;;  %985 = vmatprep.subr.bf16.mxu1 %v10730_v48  ;;  %v503_v46 = vld [vmem:[#allocation4 + $0xf8] sm:$0xff]  ;;  %v10719_v47 = vcombine.low %v478_v34, %v486_v35  ;;  %v10721_v48 = vcombine.low %v479_v36, %v487_v37  ;;  %v534_v60 = vld [vmem:[#allocation4 + $0x1f0] sm:$0xff]  ;;  %v2021_v29 = vld [vmem:[%s12849_s8 + $0xe0] sm:$0xff] }
  0xf8   : > { %974 = vmatprep.mubr.bf16.mxu0 %v12541_v0  ;;  %1015 = vmatprep.mubr.bf16.mxu1 %v12541_v0  ;;  %v10738_v50 = vcombine.high %v495_v45, %v503_v46  ;;  %v10768_v2 = vcombine.high %v526_v59, %v534_v60  ;;  %v10767_v4 = vcombine.low %v526_v59, %v534_v60  ;;  %v2025_v36 = vld [vmem:[%s12849_s8 + $0x100] sm:$0xff] }
  0xf9   : > { %v2029_v37 = vld [vmem:[%s12849_s8 + $0x120] sm:$0xff] }
  0xfa   : > { %945 = vmatpush1.bf16.msra.mxu0 %v10727_v53  ;;  %986 = vmatpush1.bf16.msra.mxu1 %v10729_v54  ;;  %v511_v53 = vld [vmem:[#allocation4 + $0x138] sm:$0xff] }
  0xfb   : > { %946 = vmatprep.subr.bf16.mxu0 %v10744_v55  ;;  %987 = vmatprep.subr.bf16.mxu1 %v10746_v56  ;;  %v519_v54 = vld [vmem:[#allocation4 + $0x178] sm:$0xff]  ;;  %v10735_v55 = vcombine.low %v494_v43, %v502_v44  ;;  %v10737_v56 = vcombine.low %v495_v45, %v503_v46  ;;  %v2033_v45 = vld [vmem:[%s12849_s8 + $0x140] sm:$0xff] }
  0xfc   : > { %v10754_v58 = vcombine.high %v511_v53, %v519_v54  ;;  %v2037_v46 = vld [vmem:[%s12849_s8 + $0x160] sm:$0xff] }
  0xfe   : > { %947 = vmatpush1.bf16.msra.mxu0 %v10743_v61  ;;  %988 = vmatpush1.bf16.msra.mxu1 %v10745_v62  ;;  %v527_v61 = vld [vmem:[#allocation4 + $0x1b8] sm:$0xff] }
  0xff   : > { %948 = vmatprep.subr.bf16.mxu0 %v10760_v63  ;;  %989 = vmatprep.subr.bf16.mxu1 %v10762_v1  ;;  %v535_v62 = vld [vmem:[#allocation4 + $0x1f8] sm:$0xff]  ;;  %v10751_v63 = vcombine.low %v510_v51, %v518_v52  ;;  %v10753_v1 = vcombine.low %v511_v53, %v519_v54  ;;  %v2041_v53 = vld [vmem:[%s12849_s8 + $0x180] sm:$0xff] }
 0x100   : > { %v10770_v3 = vcombine.high %v527_v61, %v535_v62  ;;  %v10769_v5 = vcombine.low %v527_v61, %v535_v62  ;;  %v2045_v54 = vld [vmem:[%s12849_s8 + $0x1a0] sm:$0xff] }
 0x101   : > { %v2049_v61 = vld [vmem:[%s12849_s8 + $0x1c0] sm:$0xff] }
 0x102   : > { %949 = vmatpush1.bf16.msra.mxu0 %v10759_v6  ;;  %990 = vmatpush1.bf16.msra.mxu1 %v10761_v7  ;;  %v1997_v6 = vld [vmem:[%s12849_s8 + $0x20] sm:$0xff]  ;;  %v1994_v7 = vld [vmem:[%s12849_s8 + $0x8] sm:$0xff] }
 0x103   : > { %1024 = vmatprep.subr.bf16.mxu0 %v10716_v8  ;;  %1065 = vmatprep.subr.bf16.mxu1 %v10718_v9  ;;  %v1998_v9 = vld [vmem:[%s12849_s8 + $0x28] sm:$0xff]  ;;  %v2053_v62 = vld [vmem:[%s12849_s8 + $0x1e0] sm:$0xff] }
 0x104   : > { %v10781_v11 = vcombine.low %v1994_v7, %v1998_v9  ;;  %v10782_v12 = vcombine.high %v1994_v7, %v1998_v9  ;;  %v2058_v7 = vld [vmem:[%s12849_s8 + $0x208] sm:$0xff] }
 0x105   : > { %10773 = vmatmul.mubr.msk.bf16.vlgmr.msra.gmra.mrb[4].mxu0 %vm856_vm0, %v12857_v42  ;;  %10774 = vmatmul.mubr.msk.bf16.vlgmr.msra.gmra.mrb[4].mxu1 %vm856_vm0, %v12857_v42  ;;  %v2062_v9 = vld [vmem:[%s12849_s8 + $0x228] sm:$0xff] }
 0x106   : > { %1025 = vmatpush1.bf16.msra.mxu0 %v10715_v14  ;;  %1066 = vmatpush1.bf16.msra.mxu1 %v10717_v15  ;;  %v2005_v14 = vld [vmem:[%s12849_s8 + $0x60] sm:$0xff]  ;;  %v2002_v15 = vld [vmem:[%s12849_s8 + $0x48] sm:$0xff] }
 0x107   : > { %1026 = vmatprep.subr.bf16.mxu0 %v10732_v16  ;;  %1067 = vmatprep.subr.bf16.mxu1 %v10734_v17  ;;  %v2006_v16 = vld [vmem:[%s12849_s8 + $0x68] sm:$0xff]  ;;  %v10787_v17 = vcombine.low %v2001_v13, %v2005_v14 }
 0x108   : > { %1056 = vmatprep.mubr.bf16.mxu0 %v12541_v0  ;;  %1097 = vmatprep.mubr.bf16.mxu1 %v12541_v0  ;;  %v10789_v18 = vcombine.low %v2002_v15, %v2006_v16  ;;  %v10790_v19 = vcombine.high %v2002_v15, %v2006_v16  ;;  %v2070_v16 = vld [vmem:[%s12849_s8 + $0x268] sm:$0xff] }
 0x10a   : > { %1027 = vmatpush1.bf16.msra.mxu0 %v10731_v22  ;;  %1068 = vmatpush1.bf16.msra.mxu1 %v10733_v23  ;;  %v2010_v22 = vld [vmem:[%s12849_s8 + $0x88] sm:$0xff]  ;;  %v10796_v23 = vcombine.high %v2009_v20, %v2013_v21 }
 0x10b   : > { %1028 = vmatprep.subr.bf16.mxu0 %v10748_v24  ;;  %1069 = vmatprep.subr.bf16.mxu1 %v10750_v25  ;;  %v2014_v24 = vld [vmem:[%s12849_s8 + $0xa8] sm:$0xff]  ;;  %v10795_v25 = vcombine.low %v2009_v20, %v2013_v21  ;;  %v2073_v20 = vld [vmem:[%s12849_s8 + $0x280] sm:$0xff] }
 0x10c   : > { %v10797_v26 = vcombine.low %v2010_v22, %v2014_v24  ;;  %v10798_v27 = vcombine.high %v2010_v22, %v2014_v24  ;;  %v2077_v21 = vld [vmem:[%s12849_s8 + $0x2a0] sm:$0xff]  ;;  %v2074_v22 = vld [vmem:[%s12849_s8 + $0x288] sm:$0xff] }
 0x10d   : > { %v2078_v24 = vld [vmem:[%s12849_s8 + $0x2a8] sm:$0xff] }
 0x10e   : > { %1029 = vmatpush1.bf16.msra.mxu0 %v10747_v30  ;;  %1070 = vmatpush1.bf16.msra.mxu1 %v10749_v31  ;;  %v2018_v30 = vld [vmem:[%s12849_s8 + $0xc8] sm:$0xff]  ;;  %v10804_v31 = vcombine.high %v2017_v28, %v2021_v29 }
 0x10f   : > { %1030 = vmatprep.subr.bf16.mxu0 %v10764_v32  ;;  %1071 = vmatprep.subr.bf16.mxu1 %v10766_v33  ;;  %v2022_v32 = vld [vmem:[%s12849_s8 + $0xe8] sm:$0xff]  ;;  %v10803_v33 = vcombine.low %v2017_v28, %v2021_v29  ;;  %v2081_v28 = vld [vmem:[%s12849_s8 + $0x2c0] sm:$0xff] }
 0x110   : > { %v10805_v34 = vcombine.low %v2018_v30, %v2022_v32  ;;  %v10806_v35 = vcombine.high %v2018_v30, %v2022_v32  ;;  %v2085_v29 = vld [vmem:[%s12849_s8 + $0x2e0] sm:$0xff]  ;;  %v2082_v30 = vld [vmem:[%s12849_s8 + $0x2c8] sm:$0xff] }
 0x111   : > { %v2086_v32 = vld [vmem:[%s12849_s8 + $0x2e8] sm:$0xff] }
 0x112   : > { %1031 = vmatpush1.bf16.msra.mxu0 %v10763_v38  ;;  %1072 = vmatpush1.bf16.msra.mxu1 %v10765_v39  ;;  %v2026_v38 = vld [vmem:[%s12849_s8 + $0x108] sm:$0xff]  ;;  %v10812_v39 = vcombine.high %v2025_v36, %v2029_v37 }
 0x113   : > { %1106 = vmatprep.subr.bf16.mxu0 %v10720_v40  ;;  %1147 = vmatprep.subr.bf16.mxu1 %v10722_v41  ;;  %v2030_v40 = vld [vmem:[%s12849_s8 + $0x128] sm:$0xff]  ;;  %v10811_v41 = vcombine.low %v2025_v36, %v2029_v37  ;;  %v2089_v36 = vld [vmem:[%s12849_s8 + $0x300] sm:$0xff] }
 0x114   : > { %v10813_v43 = vcombine.low %v2026_v38, %v2030_v40  ;;  %v10814_v44 = vcombine.high %v2026_v38, %v2030_v40  ;;  %v2093_v37 = vld [vmem:[%s12849_s8 + $0x320] sm:$0xff]  ;;  %v2090_v38 = vld [vmem:[%s12849_s8 + $0x308] sm:$0xff] }
 0x115   : > { %10775 = vmatmul.mubr.msk.bf16.vlgmr.msra.gmra.mrb[8].mxu0 %vm856_vm0, %v12857_v42  ;;  %10776 = vmatmul.mubr.msk.bf16.vlgmr.msra.gmra.mrb[8].mxu1 %vm856_vm0, %v12857_v42  ;;  %v2094_v40 = vld [vmem:[%s12849_s8 + $0x328] sm:$0xff] }
 0x116   : > { %1107 = vmatpush1.bf16.msra.mxu0 %v10719_v47  ;;  %1148 = vmatpush1.bf16.msra.mxu1 %v10721_v48  ;;  %v2034_v47 = vld [vmem:[%s12849_s8 + $0x148] sm:$0xff]  ;;  %v10820_v48 = vcombine.high %v2033_v45, %v2037_v46 }
 0x117   : > { %1108 = vmatprep.subr.bf16.mxu0 %v10736_v49  ;;  %1149 = vmatprep.subr.bf16.mxu1 %v10738_v50  ;;  %v2038_v49 = vld [vmem:[%s12849_s8 + $0x168] sm:$0xff]  ;;  %v10819_v50 = vcombine.low %v2033_v45, %v2037_v46  ;;  %v2097_v45 = vld [vmem:[%s12849_s8 + $0x340] sm:$0xff] }
 0x118   : > { %1138 = vmatprep.mubr.bf16.mxu0 %v12541_v0  ;;  %1179 = vmatprep.mubr.bf16.mxu1 %v12541_v0  ;;  %v1993_v0 = vld [vmem:[%s12849_s8] sm:$0xff]  ;;  %v10821_v51 = vcombine.low %v2034_v47, %v2038_v49  ;;  %v10822_v52 = vcombine.high %v2034_v47, %v2038_v49  ;;  %v2098_v47 = vld [vmem:[%s12849_s8 + $0x348] sm:$0xff] }
 0x119   : > { %v10780_v8 = vcombine.high %v1993_v0, %v1997_v6  ;;  %v10779_v10 = vcombine.low %v1993_v0, %v1997_v6  ;;  %v2057_v0 = vld [vmem:[%s12849_s8 + $0x200] sm:$0xff]  ;;  %v2102_v49 = vld [vmem:[%s12849_s8 + $0x368] sm:$0xff] }
 0x11a   : > { %1109 = vmatpush1.bf16.msra.mxu0 %v10735_v55  ;;  %1150 = vmatpush1.bf16.msra.mxu1 %v10737_v56  ;;  %v2042_v55 = vld [vmem:[%s12849_s8 + $0x188] sm:$0xff]  ;;  %v10828_v56 = vcombine.high %v2041_v53, %v2045_v54  ;;  %v2061_v6 = vld [vmem:[%s12849_s8 + $0x220] sm:$0xff] }
 0x11b   : > { %1110 = vmatprep.subr.bf16.mxu0 %v10752_v57  ;;  %1151 = vmatprep.subr.bf16.mxu1 %v10754_v58  ;;  %v2046_v57 = vld [vmem:[%s12849_s8 + $0x1a8] sm:$0xff]  ;;  %v10827_v58 = vcombine.low %v2041_v53, %v2045_v54  ;;  %v2101_v46 = vld [vmem:[%s12849_s8 + $0x360] sm:$0xff] }
 0x11c   : > { %v10829_v59 = vcombine.low %v2042_v55, %v2046_v57  ;;  %v10830_v60 = vcombine.high %v2042_v55, %v2046_v57  ;;  %v2105_v53 = vld [vmem:[%s12849_s8 + $0x380] sm:$0xff]  ;;  %v2106_v55 = vld [vmem:[%s12849_s8 + $0x388] sm:$0xff] }
 0x11d   : > { %v2109_v54 = vld [vmem:[%s12849_s8 + $0x3a0] sm:$0xff]  ;;  %v2110_v57 = vld [vmem:[%s12849_s8 + $0x3a8] sm:$0xff] }
 0x11e   : > { %1111 = vmatpush1.bf16.msra.mxu0 %v10751_v63  ;;  %1152 = vmatpush1.bf16.msra.mxu1 %v10753_v1  ;;  %v2050_v63 = vld [vmem:[%s12849_s8 + $0x1c8] sm:$0xff]  ;;  %v10836_v1 = vcombine.high %v2049_v61, %v2053_v62 }
 0x11f   : > { %1112 = vmatprep.subr.bf16.mxu0 %v10768_v2  ;;  %1153 = vmatprep.subr.bf16.mxu1 %v10770_v3  ;;  %v2054_v2 = vld [vmem:[%s12849_s8 + $0x1e8] sm:$0xff]  ;;  %v10835_v3 = vcombine.low %v2049_v61, %v2053_v62  ;;  %v2113_v61 = vld [vmem:[%s12849_s8 + $0x3c0] sm:$0xff] }
 0x120   : > { %v2117_v62 = vld [vmem:[%s12849_s8 + $0x3e0] sm:$0xff] }
 0x122   : > { %1113 = vmatpush1.bf16.msra.mxu0 %v10767_v4  ;;  %1154 = vmatpush1.bf16.msra.mxu1 %v10769_v5  ;;  %v10837_v4 = vcombine.low %v2050_v63, %v2054_v2  ;;  %v10838_v5 = vcombine.high %v2050_v63, %v2054_v2  ;;  %v2114_v63 = vld [vmem:[%s12849_s8 + $0x3c8] sm:$0xff] }
 0x123   : > { %8137 = vmatprep.subr.bf16.mxu0 %v10780_v8  ;;  %8465 = vmatprep.subr.bf16.mxu1 %v10782_v12  ;;  %v10844_v8 = vcombine.high %v2057_v0, %v2061_v6  ;;  %v10846_v12 = vcombine.high %v2058_v7, %v2062_v9  ;;  %v2118_v2 = vld [vmem:[%s12849_s8 + $0x3e8] sm:$0xff] }
 0x125   : > { %10777 = vmatmul.mubr.msk.bf16.vlgmr.msra.gmra.mrb[12].mxu0 %vm856_vm0, %v12857_v42  ;;  %10778 = vmatmul.mubr.msk.bf16.vlgmr.msra.gmra.mrb[12].mxu1 %vm856_vm0, %v12857_v42  ;;  %v10788_v42 = vcombine.high %v2001_v13, %v2005_v14  ;;  %v2065_v13 = vld [vmem:[%s12849_s8 + $0x240] sm:$0xff] }
 0x126   : > { %8138 = vmatpush1.bf16.msra.mxu0 %v10779_v10  ;;  %8466 = vmatpush1.bf16.msra.mxu1 %v10781_v11  ;;  %v10843_v10 = vcombine.low %v2057_v0, %v2061_v6  ;;  %v10845_v11 = vcombine.low %v2058_v7, %v2062_v9  ;;  %v2069_v14 = vld [vmem:[%s12849_s8 + $0x260] sm:$0xff]  ;;  %v12952_v7 = vld [vmem:[%s12849_s8 + $0x408] sm:$0xff] }
 0x127   : > { %8139 = vmatprep.subr.bf16.mxu0 %v10788_v42  ;;  %8467 = vmatprep.subr.bf16.mxu1 %v10790_v19  ;;  %v10852_v15 = vcombine.high %v2065_v13, %v2069_v14  ;;  %v2066_v42 = vld [vmem:[%s12849_s8 + $0x248] sm:$0xff]  ;;  %v12946_v0 = vld [vmem:[%s12849_s8 + $0x400] sm:$0xff] }
 0x128   : > { %v10854_v19 = vcombine.high %v2066_v42, %v2070_v16  ;;  %v12949_v6 = vld [vmem:[%s12849_s8 + $0x420] sm:$0xff]  ;;  %v12957_v9 = vld [vmem:[%s12849_s8 + $0x428] sm:$0xff] }
 0x12a   : > { %8140 = vmatpush1.bf16.msra.mxu0 %v10787_v17  ;;  %8468 = vmatpush1.bf16.msra.mxu1 %v10789_v18  ;;  %v10851_v17 = vcombine.low %v2065_v13, %v2069_v14  ;;  %v10853_v18 = vcombine.low %v2066_v42, %v2070_v16 }
 0x12b   : > { %8141 = vmatprep.subr.bf16.mxu0 %v10796_v23  ;;  %8469 = vmatprep.subr.bf16.mxu1 %v10798_v27  ;;  %v10860_v23 = vcombine.high %v2073_v20, %v2077_v21  ;;  %v10861_v27 = vcombine.low %v2074_v22, %v2078_v24 }
 0x12e   : > { %8142 = vmatpush1.bf16.msra.mxu0 %v10795_v25  ;;  %8470 = vmatpush1.bf16.msra.mxu1 %v10797_v26  ;;  %v10859_v25 = vcombine.low %v2073_v20, %v2077_v21  ;;  %v10862_v26 = vcombine.high %v2074_v22, %v2078_v24 }
 0x12f   : > { %8143 = vmatprep.subr.bf16.mxu0 %v10804_v31  ;;  %8471 = vmatprep.subr.bf16.mxu1 %v10806_v35  ;;  %v10868_v31 = vcombine.high %v2081_v28, %v2085_v29  ;;  %v10869_v35 = vcombine.low %v2082_v30, %v2086_v32 }
 0x132   : > { %8144 = vmatpush1.bf16.msra.mxu0 %v10803_v33  ;;  %8472 = vmatpush1.bf16.msra.mxu1 %v10805_v34  ;;  %v10867_v33 = vcombine.low %v2081_v28, %v2085_v29  ;;  %v10870_v34 = vcombine.high %v2082_v30, %v2086_v32 }
 0x133   : > { %8145 = vmatprep.subr.bf16.mxu0 %v10812_v39  ;;  %8473 = vmatprep.subr.bf16.mxu1 %v10814_v44  ;;  %v10876_v39 = vcombine.high %v2089_v36, %v2093_v37  ;;  %v10877_v44 = vcombine.low %v2090_v38, %v2094_v40 }
 0x136   : > { %8146 = vmatpush1.bf16.msra.mxu0 %v10811_v41  ;;  %8474 = vmatpush1.bf16.msra.mxu1 %v10813_v43  ;;  %v10875_v41 = vcombine.low %v2089_v36, %v2093_v37  ;;  %v10878_v43 = vcombine.high %v2090_v38, %v2094_v40 }
 0x137   : > { %8147 = vmatprep.subr.bf16.mxu0 %v10820_v48  ;;  %8475 = vmatprep.subr.bf16.mxu1 %v10822_v52  ;;  %v10884_v48 = vcombine.high %v2097_v45, %v2101_v46  ;;  %v10885_v52 = vcombine.low %v2098_v47, %v2102_v49 }
 0x13a   : > { %8148 = vmatpush1.bf16.msra.mxu0 %v10819_v50  ;;  %8476 = vmatpush1.bf16.msra.mxu1 %v10821_v51  ;;  %v10883_v50 = vcombine.low %v2097_v45, %v2101_v46  ;;  %v10886_v51 = vcombine.high %v2098_v47, %v2102_v49 }
 0x13b   : > { %8149 = vmatprep.subr.bf16.mxu0 %v10828_v56  ;;  %8477 = vmatprep.subr.bf16.mxu1 %v10830_v60  ;;  %v10892_v56 = vcombine.high %v2105_v53, %v2109_v54  ;;  %v10893_v60 = vcombine.low %v2106_v55, %v2110_v57 }
 0x13e   : > { %8150 = vmatpush1.bf16.msra.mxu0 %v10827_v58  ;;  %8478 = vmatpush1.bf16.msra.mxu1 %v10829_v59  ;;  %v10891_v58 = vcombine.low %v2105_v53, %v2109_v54  ;;  %v10894_v59 = vcombine.high %v2106_v55, %v2110_v57 }
 0x13f   : > { %8151 = vmatprep.subr.bf16.mxu0 %v10836_v1  ;;  %8479 = vmatprep.subr.bf16.mxu1 %v10838_v5  ;;  %v10900_v1 = vcombine.high %v2113_v61, %v2117_v62  ;;  %v10901_v5 = vcombine.low %v2114_v63, %v2118_v2 }
 0x142   : > { %8152 = vmatpush1.bf16.msra.mxu0 %v10835_v3  ;;  %8480 = vmatpush1.bf16.msra.mxu1 %v10837_v4  ;;  %v10902_v3 = vcombine.high %v2114_v63, %v2118_v2  ;;  %v10899_v4 = vcombine.low %v2113_v61, %v2117_v62 }
 0x143   : > { %8153 = vmatprep.subr.bf16.mxu0 %v10844_v8  ;;  %8481 = vmatprep.subr.bf16.mxu1 %v10846_v12  ;;  %v10908_v8 = vcombine.high %v12946_v0, %v12949_v6  ;;  %v10910_v12 = vcombine.high %v12952_v7, %v12957_v9 }
 0x146   : > { %8154 = vmatpush1.bf16.msra.mxu0 %v10843_v10  ;;  %8482 = vmatpush1.bf16.msra.mxu1 %v10845_v11 }
 0x147   : > { %8155 = vmatprep.subr.bf16.mxu0 %v10852_v15  ;;  %8483 = vmatprep.subr.bf16.mxu1 %v10854_v19 }
 0x14a   : > { %8156 = vmatpush1.bf16.msra.mxu0 %v10851_v17  ;;  %8484 = vmatpush1.bf16.msra.mxu1 %v10853_v18 }
 0x14b   : > { %8157 = vmatprep.subr.bf16.mxu0 %v10860_v23  ;;  %8485 = vmatprep.subr.bf16.mxu1 %v10862_v26 }
 0x14e   : > { %8158 = vmatpush1.bf16.msra.mxu0 %v10859_v25  ;;  %8486 = vmatpush1.bf16.msra.mxu1 %v10861_v27 }
 0x14f   : > { %8159 = vmatprep.subr.bf16.mxu0 %v10868_v31  ;;  %8487 = vmatprep.subr.bf16.mxu1 %v10870_v34 }
 0x152   : > { %8160 = vmatpush1.bf16.msra.mxu0 %v10867_v33  ;;  %8488 = vmatpush1.bf16.msra.mxu1 %v10869_v35 }
 0x153   : > { %8161 = vmatprep.subr.bf16.mxu0 %v10876_v39  ;;  %8489 = vmatprep.subr.bf16.mxu1 %v10878_v43 }
 0x156   : > { %8162 = vmatpush1.bf16.msra.mxu0 %v10875_v41  ;;  %8490 = vmatpush1.bf16.msra.mxu1 %v10877_v44 }
 0x157   : > { %8163 = vmatprep.subr.bf16.mxu0 %v10884_v48  ;;  %8491 = vmatprep.subr.bf16.mxu1 %v10886_v51 }
 0x15a   : > { %8164 = vmatpush1.bf16.msra.mxu0 %v10883_v50  ;;  %8492 = vmatpush1.bf16.msra.mxu1 %v10885_v52  ;;  %v12542_v52 = vmov 1966171168  }
 0x15b   : > { %8165 = vmatprep.subr.bf16.mxu0 %v10892_v56  ;;  %8493 = vmatprep.subr.bf16.mxu1 %v10894_v59  ;;  %v12995_v53 = vunpack.c.l.s4 %v12542_v52  ;;  %v1504_v56 = vlaneseq }
 0x15e   : > { %8166 = vmatpush1.bf16.msra.mxu0 %v10891_v58  ;;  %8494 = vmatpush1.bf16.msra.mxu1 %v10893_v60 }
 0x15f   : > { %8167 = vmatprep.subr.bf16.mxu0 %v10900_v1  ;;  %8495 = vmatprep.subr.bf16.mxu1 %v10902_v3 }
 0x162   : > { %8168 = vmatpush1.bf16.msra.mxu0 %v10899_v4  ;;  %8496 = vmatpush1.bf16.msra.mxu1 %v10901_v5 }
 0x163   : > { %8178 = vmatprep.subr.bf16.mxu0 %v10908_v8  ;;  %8506 = vmatprep.subr.bf16.mxu1 %v10910_v12 }
 0x1c8   : > { %v12965_v13 = vpop.f32.mrb[0].mxu0  ;;  %v12968_v15 = vpop.f32.mrb[0].mxu1 }
 0x1c9   : > { %v1192_v14 = vrot.slane %v12965_v13, 4  ;;  %v12970_v42 = vpop.f32.mrb[1].mxu0  ;;  %v1204_v16 = vrot.slane %v12968_v15, 4  ;;  %v12974_v18 = vpop.f32.mrb[1].mxu1 }
 0x1ca   : > { %v1198_v17 = vrot.slane %v12970_v42, 4  ;;  %v898_v19 = vpop.f32.mrb[2].mxu0  ;;  %v1210_v21 = vrot.slane %v12974_v18, 4  ;;  %v939_v22 = vpop.f32.mrb[2].mxu1 }
 0x1cb   : > { %v1193_v20 = vadd.f32 %v1192_v14, %v12965_v13  ;;  %v899_v23 = vpop.f32.mrb[3].mxu0  ;;  %v1205_v24 = vadd.f32 %v1204_v16, %v12968_v15  ;;  %v940_v26 = vpop.f32.mrb[3].mxu1 }
 0x1cc   : > { %v1199_v25 = vadd.f32 %v1198_v17, %v12970_v42  ;;  %v1211_v28 = vadd.f32 %v1210_v21, %v12974_v18 }
 0x1cd   : > { %v1194_v27 = vrot.slane %v1193_v20, 2  ;;  %v1206_v29 = vrot.slane %v1205_v24, 2 }
 0x1ce   : > { %v1200_v30 = vrot.slane %v1199_v25, 2  ;;  %v1212_v32 = vrot.slane %v1211_v28, 2 }
 0x1cf   : > { %v1195_v31 = vadd.f32 %v1194_v27, %v1193_v20  ;;  %v1207_v33 = vadd.f32 %v1206_v29, %v1205_v24 }
 0x1d0   : > { %v1201_v34 = vadd.f32 %v1200_v30, %v1199_v25  ;;  %v1213_v36 = vadd.f32 %v1212_v32, %v1211_v28 }
 0x1d1   : > { %v1196_v35 = vrot.slane %v1195_v31, 1  ;;  %v1208_v37 = vrot.slane %v1207_v33, 1 }
 0x1d2   : > { %v1202_v38 = vrot.slane %v1201_v34, 1  ;;  %v1214_v40 = vrot.slane %v1213_v36, 1 }
 0x1d3   : > { %v1197_v39 = vadd.f32 %v1196_v35, %v1195_v31  ;;  %v1209_v41 = vadd.f32 %v1208_v37, %v1207_v33 }
 0x1d4   : > { %v1203_v43 = vadd.f32 %v1202_v38, %v1201_v34  ;;  %v1215_v45 = vadd.f32 %v1214_v40, %v1213_v36 }
 0x1d5   : > { %v12981_v44 = vmul.f32 0.125, %v1197_v39  ;;  %v12983_v46 = vmul.f32 0.125, %v1209_v41 }
 0x1d6   : > { %v12985_v47 = vmul.f32 0.125, %v1203_v43  ;;  %v12989_v49 = vmul.f32 0.125, %v1215_v45 }
 0x1d7   : > { %v1305_v48 = vsub.f32 %v12965_v13, %v12981_v44  ;;  %v1307_v50 = vsub.f32 %v12968_v15, %v12983_v46 }
 0x1d8   : > { %v1306_v51 = vsub.f32 %v12970_v42, %v12985_v47  ;;  %v12997_v54 = vpop.f32.mrb[4].mxu0  ;;  %v1308_v57 = vsub.f32 %v12974_v18, %v12989_v49  ;;  %v13002_v59 = vpop.f32.mrb[4].mxu1 }
 0x1d9   : > { %v1321_v55 = vmul.f32 %v1305_v48, %v1305_v48  ;;  %v1216_v58 = vrot.slane %v12997_v54, 4  ;;  %14740 = vst [vmem:[#allocation19_spill] sm:$0xff] %v13002_v59  ;;  %v13004_v60 = vpop.f32.mrb[5].mxu0  ;;  %v1323_v61 = vmul.f32 %v1307_v50, %v1307_v50  ;;  %v1228_v63 = vrot.slane %v13002_v59, 4  ;;  %v13008_v2 = vpop.f32.mrb[5].mxu1 }
 0x1da   : > { %v1322_v62 = vmul.f32 %v1306_v51, %v1306_v51  ;;  %v1222_v1 = vrot.slane %v13004_v60, 4  ;;  %v980_v3 = vpop.f32.mrb[6].mxu0  ;;  %v1324_v5 = vmul.f32 %v1308_v57, %v1308_v57  ;;  %v1234_v12 = vrot.slane %v13008_v2, 4  ;;  %v1021_v14 = vpop.f32.mrb[6].mxu1 }
 0x1db   : > { %v1337_v4 = vrot.slane %v1321_v55, 4  ;;  %v1217_v8 = vadd.f32 %v1216_v58, %v12997_v54  ;;  %v981_v16 = vpop.f32.mrb[7].mxu0  ;;  %v1349_v17 = vrot.slane %v1323_v61, 4  ;;  %v1229_v20 = vadd.f32 %v1228_v63, %v13002_v59  ;;  %v1022_v22 = vpop.f32.mrb[7].mxu1 }
 0x1dc   : > { %v1343_v19 = vrot.slane %v1322_v62, 4  ;;  %v1223_v21 = vadd.f32 %v1222_v1, %v13004_v60  ;;  %v1355_v24 = vrot.slane %v1324_v5, 4  ;;  %v1235_v26 = vadd.f32 %v1234_v12, %v13008_v2 }
 0x1dd   : > { %v1338_v23 = vadd.f32 %v1337_v4, %v1321_v55  ;;  %v1218_v25 = vrot.slane %v1217_v8, 2  ;;  %v1350_v27 = vadd.f32 %v1349_v17, %v1323_v61  ;;  %v1230_v29 = vrot.slane %v1229_v20, 2 }
 0x1de   : > { %v1344_v28 = vadd.f32 %v1343_v19, %v1322_v62  ;;  %v1224_v30 = vrot.slane %v1223_v21, 2  ;;  %v1356_v32 = vadd.f32 %v1355_v24, %v1324_v5  ;;  %v1236_v34 = vrot.slane %v1235_v26, 2 }
 0x1df   : > { %v1339_v31 = vrot.slane %v1338_v23, 2  ;;  %v1219_v33 = vadd.f32 %v1218_v25, %v1217_v8  ;;  %v1351_v35 = vrot.slane %v1350_v27, 2  ;;  %v1231_v37 = vadd.f32 %v1230_v29, %v1229_v20 }
 0x1e0   : > { %v1345_v36 = vrot.slane %v1344_v28, 2  ;;  %v1225_v38 = vadd.f32 %v1224_v30, %v1223_v21  ;;  %v1357_v40 = vrot.slane %v1356_v32, 2  ;;  %v1237_v43 = vadd.f32 %v1236_v34, %v1235_v26 }
 0x1e1   : > { %v1340_v39 = vadd.f32 %v1339_v31, %v1338_v23  ;;  %v1220_v41 = vrot.slane %v1219_v33, 1  ;;  %v1352_v45 = vadd.f32 %v1351_v35, %v1350_v27  ;;  %v1232_v50 = vrot.slane %v1231_v37, 1 }
 0x1e2   : > { %v1346_v48 = vadd.f32 %v1345_v36, %v1344_v28  ;;  %v1226_v51 = vrot.slane %v1225_v38, 1  ;;  %v1358_v55 = vadd.f32 %v1357_v40, %v1356_v32  ;;  %v1238_v58 = vrot.slane %v1237_v43, 1 }
 0x1e3   : > { %v1341_v52 = vrot.slane %v1340_v39, 1  ;;  %v1221_v57 = vadd.f32 %v1220_v41, %v1219_v33  ;;  %v1353_v61 = vrot.slane %v1352_v45, 1  ;;  %v1233_v63 = vadd.f32 %v1232_v50, %v1231_v37 }
 0x1e4   : > { %v1347_v62 = vrot.slane %v1346_v48, 1  ;;  %v1227_v1 = vadd.f32 %v1226_v51, %v1225_v38  ;;  %v1359_v4 = vrot.slane %v1358_v55, 1  ;;  %v1239_v8 = vadd.f32 %v1238_v58, %v1237_v43 }
 0x1e5   : > { %v1342_v3 = vadd.f32 %v1341_v52, %v1340_v39  ;;  %v13015_v5 = vmul.f32 0.125, %v1221_v57  ;;  %v1354_v12 = vadd.f32 %v1353_v61, %v1352_v45  ;;  %v13017_v16 = vmul.f32 0.125, %v1233_v63 }
 0x1e6   : > { %v1348_v14 = vadd.f32 %v1347_v62, %v1346_v48  ;;  %v13019_v17 = vmul.f32 0.125, %v1227_v1  ;;  %v1360_v20 = vadd.f32 %v1359_v4, %v1358_v55  ;;  %v13023_v22 = vmul.f32 0.125, %v1239_v8 }
 0x1e7   : > { %v1433_v19 = vmul.f32 0.125, %v1342_v3  ;;  %v1309_v21 = vsub.f32 %v12997_v54, %v13015_v5  ;;  %v1435_v23 = vmul.f32 0.125, %v1354_v12  ;;  %v1311_v25 = vsub.f32 %v13002_v59, %v13017_v16 }
 0x1e8   : > { %v1434_v24 = vmul.f32 0.125, %v1348_v14  ;;  %v1310_v26 = vsub.f32 %v13004_v60, %v13019_v17  ;;  %v13029_v27 = vpop.f32.mrb[8].mxu0  ;;  %v1436_v29 = vmul.f32 0.125, %v1360_v20  ;;  %v1312_v31 = vsub.f32 %v13008_v2, %v13023_v22  ;;  %v13033_v32 = vpop.f32.mrb[8].mxu1 }
 0x1e9   : > { %14741 = vst [vmem:[#allocation20_spill] sm:$0xff] %v13029_v27  ;;  %v1449_v28 = vadd.f32 1e-05, %v1433_v19  ;;  %v1325_v30 = vmul.f32 %v1309_v21, %v1309_v21  ;;  %14742 = vst [vmem:[#allocation21_spill] sm:$0xff] %v13033_v32  ;;  %v13035_v33 = vpop.f32.mrb[9].mxu0  ;;  %v1327_v36 = vmul.f32 %v1311_v25, %v1311_v25  ;;  %v13037_v38 = vpop.f32.mrb[9].mxu1  ;;  %v1503_v62 = vunpack.c.0.s8 %v12995_v53 }
 0x1ea   : > { %14743 = vst [vmem:[#allocation22_spill] sm:$0xff] %v13035_v33  ;;  %v1451_v34 = vadd.f32 1e-05, %v1435_v23  ;;  %v1450_v35 = vadd.f32 1e-05, %v1434_v24  ;;  %v1326_v37 = vmul.f32 %v1310_v26, %v1310_v26  ;;  %14744 = vst [vmem:[#allocation23_spill] sm:$0xff] %v13037_v38  ;;  %v1328_v43 = vmul.f32 %v1312_v31, %v1312_v31 }
 0x1eb   : > { %v1062_v39 = vpop.f32.mrb[10].mxu0  ;;  %12232 = vrsqrt.f32 %v1449_v28  ;;  %v1452_v40 = vadd.f32 1e-05, %v1436_v29  ;;  %v1361_v41 = vrot.slane %v1325_v30, 4  ;;  %v1103_v45 = vpop.f32.mrb[10].mxu1  ;;  %v1373_v50 = vrot.slane %v1327_v36, 4 }
 0x1ec   : > { %v1063_v48 = vpop.f32.mrb[11].mxu0  ;;  %12234 = vrsqrt.f32 %v1451_v34  ;;  %v1367_v51 = vrot.slane %v1326_v37, 4  ;;  %v1104_v52 = vpop.f32.mrb[11].mxu1  ;;  %v1379_v57 = vrot.slane %v1328_v43, 4  ;;  %v13041_v63 = vshrl.u32 %v1504_v56, 7 }
 0x1ed   : > { %12236 = vrsqrt.f32 %v1450_v35  ;;  %v1362_v55 = vadd.f32 %v1361_v41, %v1325_v30  ;;  %v1374_v58 = vadd.f32 %v1373_v50, %v1327_v36  ;;  %v1240_v19 = vrot.slane %v13029_v27, 4 }
 0x1ee   : > { %12238 = vrsqrt.f32 %v1452_v40  ;;  %v1368_v61 = vadd.f32 %v1367_v51, %v1326_v37  ;;  %v1380_v3 = vadd.f32 %v1379_v57, %v1328_v43  ;;  %v1252_v23 = vrot.slane %v13033_v32, 4 }
 0x1ef   : > { %v1363_v1 = vrot.slane %v1362_v55, 2  ;;  %v1375_v4 = vrot.slane %v1374_v58, 2  ;;  %v13046_v24 = vsub.s32 %v1503_v62, %v13041_v63  ;;  %v1241_v56 = vadd.f32 %v1240_v19, %v13029_v27 }
 0x1f0   : > { %v1369_v8 = vrot.slane %v1368_v61, 2  ;;  %v1381_v14 = vrot.slane %v1380_v3, 2  ;;  %v13050_v29 = vsub.s32 0, %v13041_v63  ;;  %v1253_v30 = vadd.f32 %v1252_v23, %v13033_v32 }
 0x1f1   : > { %v1364_v12 = vadd.f32 %v1363_v1, %v1362_v55  ;;  %v1376_v20 = vadd.f32 %v1375_v4, %v1374_v58  ;;  %v13054_v36 = vsub.s32 1, %v13041_v63  ;;  %v1242_v37 = vrot.slane %v1241_v56, 2 }
 0x1f2   : > { %v1370_v21 = vadd.f32 %v1369_v8, %v1368_v61  ;;  %v1382_v53 = vadd.f32 %v1381_v14, %v1380_v3  ;;  %v1254_v43 = vrot.slane %v1253_v30, 2  ;;  %v1246_v45 = vrot.slane %v13035_v33, 4 }
 0x1f3   : > { %v1365_v25 = vrot.slane %v1364_v12, 1  ;;  %v1377_v26 = vrot.slane %v1376_v20, 1  ;;  %v1243_v52 = vadd.f32 %v1242_v37, %v1241_v56  ;;  %v1258_v55 = vrot.slane %v13037_v38, 4 }
 0x1f4   : > { %v1371_v28 = vrot.slane %v1370_v21, 1  ;;  %v1383_v35 = vrot.slane %v1382_v53, 1  ;;  %v1255_v1 = vadd.f32 %v1254_v43, %v1253_v30 }
 0x1f5   : > { %v12233_v31 = vpop.eup %12232  ;;  %v1366_v34 = vadd.f32 %v1365_v25, %v1364_v12  ;;  %v1378_v40 = vadd.f32 %v1377_v26, %v1376_v20  ;;  %v1244_v14 = vrot.slane %v1243_v52, 1  ;;  %v1259_v37 = vadd.f32 %v1258_v55, %v13037_v38 }
 0x1f6   : > { %v12235_v39 = vpop.eup %12234  ;;  %v1372_v41 = vadd.f32 %v1371_v28, %v1370_v21  ;;  %v1384_v51 = vadd.f32 %v1383_v35, %v1382_v53  ;;  %v1256_v53 = vrot.slane %v1255_v1, 1  ;;  %v1247_v35 = vadd.f32 %v1246_v45, %v13035_v33 }
 0x1f7   : > { %v12237_v48 = vpop.eup %12236  ;;  %v1437_v50 = vmul.f32 0.125, %v1366_v34  ;;  %v1439_v61 = vmul.f32 0.125, %v1378_v40  ;;  %v1245_v30 = vadd.f32 %v1244_v14, %v1243_v52 }
 0x1f8   : > { %v12239_v57 = vpop.eup %12238  ;;  %v1497_v58 = vcombine.low %v12233_v31, %v12237_v48  ;;  %v1438_v62 = vmul.f32 0.125, %v1372_v41  ;;  %v13058_v3 = vpop.f32.mrb[12].mxu0  ;;  %v1440_v12 = vmul.f32 0.125, %v1384_v51  ;;  %v1257_v34 = vadd.f32 %v1256_v53, %v1255_v1 }
 0x1f9   : > { %14745 = vst [vmem:[#allocation24_spill] sm:$0xff] %v13058_v3  ;;  %v1498_v4 = vcombine.low %v12235_v39, %v12239_v57  ;;  %v1453_v8 = vadd.f32 1e-05, %v1437_v50  ;;  %v13060_v19 = vpop.f32.mrb[12].mxu1  ;;  %v13062_v20 = vpop.f32.mrb[13].mxu0  ;;  %v13070_v43 = vmul.f32 0.125, %v1245_v30 }
 0x1fa   : > { %v1507_v21 = vrot.slane %v1497_v58, %v13046_v24  ;;  %v1455_v23 = vadd.f32 1e-05, %v1439_v61  ;;  %v1454_v25 = vadd.f32 1e-05, %v1438_v62  ;;  %v13065_v56 = vpop.f32.mrb[13].mxu1  ;;  %v1144_v31 = vpop.f32.mrb[14].mxu0 }
 0x1fb   : > { %v1514_v26 = vrot.slane %v1498_v4, %v13046_v24  ;;  %12240 = vrsqrt.f32 %v1453_v8  ;;  %v1456_v28 = vadd.f32 1e-05, %v1440_v12  ;;  %v1185_v39 = vpop.f32.mrb[14].mxu1  ;;  %v1145_v40 = vpop.f32.mrb[15].mxu0  ;;  %14746 = vst [vmem:[#allocation25_spill] sm:$0xff] %v13070_v43  ;;  %v1264_v48 = vrot.slane %v13058_v3, 4 }
 0x1fc   : > { %12242 = vrsqrt.f32 %v1455_v23  ;;  %v1186_v50 = vpop.f32.mrb[15].mxu1  ;;  %v13073_v51 = vmul.f32 0.125, %v1257_v34  ;;  %v1248_v52 = vrot.slane %v1247_v35, 2  ;;  %v1260_v57 = vrot.slane %v1259_v37, 2 }
 0x1fd   : > { %v1529_v41 = vcombine.low %v1507_v21, %v1514_v26  ;;  %12244 = vrsqrt.f32 %v1454_v25  ;;  %v13076_v58 = vsub.s32 2, %v13041_v63  ;;  %v1313_v45 = vsub.f32 %v13029_v27, %v13070_v43 }
 0x1fe   : > { %12246 = vrsqrt.f32 %v1456_v28  ;;  %14747 = vst [vmem:[#allocation26_spill] sm:$0xff] %v13073_v51  ;;  %v1265_v55 = vadd.f32 %v1264_v48, %v13058_v3  ;;  %v1276_v61 = vrot.slane %v13060_v19, 4  ;;  %v13083_v62 = vsub.s32 3, %v13041_v63 }
 0x1ff   : > { %v1315_v1 = vsub.f32 %v13033_v32, %v13073_v51  ;;  %v1249_v4 = vadd.f32 %v1248_v52, %v1247_v35  ;;  %v1261_v8 = vadd.f32 %v1260_v57, %v1259_v37  ;;  %v13088_v12 = vsub.s32 4, %v13041_v63 }
 0x200   : > { %v1329_v14 = vmul.f32 %v1313_v45, %v1313_v45  ;;  %v1266_v21 = vrot.slane %v1265_v55, 2  ;;  %v1277_v23 = vadd.f32 %v1276_v61, %v13060_v19  ;;  %v13092_v25 = vsub.s32 5, %v13041_v63 }
 0x201   : > { %v1331_v53 = vmul.f32 %v1315_v1, %v1315_v1  ;;  %v1250_v26 = vrot.slane %v1249_v4, 1  ;;  %v1262_v28 = vrot.slane %v1261_v8, 1  ;;  %v13095_v30 = vsub.s32 6, %v13041_v63 }
 0x202   : > { %v1385_v31 = vrot.slane %v1329_v14, 4  ;;  %v1267_v34 = vadd.f32 %v1266_v21, %v1265_v55  ;;  %v1278_v35 = vrot.slane %v1277_v23, 2  ;;  %v1270_v48 = vrot.slane %v13062_v20, 4 }
 0x203   : > { %v1397_v37 = vrot.slane %v1331_v53, 4  ;;  %v1251_v39 = vadd.f32 %v1250_v26, %v1249_v4  ;;  %v1263_v40 = vadd.f32 %v1262_v28, %v1261_v8  ;;  %v1537_v52 = vrot.slane %v1529_v41, %v13046_v24 }
 0x204   : > { %v1386_v57 = vadd.f32 %v1385_v31, %v1329_v14  ;;  %v1268_v45 = vrot.slane %v1267_v34, 1  ;;  %v1279_v61 = vadd.f32 %v1278_v35, %v1277_v23  ;;  %v1282_v55 = vrot.slane %v13065_v56, 4 }
 0x205   : > { %v12241_v50 = vpop.eup %12240  ;;  %v1398_v11 = vadd.f32 %v1397_v37, %v1331_v53  ;;  %v13099_v10 = vmul.f32 0.125, %v1251_v39  ;;  %v13101_v32 = vmul.f32 0.125, %v1263_v40  ;;  %v1271_v26 = vadd.f32 %v1270_v48, %v13062_v20 }
 0x206   : > { %v12243_v1 = vpop.eup %12242  ;;  %v1387_v27 = vrot.slane %v1386_v57, 2  ;;  %v1269_v4 = vadd.f32 %v1268_v45, %v1267_v34  ;;  %v1280_v8 = vrot.slane %v1279_v61, 1 }
 0x207   : > { %14748 = vst [vmem:[#allocation27_spill] sm:$0xff] %v13099_v10  ;;  %14749 = vst [vmem:[#allocation28_spill] sm:$0xff] %v13101_v32  ;;  %v12245_v21 = vpop.eup %12244  ;;  %v1399_v41 = vrot.slane %v1398_v11, 2  ;;  %v1314_v14 = vsub.f32 %v13035_v33, %v13099_v10  ;;  %v1316_v23 = vsub.f32 %v13037_v38, %v13101_v32 }
 0x208   : > { %v12247_v28 = vpop.eup %12246  ;;  %v1499_v59 = vcombine.low %v12241_v50, %v12245_v21  ;;  %v1388_v31 = vadd.f32 %v1387_v27, %v1386_v57  ;;  %v13109_v35 = vmul.f32 0.125, %v1269_v4  ;;  %v1281_v37 = vadd.f32 %v1280_v8, %v1279_v61 }
 0x209   : > { %v1500_v53 = vcombine.low %v12243_v1, %v12247_v28  ;;  %v1400_v34 = vadd.f32 %v1399_v41, %v1398_v11  ;;  %v1330_v40 = vmul.f32 %v1314_v14, %v1314_v14  ;;  %v1332_v45 = vmul.f32 %v1316_v23, %v1316_v23 }
 0x20a   : > { %14750 = vst [vmem:[#allocation29_spill] sm:$0xff] %v13109_v35  ;;  %v1521_v39 = vrot.slane %v1499_v59, %v13046_v24  ;;  %v1389_v50 = vrot.slane %v1388_v31, 1  ;;  %v1317_v21 = vsub.f32 %v13058_v3, %v13109_v35  ;;  %v13115_v33 = vmul.f32 0.125, %v1281_v37  ;;  %v1188_v3 = vld [vmem:[#allocation6] sm:$0xff] }
 0x20b   : > { %v1528_v48 = vrot.slane %v1500_v53, %v13046_v24  ;;  %v1401_v51 = vrot.slane %v1400_v34, 1  ;;  %v1391_v38 = vrot.slane %v1330_v40, 4  ;;  %v1403_v1 = vrot.slane %v1332_v45, 4 }
 0x20c   : > { %v1272_v27 = vrot.slane %v1271_v26, 2  ;;  %v1390_v4 = vadd.f32 %v1389_v50, %v1388_v31  ;;  %v1333_v61 = vmul.f32 %v1317_v21, %v1317_v21  ;;  %v1319_v11 = vsub.f32 %v13060_v19, %v13115_v33 }
 0x20d   : > { %v1530_v57 = vcombine.low %v1521_v39, %v1528_v48  ;;  %v1402_v59 = vadd.f32 %v1401_v51, %v1400_v34  ;;  %v1392_v8 = vadd.f32 %v1391_v38, %v1330_v40  ;;  %v1404_v28 = vadd.f32 %v1403_v1, %v1332_v45 }
 0x20e   : > { %v1273_v41 = vadd.f32 %v1272_v27, %v1271_v26  ;;  %v1441_v23 = vmul.f32 0.125, %v1390_v4  ;;  %v1409_v53 = vrot.slane %v1333_v61, 4  ;;  %v1335_v37 = vmul.f32 %v1319_v11, %v1319_v11 }
 0x20f   : > { %v1544_v14 = vrot.slane %v1530_v57, %v13046_v24  ;;  %v1443_v35 = vmul.f32 0.125, %v1402_v59  ;;  %v1393_v32 = vrot.slane %v1392_v8, 2  ;;  %v1405_v10 = vrot.slane %v1404_v28, 2 }
 0x210   : > { %v1274_v43 = vrot.slane %v1273_v41, 1  ;;  %v13121_v31 = vsub.s32 7, %v13041_v63  ;;  %v1410_v48 = vadd.f32 %v1409_v53, %v1333_v61  ;;  %v1421_v50 = vrot.slane %v1335_v37, 4 }
 0x211   : > { %v1545_v39 = vcombine.low %v1537_v52, %v1544_v14  ;;  %v1394_v51 = vadd.f32 %v1393_v32, %v1392_v8  ;;  %v1406_v38 = vadd.f32 %v1405_v10, %v1404_v28  ;;  %v1283_v26 = vadd.f32 %v1282_v55, %v13065_v56 }
 0x212   : > { %v1275_v34 = vadd.f32 %v1274_v43, %v1273_v41  ;;  %v1457_v45 = vadd.f32 1e-05, %v1441_v23  ;;  %v1459_v21 = vadd.f32 1e-05, %v1443_v35  ;;  %v1411_v1 = vrot.slane %v1410_v48, 2 }
 0x213   : > { %v1597_v40 = vmul.f32 %v1545_v39, %v1188_v3  ;;  %v1395_v27 = vrot.slane %v1394_v51, 1  ;;  %v1407_v57 = vrot.slane %v1406_v38, 1  ;;  %v1422_v4 = vadd.f32 %v1421_v50, %v1335_v37 }
 0x214   : > { %v13124_v11 = vmul.f32 0.125, %v1275_v34  ;;  %12248 = vrsqrt.f32 %v1457_v45 }
 0x215   : > { %v1604_v52 = vrot.slane %v1597_v40, %v13050_v29  ;;  %v1608_v63 = vrot.slane %v1597_v40, %v13054_v36  ;;  %v1612_v61 = vrot.slane %v1597_v40, %v13076_v58  ;;  %v1616_v10 = vrot.slane %v1597_v40, %v13083_v62 }
 0x216   : > { %v13131_v32 = vrot.slane %v1597_v40, %v13088_v12  ;;  %v13134_v3 = vrot.slane %v1597_v40, %v13092_v25  ;;  %v13137_v43 = vrot.slane %v1597_v40, %v13095_v30  ;;  %v1632_v55 = vrot.slane %v1597_v40, %v13121_v31 }
 0x217   : > { %v1681_v35 = vmul.f32 %v1604_v52, %v12981_v44  ;;  %v1682_v59 = vmul.f32 %v1608_v63, %v12985_v47  ;;  %v1683_v8 = vmul.f32 %v1612_v61, %v12983_v46  ;;  %v1684_v28 = vmul.f32 %v1616_v10, %v12989_v49 }
 0x218   : > { %v1685_v41 = vmul.f32 %v13131_v32, %v13015_v5  ;;  %v1686_v14 = vmul.f32 %v13134_v3, %v13019_v17  ;;  %v1687_v23 = vmul.f32 %v13137_v43, %v13017_v16  ;;  %v1688_v53 = vmul.f32 %v1632_v55, %v13023_v22 }
 0x219   : > { %v1713_v37 = vcombine.low %v1681_v35, %v1682_v59  ;;  %v1714_v39 = vcombine.low %v1683_v8, %v1684_v28  ;;  %v1822_v44 = vmul.f32 %v1632_v55, %v13008_v2  ;;  %v1816_v47 = vmul.f32 %v1608_v63, %v12970_v42 }
 0x21a   : > { %v1715_v46 = vcombine.low %v1685_v41, %v1686_v14  ;;  %v1716_v50 = vcombine.low %v1687_v23, %v1688_v53  ;;  %v1815_v49 = vmul.f32 %v1604_v52, %v12965_v13  ;;  %v1818_v5 = vmul.f32 %v1616_v10, %v12974_v18 }
 0x21b   : > { %v1723_v34 = vrot.slane %v1713_v37, %v13046_v24  ;;  %v1730_v17 = vrot.slane %v1714_v39, %v13046_v24  ;;  %v1396_v40 = vadd.f32 %v1395_v27, %v1394_v51  ;;  %v1408_v16 = vadd.f32 %v1407_v57, %v1406_v38  ;;  %v13166_v39 = vld [vmem:[%s12849_s8 + $0x440] sm:$0xff] }
 0x21c   : > { %v1737_v22 = vrot.slane %v1715_v46, %v13046_v24  ;;  %v1744_v35 = vrot.slane %v1716_v50, %v13046_v24  ;;  %v1412_v2 = vadd.f32 %v1411_v1, %v1410_v48  ;;  %v1318_v13 = vsub.f32 %v13062_v20, %v13124_v11  ;;  %v1190_v1 = vld [vmem:[#allocation7] sm:$0xff]  ;;  %v13169_v46 = vld [vmem:[%s12849_s8 + $0x460] sm:$0xff] }
 0x21d   : > { %v1745_v55 = vcombine.low %v1723_v34, %v1730_v17  ;;  %v1442_v42 = vmul.f32 0.125, %v1396_v40  ;;  %v1444_v63 = vmul.f32 0.125, %v1408_v16  ;;  %v1423_v10 = vrot.slane %v1422_v4, 2 }
 0x21e   : > { %v1746_v52 = vcombine.low %v1737_v22, %v1744_v35  ;;  %v1413_v18 = vrot.slane %v1412_v2, 1  ;;  %v1284_v59 = vrot.slane %v1283_v26, 2  ;;  %v1334_v27 = vmul.f32 %v1318_v13, %v1318_v13  ;;  %v12249_v17 = vpop.eup %12248 }
 0x21f   : > { %v1753_v8 = vrot.slane %v1745_v55, %v13046_v24  ;;  %v1458_v51 = vadd.f32 1e-05, %v1442_v42  ;;  %v1460_v38 = vadd.f32 1e-05, %v1444_v63  ;;  %12250 = vrsqrt.f32 %v1459_v21 }
 0x220   : > { %v1760_v45 = vrot.slane %v1746_v52, %v13046_v24  ;;  %v1285_v48 = vadd.f32 %v1284_v59, %v1283_v26  ;;  %v1414_v57 = vadd.f32 %v1413_v18, %v1412_v2  ;;  %v1415_v28 = vrot.slane %v1334_v27, 4 }
 0x221   : > { %12252 = vrsqrt.f32 %v1458_v51  ;;  %v1424_v14 = vadd.f32 %v1423_v10, %v1422_v4  ;;  %v1817_v50 = vmul.f32 %v1612_v61, %v12968_v15  ;;  %v10915_v35 = vcombine.low %v13166_v39, %v13169_v46 }
 0x222   : > { %v1761_v41 = vcombine.low %v1753_v8, %v1760_v45  ;;  %12254 = vrsqrt.f32 %v1460_v38  ;;  %v1416_v23 = vadd.f32 %v1415_v28, %v1334_v27  ;;  %v1286_v53 = vrot.slane %v1285_v48, 1 }
 0x223   : > { %v1445_v34 = vmul.f32 0.125, %v1414_v57  ;;  %v1425_v15 = vrot.slane %v1424_v14, 1  ;;  %v2134_v57 = vld [vmem:[%s12849_s8 + $0x468] sm:$0xff] }
 0x224   : > { %v13163_v37 = vsub.f32 %v1190_v1, %v1761_v41  ;;  %v1417_v21 = vrot.slane %v1416_v23, 2  ;;  %v1287_v26 = vadd.f32 %v1286_v53, %v1285_v48  ;;  %v2130_v1 = vld [vmem:[%s12849_s8 + $0x448] sm:$0xff] }
 0x225   : > { %v1461_v52 = vadd.f32 1e-05, %v1445_v34 }
 0x226   : > { %v1864_v40 = vrot.slane %v13163_v37, %v13121_v31  ;;  %v1840_v4 = vrot.slane %v13163_v37, %v13054_v36  ;;  %v1836_v16 = vrot.slane %v13163_v37, %v13050_v29  ;;  %v1848_v22 = vrot.slane %v13163_v37, %v13083_v62 }
 0x227   : > { %v1418_v61 = vadd.f32 %v1417_v21, %v1416_v23  ;;  %v13182_v2 = vmul.f32 0.125, %v1287_v26  ;;  %v1844_v59 = vrot.slane %v13163_v37, %v13076_v58  ;;  %v10916_v26 = vcombine.high %v13166_v39, %v13169_v46 }
 0x228   : > { %v13184_v55 = vadd.f32 %v1864_v40, %v1822_v44  ;;  %v1914_v42 = vadd.f32 %v1840_v4, %v1816_v47  ;;  %v1913_v63 = vadd.f32 %v1836_v16, %v1815_v49  ;;  %v1916_v13 = vadd.f32 %v1848_v22, %v1818_v5  ;;  %v2137_v40 = vld [vmem:[%s12849_s8 + $0x480] sm:$0xff] }
 0x229   : > { %v1419_v18 = vrot.slane %v1418_v61, 1  ;;  %v1320_v10 = vsub.f32 %v13065_v56, %v13182_v2  ;;  %v12251_v8 = vpop.eup %12250  ;;  %v13192_v41 = vadd.f32 %v1844_v59, %v1817_v50  ;;  %v10918_v50 = vcombine.high %v2130_v1, %v2134_v57 }
 0x22a   : > { %vm1930_vm1 = vcmp.gt.f32.partialorder %v1914_v42, 0.0  ;;  %v1946_v51 = vmul.f32 0.02, %v1914_v42  ;;  %vm1929_vm2 = vcmp.gt.f32.partialorder %v1913_v63, 0.0  ;;  %v1945_v38 = vmul.f32 0.02, %v1913_v63 }
 0x22b   : > { %v12253_v44 = vpop.eup %12252  ;;  %vm1932_vm3 = vcmp.gt.f32.partialorder %v1916_v13, 0.0  ;;  %v1948_v47 = vmul.f32 0.02, %v1916_v13  ;;  %v1420_v49 = vadd.f32 %v1419_v18, %v1418_v61  ;;  %v1336_v5 = vmul.f32 %v1320_v10, %v1320_v10  ;;  %v2138_v61 = vld [vmem:[%s12849_s8 + $0x488] sm:$0xff] }
 0x22c   : > { %v12255_v27 = vpop.eup %12254  ;;  %v1962_v45 = vsel %vm1930_vm1, %v1914_v42, %v1946_v51  ;;  %v1961_v48 = vsel %vm1929_vm2, %v1913_v63, %v1945_v38  ;;  %v1546_v28 = vcombine.low %v12249_v17, %v12253_v44  ;;  %v2141_v17 = vld [vmem:[%s12849_s8 + $0x4a0] sm:$0xff]  ;;  %v2142_v42 = vld [vmem:[%s12849_s8 + $0x4a8] sm:$0xff]  ;;  %12256 = vrsqrt.f32 %v1461_v52 }
 0x22d   : > { %v13194_v23 = vpack.c.bf16 %v1962_v45, %v1962_v45  ;;  %v13196_v53 = vpack.c.bf16 %v1961_v48, %v1961_v48  ;;  %v1964_v34 = vsel %vm1932_vm3, %v1916_v13, %v1948_v47  ;;  %v1547_v21 = vcombine.low %v12251_v8, %v12255_v27  ;;  %v2150_v44 = vld [vmem:[%s12849_s8 + $0x4e8] sm:$0xff] }
 0x22e   : > { %v13202_v4 = vrot.slane %v1546_v28, %v13046_v24  ;;  %v1446_v16 = vmul.f32 0.125, %v1420_v49  ;;  %v1427_v22 = vrot.slane %v1336_v5, 4  ;;  %v1426_v13 = vadd.f32 %v1425_v15, %v1424_v14 }
 0x22f   : > { %8169 = vmatprep.mubr.bf16.mxu0 %v13194_v23  ;;  %8497 = vmatprep.mubr.bf16.mxu1 %v13194_v23  ;;  %v13210_v63 = vrot.slane %v1547_v21, %v13046_v24  ;;  %v13214_v18 = vpack.c.bf16 %v1964_v34, %v1964_v34  ;;  %v1820_v8 = vmul.f32 %v13134_v3, %v13004_v60  ;;  %v2157_v34 = vld [vmem:[%s12849_s8 + $0x520] sm:$0xff]  ;;  %v2154_v21 = vld [vmem:[%s12849_s8 + $0x508] sm:$0xff]  ;;  %vm1931_vm4 = vcmp.gt.f32.partialorder %v13192_v41, 0.0 }
 0x230   : > { %8170 = vmatmul.mubr.bf16.vlgmr.msra.gmra.mrb[16].mxu0 %v13196_v53  ;;  %8498 = vmatmul.mubr.bf16.vlgmr.msra.gmra.mrb[16].mxu1 %v13196_v53  ;;  %v1462_v10 = vadd.f32 1e-05, %v1446_v16  ;;  %v1428_v59 = vadd.f32 %v1427_v22, %v1336_v5  ;;  %v14751_v51 = vcombine.low %v12946_v0, %v12949_v6  ;;  %v14752_v14 = vcombine.low %v12952_v7, %v12957_v9  ;;  %v2145_v6 = vld [vmem:[%s12849_s8 + $0x4c0] sm:$0xff]  ;;  %v2146_v9 = vld [vmem:[%s12849_s8 + $0x4c8] sm:$0xff] }
 0x231   : > { %v10917_v15 = vcombine.low %v2130_v1, %v2134_v57  ;;  %v1578_v52 = vcombine.low %v13202_v4, %v13210_v63  ;;  %v1856_v38 = vrot.slane %v13163_v37, %v13092_v25  ;;  %8210 = vmatprep.mubr.bf16.mxu0 %v13214_v18  ;;  %8538 = vmatprep.mubr.bf16.mxu1 %v13214_v18  ;;  %v2149_v7 = vld [vmem:[%s12849_s8 + $0x4e0] sm:$0xff]  ;;  %v1447_v49 = vmul.f32 0.125, %v1426_v13  ;;  %v2162_v13 = vld [vmem:[%s12849_s8 + $0x548] sm:$0xff] }
 0x232   : > { %8179 = vmatpush1.bf16.msra.mxu0 %v14751_v51  ;;  %8507 = vmatpush1.bf16.msra.mxu1 %v14752_v14  ;;  %v10924_v60 = vcombine.high %v2137_v40, %v2141_v17  ;;  %v10926_v0 = vcombine.high %v2138_v61, %v2142_v42  ;;  %12258 = vrsqrt.f32 %v1462_v10  ;;  %v1429_v3 = vrot.slane %v1428_v59, 2  ;;  %v2153_v57 = vld [vmem:[%s12849_s8 + $0x500] sm:$0xff]  ;;  %v2166_v10 = vld [vmem:[%s12849_s8 + $0x568] sm:$0xff] }
 0x233   : > { %8180 = vmatprep.subr.bf16.mxu0 %v10916_v26  ;;  %8508 = vmatprep.subr.bf16.mxu1 %v10918_v50  ;;  %v13234_v47 = vadd.f32 %v1856_v38, %v1820_v8  ;;  %v10923_v27 = vcombine.low %v2137_v40, %v2141_v17  ;;  %v10925_v45 = vcombine.low %v2138_v61, %v2142_v42  ;;  %v2158_v26 = vld [vmem:[%s12849_s8 + $0x528] sm:$0xff]  ;;  %v1463_v16 = vadd.f32 1e-05, %v1447_v49  ;;  %v2161_v17 = vld [vmem:[%s12849_s8 + $0x540] sm:$0xff] }
 0x234   : > { %v1430_v5 = vadd.f32 %v1429_v3, %v1428_v59  ;;  %v10932_v48 = vcombine.high %v2145_v6, %v2149_v7  ;;  %v10934_v1 = vcombine.high %v2146_v9, %v2150_v44  ;;  %v10931_v46 = vcombine.low %v2145_v6, %v2149_v7  ;;  %v2165_v42 = vld [vmem:[%s12849_s8 + $0x560] sm:$0xff]  ;;  %v2170_v3 = vld [vmem:[%s12849_s8 + $0x588] sm:$0xff] }
 0x235   : > { %v10940_v40 = vcombine.high %v2153_v57, %v2157_v34  ;;  %v10942_v50 = vcombine.high %v2154_v21, %v2158_v26  ;;  %12260 = vrsqrt.f32 %v1463_v16  ;;  %v10939_v51 = vcombine.low %v2153_v57, %v2157_v34  ;;  %v2173_v6 = vld [vmem:[%s12849_s8 + $0x5a0] sm:$0xff]  ;;  %v2174_v7 = vld [vmem:[%s12849_s8 + $0x5a8] sm:$0xff] }
 0x236   : > { %8181 = vmatpush1.bf16.msra.mxu0 %v10915_v35  ;;  %8509 = vmatpush1.bf16.msra.mxu1 %v10917_v15  ;;  %v1431_v28 = vrot.slane %v1430_v5, 1  ;;  %v13243_v39 = vpop.eup %12256  ;;  %v10933_v35 = vcombine.low %v2146_v9, %v2150_v44  ;;  %v10941_v14 = vcombine.low %v2154_v21, %v2158_v26  ;;  %v10948_v38 = vcombine.high %v2161_v17, %v2165_v42  ;;  %v2185_v16 = vld [vmem:[%s12849_s8 + $0x600] sm:$0xff]  ;;  %v2214_v63 = vld [vmem:[%s12849_s8 + $0x6e8] sm:$0xff] }
 0x237   : > { %8182 = vmatprep.subr.bf16.mxu0 %v10924_v60  ;;  %8510 = vmatprep.subr.bf16.mxu1 %v10926_v0  ;;  %v10950_v60 = vcombine.high %v2162_v13, %v2166_v10  ;;  %v2169_v0 = vld [vmem:[%s12849_s8 + $0x580] sm:$0xff]  ;;  %v10947_v9 = vcombine.low %v2161_v17, %v2165_v42  ;;  %v10949_v44 = vcombine.low %v2162_v13, %v2166_v10  ;;  %vm1934_vm5 = vcmp.gt.f32.partialorder %v13234_v47, 0.0 }
 0x238   : > { %v1432_v22 = vadd.f32 %v1431_v28, %v1430_v5  ;;  %v10956_v49 = vcombine.high %v2169_v0, %v2173_v6  ;;  %v10958_v5 = vcombine.high %v2170_v3, %v2174_v7  ;;  %v10955_v57 = vcombine.low %v2169_v0, %v2173_v6  ;;  %v2201_v0 = vld [vmem:[%s12849_s8 + $0x680] sm:$0xff] }
 0x239   : > { %v10957_v28 = vcombine.low %v2170_v3, %v2174_v7  ;;  %v1586_v6 = vrot.slane %v1578_v52, %v13046_v24  ;;  %v13294_v52 = vld [vmem:[%s12849_s8 + $0x700] sm:$0xff]  ;;  %vm1936_vm7 = vcmp.gt.f32.partialorder %v13184_v55, 0.0 }
 0x23a   : > { %8183 = vmatpush1.bf16.msra.mxu0 %v10923_v27  ;;  %8511 = vmatpush1.bf16.msra.mxu1 %v10925_v45  ;;  %v1448_v61 = vmul.f32 0.125, %v1432_v22  ;;  %v2177_v27 = vld [vmem:[%s12849_s8 + $0x5c0] sm:$0xff] }
 0x23b   : > { %8184 = vmatprep.subr.bf16.mxu0 %v10932_v48  ;;  %8512 = vmatprep.subr.bf16.mxu1 %v10934_v1  ;;  %v2181_v45 = vld [vmem:[%s12849_s8 + $0x5e0] sm:$0xff]  ;;  %v2178_v48 = vld [vmem:[%s12849_s8 + $0x5c8] sm:$0xff] }
 0x23c   : > { %v12259_v59 = vpop.eup %12258  ;;  %v1464_v8 = vadd.f32 1e-05, %v1448_v61  ;;  %v2182_v1 = vld [vmem:[%s12849_s8 + $0x5e8] sm:$0xff]  ;;  %v10964_v21 = vcombine.high %v2177_v27, %v2181_v45  ;;  %v2189_v22 = vld [vmem:[%s12849_s8 + $0x620] sm:$0xff]  ;;  %v10963_v17 = vcombine.low %v2177_v27, %v2181_v45 }
 0x23d   : > { %v1548_v15 = vcombine.low %v13243_v39, %v12259_v59  ;;  %v10966_v26 = vcombine.high %v2178_v48, %v2182_v1  ;;  %v2186_v39 = vld [vmem:[%s12849_s8 + $0x608] sm:$0xff]  ;;  %v10965_v61 = vcombine.low %v2178_v48, %v2182_v1  ;;  %v10972_v59 = vcombine.high %v2185_v16, %v2189_v22  ;;  %v13283_v27 = vld [vmem:[%s12849_s8 + $0x6c0] sm:$0xff] }
 0x23e   : > { %8185 = vmatpush1.bf16.msra.mxu0 %v10931_v46  ;;  %8513 = vmatpush1.bf16.msra.mxu1 %v10933_v35  ;;  %12262 = vrsqrt.f32 %v1464_v8  ;;  %v2190_v46 = vld [vmem:[%s12849_s8 + $0x628] sm:$0xff]  ;;  %v1819_v35 = vmul.f32 %v13131_v32, %v12997_v54  ;;  %v2193_v32 = vld [vmem:[%s12849_s8 + $0x640] sm:$0xff] }
 0x23f   : > { %8186 = vmatprep.subr.bf16.mxu0 %v10940_v40  ;;  %8514 = vmatprep.subr.bf16.mxu1 %v10942_v50  ;;  %v12261_v34 = vpop.eup %12260  ;;  %v1852_v40 = vrot.slane %v13163_v37, %v13088_v12  ;;  %v1570_v42 = vrot.slane %v1548_v15, %v13046_v24  ;;  %v10974_v54 = vcombine.high %v2186_v39, %v2190_v46  ;;  %v2197_v8 = vld [vmem:[%s12849_s8 + $0x660] sm:$0xff]  ;;  %v13289_v48 = vld [vmem:[%s12849_s8 + $0x6c8] sm:$0xff] }
 0x240   : > { %v10971_v15 = vcombine.low %v2185_v16, %v2189_v22  ;;  %v10980_v7 = vcombine.high %v2193_v32, %v2197_v8  ;;  %v13286_v45 = vld [vmem:[%s12849_s8 + $0x6e0] sm:$0xff]  ;;  %v1189_v1 = vld [vmem:[#allocation6 + $0x8] sm:$0xff] }
 0x241   : > { %v13267_v10 = vadd.f32 %v1852_v40, %v1819_v35  ;;  %v10995_v40 = vcombine.low %v13283_v27, %v13286_v45 }
 0x242   : > { %8187 = vmatpush1.bf16.msra.mxu0 %v10939_v51  ;;  %8515 = vmatpush1.bf16.msra.mxu1 %v10941_v14  ;;  %v2194_v51 = vld [vmem:[%s12849_s8 + $0x648] sm:$0xff] }
 0x243   : > { %8188 = vmatprep.subr.bf16.mxu0 %v10948_v38  ;;  %8516 = vmatprep.subr.bf16.mxu1 %v10950_v60  ;;  %v2198_v14 = vld [vmem:[%s12849_s8 + $0x668] sm:$0xff]  ;;  %v10973_v60 = vcombine.low %v2186_v39, %v2190_v46  ;;  %vm1933_vm6 = vcmp.gt.f32.partialorder %v13267_v10, 0.0 }
 0x246   : > { %8189 = vmatpush1.bf16.msra.mxu0 %v10947_v9  ;;  %8517 = vmatpush1.bf16.msra.mxu1 %v10949_v44  ;;  %v10982_v9 = vcombine.high %v2194_v51, %v2198_v14  ;;  %v2205_v44 = vld [vmem:[%s12849_s8 + $0x6a0] sm:$0xff] }
 0x247   : > { %8190 = vmatprep.subr.bf16.mxu0 %v10956_v49  ;;  %8518 = vmatprep.subr.bf16.mxu1 %v10958_v5  ;;  %v2202_v49 = vld [vmem:[%s12849_s8 + $0x688] sm:$0xff]  ;;  %v10987_v22 = vcombine.low %v2201_v0, %v2205_v44  ;;  %v10988_v39 = vcombine.high %v2201_v0, %v2205_v44  ;;  %v14753_v0 = vld [vmem:[#allocation25_spill] sm:$0xff] }
 0x248   : > { %v12263_v50 = vpop.eup %12262  ;;  %v2206_v5 = vld [vmem:[%s12849_s8 + $0x6a8] sm:$0xff] }
 0x249   : > { %v1549_v13 = vcombine.low %v12261_v34, %v12263_v50  ;;  %v13297_v34 = vld [vmem:[%s12849_s8 + $0x720] sm:$0xff]  ;;  %v10990_v46 = vcombine.high %v2202_v49, %v2206_v5  ;;  %v10989_v35 = vcombine.low %v2202_v49, %v2206_v5  ;;  %v10996_v50 = vcombine.high %v13283_v27, %v13286_v45  ;;  %v14756_v49 = vld [vmem:[#allocation28_spill] sm:$0xff]  ;;  %v14757_v27 = vld [vmem:[#allocation29_spill] sm:$0xff] }
 0x24a   : > { %8191 = vmatpush1.bf16.msra.mxu0 %v10955_v57  ;;  %8519 = vmatpush1.bf16.msra.mxu1 %v10957_v28  ;;  %v10979_v57 = vcombine.low %v2193_v32, %v2197_v8  ;;  %v10981_v28 = vcombine.low %v2194_v51, %v2198_v14 }
 0x24b   : > { %8192 = vmatprep.subr.bf16.mxu0 %v10964_v21  ;;  %8520 = vmatprep.subr.bf16.mxu1 %v10966_v26  ;;  %v1577_v38 = vrot.slane %v1549_v13, %v13046_v24  ;;  %v13300_v21 = vld [vmem:[%s12849_s8 + $0x708] sm:$0xff]  ;;  %v11004_v13 = vcombine.high %v13294_v52, %v13297_v34 }
 0x24c   : > { %v13303_v26 = vld [vmem:[%s12849_s8 + $0x728] sm:$0xff] }
 0x24d   : > { %v1579_v3 = vcombine.low %v1570_v42, %v1577_v38  ;;  %v10998_v42 = vcombine.high %v13289_v48, %v2214_v63 }
 0x24e   : > { %8193 = vmatpush1.bf16.msra.mxu0 %v10963_v17  ;;  %8521 = vmatpush1.bf16.msra.mxu1 %v10965_v61  ;;  %v10997_v61 = vcombine.low %v13289_v48, %v2214_v63 }
 0x24f   : > { %8194 = vmatprep.subr.bf16.mxu0 %v10972_v59  ;;  %8522 = vmatprep.subr.bf16.mxu1 %v10974_v54  ;;  %v1593_v4 = vrot.slane %v1579_v3, %v13046_v24  ;;  %v11006_v59 = vcombine.high %v13300_v21, %v13303_v26  ;;  %v14754_v3 = vld [vmem:[#allocation27_spill] sm:$0xff] }
 0x251   : > { %v1594_v16 = vcombine.low %v1586_v6, %v1593_v4 }
 0x252   : > { %8195 = vmatpush1.bf16.msra.mxu0 %v10971_v15  ;;  %8523 = vmatpush1.bf16.msra.mxu1 %v10973_v60 }
 0x253   : > { %8196 = vmatprep.subr.bf16.mxu0 %v10980_v7  ;;  %8524 = vmatprep.subr.bf16.mxu1 %v10982_v9  ;;  %v1598_v17 = vmul.f32 %v1594_v16, %v1189_v1  ;;  %v14755_v9 = vld [vmem:[#allocation26_spill] sm:$0xff] }
 0x255   : > { %v13316_v54 = vrot.slane %v1598_v17, %v13050_v29  ;;  %v13319_v32 = vrot.slane %v1598_v17, %v13054_v36  ;;  %v13322_v8 = vrot.slane %v1598_v17, %v13076_v58  ;;  %v13325_v51 = vrot.slane %v1598_v17, %v13083_v62 }
 0x256   : > { %8197 = vmatpush1.bf16.msra.mxu0 %v10979_v57  ;;  %8525 = vmatpush1.bf16.msra.mxu1 %v10981_v28  ;;  %v13328_v14 = vrot.slane %v1598_v17, %v13088_v12  ;;  %v13331_v38 = vrot.slane %v1598_v17, %v13092_v25  ;;  %v13334_v15 = vrot.slane %v1598_v17, %v13095_v30  ;;  %v2225_v57 = vld [vmem:[%s12849_s8 + $0x740] sm:$0xff] }
 0x257   : > { %8198 = vmatprep.subr.bf16.mxu0 %v10988_v39  ;;  %8526 = vmatprep.subr.bf16.mxu1 %v10990_v46  ;;  %v1664_v60 = vrot.slane %v1598_v17, %v13121_v31  ;;  %v1689_v6 = vmul.f32 %v13316_v54, %v14753_v0  ;;  %v1690_v7 = vmul.f32 %v13319_v32, %v14754_v3  ;;  %v2229_v46 = vld [vmem:[%s12849_s8 + $0x760] sm:$0xff]  ;;  %v2226_v17 = vld [vmem:[%s12849_s8 + $0x748] sm:$0xff] }
 0x258   : > { %v1691_v44 = vmul.f32 %v13322_v8, %v14755_v9  ;;  %v1692_v5 = vmul.f32 %v13325_v51, %v14756_v49  ;;  %v1693_v45 = vmul.f32 %v13328_v14, %v14757_v27  ;;  %v1694_v48 = vmul.f32 %v13331_v38, %v13124_v11  ;;  %v2230_v11 = vld [vmem:[%s12849_s8 + $0x768] sm:$0xff]  ;;  %v2237_v3 = vld [vmem:[%s12849_s8 + $0x7a0] sm:$0xff] }
 0x259   : > { %v1695_v4 = vmul.f32 %v13334_v15, %v13115_v33  ;;  %v1696_v63 = vmul.f32 %v1664_v60, %v13182_v2  ;;  %v1762_v1 = vcombine.low %v1689_v6, %v1690_v7  ;;  %v1830_v39 = vmul.f32 %v1664_v60, %v13065_v56  ;;  %v2233_v6 = vld [vmem:[%s12849_s8 + $0x780] sm:$0xff]  ;;  %v2234_v9 = vld [vmem:[%s12849_s8 + $0x788] sm:$0xff] }
 0x25a   : > { %8199 = vmatpush1.bf16.msra.mxu0 %v10987_v22  ;;  %8527 = vmatpush1.bf16.msra.mxu1 %v10989_v35  ;;  %v1763_v28 = vcombine.low %v1691_v44, %v1692_v5  ;;  %v1764_v16 = vcombine.low %v1693_v45, %v1694_v48  ;;  %v11005_v56 = vcombine.low %v13300_v21, %v13303_v26  ;;  %v2238_v44 = vld [vmem:[%s12849_s8 + $0x7a8] sm:$0xff]  ;;  %v2241_v49 = vld [vmem:[%s12849_s8 + $0x7c0] sm:$0xff] }
 0x25b   : > { %8200 = vmatprep.subr.bf16.mxu0 %v10996_v50  ;;  %8528 = vmatprep.subr.bf16.mxu1 %v10998_v42  ;;  %v1765_v22 = vcombine.low %v1695_v4, %v1696_v63  ;;  %v1772_v35 = vrot.slane %v1762_v1, %v13046_v24  ;;  %v11003_v50 = vcombine.low %v13294_v52, %v13297_v34  ;;  %v14758_v5 = vld [vmem:[#allocation19_spill] sm:$0xff]  ;;  %v2242_v63 = vld [vmem:[%s12849_s8 + $0x7c8] sm:$0xff] }
 0x25c   : > { %v1779_v33 = vrot.slane %v1763_v28, %v13046_v24  ;;  %v1786_v2 = vrot.slane %v1764_v16, %v13046_v24  ;;  %v11012_v60 = vcombine.high %v2225_v57, %v2229_v46  ;;  %v11014_v0 = vcombine.high %v2226_v17, %v2230_v11  ;;  %v2245_v4 = vld [vmem:[%s12849_s8 + $0x7e0] sm:$0xff]  ;;  %v2246_v1 = vld [vmem:[%s12849_s8 + $0x7e8] sm:$0xff] }
 0x25d   : > { %v1793_v42 = vrot.slane %v1765_v22, %v13046_v24  ;;  %v11013_v34 = vcombine.low %v2226_v17, %v2230_v11  ;;  %v11020_v21 = vcombine.high %v2233_v6, %v2237_v3  ;;  %v1821_v27 = vmul.f32 %v13137_v43, %v14758_v5 }
 0x25e   : > { %8201 = vmatpush1.bf16.msra.mxu0 %v10995_v40  ;;  %8529 = vmatpush1.bf16.msra.mxu1 %v10997_v61  ;;  %v1794_v7 = vcombine.low %v1772_v35, %v1779_v33  ;;  %v11011_v61 = vcombine.low %v2225_v57, %v2229_v46  ;;  %v1860_v45 = vrot.slane %v13163_v37, %v13095_v30  ;;  %v2249_v37 = vld [vmem:[%s12849_s8 + $0x800] sm:$0xff]  ;;  %v1947_v22 = vmul.f32 0.02, %v13192_v41  ;;  %v2250_v33 = vld [vmem:[%s12849_s8 + $0x808] sm:$0xff] }
 0x25f   : > { %8202 = vmatprep.subr.bf16.mxu0 %v11004_v13  ;;  %8530 = vmatprep.subr.bf16.mxu1 %v11006_v59  ;;  %v1795_v40 = vcombine.low %v1786_v2, %v1793_v42  ;;  %v11022_v13 = vcombine.high %v2234_v9, %v2238_v44  ;;  %v1191_v59 = vld [vmem:[#allocation7 + $0x8] sm:$0xff]  ;;  %v11019_v28 = vcombine.low %v2233_v6, %v2237_v3  ;;  %v2253_v35 = vld [vmem:[%s12849_s8 + $0x820] sm:$0xff]  ;;  %v2254_v2 = vld [vmem:[%s12849_s8 + $0x828] sm:$0xff] }
 0x260   : > { %v1802_v52 = vrot.slane %v1794_v7, %v13046_v24  ;;  %v13379_v57 = vadd.f32 %v1860_v45, %v1821_v27  ;;  %v11021_v16 = vcombine.low %v2234_v9, %v2238_v44  ;;  %v11028_v43 = vcombine.high %v2241_v49, %v2245_v4  ;;  %v2257_v7 = vld [vmem:[%s12849_s8 + $0x840] sm:$0xff]  ;;  %v14759_v27 = vld [vmem:[#allocation22_spill] sm:$0xff] }
 0x261   : > { %v1809_v26 = vrot.slane %v1795_v40, %v13046_v24  ;;  %v11030_v17 = vcombine.high %v2242_v63, %v2246_v1  ;;  %v11027_v42 = vcombine.low %v2241_v49, %v2245_v4  ;;  %v11038_v6 = vcombine.high %v2250_v33, %v2254_v2  ;;  %v2261_v44 = vld [vmem:[%s12849_s8 + $0x860] sm:$0xff]  ;;  %v2262_v40 = vld [vmem:[%s12849_s8 + $0x868] sm:$0xff] }
 0x262   : > { %8203 = vmatpush1.bf16.msra.mxu0 %v11003_v50  ;;  %8531 = vmatpush1.bf16.msra.mxu1 %v11005_v56  ;;  %v1950_v50 = vmul.f32 0.02, %v13234_v47  ;;  %v1963_v3 = vsel %vm1931_vm4, %v13192_v41, %v1947_v22  ;;  %v11044_v41 = vcombine.high %v2257_v7, %v2261_v44  ;;  %v2270_v49 = vld [vmem:[%s12849_s8 + $0x8a8] sm:$0xff]  ;;  %v11043_v5 = vcombine.low %v2257_v7, %v2261_v44  ;;  %v2289_v7 = vld [vmem:[%s12849_s8 + $0x940] sm:$0xff] }
 0x263   : > { %8204 = vmatprep.subr.bf16.mxu0 %v11012_v60  ;;  %8532 = vmatprep.subr.bf16.mxu1 %v11014_v0  ;;  %v1810_v48 = vcombine.low %v1802_v52, %v1809_v26  ;;  %v11029_v60 = vcombine.low %v2242_v63, %v2246_v1  ;;  %v11036_v0 = vcombine.high %v2249_v37, %v2253_v35  ;;  %vm1935_vm8 = vcmp.gt.f32.partialorder %v13379_v57, 0.0 }
 0x264   : > { %v1966_v9 = vsel %vm1934_vm5, %v13234_v47, %v1950_v50  ;;  %v13401_v52 = vpack.c.bf16 %v1963_v3, %v1963_v3  ;;  %v2266_v47 = vld [vmem:[%s12849_s8 + $0x888] sm:$0xff]  ;;  %v1824_v45 = vmul.f32 %v13319_v32, %v14759_v27 }
 0x265   : > { %v13381_v46 = vsub.f32 %v1191_v59, %v1810_v48  ;;  %v2269_v59 = vld [vmem:[%s12849_s8 + $0x8a0] sm:$0xff]  ;;  %v11054_v1 = vcombine.high %v2266_v47, %v2270_v49  ;;  %v2282_v50 = vld [vmem:[%s12849_s8 + $0x908] sm:$0xff] }
 0x266   : > { %8205 = vmatpush1.bf16.msra.mxu0 %v11011_v61  ;;  %8533 = vmatpush1.bf16.msra.mxu1 %v11013_v34  ;;  %v11035_v61 = vcombine.low %v2249_v37, %v2253_v35  ;;  %v11037_v34 = vcombine.low %v2250_v33, %v2254_v2  ;;  %v2281_v33 = vld [vmem:[%s12849_s8 + $0x900] sm:$0xff] }
 0x267   : > { %8206 = vmatprep.subr.bf16.mxu0 %v11020_v21  ;;  %8534 = vmatprep.subr.bf16.mxu1 %v11022_v13  ;;  %v1896_v11 = vrot.slane %v13381_v46, %v13121_v31  ;;  %v13403_v21 = vpack.c.bf16 %v1966_v9, %v1966_v9  ;;  %v2265_v13 = vld [vmem:[%s12849_s8 + $0x880] sm:$0xff]  ;;  %v1872_v63 = vrot.slane %v13381_v46, %v13054_v36 }
 0x268   : > { %v11052_v4 = vcombine.high %v2265_v13, %v2269_v59  ;;  %v11051_v37 = vcombine.low %v2265_v13, %v2269_v59  ;;  %v2285_v2 = vld [vmem:[%s12849_s8 + $0x920] sm:$0xff]  ;;  %v1880_v59 = vrot.slane %v13381_v46, %v13083_v62 }
 0x269   : > { %v13392_v56 = vadd.f32 %v1896_v11, %v1830_v39  ;;  %v2258_v39 = vld [vmem:[%s12849_s8 + $0x848] sm:$0xff]  ;;  %v13421_v32 = vadd.f32 %v1872_v63, %v1824_v45  ;;  %v11053_v11 = vcombine.low %v2266_v47, %v2270_v49  ;;  %v2293_v9 = vld [vmem:[%s12849_s8 + $0x960] sm:$0xff]  ;;  %v11067_v44 = vcombine.low %v2281_v33, %v2285_v2  ;;  %v14762_v47 = vld [vmem:[#allocation21_spill] sm:$0xff] }
 0x26a   : > { %8207 = vmatpush1.bf16.msra.mxu0 %v11019_v28  ;;  %8535 = vmatpush1.bf16.msra.mxu1 %v11021_v16  ;;  %v11046_v26 = vcombine.high %v2258_v39, %v2262_v40  ;;  %v11045_v48 = vcombine.low %v2258_v39, %v2262_v40  ;;  %v2273_v28 = vld [vmem:[%s12849_s8 + $0x8c0] sm:$0xff]  ;;  %v2290_v39 = vld [vmem:[%s12849_s8 + $0x948] sm:$0xff]  ;;  %v1825_v49 = vmul.f32 %v13322_v8, %v14762_v47 }
 0x26b   : > { %8208 = vmatprep.subr.bf16.mxu0 %v11028_v43  ;;  %8536 = vmatprep.subr.bf16.mxu1 %v11030_v17  ;;  %v2277_v16 = vld [vmem:[%s12849_s8 + $0x8e0] sm:$0xff]  ;;  %v2274_v43 = vld [vmem:[%s12849_s8 + $0x8c8] sm:$0xff]  ;;  %v11076_v27 = vcombine.high %v2289_v7, %v2293_v9  ;;  %v1888_v47 = vrot.slane %v13381_v46, %v13092_v25  ;;  %vm1938_vm9 = vcmp.gt.f32.partialorder %v13421_v32, 0.0  ;;  %vm1944_vm15 = vcmp.gt.f32.partialorder %v13392_v56, 0.0 }
 0x26c   : > { %v2278_v17 = vld [vmem:[%s12849_s8 + $0x8e8] sm:$0xff]  ;;  %v11060_v22 = vcombine.high %v2273_v28, %v2277_v16 }
 0x26d   : > { %v11062_v35 = vcombine.high %v2274_v43, %v2278_v17  ;;  %v2294_v40 = vld [vmem:[%s12849_s8 + $0x968] sm:$0xff] }
 0x26e   : > { %8209 = vmatpush1.bf16.msra.mxu0 %v11027_v42  ;;  %8537 = vmatpush1.bf16.msra.mxu1 %v11029_v60  ;;  %v2286_v42 = vld [vmem:[%s12849_s8 + $0x928] sm:$0xff]  ;;  %v11059_v60 = vcombine.low %v2273_v28, %v2277_v16  ;;  %v11075_v16 = vcombine.low %v2289_v7, %v2293_v9 }
 0x26f   : > { %8219 = vmatprep.subr.bf16.mxu0 %v11036_v0  ;;  %8547 = vmatprep.subr.bf16.mxu1 %v11038_v6  ;;  %v11061_v0 = vcombine.low %v2274_v43, %v2278_v17  ;;  %v11068_v6 = vcombine.high %v2281_v33, %v2285_v2  ;;  %v11070_v3 = vcombine.high %v2282_v50, %v2286_v42  ;;  %v2302_v28 = vld [vmem:[%s12849_s8 + $0x9a8] sm:$0xff] }
 0x270   : > { %v11077_v43 = vcombine.low %v2290_v39, %v2294_v40  ;;  %v2310_v33 = vld [vmem:[%s12849_s8 + $0x9e8] sm:$0xff] }
 0x271   : > { %8211 = vmatmul.mubr.bf16.vlgmr.msra.gmra.mrb[16].mxu0 %v13401_v52  ;;  %8539 = vmatmul.mubr.bf16.vlgmr.msra.gmra.mrb[16].mxu1 %v13401_v52  ;;  %v2318_v7 = vld [vmem:[%s12849_s8 + $0xa28] sm:$0xff] }
 0x272   : > { %8220 = vmatpush1.bf16.msra.mxu0 %v11035_v61  ;;  %8251 = vmatprep.mubr.bf16.mxu0 %v13403_v21  ;;  %v14760_v61 = vld [vmem:[#allocation20_spill] sm:$0xff] }
 0x273   : > { %8548 = vmatpush1.bf16.msra.mxu1 %v11037_v34  ;;  %8579 = vmatprep.mubr.bf16.mxu1 %v13403_v21  ;;  %v1823_v34 = vmul.f32 %v13316_v54, %v14760_v61  ;;  %v11069_v54 = vcombine.low %v2282_v50, %v2286_v42  ;;  %v2321_v61 = vld [vmem:[%s12849_s8 + $0xa40] sm:$0xff] }
 0x274   : > { %8221 = vmatprep.subr.bf16.mxu0 %v11044_v41  ;;  %8549 = vmatprep.subr.bf16.mxu1 %v11046_v26  ;;  %v1868_v41 = vrot.slane %v13381_v46, %v13050_v29  ;;  %v14761_v26 = vld [vmem:[#allocation23_spill] sm:$0xff] }
 0x275   : > { %v1826_v13 = vmul.f32 %v13325_v51, %v14761_v26  ;;  %v2297_v51 = vld [vmem:[%s12849_s8 + $0x980] sm:$0xff]  ;;  %v2322_v26 = vld [vmem:[%s12849_s8 + $0xa48] sm:$0xff] }
 0x276   : > { %8222 = vmatpush1.bf16.msra.mxu0 %v11043_v5  ;;  %v1876_v5 = vrot.slane %v13381_v46, %v13076_v58  ;;  %v13443_v45 = vadd.f32 %v1868_v41, %v1823_v34  ;;  %v2325_v34 = vld [vmem:[%s12849_s8 + $0xa60] sm:$0xff] }
 0x277   : > { %8550 = vmatpush1.bf16.msra.mxu1 %v11045_v48  ;;  %8223 = vmatprep.subr.bf16.mxu0 %v11052_v4  ;;  %v11078_v48 = vcombine.high %v2290_v39, %v2294_v40  ;;  %v2301_v4 = vld [vmem:[%s12849_s8 + $0x9a0] sm:$0xff]  ;;  %v13447_v63 = vadd.f32 %v1880_v59, %v1826_v13  ;;  %v2326_v13 = vld [vmem:[%s12849_s8 + $0xa68] sm:$0xff]  ;;  %v1828_v59 = vmul.f32 %v13331_v38, %v13062_v20 }
 0x278   : > { %8551 = vmatprep.subr.bf16.mxu1 %v11054_v1  ;;  %v13449_v8 = vadd.f32 %v1876_v5, %v1825_v49  ;;  %v2298_v1 = vld [vmem:[%s12849_s8 + $0x988] sm:$0xff]  ;;  %v11084_v17 = vcombine.high %v2297_v51, %v2301_v4  ;;  %v11083_v2 = vcombine.low %v2297_v51, %v2301_v4  ;;  %v11108_v38 = vcombine.high %v2321_v61, %v2325_v34 }
 0x279   : > { %v11085_v50 = vcombine.low %v2298_v1, %v2302_v28  ;;  %v14763_v49 = vld [vmem:[#allocation24_spill] sm:$0xff]  ;;  %v13477_v51 = vadd.f32 %v1888_v47, %v1828_v59  ;;  %v11110_v4 = vcombine.high %v2322_v26, %v2326_v13  ;;  %vm1937_vm10 = vcmp.gt.f32.partialorder %v13443_v45, 0.0 }
 0x27a   : > { %8224 = vmatpush1.bf16.msra.mxu0 %v11051_v37  ;;  %v11086_v37 = vcombine.high %v2298_v1, %v2302_v28  ;;  %v1827_v5 = vmul.f32 %v13328_v14, %v14763_v49  ;;  %v2329_v14 = vld [vmem:[%s12849_s8 + $0xa80] sm:$0xff]  ;;  %vm1940_vm11 = vcmp.gt.f32.partialorder %v13447_v63, 0.0  ;;  %vm1939_vm12 = vcmp.gt.f32.partialorder %v13449_v8, 0.0 }
 0x27b   : > { %8552 = vmatpush1.bf16.msra.mxu1 %v11053_v11  ;;  %8225 = vmatprep.subr.bf16.mxu0 %v11060_v22  ;;  %v2305_v11 = vld [vmem:[%s12849_s8 + $0x9c0] sm:$0xff]  ;;  %vm1942_vm13 = vcmp.gt.f32.partialorder %v13477_v51, 0.0 }
 0x27c   : > { %8553 = vmatprep.subr.bf16.mxu1 %v11062_v35  ;;  %v2309_v22 = vld [vmem:[%s12849_s8 + $0x9e0] sm:$0xff]  ;;  %v2306_v35 = vld [vmem:[%s12849_s8 + $0x9c8] sm:$0xff] }
 0x27d   : > { %v11092_v42 = vcombine.high %v2305_v11, %v2309_v22  ;;  %v11091_v9 = vcombine.low %v2305_v11, %v2309_v22  ;;  %v2333_v1 = vld [vmem:[%s12849_s8 + $0xaa0] sm:$0xff] }
 0x27e   : > { %8226 = vmatpush1.bf16.msra.mxu0 %v11059_v60  ;;  %v11094_v60 = vcombine.high %v2306_v35, %v2310_v33  ;;  %v2337_v11 = vld [vmem:[%s12849_s8 + $0xac0] sm:$0xff] }
 0x27f   : > { %8554 = vmatpush1.bf16.msra.mxu1 %v11061_v0  ;;  %8227 = vmatprep.subr.bf16.mxu0 %v11068_v6  ;;  %v2313_v0 = vld [vmem:[%s12849_s8 + $0xa00] sm:$0xff] }
 0x280   : > { %8555 = vmatprep.subr.bf16.mxu1 %v11070_v3  ;;  %v2317_v6 = vld [vmem:[%s12849_s8 + $0xa20] sm:$0xff]  ;;  %v2314_v3 = vld [vmem:[%s12849_s8 + $0xa08] sm:$0xff] }
 0x281   : > { %v11100_v39 = vcombine.high %v2313_v0, %v2317_v6  ;;  %v11102_v40 = vcombine.high %v2314_v3, %v2318_v7  ;;  %v11099_v41 = vcombine.low %v2313_v0, %v2317_v6  ;;  %v11101_v20 = vcombine.low %v2314_v3, %v2318_v7  ;;  %v2341_v22 = vld [vmem:[%s12849_s8 + $0xae0] sm:$0xff]  ;;  %v2346_v3 = vld [vmem:[%s12849_s8 + $0xb08] sm:$0xff] }
 0x282   : > { %8228 = vmatpush1.bf16.msra.mxu0 %v11067_v44  ;;  %v11093_v44 = vcombine.low %v2306_v35, %v2310_v33  ;;  %v2338_v35 = vld [vmem:[%s12849_s8 + $0xac8] sm:$0xff]  ;;  %v2345_v0 = vld [vmem:[%s12849_s8 + $0xb00] sm:$0xff] }
 0x283   : > { %8556 = vmatpush1.bf16.msra.mxu1 %v11069_v54  ;;  %8229 = vmatprep.subr.bf16.mxu0 %v11076_v27  ;;  %v1884_v54 = vrot.slane %v13381_v46, %v13088_v12  ;;  %v1829_v27 = vmul.f32 %v13334_v15, %v13060_v19  ;;  %v2330_v15 = vld [vmem:[%s12849_s8 + $0xa88] sm:$0xff]  ;;  %v2349_v6 = vld [vmem:[%s12849_s8 + $0xb20] sm:$0xff] }
 0x284   : > { %8557 = vmatprep.subr.bf16.mxu1 %v11078_v48  ;;  %v1892_v48 = vrot.slane %v13381_v46, %v13095_v30  ;;  %v2334_v46 = vld [vmem:[%s12849_s8 + $0xaa8] sm:$0xff] }
 0x285   : > { %v13481_v28 = vadd.f32 %v1884_v54, %v1827_v5  ;;  %v2342_v33 = vld [vmem:[%s12849_s8 + $0xae8] sm:$0xff]  ;;  %v2361_v5 = vld [vmem:[%s12849_s8 + $0xb80] sm:$0xff] }
 0x286   : > { %8230 = vmatpush1.bf16.msra.mxu0 %v11075_v16  ;;  %v13483_v19 = vadd.f32 %v1892_v48, %v1829_v27  ;;  %v11107_v16 = vcombine.low %v2321_v61, %v2325_v34  ;;  %v2350_v7 = vld [vmem:[%s12849_s8 + $0xb28] sm:$0xff]  ;;  %v2353_v61 = vld [vmem:[%s12849_s8 + $0xb40] sm:$0xff] }
 0x287   : > { %8558 = vmatpush1.bf16.msra.mxu1 %v11077_v43  ;;  %8231 = vmatprep.subr.bf16.mxu0 %v11084_v17  ;;  %v11109_v43 = vcombine.low %v2322_v26, %v2326_v13  ;;  %v11116_v17 = vcombine.high %v2329_v14, %v2333_v1  ;;  %v2357_v34 = vld [vmem:[%s12849_s8 + $0xb60] sm:$0xff]  ;;  %v2358_v26 = vld [vmem:[%s12849_s8 + $0xb68] sm:$0xff]  ;;  %v11131_v13 = vcombine.low %v2345_v0, %v2349_v6  ;;  %vm1941_vm14 = vcmp.gt.f32.partialorder %v13481_v28, 0.0 }
 0x288   : > { %8559 = vmatprep.subr.bf16.mxu1 %v11086_v37  ;;  %v11118_v37 = vcombine.high %v2330_v15, %v2334_v46  ;;  %v11133_v59 = vcombine.low %v2346_v3, %v2350_v7  ;;  %v11140_v47 = vcombine.high %v2353_v61, %v2357_v34  ;;  %v2365_v54 = vld [vmem:[%s12849_s8 + $0xba0] sm:$0xff]  ;;  %v2362_v27 = vld [vmem:[%s12849_s8 + $0xb88] sm:$0xff]  ;;  %vm1943_vm0 = vcmp.gt.f32.partialorder %v13483_v19, 0.0 }
 0x289   : > { %v2366_v48 = vld [vmem:[%s12849_s8 + $0xba8] sm:$0xff] }
 0x28a   : > { %8232 = vmatpush1.bf16.msra.mxu0 %v11083_v2  ;;  %v11115_v2 = vcombine.low %v2329_v14, %v2333_v1  ;;  %v11150_v14 = vcombine.high %v2362_v27, %v2366_v48  ;;  %v2369_v1 = vld [vmem:[%s12849_s8 + $0xbc0] sm:$0xff] }
 0x28b   : > { %8560 = vmatpush1.bf16.msra.mxu1 %v11085_v50  ;;  %8233 = vmatprep.subr.bf16.mxu0 %v11092_v42  ;;  %v11117_v50 = vcombine.low %v2330_v15, %v2334_v46  ;;  %v11124_v42 = vcombine.high %v2337_v11, %v2341_v22  ;;  %v2373_v15 = vld [vmem:[%s12849_s8 + $0xbe0] sm:$0xff]  ;;  %v2370_v46 = vld [vmem:[%s12849_s8 + $0xbc8] sm:$0xff] }
 0x28c   : > { %8561 = vmatprep.subr.bf16.mxu1 %v11094_v60  ;;  %v11126_v60 = vcombine.high %v2338_v35, %v2342_v33 }
 0x28e   : > { %8234 = vmatpush1.bf16.msra.mxu0 %v11091_v9  ;;  %v11123_v9 = vcombine.low %v2337_v11, %v2341_v22  ;;  %v1949_v22 = vmul.f32 0.02, %v13267_v10 }
 0x28f   : > { %8562 = vmatpush1.bf16.msra.mxu1 %v11093_v44  ;;  %8235 = vmatprep.subr.bf16.mxu0 %v11100_v39  ;;  %v11125_v44 = vcombine.low %v2338_v35, %v2342_v33  ;;  %v11132_v39 = vcombine.high %v2345_v0, %v2349_v6  ;;  %v2377_v35 = vld [vmem:[%s12849_s8 + $0xc00] sm:$0xff] }
 0x290   : > { %8563 = vmatprep.subr.bf16.mxu1 %v11102_v40  ;;  %v11134_v40 = vcombine.high %v2346_v3, %v2350_v7  ;;  %v2381_v33 = vld [vmem:[%s12849_s8 + $0xc20] sm:$0xff]  ;;  %v1965_v3 = vsel %vm1933_vm6, %v13267_v10, %v1949_v22  ;;  %v2414_v22 = vld [vmem:[%s12849_s8 + $0xd28] sm:$0xff] }
 0x291   : > { %v11164_v6 = vcombine.high %v2377_v35, %v2381_v33  ;;  %v2393_v10 = vld [vmem:[%s12849_s8 + $0xc80] sm:$0xff] }
 0x292   : > { %8236 = vmatpush1.bf16.msra.mxu0 %v11099_v41  ;;  %v2354_v41 = vld [vmem:[%s12849_s8 + $0xb48] sm:$0xff] }
 0x293   : > { %8564 = vmatpush1.bf16.msra.mxu1 %v11101_v20  ;;  %8237 = vmatprep.subr.bf16.mxu0 %v11108_v38  ;;  %v11142_v49 = vcombine.high %v2354_v41, %v2358_v26  ;;  %v11139_v20 = vcombine.low %v2353_v61, %v2357_v34  ;;  %v11141_v38 = vcombine.low %v2354_v41, %v2358_v26  ;;  %v2386_v61 = vld [vmem:[%s12849_s8 + $0xc48] sm:$0xff] }
 0x294   : > { %8565 = vmatprep.subr.bf16.mxu1 %v11110_v4  ;;  %v11148_v4 = vcombine.high %v2361_v5, %v2365_v54  ;;  %v2390_v34 = vld [vmem:[%s12849_s8 + $0xc68] sm:$0xff]  ;;  %v13521_v41 = vpack.c.bf16 %v1965_v3, %v1965_v3 }
 0x296   : > { %8238 = vmatpush1.bf16.msra.mxu0 %v11107_v16  ;;  %v2374_v16 = vld [vmem:[%s12849_s8 + $0xbe8] sm:$0xff] }
 0x297   : > { %8566 = vmatpush1.bf16.msra.mxu1 %v11109_v43  ;;  %8239 = vmatprep.subr.bf16.mxu0 %v11116_v17  ;;  %v11147_v43 = vcombine.low %v2361_v5, %v2365_v54  ;;  %v11149_v17 = vcombine.low %v2362_v27, %v2366_v48  ;;  %v11158_v11 = vcombine.high %v2370_v46, %v2374_v16  ;;  %v2398_v5 = vld [vmem:[%s12849_s8 + $0xca8] sm:$0xff] }
 0x298   : > { %8567 = vmatprep.subr.bf16.mxu1 %v11118_v37  ;;  %v11156_v37 = vcombine.high %v2369_v1, %v2373_v15  ;;  %v11157_v0 = vcombine.low %v2370_v46, %v2374_v16  ;;  %v11173_v27 = vcombine.low %v2386_v61, %v2390_v34 }
 0x29a   : > { %8240 = vmatpush1.bf16.msra.mxu0 %v11115_v2  ;;  %v2378_v2 = vld [vmem:[%s12849_s8 + $0xc08] sm:$0xff] }
 0x29b   : > { %8568 = vmatpush1.bf16.msra.mxu1 %v11117_v50  ;;  %8241 = vmatprep.subr.bf16.mxu0 %v11124_v42  ;;  %v2382_v50 = vld [vmem:[%s12849_s8 + $0xc28] sm:$0xff]  ;;  %v11155_v42 = vcombine.low %v2369_v1, %v2373_v15 }
 0x29c   : > { %8569 = vmatprep.subr.bf16.mxu1 %v11126_v60  ;;  %v1952_v60 = vmul.f32 0.02, %v13184_v55  ;;  %v11166_v7 = vcombine.high %v2378_v2, %v2382_v50  ;;  %v11165_v26 = vcombine.low %v2378_v2, %v2382_v50  ;;  %v2406_v1 = vld [vmem:[%s12849_s8 + $0xce8] sm:$0xff] }
 0x29e   : > { %8242 = vmatpush1.bf16.msra.mxu0 %v11123_v9  ;;  %v2385_v9 = vld [vmem:[%s12849_s8 + $0xc40] sm:$0xff] }
 0x29f   : > { %8570 = vmatpush1.bf16.msra.mxu1 %v11125_v44  ;;  %8243 = vmatprep.subr.bf16.mxu0 %v11132_v39  ;;  %v2389_v44 = vld [vmem:[%s12849_s8 + $0xc60] sm:$0xff]  ;;  %v11163_v39 = vcombine.low %v2377_v35, %v2381_v33 }
 0x2a0   : > { %8571 = vmatprep.subr.bf16.mxu1 %v11134_v40  ;;  %v1968_v40 = vsel %vm1936_vm7, %v13184_v55, %v1952_v60  ;;  %v2394_v55 = vld [vmem:[%s12849_s8 + $0xc88] sm:$0xff]  ;;  %v11171_v54 = vcombine.low %v2385_v9, %v2389_v44  ;;  %v2421_v60 = vld [vmem:[%s12849_s8 + $0xd60] sm:$0xff] }
 0x2a1   : > { %v11181_v46 = vcombine.low %v2394_v55, %v2398_v5 }
 0x2a2   : > { %8244 = vmatpush1.bf16.msra.mxu0 %v11131_v13  ;;  %v11172_v13 = vcombine.high %v2385_v9, %v2389_v44 }
 0x2a3   : > { %8572 = vmatpush1.bf16.msra.mxu1 %v11133_v59  ;;  %8245 = vmatprep.subr.bf16.mxu0 %v11140_v47  ;;  %v2397_v59 = vld [vmem:[%s12849_s8 + $0xca0] sm:$0xff]  ;;  %v13526_v47 = vpack.c.bf16 %v1968_v40, %v1968_v40 }
 0x2a4   : > { %8573 = vmatprep.subr.bf16.mxu1 %v11142_v49  ;;  %v11174_v49 = vcombine.high %v2386_v61, %v2390_v34  ;;  %v11180_v48 = vcombine.high %v2393_v10, %v2397_v59  ;;  %v11179_v15 = vcombine.low %v2393_v10, %v2397_v59  ;;  %v2429_v40 = vld [vmem:[%s12849_s8 + $0xda0] sm:$0xff]  ;;  %v2426_v61 = vld [vmem:[%s12849_s8 + $0xd88] sm:$0xff] }
 0x2a5   : > { %v2430_v34 = vld [vmem:[%s12849_s8 + $0xda8] sm:$0xff] }
 0x2a6   : > { %8246 = vmatpush1.bf16.msra.mxu0 %v11139_v20  ;;  %v11182_v20 = vcombine.high %v2394_v55, %v2398_v5  ;;  %v11214_v59 = vcombine.high %v2426_v61, %v2430_v34  ;;  %v2437_v55 = vld [vmem:[%s12849_s8 + $0xde0] sm:$0xff]  ;;  %v2434_v5 = vld [vmem:[%s12849_s8 + $0xdc8] sm:$0xff] }
 0x2a7   : > { %8574 = vmatpush1.bf16.msra.mxu1 %v11141_v38  ;;  %8247 = vmatprep.subr.bf16.mxu0 %v11148_v4  ;;  %v2401_v38 = vld [vmem:[%s12849_s8 + $0xcc0] sm:$0xff] }
 0x2a8   : > { %8575 = vmatprep.subr.bf16.mxu1 %v11150_v14  ;;  %v2405_v4 = vld [vmem:[%s12849_s8 + $0xce0] sm:$0xff]  ;;  %v2402_v14 = vld [vmem:[%s12849_s8 + $0xcc8] sm:$0xff] }
 0x2a9   : > { %v11188_v16 = vcombine.high %v2401_v38, %v2405_v4  ;;  %v11187_v35 = vcombine.low %v2401_v38, %v2405_v4  ;;  %v11189_v33 = vcombine.low %v2402_v14, %v2406_v1  ;;  %v2441_v4 = vld [vmem:[%s12849_s8 + $0xe00] sm:$0xff] }
 0x2aa   : > { %8248 = vmatpush1.bf16.msra.mxu0 %v11147_v43  ;;  %v11190_v43 = vcombine.high %v2402_v14, %v2406_v1  ;;  %v2445_v14 = vld [vmem:[%s12849_s8 + $0xe20] sm:$0xff]  ;;  %v2442_v1 = vld [vmem:[%s12849_s8 + $0xe08] sm:$0xff] }
 0x2ab   : > { %8576 = vmatpush1.bf16.msra.mxu1 %v11149_v17  ;;  %8249 = vmatprep.subr.bf16.mxu0 %v11156_v37  ;;  %v2409_v17 = vld [vmem:[%s12849_s8 + $0xd00] sm:$0xff] }
 0x2ac   : > { %8577 = vmatprep.subr.bf16.mxu1 %v11158_v11  ;;  %v2413_v37 = vld [vmem:[%s12849_s8 + $0xd20] sm:$0xff]  ;;  %v2410_v11 = vld [vmem:[%s12849_s8 + $0xd08] sm:$0xff] }
 0x2ad   : > { %v11196_v2 = vcombine.high %v2409_v17, %v2413_v37  ;;  %v11198_v50 = vcombine.high %v2410_v11, %v2414_v22  ;;  %v11195_v3 = vcombine.low %v2409_v17, %v2413_v37  ;;  %v2449_v37 = vld [vmem:[%s12849_s8 + $0xe40] sm:$0xff] }
 0x2ae   : > { %8250 = vmatpush1.bf16.msra.mxu0 %v11155_v42  ;;  %v2417_v42 = vld [vmem:[%s12849_s8 + $0xd40] sm:$0xff] }
 0x2af   : > { %8578 = vmatpush1.bf16.msra.mxu1 %v11157_v0  ;;  %8260 = vmatprep.subr.bf16.mxu0 %v11164_v6  ;;  %v2418_v0 = vld [vmem:[%s12849_s8 + $0xd48] sm:$0xff]  ;;  %v11204_v9 = vcombine.high %v2417_v42, %v2421_v60 }
 0x2b0   : > { %8588 = vmatprep.subr.bf16.mxu1 %v11166_v7  ;;  %v2422_v6 = vld [vmem:[%s12849_s8 + $0xd68] sm:$0xff]  ;;  %v11197_v7 = vcombine.low %v2410_v11, %v2414_v22  ;;  %v2453_v11 = vld [vmem:[%s12849_s8 + $0xe60] sm:$0xff] }
 0x2b1   : > { %8252 = vmatmul.mubr.bf16.vlgmr.msra.gmra.mrb[16].mxu0 %v13521_v41  ;;  %v11206_v44 = vcombine.high %v2418_v0, %v2422_v6  ;;  %v2450_v22 = vld [vmem:[%s12849_s8 + $0xe48] sm:$0xff] }
 0x2b2   : > { %8580 = vmatmul.mubr.bf16.vlgmr.msra.gmra.mrb[16].mxu1 %v13521_v41  ;;  %8261 = vmatpush1.bf16.msra.mxu0 %v11163_v39  ;;  %v2425_v39 = vld [vmem:[%s12849_s8 + $0xd80] sm:$0xff] }
 0x2b3   : > { %8292 = vmatprep.mubr.bf16.mxu0 %v13526_v47  ;;  %8589 = vmatpush1.bf16.msra.mxu1 %v11165_v26  ;;  %v11203_v26 = vcombine.low %v2417_v42, %v2421_v60  ;;  %v11212_v10 = vcombine.high %v2425_v39, %v2429_v40  ;;  %v2457_v60 = vld [vmem:[%s12849_s8 + $0xe80] sm:$0xff] }
 0x2b4   : > { %8620 = vmatprep.mubr.bf16.mxu1 %v13526_v47  ;;  %8262 = vmatprep.subr.bf16.mxu0 %v11172_v13  ;;  %v11205_v13 = vcombine.low %v2418_v0, %v2422_v6  ;;  %v2461_v0 = vld [vmem:[%s12849_s8 + $0xea0] sm:$0xff]  ;;  %v2458_v6 = vld [vmem:[%s12849_s8 + $0xe88] sm:$0xff] }
 0x2b5   : > { %8590 = vmatprep.subr.bf16.mxu1 %v11174_v49  ;;  %v2433_v49 = vld [vmem:[%s12849_s8 + $0xdc0] sm:$0xff] }
 0x2b6   : > { %8263 = vmatpush1.bf16.msra.mxu0 %v11171_v54  ;;  %v2438_v54 = vld [vmem:[%s12849_s8 + $0xde8] sm:$0xff] }
 0x2b7   : > { %8591 = vmatpush1.bf16.msra.mxu1 %v11173_v27  ;;  %8264 = vmatprep.subr.bf16.mxu0 %v11180_v48  ;;  %v11211_v27 = vcombine.low %v2425_v39, %v2429_v40  ;;  %v11213_v48 = vcombine.low %v2426_v61, %v2430_v34  ;;  %v11222_v38 = vcombine.high %v2434_v5, %v2438_v54  ;;  %v2465_v40 = vld [vmem:[%s12849_s8 + $0xec0] sm:$0xff]  ;;  %v2466_v34 = vld [vmem:[%s12849_s8 + $0xec8] sm:$0xff] }
 0x2b8   : > { %8592 = vmatprep.subr.bf16.mxu1 %v11182_v20  ;;  %v11220_v20 = vcombine.high %v2433_v49, %v2437_v55  ;;  %v2469_v61 = vld [vmem:[%s12849_s8 + $0xee0] sm:$0xff] }
 0x2ba   : > { %8265 = vmatpush1.bf16.msra.mxu0 %v11179_v15  ;;  %v2446_v15 = vld [vmem:[%s12849_s8 + $0xe28] sm:$0xff] }
 0x2bb   : > { %8593 = vmatpush1.bf16.msra.mxu1 %v11181_v46  ;;  %8266 = vmatprep.subr.bf16.mxu0 %v11188_v16  ;;  %v11219_v46 = vcombine.low %v2433_v49, %v2437_v55  ;;  %v11221_v16 = vcombine.low %v2434_v5, %v2438_v54  ;;  %v11230_v17 = vcombine.high %v2442_v1, %v2446_v15  ;;  %v2473_v55 = vld [vmem:[%s12849_s8 + $0xf00] sm:$0xff]  ;;  %v2474_v54 = vld [vmem:[%s12849_s8 + $0xf08] sm:$0xff] }
 0x2bc   : > { %8594 = vmatprep.subr.bf16.mxu1 %v11190_v43  ;;  %v11228_v43 = vcombine.high %v2441_v4, %v2445_v14  ;;  %v2477_v5 = vld [vmem:[%s12849_s8 + $0xf20] sm:$0xff] }
 0x2be   : > { %8267 = vmatpush1.bf16.msra.mxu0 %v11187_v35  ;;  %v2454_v35 = vld [vmem:[%s12849_s8 + $0xe68] sm:$0xff] }
 0x2bf   : > { %8595 = vmatpush1.bf16.msra.mxu1 %v11189_v33  ;;  %8268 = vmatprep.subr.bf16.mxu0 %v11196_v2  ;;  %v11227_v33 = vcombine.low %v2441_v4, %v2445_v14  ;;  %v11229_v2 = vcombine.low %v2442_v1, %v2446_v15  ;;  %v11238_v42 = vcombine.high %v2450_v22, %v2454_v35  ;;  %v2481_v14 = vld [vmem:[%s12849_s8 + $0xf40] sm:$0xff]  ;;  %v2482_v15 = vld [vmem:[%s12849_s8 + $0xf48] sm:$0xff] }
 0x2c0   : > { %8596 = vmatprep.subr.bf16.mxu1 %v11198_v50  ;;  %v11236_v50 = vcombine.high %v2449_v37, %v2453_v11  ;;  %v2485_v1 = vld [vmem:[%s12849_s8 + $0xf60] sm:$0xff] }
 0x2c2   : > { %8269 = vmatpush1.bf16.msra.mxu0 %v11195_v3  ;;  %v2462_v3 = vld [vmem:[%s12849_s8 + $0xea8] sm:$0xff] }
 0x2c3   : > { %8597 = vmatpush1.bf16.msra.mxu1 %v11197_v7  ;;  %8270 = vmatprep.subr.bf16.mxu0 %v11204_v9  ;;  %v11235_v7 = vcombine.low %v2449_v37, %v2453_v11  ;;  %v11237_v9 = vcombine.low %v2450_v22, %v2454_v35  ;;  %v11246_v39 = vcombine.high %v2458_v6, %v2462_v3  ;;  %v2489_v11 = vld [vmem:[%s12849_s8 + $0xf80] sm:$0xff]  ;;  %v2490_v35 = vld [vmem:[%s12849_s8 + $0xf88] sm:$0xff] }
 0x2c4   : > { %8598 = vmatprep.subr.bf16.mxu1 %v11206_v44  ;;  %v11244_v44 = vcombine.high %v2457_v60, %v2461_v0  ;;  %v2493_v22 = vld [vmem:[%s12849_s8 + $0xfa0] sm:$0xff] }
 0x2c6   : > { %8271 = vmatpush1.bf16.msra.mxu0 %v11203_v26  ;;  %v2470_v26 = vld [vmem:[%s12849_s8 + $0xee8] sm:$0xff] }
 0x2c7   : > { %8599 = vmatpush1.bf16.msra.mxu1 %v11205_v13  ;;  %8272 = vmatprep.subr.bf16.mxu0 %v11212_v10  ;;  %v11243_v13 = vcombine.low %v2457_v60, %v2461_v0  ;;  %v11245_v10 = vcombine.low %v2458_v6, %v2462_v3  ;;  %v11254_v49 = vcombine.high %v2466_v34, %v2470_v26  ;;  %v2497_v0 = vld [vmem:[%s12849_s8 + $0xfc0] sm:$0xff]  ;;  %v2498_v3 = vld [vmem:[%s12849_s8 + $0xfc8] sm:$0xff] }
 0x2c8   : > { %8600 = vmatprep.subr.bf16.mxu1 %v11214_v59  ;;  %v11252_v59 = vcombine.high %v2465_v40, %v2469_v61  ;;  %v2501_v6 = vld [vmem:[%s12849_s8 + $0xfe0] sm:$0xff] }
 0x2ca   : > { %8273 = vmatpush1.bf16.msra.mxu0 %v11211_v27  ;;  %v2478_v27 = vld [vmem:[%s12849_s8 + $0xf28] sm:$0xff] }
 0x2cb   : > { %8601 = vmatpush1.bf16.msra.mxu1 %v11213_v48  ;;  %8274 = vmatprep.subr.bf16.mxu0 %v11220_v20  ;;  %v11251_v48 = vcombine.low %v2465_v40, %v2469_v61  ;;  %v11253_v20 = vcombine.low %v2466_v34, %v2470_v26  ;;  %v11262_v4 = vcombine.high %v2474_v54, %v2478_v27  ;;  %v1951_v61 = vmul.f32 0.02, %v13379_v57  ;;  %v2505_v34 = vld [vmem:[%s12849_s8 + $0x1000] sm:$0xff] }
 0x2cc   : > { %8602 = vmatprep.subr.bf16.mxu1 %v11222_v38  ;;  %v11260_v38 = vcombine.high %v2473_v55, %v2477_v5  ;;  %v2509_v26 = vld [vmem:[%s12849_s8 + $0x1020] sm:$0xff] }
 0x2ce   : > { %8275 = vmatpush1.bf16.msra.mxu0 %v11219_v46  ;;  %v2486_v46 = vld [vmem:[%s12849_s8 + $0xf68] sm:$0xff] }
 0x2cf   : > { %8603 = vmatpush1.bf16.msra.mxu1 %v11221_v16  ;;  %8276 = vmatprep.subr.bf16.mxu0 %v11228_v43  ;;  %v11259_v16 = vcombine.low %v2473_v55, %v2477_v5  ;;  %v11261_v43 = vcombine.low %v2474_v54, %v2478_v27  ;;  %v11270_v37 = vcombine.high %v2482_v15, %v2486_v46 }
 0x2d0   : > { %8604 = vmatprep.subr.bf16.mxu1 %v11230_v17  ;;  %v11268_v17 = vcombine.high %v2481_v14, %v2485_v1  ;;  %v11292_v5 = vcombine.high %v2505_v34, %v2509_v26  ;;  %v1967_v54 = vsel %vm1935_vm8, %v13379_v57, %v1951_v61  ;;  %v2521_v57 = vld [vmem:[%s12849_s8 + $0x1080] sm:$0xff]  ;;  %v2542_v61 = vld [vmem:[%s12849_s8 + $0x1128] sm:$0xff] }
 0x2d2   : > { %8277 = vmatpush1.bf16.msra.mxu0 %v11227_v33  ;;  %v2494_v33 = vld [vmem:[%s12849_s8 + $0xfa8] sm:$0xff] }
 0x2d3   : > { %8605 = vmatpush1.bf16.msra.mxu1 %v11229_v2  ;;  %8278 = vmatprep.subr.bf16.mxu0 %v11236_v50  ;;  %v11267_v2 = vcombine.low %v2481_v14, %v2485_v1  ;;  %v11269_v50 = vcombine.low %v2482_v15, %v2486_v46  ;;  %v11278_v60 = vcombine.high %v2490_v35, %v2494_v33  ;;  %v2514_v14 = vld [vmem:[%s12849_s8 + $0x1048] sm:$0xff] }
 0x2d4   : > { %8606 = vmatprep.subr.bf16.mxu1 %v11238_v42  ;;  %v11276_v42 = vcombine.high %v2489_v11, %v2493_v22  ;;  %v2518_v1 = vld [vmem:[%s12849_s8 + $0x1068] sm:$0xff]  ;;  %v13599_v15 = vpack.c.bf16 %v1967_v54, %v1967_v54 }
 0x2d6   : > { %8279 = vmatpush1.bf16.msra.mxu0 %v11235_v7  ;;  %v2502_v7 = vld [vmem:[%s12849_s8 + $0xfe8] sm:$0xff] }
 0x2d7   : > { %8607 = vmatpush1.bf16.msra.mxu1 %v11237_v9  ;;  %8280 = vmatprep.subr.bf16.mxu0 %v11244_v44  ;;  %v11275_v9 = vcombine.low %v2489_v11, %v2493_v22  ;;  %v11277_v44 = vcombine.low %v2490_v35, %v2494_v33  ;;  %v11286_v40 = vcombine.high %v2498_v3, %v2502_v7  ;;  %v2526_v11 = vld [vmem:[%s12849_s8 + $0x10a8] sm:$0xff] }
 0x2d8   : > { %8608 = vmatprep.subr.bf16.mxu1 %v11246_v39  ;;  %v11284_v39 = vcombine.high %v2497_v0, %v2501_v6  ;;  %v11285_v55 = vcombine.low %v2498_v3, %v2502_v7  ;;  %v11301_v35 = vcombine.low %v2514_v14, %v2518_v1 }
 0x2da   : > { %8281 = vmatpush1.bf16.msra.mxu0 %v11243_v13  ;;  %v2506_v13 = vld [vmem:[%s12849_s8 + $0x1008] sm:$0xff] }
 0x2db   : > { %8609 = vmatpush1.bf16.msra.mxu1 %v11245_v10  ;;  %8282 = vmatprep.subr.bf16.mxu0 %v11252_v59  ;;  %v2510_v10 = vld [vmem:[%s12849_s8 + $0x1028] sm:$0xff]  ;;  %v11283_v59 = vcombine.low %v2497_v0, %v2501_v6 }
 0x2dc   : > { %8610 = vmatprep.subr.bf16.mxu1 %v11254_v49  ;;  %v1954_v49 = vmul.f32 0.02, %v13421_v32  ;;  %v11294_v27 = vcombine.high %v2506_v13, %v2510_v10  ;;  %v11293_v46 = vcombine.low %v2506_v13, %v2510_v10  ;;  %v2534_v0 = vld [vmem:[%s12849_s8 + $0x10e8] sm:$0xff] }
 0x2de   : > { %8283 = vmatpush1.bf16.msra.mxu0 %v11251_v48  ;;  %v2513_v48 = vld [vmem:[%s12849_s8 + $0x1040] sm:$0xff] }
 0x2df   : > { %8611 = vmatpush1.bf16.msra.mxu1 %v11253_v20  ;;  %8284 = vmatprep.subr.bf16.mxu0 %v11260_v38  ;;  %v2517_v20 = vld [vmem:[%s12849_s8 + $0x1060] sm:$0xff]  ;;  %v11291_v38 = vcombine.low %v2505_v34, %v2509_v26 }
 0x2e0   : > { %8612 = vmatprep.subr.bf16.mxu1 %v11262_v4  ;;  %v1970_v4 = vsel %vm1938_vm9, %v13421_v32, %v1954_v49  ;;  %v2522_v32 = vld [vmem:[%s12849_s8 + $0x1088] sm:$0xff]  ;;  %v11299_v22 = vcombine.low %v2513_v48, %v2517_v20  ;;  %v2549_v49 = vld [vmem:[%s12849_s8 + $0x1160] sm:$0xff]  ;;  %vm10523_vm9 = vcmask 261120  }
 0x2e1   : > { %v11309_v3 = vcombine.low %v2522_v32, %v2526_v11 }
 0x2e2   : > { %8285 = vmatpush1.bf16.msra.mxu0 %v11259_v16  ;;  %v11300_v16 = vcombine.high %v2513_v48, %v2517_v20 }
 0x2e3   : > { %8613 = vmatpush1.bf16.msra.mxu1 %v11261_v43  ;;  %8286 = vmatprep.subr.bf16.mxu0 %v11268_v17  ;;  %v2525_v43 = vld [vmem:[%s12849_s8 + $0x10a0] sm:$0xff]  ;;  %v13604_v17 = vpack.c.bf16 %v1970_v4, %v1970_v4 }
 0x2e4   : > { %8614 = vmatprep.subr.bf16.mxu1 %v11270_v37  ;;  %v11302_v37 = vcombine.high %v2514_v14, %v2518_v1  ;;  %v11308_v33 = vcombine.high %v2521_v57, %v2525_v43  ;;  %v11307_v6 = vcombine.low %v2521_v57, %v2525_v43  ;;  %v2557_v4 = vld [vmem:[%s12849_s8 + $0x11a0] sm:$0xff]  ;;  %v2554_v14 = vld [vmem:[%s12849_s8 + $0x1188] sm:$0xff] }
 0x2e5   : > { %v2558_v1 = vld [vmem:[%s12849_s8 + $0x11a8] sm:$0xff] }
 0x2e6   : > { %8287 = vmatpush1.bf16.msra.mxu0 %v11267_v2  ;;  %v11310_v2 = vcombine.high %v2522_v32, %v2526_v11  ;;  %v11342_v43 = vcombine.high %v2554_v14, %v2558_v1  ;;  %v2565_v32 = vld [vmem:[%s12849_s8 + $0x11e0] sm:$0xff]  ;;  %v2562_v11 = vld [vmem:[%s12849_s8 + $0x11c8] sm:$0xff] }
 0x2e7   : > { %8615 = vmatpush1.bf16.msra.mxu1 %v11269_v50  ;;  %8288 = vmatprep.subr.bf16.mxu0 %v11276_v42  ;;  %v2529_v50 = vld [vmem:[%s12849_s8 + $0x10c0] sm:$0xff] }
 0x2e8   : > { %8616 = vmatprep.subr.bf16.mxu1 %v11278_v60  ;;  %v2533_v42 = vld [vmem:[%s12849_s8 + $0x10e0] sm:$0xff]  ;;  %v2530_v60 = vld [vmem:[%s12849_s8 + $0x10c8] sm:$0xff] }
 0x2e9   : > { %v11316_v7 = vcombine.high %v2529_v50, %v2533_v42  ;;  %v11315_v34 = vcombine.low %v2529_v50, %v2533_v42  ;;  %v11317_v26 = vcombine.low %v2530_v60, %v2534_v0  ;;  %v2569_v42 = vld [vmem:[%s12849_s8 + $0x1200] sm:$0xff] }
 0x2ea   : > { %8289 = vmatpush1.bf16.msra.mxu0 %v11275_v9  ;;  %v11318_v9 = vcombine.high %v2530_v60, %v2534_v0  ;;  %v2573_v60 = vld [vmem:[%s12849_s8 + $0x1220] sm:$0xff]  ;;  %v2570_v0 = vld [vmem:[%s12849_s8 + $0x1208] sm:$0xff] }
 0x2eb   : > { %8617 = vmatpush1.bf16.msra.mxu1 %v11277_v44  ;;  %8290 = vmatprep.subr.bf16.mxu0 %v11284_v39  ;;  %v2537_v44 = vld [vmem:[%s12849_s8 + $0x1100] sm:$0xff] }
 0x2ec   : > { %8618 = vmatprep.subr.bf16.mxu1 %v11286_v40  ;;  %v2541_v39 = vld [vmem:[%s12849_s8 + $0x1120] sm:$0xff]  ;;  %v2538_v40 = vld [vmem:[%s12849_s8 + $0x1108] sm:$0xff] }
 0x2ed   : > { %v11324_v13 = vcombine.high %v2537_v44, %v2541_v39  ;;  %v11326_v10 = vcombine.high %v2538_v40, %v2542_v61  ;;  %v11323_v54 = vcombine.low %v2537_v44, %v2541_v39  ;;  %v2577_v39 = vld [vmem:[%s12849_s8 + $0x1240] sm:$0xff] }
 0x2ee   : > { %8291 = vmatpush1.bf16.msra.mxu0 %v11283_v59  ;;  %v2545_v59 = vld [vmem:[%s12849_s8 + $0x1140] sm:$0xff] }
 0x2ef   : > { %8619 = vmatpush1.bf16.msra.mxu1 %v11285_v55  ;;  %8301 = vmatprep.subr.bf16.mxu0 %v11292_v5  ;;  %v2546_v55 = vld [vmem:[%s12849_s8 + $0x1148] sm:$0xff]  ;;  %v11332_v48 = vcombine.high %v2545_v59, %v2549_v49 }
 0x2f0   : > { %8629 = vmatprep.subr.bf16.mxu1 %v11294_v27  ;;  %v2550_v5 = vld [vmem:[%s12849_s8 + $0x1168] sm:$0xff]  ;;  %v11325_v27 = vcombine.low %v2538_v40, %v2542_v61  ;;  %v2581_v40 = vld [vmem:[%s12849_s8 + $0x1260] sm:$0xff] }
 0x2f1   : > { %8293 = vmatmul.mubr.bf16.vlgmr.msra.gmra.mrb[16].mxu0 %v13599_v15  ;;  %v11334_v20 = vcombine.high %v2546_v55, %v2550_v5  ;;  %v2578_v61 = vld [vmem:[%s12849_s8 + $0x1248] sm:$0xff] }
 0x2f2   : > { %8621 = vmatmul.mubr.bf16.vlgmr.msra.gmra.mrb[16].mxu1 %v13599_v15  ;;  %8302 = vmatpush1.bf16.msra.mxu0 %v11291_v38  ;;  %v2553_v38 = vld [vmem:[%s12849_s8 + $0x1180] sm:$0xff] }
 0x2f3   : > { %8333 = vmatprep.mubr.bf16.mxu0 %v13604_v17  ;;  %8630 = vmatpush1.bf16.msra.mxu1 %v11293_v46  ;;  %v11331_v46 = vcombine.low %v2545_v59, %v2549_v49  ;;  %v11340_v57 = vcombine.high %v2553_v38, %v2557_v4  ;;  %v2585_v49 = vld [vmem:[%s12849_s8 + $0x1280] sm:$0xff] }
 0x2f4   : > { %8661 = vmatprep.mubr.bf16.mxu1 %v13604_v17  ;;  %8303 = vmatprep.subr.bf16.mxu0 %v11300_v16  ;;  %v11333_v16 = vcombine.low %v2546_v55, %v2550_v5  ;;  %v2589_v55 = vld [vmem:[%s12849_s8 + $0x12a0] sm:$0xff]  ;;  %v2586_v5 = vld [vmem:[%s12849_s8 + $0x1288] sm:$0xff] }
 0x2f5   : > { %8631 = vmatprep.subr.bf16.mxu1 %v11302_v37  ;;  %v2561_v37 = vld [vmem:[%s12849_s8 + $0x11c0] sm:$0xff] }
 0x2f6   : > { %8304 = vmatpush1.bf16.msra.mxu0 %v11299_v22  ;;  %v2566_v22 = vld [vmem:[%s12849_s8 + $0x11e8] sm:$0xff] }
 0x2f7   : > { %8632 = vmatpush1.bf16.msra.mxu1 %v11301_v35  ;;  %8305 = vmatprep.subr.bf16.mxu0 %v11308_v33  ;;  %v11339_v35 = vcombine.low %v2553_v38, %v2557_v4  ;;  %v11341_v33 = vcombine.low %v2554_v14, %v2558_v1  ;;  %v11350_v50 = vcombine.high %v2562_v11, %v2566_v22  ;;  %v2593_v4 = vld [vmem:[%s12849_s8 + $0x12c0] sm:$0xff]  ;;  %v2594_v1 = vld [vmem:[%s12849_s8 + $0x12c8] sm:$0xff] }
 0x2f8   : > { %8633 = vmatprep.subr.bf16.mxu1 %v11310_v2  ;;  %v11348_v2 = vcombine.high %v2561_v37, %v2565_v32  ;;  %v2597_v14 = vld [vmem:[%s12849_s8 + $0x12e0] sm:$0xff] }
 0x2fa   : > { %8306 = vmatpush1.bf16.msra.mxu0 %v11307_v6  ;;  %v2574_v6 = vld [vmem:[%s12849_s8 + $0x1228] sm:$0xff] }
 0x2fb   : > { %8634 = vmatpush1.bf16.msra.mxu1 %v11309_v3  ;;  %8307 = vmatprep.subr.bf16.mxu0 %v11316_v7  ;;  %v11347_v3 = vcombine.low %v2561_v37, %v2565_v32  ;;  %v11349_v7 = vcombine.low %v2562_v11, %v2566_v22  ;;  %v11358_v44 = vcombine.high %v2570_v0, %v2574_v6  ;;  %v2601_v32 = vld [vmem:[%s12849_s8 + $0x1300] sm:$0xff]  ;;  %v2602_v22 = vld [vmem:[%s12849_s8 + $0x1308] sm:$0xff] }
 0x2fc   : > { %8635 = vmatprep.subr.bf16.mxu1 %v11318_v9  ;;  %v11356_v9 = vcombine.high %v2569_v42, %v2573_v60  ;;  %v2605_v11 = vld [vmem:[%s12849_s8 + $0x1320] sm:$0xff] }
 0x2fe   : > { %8308 = vmatpush1.bf16.msra.mxu0 %v11315_v34  ;;  %v2582_v34 = vld [vmem:[%s12849_s8 + $0x1268] sm:$0xff] }
 0x2ff   : > { %8636 = vmatpush1.bf16.msra.mxu1 %v11317_v26  ;;  %8309 = vmatprep.subr.bf16.mxu0 %v11324_v13  ;;  %v11355_v26 = vcombine.low %v2569_v42, %v2573_v60  ;;  %v11357_v13 = vcombine.low %v2570_v0, %v2574_v6  ;;  %v11366_v59 = vcombine.high %v2578_v61, %v2582_v34  ;;  %v2609_v60 = vld [vmem:[%s12849_s8 + $0x1340] sm:$0xff]  ;;  %v2610_v6 = vld [vmem:[%s12849_s8 + $0x1348] sm:$0xff] }
 0x300   : > { %8637 = vmatprep.subr.bf16.mxu1 %v11326_v10  ;;  %v11364_v10 = vcombine.high %v2577_v39, %v2581_v40  ;;  %v2613_v0 = vld [vmem:[%s12849_s8 + $0x1360] sm:$0xff] }
 0x302   : > { %8310 = vmatpush1.bf16.msra.mxu0 %v11323_v54  ;;  %v2590_v54 = vld [vmem:[%s12849_s8 + $0x12a8] sm:$0xff] }
 0x303   : > { %8638 = vmatpush1.bf16.msra.mxu1 %v11325_v27  ;;  %8311 = vmatprep.subr.bf16.mxu0 %v11332_v48  ;;  %v11363_v27 = vcombine.low %v2577_v39, %v2581_v40  ;;  %v11365_v48 = vcombine.low %v2578_v61, %v2582_v34  ;;  %v11374_v38 = vcombine.high %v2586_v5, %v2590_v54  ;;  %v2617_v40 = vld [vmem:[%s12849_s8 + $0x1380] sm:$0xff]  ;;  %v2618_v34 = vld [vmem:[%s12849_s8 + $0x1388] sm:$0xff] }
 0x304   : > { %8639 = vmatprep.subr.bf16.mxu1 %v11334_v20  ;;  %v11372_v20 = vcombine.high %v2585_v49, %v2589_v55  ;;  %v2621_v61 = vld [vmem:[%s12849_s8 + $0x13a0] sm:$0xff] }
 0x306   : > { %8312 = vmatpush1.bf16.msra.mxu0 %v11331_v46  ;;  %v2598_v46 = vld [vmem:[%s12849_s8 + $0x12e8] sm:$0xff] }
 0x307   : > { %8640 = vmatpush1.bf16.msra.mxu1 %v11333_v16  ;;  %8313 = vmatprep.subr.bf16.mxu0 %v11340_v57  ;;  %v11371_v16 = vcombine.low %v2585_v49, %v2589_v55  ;;  %v11373_v57 = vcombine.low %v2586_v5, %v2590_v54  ;;  %v11382_v37 = vcombine.high %v2594_v1, %v2598_v46  ;;  %v2625_v55 = vld [vmem:[%s12849_s8 + $0x13c0] sm:$0xff]  ;;  %v2626_v54 = vld [vmem:[%s12849_s8 + $0x13c8] sm:$0xff] }
 0x308   : > { %8641 = vmatprep.subr.bf16.mxu1 %v11342_v43  ;;  %v11380_v43 = vcombine.high %v2593_v4, %v2597_v14  ;;  %v2629_v5 = vld [vmem:[%s12849_s8 + $0x13e0] sm:$0xff] }
 0x30a   : > { %8314 = vmatpush1.bf16.msra.mxu0 %v11339_v35  ;;  %v2606_v35 = vld [vmem:[%s12849_s8 + $0x1328] sm:$0xff] }
 0x30b   : > { %8642 = vmatpush1.bf16.msra.mxu1 %v11341_v33  ;;  %8315 = vmatprep.subr.bf16.mxu0 %v11348_v2  ;;  %v11379_v33 = vcombine.low %v2593_v4, %v2597_v14  ;;  %v11381_v2 = vcombine.low %v2594_v1, %v2598_v46  ;;  %v11390_v42 = vcombine.high %v2602_v22, %v2606_v35  ;;  %v1953_v14 = vmul.f32 0.02, %v13443_v45  ;;  %v2633_v1 = vld [vmem:[%s12849_s8 + $0x1400] sm:$0xff] }
 0x30c   : > { %8643 = vmatprep.subr.bf16.mxu1 %v11350_v50  ;;  %v11388_v50 = vcombine.high %v2601_v32, %v2605_v11  ;;  %v2637_v46 = vld [vmem:[%s12849_s8 + $0x1420] sm:$0xff] }
 0x30e   : > { %8316 = vmatpush1.bf16.msra.mxu0 %v11347_v3  ;;  %v2614_v3 = vld [vmem:[%s12849_s8 + $0x1368] sm:$0xff] }
 0x30f   : > { %8644 = vmatpush1.bf16.msra.mxu1 %v11349_v7  ;;  %8317 = vmatprep.subr.bf16.mxu0 %v11356_v9  ;;  %v11387_v7 = vcombine.low %v2601_v32, %v2605_v11  ;;  %v11389_v9 = vcombine.low %v2602_v22, %v2606_v35  ;;  %v11398_v39 = vcombine.high %v2610_v6, %v2614_v3 }
 0x310   : > { %8645 = vmatprep.subr.bf16.mxu1 %v11358_v44  ;;  %v11396_v44 = vcombine.high %v2609_v60, %v2613_v0  ;;  %v11420_v11 = vcombine.high %v2633_v1, %v2637_v46  ;;  %v1969_v22 = vsel %vm1937_vm10, %v13443_v45, %v1953_v14  ;;  %v2649_v45 = vld [vmem:[%s12849_s8 + $0x1480] sm:$0xff]  ;;  %v2670_v14 = vld [vmem:[%s12849_s8 + $0x1528] sm:$0xff] }
 0x312   : > { %8318 = vmatpush1.bf16.msra.mxu0 %v11355_v26  ;;  %v2622_v26 = vld [vmem:[%s12849_s8 + $0x13a8] sm:$0xff] }
 0x313   : > { %8646 = vmatpush1.bf16.msra.mxu1 %v11357_v13  ;;  %8319 = vmatprep.subr.bf16.mxu0 %v11364_v10  ;;  %v11395_v13 = vcombine.low %v2609_v60, %v2613_v0  ;;  %v11397_v10 = vcombine.low %v2610_v6, %v2614_v3  ;;  %v11406_v49 = vcombine.high %v2618_v34, %v2622_v26  ;;  %v2642_v60 = vld [vmem:[%s12849_s8 + $0x1448] sm:$0xff] }
 0x314   : > { %8647 = vmatprep.subr.bf16.mxu1 %v11366_v59  ;;  %v11404_v59 = vcombine.high %v2617_v40, %v2621_v61  ;;  %v2646_v0 = vld [vmem:[%s12849_s8 + $0x1468] sm:$0xff]  ;;  %v13677_v6 = vpack.c.bf16 %v1969_v22, %v1969_v22 }
 0x316   : > { %8320 = vmatpush1.bf16.msra.mxu0 %v11363_v27  ;;  %v2630_v27 = vld [vmem:[%s12849_s8 + $0x13e8] sm:$0xff] }
 0x317   : > { %8648 = vmatpush1.bf16.msra.mxu1 %v11365_v48  ;;  %8321 = vmatprep.subr.bf16.mxu0 %v11372_v20  ;;  %v11403_v48 = vcombine.low %v2617_v40, %v2621_v61  ;;  %v11405_v20 = vcombine.low %v2618_v34, %v2622_v26  ;;  %v11414_v4 = vcombine.high %v2626_v54, %v2630_v27  ;;  %v2654_v40 = vld [vmem:[%s12849_s8 + $0x14a8] sm:$0xff] }
 0x318   : > { %8649 = vmatprep.subr.bf16.mxu1 %v11374_v38  ;;  %v11412_v38 = vcombine.high %v2625_v55, %v2629_v5  ;;  %v11413_v32 = vcombine.low %v2626_v54, %v2630_v27  ;;  %v11429_v34 = vcombine.low %v2642_v60, %v2646_v0 }
 0x31a   : > { %8322 = vmatpush1.bf16.msra.mxu0 %v11371_v16  ;;  %v2634_v16 = vld [vmem:[%s12849_s8 + $0x1408] sm:$0xff] }
 0x31b   : > { %8650 = vmatpush1.bf16.msra.mxu1 %v11373_v57  ;;  %8323 = vmatprep.subr.bf16.mxu0 %v11380_v43  ;;  %v2638_v57 = vld [vmem:[%s12849_s8 + $0x1428] sm:$0xff]  ;;  %v11411_v43 = vcombine.low %v2625_v55, %v2629_v5 }
 0x31c   : > { %8651 = vmatprep.subr.bf16.mxu1 %v11382_v37  ;;  %v1956_v37 = vmul.f32 0.02, %v13447_v63  ;;  %v11422_v35 = vcombine.high %v2634_v16, %v2638_v57  ;;  %v11421_v3 = vcombine.low %v2634_v16, %v2638_v57  ;;  %v2662_v55 = vld [vmem:[%s12849_s8 + $0x14e8] sm:$0xff] }
 0x31e   : > { %8324 = vmatpush1.bf16.msra.mxu0 %v11379_v33  ;;  %v2641_v33 = vld [vmem:[%s12849_s8 + $0x1440] sm:$0xff] }
 0x31f   : > { %8652 = vmatpush1.bf16.msra.mxu1 %v11381_v2  ;;  %8325 = vmatprep.subr.bf16.mxu0 %v11388_v50  ;;  %v2645_v2 = vld [vmem:[%s12849_s8 + $0x1460] sm:$0xff]  ;;  %v11419_v50 = vcombine.low %v2633_v1, %v2637_v46 }
 0x320   : > { %8653 = vmatprep.subr.bf16.mxu1 %v11390_v42  ;;  %v1972_v42 = vsel %vm1940_vm11, %v13447_v63, %v1956_v37  ;;  %v2650_v63 = vld [vmem:[%s12849_s8 + $0x1488] sm:$0xff]  ;;  %v11427_v61 = vcombine.low %v2641_v33, %v2645_v2  ;;  %v2677_v37 = vld [vmem:[%s12849_s8 + $0x1560] sm:$0xff] }
 0x321   : > { %v11437_v54 = vcombine.low %v2650_v63, %v2654_v40 }
 0x322   : > { %8326 = vmatpush1.bf16.msra.mxu0 %v11387_v7  ;;  %v11428_v7 = vcombine.high %v2641_v33, %v2645_v2 }
 0x323   : > { %8654 = vmatpush1.bf16.msra.mxu1 %v11389_v9  ;;  %8327 = vmatprep.subr.bf16.mxu0 %v11396_v44  ;;  %v2653_v9 = vld [vmem:[%s12849_s8 + $0x14a0] sm:$0xff]  ;;  %v13682_v44 = vpack.c.bf16 %v1972_v42, %v1972_v42 }
 0x324   : > { %8655 = vmatprep.subr.bf16.mxu1 %v11398_v39  ;;  %v11430_v39 = vcombine.high %v2642_v60, %v2646_v0  ;;  %v11436_v26 = vcombine.high %v2649_v45, %v2653_v9  ;;  %v11435_v5 = vcombine.low %v2649_v45, %v2653_v9  ;;  %v2685_v42 = vld [vmem:[%s12849_s8 + $0x15a0] sm:$0xff]  ;;  %v2682_v60 = vld [vmem:[%s12849_s8 + $0x1588] sm:$0xff] }
 0x325   : > { %v2686_v0 = vld [vmem:[%s12849_s8 + $0x15a8] sm:$0xff] }
 0x326   : > { %8328 = vmatpush1.bf16.msra.mxu0 %v11395_v13  ;;  %v11438_v13 = vcombine.high %v2650_v63, %v2654_v40  ;;  %v11470_v9 = vcombine.high %v2682_v60, %v2686_v0  ;;  %v2693_v63 = vld [vmem:[%s12849_s8 + $0x15e0] sm:$0xff]  ;;  %v2690_v40 = vld [vmem:[%s12849_s8 + $0x15c8] sm:$0xff] }
 0x327   : > { %8656 = vmatpush1.bf16.msra.mxu1 %v11397_v10  ;;  %8329 = vmatprep.subr.bf16.mxu0 %v11404_v59  ;;  %v2657_v10 = vld [vmem:[%s12849_s8 + $0x14c0] sm:$0xff] }
 0x328   : > { %8657 = vmatprep.subr.bf16.mxu1 %v11406_v49  ;;  %v2661_v59 = vld [vmem:[%s12849_s8 + $0x14e0] sm:$0xff]  ;;  %v2658_v49 = vld [vmem:[%s12849_s8 + $0x14c8] sm:$0xff] }
 0x329   : > { %v11444_v27 = vcombine.high %v2657_v10, %v2661_v59  ;;  %v11443_v1 = vcombine.low %v2657_v10, %v2661_v59  ;;  %v11445_v46 = vcombine.low %v2658_v49, %v2662_v55  ;;  %v2697_v59 = vld [vmem:[%s12849_s8 + $0x1600] sm:$0xff] }
 0x32a   : > { %8330 = vmatpush1.bf16.msra.mxu0 %v11403_v48  ;;  %v11446_v48 = vcombine.high %v2658_v49, %v2662_v55  ;;  %v2701_v49 = vld [vmem:[%s12849_s8 + $0x1620] sm:$0xff]  ;;  %v2698_v55 = vld [vmem:[%s12849_s8 + $0x1608] sm:$0xff] }
 0x32b   : > { %8658 = vmatpush1.bf16.msra.mxu1 %v11405_v20  ;;  %8331 = vmatprep.subr.bf16.mxu0 %v11412_v38  ;;  %v2665_v20 = vld [vmem:[%s12849_s8 + $0x1500] sm:$0xff] }
 0x32c   : > { %8659 = vmatprep.subr.bf16.mxu1 %v11414_v4  ;;  %v2669_v38 = vld [vmem:[%s12849_s8 + $0x1520] sm:$0xff]  ;;  %v2666_v4 = vld [vmem:[%s12849_s8 + $0x1508] sm:$0xff] }
 0x32d   : > { %v11452_v16 = vcombine.high %v2665_v20, %v2669_v38  ;;  %v11454_v57 = vcombine.high %v2666_v4, %v2670_v14  ;;  %v11451_v22 = vcombine.low %v2665_v20, %v2669_v38  ;;  %v2705_v38 = vld [vmem:[%s12849_s8 + $0x1640] sm:$0xff] }
 0x32e   : > { %8332 = vmatpush1.bf16.msra.mxu0 %v11411_v43  ;;  %v2673_v43 = vld [vmem:[%s12849_s8 + $0x1540] sm:$0xff] }
 0x32f   : > { %8660 = vmatpush1.bf16.msra.mxu1 %v11413_v32  ;;  %8342 = vmatprep.subr.bf16.mxu0 %v11420_v11  ;;  %v2674_v32 = vld [vmem:[%s12849_s8 + $0x1548] sm:$0xff]  ;;  %v11460_v33 = vcombine.high %v2673_v43, %v2677_v37 }
 0x330   : > { %8670 = vmatprep.subr.bf16.mxu1 %v11422_v35  ;;  %v2678_v11 = vld [vmem:[%s12849_s8 + $0x1568] sm:$0xff]  ;;  %v11453_v35 = vcombine.low %v2666_v4, %v2670_v14  ;;  %v2709_v4 = vld [vmem:[%s12849_s8 + $0x1660] sm:$0xff] }
 0x331   : > { %8334 = vmatmul.mubr.bf16.vlgmr.msra.gmra.mrb[16].mxu0 %v13677_v6  ;;  %v11462_v2 = vcombine.high %v2674_v32, %v2678_v11  ;;  %v2706_v14 = vld [vmem:[%s12849_s8 + $0x1648] sm:$0xff] }
 0x332   : > { %8662 = vmatmul.mubr.bf16.vlgmr.msra.gmra.mrb[16].mxu1 %v13677_v6  ;;  %8343 = vmatpush1.bf16.msra.mxu0 %v11419_v50  ;;  %v2681_v50 = vld [vmem:[%s12849_s8 + $0x1580] sm:$0xff] }
 0x333   : > { %8374 = vmatprep.mubr.bf16.mxu0 %v13682_v44  ;;  %8671 = vmatpush1.bf16.msra.mxu1 %v11421_v3  ;;  %v11459_v3 = vcombine.low %v2673_v43, %v2677_v37  ;;  %v11468_v45 = vcombine.high %v2681_v50, %v2685_v42  ;;  %v2713_v37 = vld [vmem:[%s12849_s8 + $0x1680] sm:$0xff] }
 0x334   : > { %8702 = vmatprep.mubr.bf16.mxu1 %v13682_v44  ;;  %8344 = vmatprep.subr.bf16.mxu0 %v11428_v7  ;;  %v11461_v7 = vcombine.low %v2674_v32, %v2678_v11  ;;  %v2717_v32 = vld [vmem:[%s12849_s8 + $0x16a0] sm:$0xff]  ;;  %v2714_v11 = vld [vmem:[%s12849_s8 + $0x1688] sm:$0xff] }
 0x335   : > { %8672 = vmatprep.subr.bf16.mxu1 %v11430_v39  ;;  %v2689_v39 = vld [vmem:[%s12849_s8 + $0x15c0] sm:$0xff] }
 0x336   : > { %8345 = vmatpush1.bf16.msra.mxu0 %v11427_v61  ;;  %v2694_v61 = vld [vmem:[%s12849_s8 + $0x15e8] sm:$0xff] }
 0x337   : > { %8673 = vmatpush1.bf16.msra.mxu1 %v11429_v34  ;;  %8346 = vmatprep.subr.bf16.mxu0 %v11436_v26  ;;  %v11467_v34 = vcombine.low %v2681_v50, %v2685_v42  ;;  %v11469_v26 = vcombine.low %v2682_v60, %v2686_v0  ;;  %v11478_v10 = vcombine.high %v2690_v40, %v2694_v61  ;;  %v2721_v42 = vld [vmem:[%s12849_s8 + $0x16c0] sm:$0xff]  ;;  %v2722_v0 = vld [vmem:[%s12849_s8 + $0x16c8] sm:$0xff] }
 0x338   : > { %8674 = vmatprep.subr.bf16.mxu1 %v11438_v13  ;;  %v11476_v13 = vcombine.high %v2689_v39, %v2693_v63  ;;  %v2725_v60 = vld [vmem:[%s12849_s8 + $0x16e0] sm:$0xff] }
 0x33a   : > { %8347 = vmatpush1.bf16.msra.mxu0 %v11435_v5  ;;  %v2702_v5 = vld [vmem:[%s12849_s8 + $0x1628] sm:$0xff] }
 0x33b   : > { %8675 = vmatpush1.bf16.msra.mxu1 %v11437_v54  ;;  %8348 = vmatprep.subr.bf16.mxu0 %v11444_v27  ;;  %v11475_v54 = vcombine.low %v2689_v39, %v2693_v63  ;;  %v11477_v27 = vcombine.low %v2690_v40, %v2694_v61  ;;  %v11486_v20 = vcombine.high %v2698_v55, %v2702_v5  ;;  %v2729_v63 = vld [vmem:[%s12849_s8 + $0x1700] sm:$0xff]  ;;  %v2730_v61 = vld [vmem:[%s12849_s8 + $0x1708] sm:$0xff] }
 0x33c   : > { %8676 = vmatprep.subr.bf16.mxu1 %v11446_v48  ;;  %v11484_v48 = vcombine.high %v2697_v59, %v2701_v49  ;;  %v2733_v40 = vld [vmem:[%s12849_s8 + $0x1720] sm:$0xff] }
 0x33e   : > { %8349 = vmatpush1.bf16.msra.mxu0 %v11443_v1  ;;  %v2710_v1 = vld [vmem:[%s12849_s8 + $0x1668] sm:$0xff] }
 0x33f   : > { %8677 = vmatpush1.bf16.msra.mxu1 %v11445_v46  ;;  %8350 = vmatprep.subr.bf16.mxu0 %v11452_v16  ;;  %v11483_v46 = vcombine.low %v2697_v59, %v2701_v49  ;;  %v11485_v16 = vcombine.low %v2698_v55, %v2702_v5  ;;  %v11494_v43 = vcombine.high %v2706_v14, %v2710_v1  ;;  %v2737_v49 = vld [vmem:[%s12849_s8 + $0x1740] sm:$0xff]  ;;  %v2738_v5 = vld [vmem:[%s12849_s8 + $0x1748] sm:$0xff] }
 0x340   : > { %8678 = vmatprep.subr.bf16.mxu1 %v11454_v57  ;;  %v11492_v57 = vcombine.high %v2705_v38, %v2709_v4  ;;  %v2741_v55 = vld [vmem:[%s12849_s8 + $0x1760] sm:$0xff] }
 0x342   : > { %8351 = vmatpush1.bf16.msra.mxu0 %v11451_v22  ;;  %v2718_v22 = vld [vmem:[%s12849_s8 + $0x16a8] sm:$0xff] }
 0x343   : > { %8679 = vmatpush1.bf16.msra.mxu1 %v11453_v35  ;;  %8352 = vmatprep.subr.bf16.mxu0 %v11460_v33  ;;  %v11491_v35 = vcombine.low %v2705_v38, %v2709_v4  ;;  %v11493_v33 = vcombine.low %v2706_v14, %v2710_v1  ;;  %v11502_v50 = vcombine.high %v2714_v11, %v2718_v22  ;;  %v2745_v4 = vld [vmem:[%s12849_s8 + $0x1780] sm:$0xff]  ;;  %v2746_v1 = vld [vmem:[%s12849_s8 + $0x1788] sm:$0xff] }
 0x344   : > { %8680 = vmatprep.subr.bf16.mxu1 %v11462_v2  ;;  %v11500_v2 = vcombine.high %v2713_v37, %v2717_v32  ;;  %v2749_v14 = vld [vmem:[%s12849_s8 + $0x17a0] sm:$0xff] }
 0x346   : > { %8353 = vmatpush1.bf16.msra.mxu0 %v11459_v3  ;;  %v2726_v3 = vld [vmem:[%s12849_s8 + $0x16e8] sm:$0xff] }
 0x347   : > { %8681 = vmatpush1.bf16.msra.mxu1 %v11461_v7  ;;  %8354 = vmatprep.subr.bf16.mxu0 %v11468_v45  ;;  %v11499_v7 = vcombine.low %v2713_v37, %v2717_v32  ;;  %v11501_v45 = vcombine.low %v2714_v11, %v2718_v22  ;;  %v11510_v39 = vcombine.high %v2722_v0, %v2726_v3  ;;  %v2753_v32 = vld [vmem:[%s12849_s8 + $0x17c0] sm:$0xff]  ;;  %v2754_v22 = vld [vmem:[%s12849_s8 + $0x17c8] sm:$0xff] }
 0x348   : > { %8682 = vmatprep.subr.bf16.mxu1 %v11470_v9  ;;  %v11508_v9 = vcombine.high %v2721_v42, %v2725_v60  ;;  %v2757_v11 = vld [vmem:[%s12849_s8 + $0x17e0] sm:$0xff] }
 0x34a   : > { %8355 = vmatpush1.bf16.msra.mxu0 %v11467_v34  ;;  %v2734_v34 = vld [vmem:[%s12849_s8 + $0x1728] sm:$0xff] }
 0x34b   : > { %8683 = vmatpush1.bf16.msra.mxu1 %v11469_v26  ;;  %8356 = vmatprep.subr.bf16.mxu0 %v11476_v13  ;;  %v11507_v26 = vcombine.low %v2721_v42, %v2725_v60  ;;  %v11509_v13 = vcombine.low %v2722_v0, %v2726_v3  ;;  %v11518_v59 = vcombine.high %v2730_v61, %v2734_v34  ;;  %v1955_v60 = vmul.f32 0.02, %v13449_v8  ;;  %v2761_v0 = vld [vmem:[%s12849_s8 + $0x1800] sm:$0xff] }
 0x34c   : > { %8684 = vmatprep.subr.bf16.mxu1 %v11478_v10  ;;  %v11516_v10 = vcombine.high %v2729_v63, %v2733_v40  ;;  %v2765_v3 = vld [vmem:[%s12849_s8 + $0x1820] sm:$0xff] }
 0x34e   : > { %8357 = vmatpush1.bf16.msra.mxu0 %v11475_v54  ;;  %v2742_v54 = vld [vmem:[%s12849_s8 + $0x1768] sm:$0xff] }
 0x34f   : > { %8685 = vmatpush1.bf16.msra.mxu1 %v11477_v27  ;;  %8358 = vmatprep.subr.bf16.mxu0 %v11484_v48  ;;  %v11515_v27 = vcombine.low %v2729_v63, %v2733_v40  ;;  %v11517_v48 = vcombine.low %v2730_v61, %v2734_v34  ;;  %v11526_v38 = vcombine.high %v2738_v5, %v2742_v54 }
 0x350   : > { %8686 = vmatprep.subr.bf16.mxu1 %v11486_v20  ;;  %v11524_v20 = vcombine.high %v2737_v49, %v2741_v55  ;;  %v11548_v40 = vcombine.high %v2761_v0, %v2765_v3  ;;  %v1971_v61 = vsel %vm1939_vm12, %v13449_v8, %v1955_v60  ;;  %v2777_v8 = vld [vmem:[%s12849_s8 + $0x1880] sm:$0xff]  ;;  %v2798_v60 = vld [vmem:[%s12849_s8 + $0x1928] sm:$0xff] }
 0x352   : > { %8359 = vmatpush1.bf16.msra.mxu0 %v11483_v46  ;;  %v2750_v46 = vld [vmem:[%s12849_s8 + $0x17a8] sm:$0xff] }
 0x353   : > { %8687 = vmatpush1.bf16.msra.mxu1 %v11485_v16  ;;  %8360 = vmatprep.subr.bf16.mxu0 %v11492_v57  ;;  %v11523_v16 = vcombine.low %v2737_v49, %v2741_v55  ;;  %v11525_v57 = vcombine.low %v2738_v5, %v2742_v54  ;;  %v11534_v37 = vcombine.high %v2746_v1, %v2750_v46  ;;  %v2770_v49 = vld [vmem:[%s12849_s8 + $0x1848] sm:$0xff] }
 0x354   : > { %8688 = vmatprep.subr.bf16.mxu1 %v11494_v43  ;;  %v11532_v43 = vcombine.high %v2745_v4, %v2749_v14  ;;  %v2774_v55 = vld [vmem:[%s12849_s8 + $0x1868] sm:$0xff]  ;;  %v13755_v5 = vpack.c.bf16 %v1971_v61, %v1971_v61 }
 0x356   : > { %8361 = vmatpush1.bf16.msra.mxu0 %v11491_v35  ;;  %v2758_v35 = vld [vmem:[%s12849_s8 + $0x17e8] sm:$0xff] }
 0x357   : > { %8689 = vmatpush1.bf16.msra.mxu1 %v11493_v33  ;;  %8362 = vmatprep.subr.bf16.mxu0 %v11500_v2  ;;  %v11531_v33 = vcombine.low %v2745_v4, %v2749_v14  ;;  %v11533_v2 = vcombine.low %v2746_v1, %v2750_v46  ;;  %v11542_v42 = vcombine.high %v2754_v22, %v2758_v35  ;;  %v2782_v4 = vld [vmem:[%s12849_s8 + $0x18a8] sm:$0xff] }
 0x358   : > { %8690 = vmatprep.subr.bf16.mxu1 %v11502_v50  ;;  %v11540_v50 = vcombine.high %v2753_v32, %v2757_v11  ;;  %v11541_v63 = vcombine.low %v2754_v22, %v2758_v35  ;;  %v11557_v1 = vcombine.low %v2770_v49, %v2774_v55 }
 0x35a   : > { %8363 = vmatpush1.bf16.msra.mxu0 %v11499_v7  ;;  %v2762_v7 = vld [vmem:[%s12849_s8 + $0x1808] sm:$0xff] }
 0x35b   : > { %8691 = vmatpush1.bf16.msra.mxu1 %v11501_v45  ;;  %8364 = vmatprep.subr.bf16.mxu0 %v11508_v9  ;;  %v2766_v45 = vld [vmem:[%s12849_s8 + $0x1828] sm:$0xff]  ;;  %v11539_v9 = vcombine.low %v2753_v32, %v2757_v11 }
 0x35c   : > { %8692 = vmatprep.subr.bf16.mxu1 %v11510_v39  ;;  %v1958_v39 = vmul.f32 0.02, %v13477_v51  ;;  %v11550_v34 = vcombine.high %v2762_v7, %v2766_v45  ;;  %v11549_v54 = vcombine.low %v2762_v7, %v2766_v45  ;;  %v2790_v32 = vld [vmem:[%s12849_s8 + $0x18e8] sm:$0xff] }
 0x35e   : > { %8365 = vmatpush1.bf16.msra.mxu0 %v11507_v26  ;;  %v2769_v26 = vld [vmem:[%s12849_s8 + $0x1840] sm:$0xff] }
 0x35f   : > { %8693 = vmatpush1.bf16.msra.mxu1 %v11509_v13  ;;  %8366 = vmatprep.subr.bf16.mxu0 %v11516_v10  ;;  %v2773_v13 = vld [vmem:[%s12849_s8 + $0x1860] sm:$0xff]  ;;  %v11547_v10 = vcombine.low %v2761_v0, %v2765_v3 }
 0x360   : > { %8694 = vmatprep.subr.bf16.mxu1 %v11518_v59  ;;  %v1974_v59 = vsel %vm1942_vm13, %v13477_v51, %v1958_v39  ;;  %v2778_v51 = vld [vmem:[%s12849_s8 + $0x1888] sm:$0xff]  ;;  %v11555_v14 = vcombine.low %v2769_v26, %v2773_v13  ;;  %v2805_v39 = vld [vmem:[%s12849_s8 + $0x1960] sm:$0xff] }
 0x361   : > { %v11565_v22 = vcombine.low %v2778_v51, %v2782_v4 }
 0x362   : > { %8367 = vmatpush1.bf16.msra.mxu0 %v11515_v27  ;;  %v11556_v27 = vcombine.high %v2769_v26, %v2773_v13 }
 0x363   : > { %8695 = vmatpush1.bf16.msra.mxu1 %v11517_v48  ;;  %8368 = vmatprep.subr.bf16.mxu0 %v11524_v20  ;;  %v2781_v48 = vld [vmem:[%s12849_s8 + $0x18a0] sm:$0xff]  ;;  %v13760_v20 = vpack.c.bf16 %v1974_v59, %v1974_v59 }
 0x364   : > { %8696 = vmatprep.subr.bf16.mxu1 %v11526_v38  ;;  %v11558_v38 = vcombine.high %v2770_v49, %v2774_v55  ;;  %v11564_v46 = vcombine.high %v2777_v8, %v2781_v48  ;;  %v11563_v11 = vcombine.low %v2777_v8, %v2781_v48  ;;  %v2813_v59 = vld [vmem:[%s12849_s8 + $0x19a0] sm:$0xff]  ;;  %v2810_v49 = vld [vmem:[%s12849_s8 + $0x1988] sm:$0xff] }
 0x365   : > { %v2814_v55 = vld [vmem:[%s12849_s8 + $0x19a8] sm:$0xff] }
 0x366   : > { %8369 = vmatpush1.bf16.msra.mxu0 %v11523_v16  ;;  %v11566_v16 = vcombine.high %v2778_v51, %v2782_v4  ;;  %v11598_v48 = vcombine.high %v2810_v49, %v2814_v55  ;;  %v2821_v51 = vld [vmem:[%s12849_s8 + $0x19e0] sm:$0xff]  ;;  %v2818_v4 = vld [vmem:[%s12849_s8 + $0x19c8] sm:$0xff] }
 0x367   : > { %8697 = vmatpush1.bf16.msra.mxu1 %v11525_v57  ;;  %8370 = vmatprep.subr.bf16.mxu0 %v11532_v43  ;;  %v2785_v57 = vld [vmem:[%s12849_s8 + $0x18c0] sm:$0xff] }
 0x368   : > { %8698 = vmatprep.subr.bf16.mxu1 %v11534_v37  ;;  %v2789_v43 = vld [vmem:[%s12849_s8 + $0x18e0] sm:$0xff]  ;;  %v2786_v37 = vld [vmem:[%s12849_s8 + $0x18c8] sm:$0xff] }
 0x369   : > { %v11572_v35 = vcombine.high %v2785_v57, %v2789_v43  ;;  %v11571_v0 = vcombine.low %v2785_v57, %v2789_v43  ;;  %v11573_v3 = vcombine.low %v2786_v37, %v2790_v32  ;;  %v2825_v43 = vld [vmem:[%s12849_s8 + $0x1a00] sm:$0xff] }
 0x36a   : > { %8371 = vmatpush1.bf16.msra.mxu0 %v11531_v33  ;;  %v11574_v33 = vcombine.high %v2786_v37, %v2790_v32  ;;  %v2829_v37 = vld [vmem:[%s12849_s8 + $0x1a20] sm:$0xff]  ;;  %v2826_v32 = vld [vmem:[%s12849_s8 + $0x1a08] sm:$0xff] }
 0x36b   : > { %8699 = vmatpush1.bf16.msra.mxu1 %v11533_v2  ;;  %8372 = vmatprep.subr.bf16.mxu0 %v11540_v50  ;;  %v2793_v2 = vld [vmem:[%s12849_s8 + $0x1900] sm:$0xff] }
 0x36c   : > { %8700 = vmatprep.subr.bf16.mxu1 %v11542_v42  ;;  %v2797_v50 = vld [vmem:[%s12849_s8 + $0x1920] sm:$0xff]  ;;  %v2794_v42 = vld [vmem:[%s12849_s8 + $0x1908] sm:$0xff] }
 0x36d   : > { %v11580_v7 = vcombine.high %v2793_v2, %v2797_v50  ;;  %v11582_v45 = vcombine.high %v2794_v42, %v2798_v60  ;;  %v11579_v61 = vcombine.low %v2793_v2, %v2797_v50  ;;  %v2833_v50 = vld [vmem:[%s12849_s8 + $0x1a40] sm:$0xff] }
 0x36e   : > { %8373 = vmatpush1.bf16.msra.mxu0 %v11539_v9  ;;  %v2801_v9 = vld [vmem:[%s12849_s8 + $0x1940] sm:$0xff] }
 0x36f   : > { %8701 = vmatpush1.bf16.msra.mxu1 %v11541_v63  ;;  %8383 = vmatprep.subr.bf16.mxu0 %v11548_v40  ;;  %v2802_v63 = vld [vmem:[%s12849_s8 + $0x1948] sm:$0xff]  ;;  %v11588_v26 = vcombine.high %v2801_v9, %v2805_v39 }
 0x370   : > { %8711 = vmatprep.subr.bf16.mxu1 %v11550_v34  ;;  %v2806_v40 = vld [vmem:[%s12849_s8 + $0x1968] sm:$0xff]  ;;  %v11581_v34 = vcombine.low %v2794_v42, %v2798_v60  ;;  %v2837_v42 = vld [vmem:[%s12849_s8 + $0x1a60] sm:$0xff] }
 0x371   : > { %8375 = vmatmul.mubr.bf16.vlgmr.msra.gmra.mrb[16].mxu0 %v13755_v5  ;;  %v11590_v13 = vcombine.high %v2802_v63, %v2806_v40  ;;  %v2834_v60 = vld [vmem:[%s12849_s8 + $0x1a48] sm:$0xff] }
 0x372   : > { %8703 = vmatmul.mubr.bf16.vlgmr.msra.gmra.mrb[16].mxu1 %v13755_v5  ;;  %8384 = vmatpush1.bf16.msra.mxu0 %v11547_v10  ;;  %v2809_v10 = vld [vmem:[%s12849_s8 + $0x1980] sm:$0xff] }
 0x373   : > { %8415 = vmatprep.mubr.bf16.mxu0 %v13760_v20  ;;  %8712 = vmatpush1.bf16.msra.mxu1 %v11549_v54  ;;  %v11587_v54 = vcombine.low %v2801_v9, %v2805_v39  ;;  %v11596_v8 = vcombine.high %v2809_v10, %v2813_v59  ;;  %v2841_v39 = vld [vmem:[%s12849_s8 + $0x1a80] sm:$0xff] }
 0x374   : > { %8743 = vmatprep.mubr.bf16.mxu1 %v13760_v20  ;;  %8385 = vmatprep.subr.bf16.mxu0 %v11556_v27  ;;  %v11589_v27 = vcombine.low %v2802_v63, %v2806_v40  ;;  %v2845_v63 = vld [vmem:[%s12849_s8 + $0x1aa0] sm:$0xff]  ;;  %v2842_v40 = vld [vmem:[%s12849_s8 + $0x1a88] sm:$0xff] }
 0x375   : > { %8713 = vmatprep.subr.bf16.mxu1 %v11558_v38  ;;  %v2817_v38 = vld [vmem:[%s12849_s8 + $0x19c0] sm:$0xff] }
 0x376   : > { %8386 = vmatpush1.bf16.msra.mxu0 %v11555_v14  ;;  %v2822_v14 = vld [vmem:[%s12849_s8 + $0x19e8] sm:$0xff] }
 0x377   : > { %8714 = vmatpush1.bf16.msra.mxu1 %v11557_v1  ;;  %8387 = vmatprep.subr.bf16.mxu0 %v11564_v46  ;;  %v11595_v1 = vcombine.low %v2809_v10, %v2813_v59  ;;  %v11597_v46 = vcombine.low %v2810_v49, %v2814_v55  ;;  %v11606_v57 = vcombine.high %v2818_v4, %v2822_v14  ;;  %v2849_v59 = vld [vmem:[%s12849_s8 + $0x1ac0] sm:$0xff]  ;;  %v2850_v55 = vld [vmem:[%s12849_s8 + $0x1ac8] sm:$0xff] }
 0x378   : > { %8715 = vmatprep.subr.bf16.mxu1 %v11566_v16  ;;  %v11604_v16 = vcombine.high %v2817_v38, %v2821_v51  ;;  %v2853_v49 = vld [vmem:[%s12849_s8 + $0x1ae0] sm:$0xff] }
 0x37a   : > { %8388 = vmatpush1.bf16.msra.mxu0 %v11563_v11  ;;  %v2830_v11 = vld [vmem:[%s12849_s8 + $0x1a28] sm:$0xff] }
 0x37b   : > { %8716 = vmatpush1.bf16.msra.mxu1 %v11565_v22  ;;  %8389 = vmatprep.subr.bf16.mxu0 %v11572_v35  ;;  %v11603_v22 = vcombine.low %v2817_v38, %v2821_v51  ;;  %v11605_v35 = vcombine.low %v2818_v4, %v2822_v14  ;;  %v11614_v2 = vcombine.high %v2826_v32, %v2830_v11  ;;  %v2857_v51 = vld [vmem:[%s12849_s8 + $0x1b00] sm:$0xff]  ;;  %v2858_v14 = vld [vmem:[%s12849_s8 + $0x1b08] sm:$0xff] }
 0x37c   : > { %8717 = vmatprep.subr.bf16.mxu1 %v11574_v33  ;;  %v11612_v33 = vcombine.high %v2825_v43, %v2829_v37  ;;  %v2861_v4 = vld [vmem:[%s12849_s8 + $0x1b20] sm:$0xff] }
 0x37e   : > { %8390 = vmatpush1.bf16.msra.mxu0 %v11571_v0  ;;  %v2838_v0 = vld [vmem:[%s12849_s8 + $0x1a68] sm:$0xff] }
 0x37f   : > { %8718 = vmatpush1.bf16.msra.mxu1 %v11573_v3  ;;  %8391 = vmatprep.subr.bf16.mxu0 %v11580_v7  ;;  %v11611_v3 = vcombine.low %v2825_v43, %v2829_v37  ;;  %v11613_v7 = vcombine.low %v2826_v32, %v2830_v11  ;;  %v11622_v9 = vcombine.high %v2834_v60, %v2838_v0  ;;  %v2865_v37 = vld [vmem:[%s12849_s8 + $0x1b40] sm:$0xff]  ;;  %v2866_v11 = vld [vmem:[%s12849_s8 + $0x1b48] sm:$0xff] }
 0x380   : > { %8719 = vmatprep.subr.bf16.mxu1 %v11582_v45  ;;  %v11620_v45 = vcombine.high %v2833_v50, %v2837_v42  ;;  %v2869_v32 = vld [vmem:[%s12849_s8 + $0x1b60] sm:$0xff] }
 0x382   : > { %8392 = vmatpush1.bf16.msra.mxu0 %v11579_v61  ;;  %v2846_v61 = vld [vmem:[%s12849_s8 + $0x1aa8] sm:$0xff] }
 0x383   : > { %8720 = vmatpush1.bf16.msra.mxu1 %v11581_v34  ;;  %8393 = vmatprep.subr.bf16.mxu0 %v11588_v26  ;;  %v11619_v34 = vcombine.low %v2833_v50, %v2837_v42  ;;  %v11621_v26 = vcombine.low %v2834_v60, %v2838_v0  ;;  %v11630_v10 = vcombine.high %v2842_v40, %v2846_v61  ;;  %v2873_v42 = vld [vmem:[%s12849_s8 + $0x1b80] sm:$0xff]  ;;  %v2874_v0 = vld [vmem:[%s12849_s8 + $0x1b88] sm:$0xff] }
 0x384   : > { %8721 = vmatprep.subr.bf16.mxu1 %v11590_v13  ;;  %v11628_v13 = vcombine.high %v2841_v39, %v2845_v63  ;;  %v2877_v60 = vld [vmem:[%s12849_s8 + $0x1ba0] sm:$0xff] }
 0x386   : > { %8394 = vmatpush1.bf16.msra.mxu0 %v11587_v54  ;;  %v2854_v54 = vld [vmem:[%s12849_s8 + $0x1ae8] sm:$0xff] }
 0x387   : > { %8722 = vmatpush1.bf16.msra.mxu1 %v11589_v27  ;;  %8395 = vmatprep.subr.bf16.mxu0 %v11596_v8  ;;  %v11627_v27 = vcombine.low %v2841_v39, %v2845_v63  ;;  %v11629_v8 = vcombine.low %v2842_v40, %v2846_v61  ;;  %v11638_v38 = vcombine.high %v2850_v55, %v2854_v54  ;;  %v2881_v63 = vld [vmem:[%s12849_s8 + $0x1bc0] sm:$0xff]  ;;  %v2882_v61 = vld [vmem:[%s12849_s8 + $0x1bc8] sm:$0xff] }
 0x388   : > { %8723 = vmatprep.subr.bf16.mxu1 %v11598_v48  ;;  %v11636_v48 = vcombine.high %v2849_v59, %v2853_v49  ;;  %v2885_v40 = vld [vmem:[%s12849_s8 + $0x1be0] sm:$0xff] }
 0x38a   : > { %8396 = vmatpush1.bf16.msra.mxu0 %v11595_v1  ;;  %v2862_v1 = vld [vmem:[%s12849_s8 + $0x1b28] sm:$0xff] }
 0x38b   : > { %8724 = vmatpush1.bf16.msra.mxu1 %v11597_v46  ;;  %8397 = vmatprep.subr.bf16.mxu0 %v11604_v16  ;;  %v11635_v46 = vcombine.low %v2849_v59, %v2853_v49  ;;  %v11637_v16 = vcombine.low %v2850_v55, %v2854_v54  ;;  %v11646_v43 = vcombine.high %v2858_v14, %v2862_v1  ;;  %v1957_v49 = vmul.f32 0.02, %v13481_v28  ;;  %v2889_v55 = vld [vmem:[%s12849_s8 + $0x1c00] sm:$0xff] }
 0x38c   : > { %8725 = vmatprep.subr.bf16.mxu1 %v11606_v57  ;;  %v11644_v57 = vcombine.high %v2857_v51, %v2861_v4  ;;  %v2893_v54 = vld [vmem:[%s12849_s8 + $0x1c20] sm:$0xff] }
 0x38e   : > { %8398 = vmatpush1.bf16.msra.mxu0 %v11603_v22  ;;  %v2870_v22 = vld [vmem:[%s12849_s8 + $0x1b68] sm:$0xff] }
 0x38f   : > { %8726 = vmatpush1.bf16.msra.mxu1 %v11605_v35  ;;  %8399 = vmatprep.subr.bf16.mxu0 %v11612_v33  ;;  %v11643_v35 = vcombine.low %v2857_v51, %v2861_v4  ;;  %v11645_v33 = vcombine.low %v2858_v14, %v2862_v1  ;;  %v11654_v50 = vcombine.high %v2866_v11, %v2870_v22 }
 0x390   : > { %8727 = vmatprep.subr.bf16.mxu1 %v11614_v2  ;;  %v11652_v2 = vcombine.high %v2865_v37, %v2869_v32  ;;  %v11676_v4 = vcombine.high %v2889_v55, %v2893_v54  ;;  %v1973_v14 = vsel %vm1941_vm14, %v13481_v28, %v1957_v49  ;;  %v2905_v28 = vld [vmem:[%s12849_s8 + $0x1c80] sm:$0xff]  ;;  %v2926_v49 = vld [vmem:[%s12849_s8 + $0x1d28] sm:$0xff] }
 0x392   : > { %8400 = vmatpush1.bf16.msra.mxu0 %v11611_v3  ;;  %v2878_v3 = vld [vmem:[%s12849_s8 + $0x1ba8] sm:$0xff] }
 0x393   : > { %8728 = vmatpush1.bf16.msra.mxu1 %v11613_v7  ;;  %8401 = vmatprep.subr.bf16.mxu0 %v11620_v45  ;;  %v11651_v7 = vcombine.low %v2865_v37, %v2869_v32  ;;  %v11653_v45 = vcombine.low %v2866_v11, %v2870_v22  ;;  %v11662_v39 = vcombine.high %v2874_v0, %v2878_v3  ;;  %v2898_v37 = vld [vmem:[%s12849_s8 + $0x1c48] sm:$0xff] }
 0x394   : > { %8729 = vmatprep.subr.bf16.mxu1 %v11622_v9  ;;  %v11660_v9 = vcombine.high %v2873_v42, %v2877_v60  ;;  %v2902_v32 = vld [vmem:[%s12849_s8 + $0x1c68] sm:$0xff]  ;;  %v13833_v11 = vpack.c.bf16 %v1973_v14, %v1973_v14 }
 0x396   : > { %8402 = vmatpush1.bf16.msra.mxu0 %v11619_v34  ;;  %v2886_v34 = vld [vmem:[%s12849_s8 + $0x1be8] sm:$0xff] }
 0x397   : > { %8730 = vmatpush1.bf16.msra.mxu1 %v11621_v26  ;;  %8403 = vmatprep.subr.bf16.mxu0 %v11628_v13  ;;  %v11659_v26 = vcombine.low %v2873_v42, %v2877_v60  ;;  %v11661_v13 = vcombine.low %v2874_v0, %v2878_v3  ;;  %v11670_v59 = vcombine.high %v2882_v61, %v2886_v34  ;;  %v2910_v42 = vld [vmem:[%s12849_s8 + $0x1ca8] sm:$0xff] }
 0x398   : > { %8731 = vmatprep.subr.bf16.mxu1 %v11630_v10  ;;  %v11668_v10 = vcombine.high %v2881_v63, %v2885_v40  ;;  %v11669_v51 = vcombine.low %v2882_v61, %v2886_v34  ;;  %v11685_v0 = vcombine.low %v2898_v37, %v2902_v32 }
 0x39a   : > { %8404 = vmatpush1.bf16.msra.mxu0 %v11627_v27  ;;  %v2890_v27 = vld [vmem:[%s12849_s8 + $0x1c08] sm:$0xff] }
 0x39b   : > { %8732 = vmatpush1.bf16.msra.mxu1 %v11629_v8  ;;  %8405 = vmatprep.subr.bf16.mxu0 %v11636_v48  ;;  %v2894_v8 = vld [vmem:[%s12849_s8 + $0x1c28] sm:$0xff]  ;;  %v11667_v48 = vcombine.low %v2881_v63, %v2885_v40 }
 0x39c   : > { %8733 = vmatprep.subr.bf16.mxu1 %v11638_v38  ;;  %v1960_v38 = vmul.f32 0.02, %v13392_v56  ;;  %v11678_v1 = vcombine.high %v2890_v27, %v2894_v8  ;;  %v11677_v22 = vcombine.low %v2890_v27, %v2894_v8  ;;  %v2918_v63 = vld [vmem:[%s12849_s8 + $0x1ce8] sm:$0xff] }
 0x39e   : > { %8406 = vmatpush1.bf16.msra.mxu0 %v11635_v46  ;;  %v2897_v46 = vld [vmem:[%s12849_s8 + $0x1c40] sm:$0xff] }
 0x39f   : > { %8734 = vmatpush1.bf16.msra.mxu1 %v11637_v16  ;;  %8407 = vmatprep.subr.bf16.mxu0 %v11644_v57  ;;  %v2901_v16 = vld [vmem:[%s12849_s8 + $0x1c60] sm:$0xff]  ;;  %v11675_v57 = vcombine.low %v2889_v55, %v2893_v54 }
 0x3a0   : > { %8735 = vmatprep.subr.bf16.mxu1 %v11646_v43  ;;  %v1976_v43 = vsel %vm1944_vm15, %v13392_v56, %v1960_v38  ;;  %v2906_v56 = vld [vmem:[%s12849_s8 + $0x1c88] sm:$0xff]  ;;  %v11683_v60 = vcombine.low %v2897_v46, %v2901_v16  ;;  %v2933_v38 = vld [vmem:[%s12849_s8 + $0x1d60] sm:$0xff] }
 0x3a1   : > { %v11693_v61 = vcombine.low %v2906_v56, %v2910_v42 }
 0x3a2   : > { %8408 = vmatpush1.bf16.msra.mxu0 %v11643_v35  ;;  %v11684_v35 = vcombine.high %v2897_v46, %v2901_v16 }
 0x3a3   : > { %8736 = vmatpush1.bf16.msra.mxu1 %v11645_v33  ;;  %8409 = vmatprep.subr.bf16.mxu0 %v11652_v2  ;;  %v2909_v33 = vld [vmem:[%s12849_s8 + $0x1ca0] sm:$0xff]  ;;  %v13838_v2 = vpack.c.bf16 %v1976_v43, %v1976_v43 }
 0x3a4   : > { %8737 = vmatprep.subr.bf16.mxu1 %v11654_v50  ;;  %v11686_v50 = vcombine.high %v2898_v37, %v2902_v32  ;;  %v11692_v3 = vcombine.high %v2905_v28, %v2909_v33  ;;  %v11691_v40 = vcombine.low %v2905_v28, %v2909_v33  ;;  %v2941_v43 = vld [vmem:[%s12849_s8 + $0x1da0] sm:$0xff]  ;;  %v2938_v37 = vld [vmem:[%s12849_s8 + $0x1d88] sm:$0xff] }
 0x3a5   : > { %v2942_v32 = vld [vmem:[%s12849_s8 + $0x1da8] sm:$0xff] }
 0x3a6   : > { %8410 = vmatpush1.bf16.msra.mxu0 %v11651_v7  ;;  %v11694_v7 = vcombine.high %v2906_v56, %v2910_v42  ;;  %v11726_v33 = vcombine.high %v2938_v37, %v2942_v32  ;;  %v2949_v56 = vld [vmem:[%s12849_s8 + $0x1de0] sm:$0xff]  ;;  %v2946_v42 = vld [vmem:[%s12849_s8 + $0x1dc8] sm:$0xff] }
 0x3a7   : > { %8738 = vmatpush1.bf16.msra.mxu1 %v11653_v45  ;;  %8411 = vmatprep.subr.bf16.mxu0 %v11660_v9  ;;  %v2913_v45 = vld [vmem:[%s12849_s8 + $0x1cc0] sm:$0xff] }
 0x3a8   : > { %8739 = vmatprep.subr.bf16.mxu1 %v11662_v39  ;;  %v2917_v9 = vld [vmem:[%s12849_s8 + $0x1ce0] sm:$0xff]  ;;  %v2914_v39 = vld [vmem:[%s12849_s8 + $0x1cc8] sm:$0xff] }
 0x3a9   : > { %v11700_v34 = vcombine.high %v2913_v45, %v2917_v9  ;;  %v11699_v55 = vcombine.low %v2913_v45, %v2917_v9  ;;  %v11701_v54 = vcombine.low %v2914_v39, %v2918_v63  ;;  %v2953_v9 = vld [vmem:[%s12849_s8 + $0x1e00] sm:$0xff] }
 0x3aa   : > { %8412 = vmatpush1.bf16.msra.mxu0 %v11659_v26  ;;  %v11702_v26 = vcombine.high %v2914_v39, %v2918_v63  ;;  %v2957_v39 = vld [vmem:[%s12849_s8 + $0x1e20] sm:$0xff]  ;;  %v2954_v63 = vld [vmem:[%s12849_s8 + $0x1e08] sm:$0xff] }
 0x3ab   : > { %8740 = vmatpush1.bf16.msra.mxu1 %v11661_v13  ;;  %8413 = vmatprep.subr.bf16.mxu0 %v11668_v10  ;;  %v2921_v13 = vld [vmem:[%s12849_s8 + $0x1d00] sm:$0xff] }
 0x3ac   : > { %8741 = vmatprep.subr.bf16.mxu1 %v11670_v59  ;;  %v2925_v10 = vld [vmem:[%s12849_s8 + $0x1d20] sm:$0xff]  ;;  %v2922_v59 = vld [vmem:[%s12849_s8 + $0x1d08] sm:$0xff] }
 0x3ad   : > { %v11708_v27 = vcombine.high %v2921_v13, %v2925_v10  ;;  %v11710_v8 = vcombine.high %v2922_v59, %v2926_v49  ;;  %v11707_v14 = vcombine.low %v2921_v13, %v2925_v10  ;;  %v2961_v10 = vld [vmem:[%s12849_s8 + $0x1e40] sm:$0xff] }
 0x3ae   : > { %8414 = vmatpush1.bf16.msra.mxu0 %v11667_v48  ;;  %v2929_v48 = vld [vmem:[%s12849_s8 + $0x1d40] sm:$0xff] }
 0x3af   : > { %8742 = vmatpush1.bf16.msra.mxu1 %v11669_v51  ;;  %8424 = vmatprep.subr.bf16.mxu0 %v11676_v4  ;;  %v2930_v51 = vld [vmem:[%s12849_s8 + $0x1d48] sm:$0xff]  ;;  %v11716_v46 = vcombine.high %v2929_v48, %v2933_v38 }
 0x3b0   : > { %8752 = vmatprep.subr.bf16.mxu1 %v11678_v1  ;;  %v2934_v4 = vld [vmem:[%s12849_s8 + $0x1d68] sm:$0xff]  ;;  %v11709_v1 = vcombine.low %v2922_v59, %v2926_v49  ;;  %v2965_v59 = vld [vmem:[%s12849_s8 + $0x1e60] sm:$0xff] }
 0x3b1   : > { %8416 = vmatmul.mubr.bf16.vlgmr.msra.gmra.mrb[16].mxu0 %v13833_v11  ;;  %v11718_v16 = vcombine.high %v2930_v51, %v2934_v4  ;;  %v2962_v49 = vld [vmem:[%s12849_s8 + $0x1e48] sm:$0xff] }
 0x3b2   : > { %8744 = vmatmul.mubr.bf16.vlgmr.msra.gmra.mrb[16].mxu1 %v13833_v11  ;;  %8425 = vmatpush1.bf16.msra.mxu0 %v11675_v57  ;;  %v2937_v57 = vld [vmem:[%s12849_s8 + $0x1d80] sm:$0xff] }
 0x3b3   : > { %8456 = vmatprep.mubr.bf16.mxu0 %v13838_v2  ;;  %8753 = vmatpush1.bf16.msra.mxu1 %v11677_v22  ;;  %v11715_v22 = vcombine.low %v2929_v48, %v2933_v38  ;;  %v11724_v28 = vcombine.high %v2937_v57, %v2941_v43  ;;  %v2969_v38 = vld [vmem:[%s12849_s8 + $0x1e80] sm:$0xff] }
 0x3b4   : > { %8784 = vmatprep.mubr.bf16.mxu1 %v13838_v2  ;;  %8426 = vmatprep.subr.bf16.mxu0 %v11684_v35  ;;  %v11717_v35 = vcombine.low %v2930_v51, %v2934_v4  ;;  %v2973_v51 = vld [vmem:[%s12849_s8 + $0x1ea0] sm:$0xff]  ;;  %v2970_v4 = vld [vmem:[%s12849_s8 + $0x1e88] sm:$0xff] }
 0x3b5   : > { %8754 = vmatprep.subr.bf16.mxu1 %v11686_v50  ;;  %v2945_v50 = vld [vmem:[%s12849_s8 + $0x1dc0] sm:$0xff] }
 0x3b6   : > { %8427 = vmatpush1.bf16.msra.mxu0 %v11683_v60  ;;  %v2950_v60 = vld [vmem:[%s12849_s8 + $0x1de8] sm:$0xff] }
 0x3b7   : > { %8755 = vmatpush1.bf16.msra.mxu1 %v11685_v0  ;;  %8428 = vmatprep.subr.bf16.mxu0 %v11692_v3  ;;  %v11723_v0 = vcombine.low %v2937_v57, %v2941_v43  ;;  %v11725_v3 = vcombine.low %v2938_v37, %v2942_v32  ;;  %v11734_v45 = vcombine.high %v2946_v42, %v2950_v60  ;;  %v2977_v43 = vld [vmem:[%s12849_s8 + $0x1ec0] sm:$0xff]  ;;  %v2978_v32 = vld [vmem:[%s12849_s8 + $0x1ec8] sm:$0xff] }
 0x3b8   : > { %8756 = vmatprep.subr.bf16.mxu1 %v11694_v7  ;;  %v11732_v7 = vcombine.high %v2945_v50, %v2949_v56  ;;  %v2981_v37 = vld [vmem:[%s12849_s8 + $0x1ee0] sm:$0xff] }
 0x3ba   : > { %8429 = vmatpush1.bf16.msra.mxu0 %v11691_v40  ;;  %v2958_v40 = vld [vmem:[%s12849_s8 + $0x1e28] sm:$0xff] }
 0x3bb   : > { %8757 = vmatpush1.bf16.msra.mxu1 %v11693_v61  ;;  %8430 = vmatprep.subr.bf16.mxu0 %v11700_v34  ;;  %v11731_v61 = vcombine.low %v2945_v50, %v2949_v56  ;;  %v11733_v34 = vcombine.low %v2946_v42, %v2950_v60  ;;  %v11742_v13 = vcombine.high %v2954_v63, %v2958_v40  ;;  %v2985_v56 = vld [vmem:[%s12849_s8 + $0x1f00] sm:$0xff]  ;;  %v2986_v60 = vld [vmem:[%s12849_s8 + $0x1f08] sm:$0xff] }
 0x3bc   : > { %8758 = vmatprep.subr.bf16.mxu1 %v11702_v26  ;;  %v11740_v26 = vcombine.high %v2953_v9, %v2957_v39  ;;  %v2989_v42 = vld [vmem:[%s12849_s8 + $0x1f20] sm:$0xff] }
 0x3be   : > { %8431 = vmatpush1.bf16.msra.mxu0 %v11699_v55  ;;  %v2966_v55 = vld [vmem:[%s12849_s8 + $0x1e68] sm:$0xff] }
 0x3bf   : > { %8759 = vmatpush1.bf16.msra.mxu1 %v11701_v54  ;;  %8432 = vmatprep.subr.bf16.mxu0 %v11708_v27  ;;  %v11739_v54 = vcombine.low %v2953_v9, %v2957_v39  ;;  %v11741_v27 = vcombine.low %v2954_v63, %v2958_v40  ;;  %v11750_v48 = vcombine.high %v2962_v49, %v2966_v55  ;;  %v2993_v39 = vld [vmem:[%s12849_s8 + $0x1f40] sm:$0xff]  ;;  %v2994_v40 = vld [vmem:[%s12849_s8 + $0x1f48] sm:$0xff] }
 0x3c0   : > { %8760 = vmatprep.subr.bf16.mxu1 %v11710_v8  ;;  %v11748_v8 = vcombine.high %v2961_v10, %v2965_v59  ;;  %v2997_v63 = vld [vmem:[%s12849_s8 + $0x1f60] sm:$0xff] }
 0x3c2   : > { %8433 = vmatpush1.bf16.msra.mxu0 %v11707_v14  ;;  %v2974_v14 = vld [vmem:[%s12849_s8 + $0x1ea8] sm:$0xff] }
 0x3c3   : > { %8761 = vmatpush1.bf16.msra.mxu1 %v11709_v1  ;;  %8434 = vmatprep.subr.bf16.mxu0 %v11716_v46  ;;  %v11747_v1 = vcombine.low %v2961_v10, %v2965_v59  ;;  %v11749_v46 = vcombine.low %v2962_v49, %v2966_v55  ;;  %v11758_v57 = vcombine.high %v2970_v4, %v2974_v14  ;;  %v3001_v59 = vld [vmem:[%s12849_s8 + $0x1f80] sm:$0xff]  ;;  %v3002_v55 = vld [vmem:[%s12849_s8 + $0x1f88] sm:$0xff] }
 0x3c4   : > { %8762 = vmatprep.subr.bf16.mxu1 %v11718_v16  ;;  %v11756_v16 = vcombine.high %v2969_v38, %v2973_v51  ;;  %v3005_v49 = vld [vmem:[%s12849_s8 + $0x1fa0] sm:$0xff] }
 0x3c6   : > { %8435 = vmatpush1.bf16.msra.mxu0 %v11715_v22  ;;  %v2982_v22 = vld [vmem:[%s12849_s8 + $0x1ee8] sm:$0xff] }
 0x3c7   : > { %8763 = vmatpush1.bf16.msra.mxu1 %v11717_v35  ;;  %8436 = vmatprep.subr.bf16.mxu0 %v11724_v28  ;;  %v11755_v35 = vcombine.low %v2969_v38, %v2973_v51  ;;  %v11757_v28 = vcombine.low %v2970_v4, %v2974_v14  ;;  %v11766_v50 = vcombine.high %v2978_v32, %v2982_v22  ;;  %v3009_v51 = vld [vmem:[%s12849_s8 + $0x1fc0] sm:$0xff]  ;;  %v3010_v14 = vld [vmem:[%s12849_s8 + $0x1fc8] sm:$0xff] }
 0x3c8   : > { %8764 = vmatprep.subr.bf16.mxu1 %v11726_v33  ;;  %v11764_v33 = vcombine.high %v2977_v43, %v2981_v37  ;;  %v3013_v4 = vld [vmem:[%s12849_s8 + $0x1fe0] sm:$0xff] }
 0x3ca   : > { %8437 = vmatpush1.bf16.msra.mxu0 %v11723_v0  ;;  %v2990_v0 = vld [vmem:[%s12849_s8 + $0x1f28] sm:$0xff] }
 0x3cb   : > { %8765 = vmatpush1.bf16.msra.mxu1 %v11725_v3  ;;  %8438 = vmatprep.subr.bf16.mxu0 %v11732_v7  ;;  %v11763_v3 = vcombine.low %v2977_v43, %v2981_v37  ;;  %v11765_v7 = vcombine.low %v2978_v32, %v2982_v22  ;;  %v11774_v9 = vcombine.high %v2986_v60, %v2990_v0  ;;  %v1959_v37 = vmul.f32 0.02, %v13483_v19  ;;  %v1995_v32 = vld [vmem:[%s12849_s8 + $0x10] sm:$0xff] }
 0x3cc   : > { %8766 = vmatprep.subr.bf16.mxu1 %v11734_v45  ;;  %v11772_v45 = vcombine.high %v2985_v56, %v2989_v42  ;;  %v1999_v22 = vld [vmem:[%s12849_s8 + $0x30] sm:$0xff] }
 0x3ce   : > { %8439 = vmatpush1.bf16.msra.mxu0 %v11731_v61  ;;  %v2998_v61 = vld [vmem:[%s12849_s8 + $0x1f68] sm:$0xff] }
 0x3cf   : > { %8767 = vmatpush1.bf16.msra.mxu1 %v11733_v34  ;;  %8440 = vmatprep.subr.bf16.mxu0 %v11740_v26  ;;  %v11771_v34 = vcombine.low %v2985_v56, %v2989_v42  ;;  %v11773_v26 = vcombine.low %v2986_v60, %v2990_v0  ;;  %v11782_v10 = vcombine.high %v2994_v40, %v2998_v61  ;;  %v2003_v0 = vld [vmem:[%s12849_s8 + $0x50] sm:$0xff] }
 0x3d0   : > { %8768 = vmatprep.subr.bf16.mxu1 %v11742_v13  ;;  %v11780_v13 = vcombine.high %v2993_v39, %v2997_v63  ;;  %v10784_v56 = vcombine.high %v1995_v32, %v1999_v22  ;;  %v1975_v42 = vsel %vm1943_vm0, %v13483_v19, %v1959_v37 }
 0x3d2   : > { %8441 = vmatpush1.bf16.msra.mxu0 %v11739_v54  ;;  %v3006_v54 = vld [vmem:[%s12849_s8 + $0x1fa8] sm:$0xff] }
 0x3d3   : > { %8769 = vmatpush1.bf16.msra.mxu1 %v11741_v27  ;;  %8442 = vmatprep.subr.bf16.mxu0 %v11748_v8  ;;  %v11779_v27 = vcombine.low %v2993_v39, %v2997_v63  ;;  %v11781_v8 = vcombine.low %v2994_v40, %v2998_v61  ;;  %v11790_v38 = vcombine.high %v3002_v55, %v3006_v54  ;;  %v2011_v61 = vld [vmem:[%s12849_s8 + $0x90] sm:$0xff] }
 0x3d4   : > { %8770 = vmatprep.subr.bf16.mxu1 %v11750_v48  ;;  %v11788_v48 = vcombine.high %v3001_v59, %v3005_v49  ;;  %v13908_v39 = vpack.c.bf16 %v1975_v42, %v1975_v42 }
 0x3d6   : > { %8443 = vmatpush1.bf16.msra.mxu0 %v11747_v1  ;;  %v3014_v1 = vld [vmem:[%s12849_s8 + $0x1fe8] sm:$0xff] }
 0x3d7   : > { %8771 = vmatpush1.bf16.msra.mxu1 %v11749_v46  ;;  %8444 = vmatprep.subr.bf16.mxu0 %v11756_v16  ;;  %v11787_v46 = vcombine.low %v3001_v59, %v3005_v49  ;;  %v11789_v16 = vcombine.low %v3002_v55, %v3006_v54  ;;  %v11798_v43 = vcombine.high %v3010_v14, %v3014_v1  ;;  %v2019_v54 = vld [vmem:[%s12849_s8 + $0xd0] sm:$0xff] }
 0x3d8   : > { %8772 = vmatprep.subr.bf16.mxu1 %v11758_v57  ;;  %v11796_v57 = vcombine.high %v3009_v51, %v3013_v4 }
 0x3da   : > { %8445 = vmatpush1.bf16.msra.mxu0 %v11755_v35  ;;  %v1996_v35 = vld [vmem:[%s12849_s8 + $0x18] sm:$0xff] }
 0x3db   : > { %8773 = vmatpush1.bf16.msra.mxu1 %v11757_v28  ;;  %8446 = vmatprep.subr.bf16.mxu0 %v11764_v33  ;;  %v2000_v28 = vld [vmem:[%s12849_s8 + $0x38] sm:$0xff]  ;;  %v11795_v33 = vcombine.low %v3009_v51, %v3013_v4 }
 0x3dc   : > { %8774 = vmatprep.subr.bf16.mxu1 %v11766_v50  ;;  %v11797_v50 = vcombine.low %v3010_v14, %v3014_v1  ;;  %v10786_v60 = vcombine.high %v1996_v35, %v2000_v28  ;;  %v10785_v63 = vcombine.low %v1996_v35, %v2000_v28  ;;  %v2027_v14 = vld [vmem:[%s12849_s8 + $0x110] sm:$0xff]  ;;  %v2036_v28 = vld [vmem:[%s12849_s8 + $0x158] sm:$0xff] }
 0x3dd   : > { %v2031_v1 = vld [vmem:[%s12849_s8 + $0x130] sm:$0xff] }
 0x3de   : > { %8447 = vmatpush1.bf16.msra.mxu0 %v11763_v3  ;;  %v2007_v3 = vld [vmem:[%s12849_s8 + $0x70] sm:$0xff]  ;;  %v10816_v37 = vcombine.high %v2027_v14, %v2031_v1 }
 0x3df   : > { %8775 = vmatpush1.bf16.msra.mxu1 %v11765_v7  ;;  %8448 = vmatprep.subr.bf16.mxu0 %v11772_v45  ;;  %v10783_v7 = vcombine.low %v1995_v32, %v1999_v22  ;;  %v2004_v45 = vld [vmem:[%s12849_s8 + $0x58] sm:$0xff]  ;;  %v10792_v40 = vcombine.high %v2003_v0, %v2007_v3  ;;  %v2035_v22 = vld [vmem:[%s12849_s8 + $0x150] sm:$0xff] }
 0x3e0   : > { %8776 = vmatprep.subr.bf16.mxu1 %v11774_v9  ;;  %v2008_v9 = vld [vmem:[%s12849_s8 + $0x78] sm:$0xff]  ;;  %v2039_v35 = vld [vmem:[%s12849_s8 + $0x170] sm:$0xff] }
 0x3e1   : > { %v10794_v19 = vcombine.high %v2004_v45, %v2008_v9  ;;  %v10793_v59 = vcombine.low %v2004_v45, %v2008_v9  ;;  %v10824_v42 = vcombine.high %v2035_v22, %v2039_v35  ;;  %v2048_v45 = vld [vmem:[%s12849_s8 + $0x1b8] sm:$0xff]  ;;  %v10823_v9 = vcombine.low %v2035_v22, %v2039_v35  ;;  %v2075_v22 = vld [vmem:[%s12849_s8 + $0x290] sm:$0xff] }
 0x3e2   : > { %8449 = vmatpush1.bf16.msra.mxu0 %v11771_v34  ;;  %v2015_v34 = vld [vmem:[%s12849_s8 + $0xb0] sm:$0xff] }
 0x3e3   : > { %8777 = vmatpush1.bf16.msra.mxu1 %v11773_v26  ;;  %8450 = vmatprep.subr.bf16.mxu0 %v11780_v13  ;;  %v2012_v26 = vld [vmem:[%s12849_s8 + $0x98] sm:$0xff]  ;;  %v10800_v49 = vcombine.high %v2011_v61, %v2015_v34  ;;  %v2079_v35 = vld [vmem:[%s12849_s8 + $0x2b0] sm:$0xff] }
 0x3e4   : > { %8778 = vmatprep.subr.bf16.mxu1 %v11782_v10  ;;  %v2016_v13 = vld [vmem:[%s12849_s8 + $0xb8] sm:$0xff]  ;;  %v10791_v10 = vcombine.low %v2003_v0, %v2007_v3  ;;  %v2043_v0 = vld [vmem:[%s12849_s8 + $0x190] sm:$0xff] }
 0x3e5   : > { %v10802_v55 = vcombine.high %v2012_v26, %v2016_v13  ;;  %v10801_v51 = vcombine.low %v2012_v26, %v2016_v13  ;;  %v2047_v3 = vld [vmem:[%s12849_s8 + $0x1b0] sm:$0xff]  ;;  %v2052_v26 = vld [vmem:[%s12849_s8 + $0x1d8] sm:$0xff] }
 0x3e6   : > { %8451 = vmatpush1.bf16.msra.mxu0 %v11779_v27  ;;  %v2023_v27 = vld [vmem:[%s12849_s8 + $0xf0] sm:$0xff]  ;;  %v2056_v13 = vld [vmem:[%s12849_s8 + $0x1f8] sm:$0xff] }
 0x3e7   : > { %8779 = vmatpush1.bf16.msra.mxu1 %v11781_v8  ;;  %8452 = vmatprep.subr.bf16.mxu0 %v11788_v48  ;;  %v2020_v8 = vld [vmem:[%s12849_s8 + $0xd8] sm:$0xff]  ;;  %v10808_v4 = vcombine.high %v2019_v54, %v2023_v27 }
 0x3e8   : > { %8780 = vmatprep.subr.bf16.mxu1 %v11790_v38  ;;  %v2024_v48 = vld [vmem:[%s12849_s8 + $0xf8] sm:$0xff]  ;;  %v10799_v38 = vcombine.low %v2011_v61, %v2015_v34  ;;  %v2051_v34 = vld [vmem:[%s12849_s8 + $0x1d0] sm:$0xff] }
 0x3ea   : > { %8453 = vmatpush1.bf16.msra.mxu0 %v11787_v46  ;;  %v2028_v46 = vld [vmem:[%s12849_s8 + $0x118] sm:$0xff] }
 0x3eb   : > { %8781 = vmatpush1.bf16.msra.mxu1 %v11789_v16  ;;  %8454 = vmatprep.subr.bf16.mxu0 %v11796_v57  ;;  %v2032_v16 = vld [vmem:[%s12849_s8 + $0x138] sm:$0xff]  ;;  %v10807_v57 = vcombine.low %v2019_v54, %v2023_v27  ;;  %v2059_v54 = vld [vmem:[%s12849_s8 + $0x210] sm:$0xff] }
 0x3ec   : > { %8782 = vmatprep.subr.bf16.mxu1 %v11798_v43  ;;  %v10809_v43 = vcombine.low %v2020_v8, %v2024_v48  ;;  %v10818_v32 = vcombine.high %v2028_v46, %v2032_v16  ;;  %v2063_v27 = vld [vmem:[%s12849_s8 + $0x230] sm:$0xff] }
 0x3ee   : > { %8455 = vmatpush1.bf16.msra.mxu0 %v11795_v33  ;;  %v2040_v33 = vld [vmem:[%s12849_s8 + $0x178] sm:$0xff] }
 0x3ef   : > { %8783 = vmatpush1.bf16.msra.mxu1 %v11797_v50  ;;  %8793 = vmatprep.subr.bf16.mxu0 %v10784_v56  ;;  %v10815_v50 = vcombine.low %v2027_v14, %v2031_v1  ;;  %v10817_v56 = vcombine.low %v2028_v46, %v2032_v16  ;;  %v2067_v14 = vld [vmem:[%s12849_s8 + $0x250] sm:$0xff]  ;;  %v2068_v46 = vld [vmem:[%s12849_s8 + $0x258] sm:$0xff] }
 0x3f0   : > { %9121 = vmatprep.subr.bf16.mxu1 %v10786_v60  ;;  %v10826_v60 = vcombine.high %v2036_v28, %v2040_v33  ;;  %v2071_v1 = vld [vmem:[%s12849_s8 + $0x270] sm:$0xff]  ;;  %v2072_v16 = vld [vmem:[%s12849_s8 + $0x278] sm:$0xff] }
 0x3f1   : > { %8457 = vmatmul.mubr.bf16.vlgmr.msra.gmra.mrb[16].mxu0 %v13908_v39 }
 0x3f2   : > { %8785 = vmatmul.mubr.bf16.vlgmr.msra.gmra.mrb[16].mxu1 %v13908_v39  ;;  %8794 = vmatpush1.bf16.msra.mxu0 %v10783_v7  ;;  %v2044_v7 = vld [vmem:[%s12849_s8 + $0x198] sm:$0xff] }
 0x3f3   : > { %8825 = vmatprep.mubr.bf16.mxu0 %v13194_v23  ;;  %9122 = vmatpush1.bf16.msra.mxu1 %v10785_v63  ;;  %v10825_v63 = vcombine.low %v2036_v28, %v2040_v33  ;;  %v10834_v61 = vcombine.high %v2044_v7, %v2048_v45  ;;  %v2076_v28 = vld [vmem:[%s12849_s8 + $0x298] sm:$0xff] }
 0x3f4   : > { %9153 = vmatprep.mubr.bf16.mxu1 %v13194_v23  ;;  %8795 = vmatprep.subr.bf16.mxu0 %v10792_v40  ;;  %v10810_v23 = vcombine.high %v2020_v8, %v2024_v48  ;;  %v10832_v40 = vcombine.high %v2043_v0, %v2047_v3  ;;  %v2060_v8 = vld [vmem:[%s12849_s8 + $0x218] sm:$0xff] }
 0x3f5   : > { %9123 = vmatprep.subr.bf16.mxu1 %v10794_v19  ;;  %v2055_v19 = vld [vmem:[%s12849_s8 + $0x1f0] sm:$0xff]  ;;  %v2064_v48 = vld [vmem:[%s12849_s8 + $0x238] sm:$0xff] }
 0x3f6   : > { %8796 = vmatpush1.bf16.msra.mxu0 %v10791_v10  ;;  %v10831_v10 = vcombine.low %v2043_v0, %v2047_v3  ;;  %v2080_v33 = vld [vmem:[%s12849_s8 + $0x2b8] sm:$0xff]  ;;  %v2083_v0 = vld [vmem:[%s12849_s8 + $0x2d0] sm:$0xff] }
 0x3f7   : > { %9124 = vmatpush1.bf16.msra.mxu1 %v10793_v59  ;;  %8797 = vmatprep.subr.bf16.mxu0 %v10800_v49  ;;  %v10833_v59 = vcombine.low %v2044_v7, %v2048_v45  ;;  %v10840_v49 = vcombine.high %v2051_v34, %v2055_v19  ;;  %v2087_v3 = vld [vmem:[%s12849_s8 + $0x2f0] sm:$0xff]  ;;  %v2084_v7 = vld [vmem:[%s12849_s8 + $0x2d8] sm:$0xff] }
 0x3f8   : > { %9125 = vmatprep.subr.bf16.mxu1 %v10802_v55  ;;  %v10842_v55 = vcombine.high %v2052_v26, %v2056_v13  ;;  %v2088_v45 = vld [vmem:[%s12849_s8 + $0x2f8] sm:$0xff] }
 0x3fa   : > { %8798 = vmatpush1.bf16.msra.mxu0 %v10799_v38  ;;  %v10839_v38 = vcombine.low %v2051_v34, %v2055_v19  ;;  %v2091_v34 = vld [vmem:[%s12849_s8 + $0x310] sm:$0xff] }
 0x3fb   : > { %9126 = vmatpush1.bf16.msra.mxu1 %v10801_v51  ;;  %8799 = vmatprep.subr.bf16.mxu0 %v10808_v4  ;;  %v10841_v51 = vcombine.low %v2052_v26, %v2056_v13  ;;  %v10848_v4 = vcombine.high %v2059_v54, %v2063_v27  ;;  %v2095_v19 = vld [vmem:[%s12849_s8 + $0x330] sm:$0xff]  ;;  %v2092_v26 = vld [vmem:[%s12849_s8 + $0x318] sm:$0xff] }
 0x3fc   : > { %9127 = vmatprep.subr.bf16.mxu1 %v10810_v23  ;;  %v10850_v23 = vcombine.high %v2060_v8, %v2064_v48  ;;  %v2096_v13 = vld [vmem:[%s12849_s8 + $0x338] sm:$0xff] }
 0x3fe   : > { %8800 = vmatpush1.bf16.msra.mxu0 %v10807_v57  ;;  %v10847_v57 = vcombine.low %v2059_v54, %v2063_v27  ;;  %v2099_v54 = vld [vmem:[%s12849_s8 + $0x350] sm:$0xff] }
 0x3ff   : > { %9128 = vmatpush1.bf16.msra.mxu1 %v10809_v43  ;;  %8801 = vmatprep.subr.bf16.mxu0 %v10816_v37  ;;  %v10849_v43 = vcombine.low %v2060_v8, %v2064_v48  ;;  %v10856_v37 = vcombine.high %v2067_v14, %v2071_v1  ;;  %v2103_v27 = vld [vmem:[%s12849_s8 + $0x370] sm:$0xff]  ;;  %v2100_v8 = vld [vmem:[%s12849_s8 + $0x358] sm:$0xff] }
 0x400   : > { %9129 = vmatprep.subr.bf16.mxu1 %v10818_v32  ;;  %v10858_v32 = vcombine.high %v2068_v46, %v2072_v16  ;;  %v2104_v48 = vld [vmem:[%s12849_s8 + $0x378] sm:$0xff] }
 0x402   : > { %8802 = vmatpush1.bf16.msra.mxu0 %v10815_v50  ;;  %v10855_v50 = vcombine.low %v2067_v14, %v2071_v1  ;;  %v2107_v14 = vld [vmem:[%s12849_s8 + $0x390] sm:$0xff] }
 0x403   : > { %9130 = vmatpush1.bf16.msra.mxu1 %v10817_v56  ;;  %8803 = vmatprep.subr.bf16.mxu0 %v10824_v42  ;;  %v10857_v56 = vcombine.low %v2068_v46, %v2072_v16  ;;  %v10864_v42 = vcombine.high %v2075_v22, %v2079_v35  ;;  %v2111_v1 = vld [vmem:[%s12849_s8 + $0x3b0] sm:$0xff]  ;;  %v2108_v46 = vld [vmem:[%s12849_s8 + $0x398] sm:$0xff] }
 0x404   : > { %9131 = vmatprep.subr.bf16.mxu1 %v10826_v60  ;;  %v10866_v60 = vcombine.high %v2076_v28, %v2080_v33  ;;  %v2112_v16 = vld [vmem:[%s12849_s8 + $0x3b8] sm:$0xff] }
 0x406   : > { %8804 = vmatpush1.bf16.msra.mxu0 %v10823_v9  ;;  %v10863_v9 = vcombine.low %v2075_v22, %v2079_v35  ;;  %v2115_v22 = vld [vmem:[%s12849_s8 + $0x3d0] sm:$0xff] }
 0x407   : > { %9132 = vmatpush1.bf16.msra.mxu1 %v10825_v63  ;;  %8805 = vmatprep.subr.bf16.mxu0 %v10832_v40  ;;  %v10865_v63 = vcombine.low %v2076_v28, %v2080_v33  ;;  %v10872_v40 = vcombine.high %v2083_v0, %v2087_v3  ;;  %v2119_v35 = vld [vmem:[%s12849_s8 + $0x3f0] sm:$0xff]  ;;  %v2116_v28 = vld [vmem:[%s12849_s8 + $0x3d8] sm:$0xff] }
 0x408   : > { %9133 = vmatprep.subr.bf16.mxu1 %v10834_v61  ;;  %v10874_v61 = vcombine.high %v2084_v7, %v2088_v45  ;;  %v2120_v33 = vld [vmem:[%s12849_s8 + $0x3f8] sm:$0xff] }
 0x40a   : > { %8806 = vmatpush1.bf16.msra.mxu0 %v10831_v10  ;;  %v10871_v10 = vcombine.low %v2083_v0, %v2087_v3  ;;  %v2123_v0 = vld [vmem:[%s12849_s8 + $0x410] sm:$0xff] }
 0x40b   : > { %9134 = vmatpush1.bf16.msra.mxu1 %v10833_v59  ;;  %8807 = vmatprep.subr.bf16.mxu0 %v10840_v49  ;;  %v10873_v59 = vcombine.low %v2084_v7, %v2088_v45  ;;  %v10880_v49 = vcombine.high %v2091_v34, %v2095_v19  ;;  %v2127_v3 = vld [vmem:[%s12849_s8 + $0x430] sm:$0xff]  ;;  %v2124_v7 = vld [vmem:[%s12849_s8 + $0x418] sm:$0xff] }
 0x40c   : > { %9135 = vmatprep.subr.bf16.mxu1 %v10842_v55  ;;  %v10882_v55 = vcombine.high %v2092_v26, %v2096_v13  ;;  %v2128_v45 = vld [vmem:[%s12849_s8 + $0x438] sm:$0xff] }
 0x40e   : > { %8808 = vmatpush1.bf16.msra.mxu0 %v10839_v38  ;;  %v10879_v38 = vcombine.low %v2091_v34, %v2095_v19  ;;  %v2131_v34 = vld [vmem:[%s12849_s8 + $0x450] sm:$0xff] }
 0x40f   : > { %9136 = vmatpush1.bf16.msra.mxu1 %v10841_v51  ;;  %8809 = vmatprep.subr.bf16.mxu0 %v10848_v4  ;;  %v10881_v51 = vcombine.low %v2092_v26, %v2096_v13  ;;  %v10888_v4 = vcombine.high %v2099_v54, %v2103_v27  ;;  %v2135_v19 = vld [vmem:[%s12849_s8 + $0x470] sm:$0xff]  ;;  %v10911_v26 = vcombine.low %v2123_v0, %v2127_v3  ;;  %v2132_v13 = vld [vmem:[%s12849_s8 + $0x458] sm:$0xff] }
 0x410   : > { %9137 = vmatprep.subr.bf16.mxu1 %v10850_v23  ;;  %v10890_v23 = vcombine.high %v2100_v8, %v2104_v48 }
 0x412   : > { %8810 = vmatpush1.bf16.msra.mxu0 %v10847_v57  ;;  %v10887_v57 = vcombine.low %v2099_v54, %v2103_v27  ;;  %v2143_v54 = vld [vmem:[%s12849_s8 + $0x4b0] sm:$0xff] }
 0x413   : > { %9138 = vmatpush1.bf16.msra.mxu1 %v10849_v43  ;;  %8811 = vmatprep.subr.bf16.mxu0 %v10856_v37  ;;  %v10889_v43 = vcombine.low %v2100_v8, %v2104_v48  ;;  %v10896_v37 = vcombine.high %v2107_v14, %v2111_v1  ;;  %v2140_v8 = vld [vmem:[%s12849_s8 + $0x498] sm:$0xff] }
 0x414   : > { %9139 = vmatprep.subr.bf16.mxu1 %v10858_v32  ;;  %v10898_v32 = vcombine.high %v2108_v46, %v2112_v16  ;;  %v2144_v48 = vld [vmem:[%s12849_s8 + $0x4b8] sm:$0xff] }
 0x416   : > { %8812 = vmatpush1.bf16.msra.mxu0 %v10855_v50  ;;  %v10895_v50 = vcombine.low %v2107_v14, %v2111_v1  ;;  %v2147_v14 = vld [vmem:[%s12849_s8 + $0x4d0] sm:$0xff] }
 0x417   : > { %9140 = vmatpush1.bf16.msra.mxu1 %v10857_v56  ;;  %8813 = vmatprep.subr.bf16.mxu0 %v10864_v42  ;;  %v10897_v56 = vcombine.low %v2108_v46, %v2112_v16  ;;  %v10904_v42 = vcombine.high %v2115_v22, %v2119_v35  ;;  %v2151_v1 = vld [vmem:[%s12849_s8 + $0x4f0] sm:$0xff]  ;;  %v2148_v46 = vld [vmem:[%s12849_s8 + $0x4d8] sm:$0xff] }
 0x418   : > { %9141 = vmatprep.subr.bf16.mxu1 %v10866_v60  ;;  %v10906_v60 = vcombine.high %v2116_v28, %v2120_v33 }
 0x41a   : > { %8814 = vmatpush1.bf16.msra.mxu0 %v10863_v9  ;;  %v10903_v9 = vcombine.low %v2115_v22, %v2119_v35  ;;  %v2156_v22 = vld [vmem:[%s12849_s8 + $0x518] sm:$0xff] }
 0x41b   : > { %9142 = vmatpush1.bf16.msra.mxu1 %v10865_v63  ;;  %8815 = vmatprep.subr.bf16.mxu0 %v10872_v40  ;;  %v10905_v63 = vcombine.low %v2116_v28, %v2120_v33  ;;  %v10912_v40 = vcombine.high %v2123_v0, %v2127_v3  ;;  %v2160_v35 = vld [vmem:[%s12849_s8 + $0x538] sm:$0xff]  ;;  %v10935_v28 = vcombine.low %v2147_v14, %v2151_v1 }
 0x41c   : > { %9143 = vmatprep.subr.bf16.mxu1 %v10874_v61  ;;  %v10914_v61 = vcombine.high %v2124_v7, %v2128_v45  ;;  %v2164_v0 = vld [vmem:[%s12849_s8 + $0x558] sm:$0xff] }
 0x41d   : > { %v2168_v3 = vld [vmem:[%s12849_s8 + $0x578] sm:$0xff] }
 0x41e   : > { %8816 = vmatpush1.bf16.msra.mxu0 %v10871_v10  ;;  %v2136_v10 = vld [vmem:[%s12849_s8 + $0x478] sm:$0xff] }
 0x41f   : > { %9144 = vmatpush1.bf16.msra.mxu1 %v10873_v59  ;;  %8817 = vmatprep.subr.bf16.mxu0 %v10880_v49  ;;  %v10913_v59 = vcombine.low %v2124_v7, %v2128_v45  ;;  %v10920_v49 = vcombine.high %v2131_v34, %v2135_v19  ;;  %v10922_v27 = vcombine.high %v2132_v13, %v2136_v10 }
 0x420   : > { %9145 = vmatprep.subr.bf16.mxu1 %v10882_v55  ;;  %v2139_v55 = vld [vmem:[%s12849_s8 + $0x490] sm:$0xff]  ;;  %v10945_v45 = vcombine.low %v2156_v22, %v2160_v35 }
 0x421   : > { %v10927_v16 = vcombine.low %v2139_v55, %v2143_v54 }
 0x422   : > { %8818 = vmatpush1.bf16.msra.mxu0 %v10879_v38  ;;  %v10919_v38 = vcombine.low %v2131_v34, %v2135_v19  ;;  %v2172_v34 = vld [vmem:[%s12849_s8 + $0x598] sm:$0xff] }
 0x423   : > { %9146 = vmatpush1.bf16.msra.mxu1 %v10881_v51  ;;  %8819 = vmatprep.subr.bf16.mxu0 %v10888_v4  ;;  %v10921_v51 = vcombine.low %v2132_v13, %v2136_v10  ;;  %v10928_v4 = vcombine.high %v2139_v55, %v2143_v54  ;;  %v2176_v19 = vld [vmem:[%s12849_s8 + $0x5b8] sm:$0xff]  ;;  %v10953_v13 = vcombine.low %v2164_v0, %v2168_v3  ;;  %v2183_v55 = vld [vmem:[%s12849_s8 + $0x5f0] sm:$0xff] }
 0x424   : > { %9147 = vmatprep.subr.bf16.mxu1 %v10890_v23  ;;  %v10930_v23 = vcombine.high %v2140_v8, %v2144_v48  ;;  %v2180_v54 = vld [vmem:[%s12849_s8 + $0x5d8] sm:$0xff] }
 0x426   : > { %8820 = vmatpush1.bf16.msra.mxu0 %v10887_v57  ;;  %v10929_v57 = vcombine.low %v2140_v8, %v2144_v48  ;;  %v10961_v48 = vcombine.low %v2172_v34, %v2176_v19 }
 0x427   : > { %9148 = vmatpush1.bf16.msra.mxu1 %v10889_v43  ;;  %8821 = vmatprep.subr.bf16.mxu0 %v10896_v37  ;;  %v10936_v43 = vcombine.high %v2147_v14, %v2151_v1  ;;  %v2155_v37 = vld [vmem:[%s12849_s8 + $0x510] sm:$0xff]  ;;  %v2188_v14 = vld [vmem:[%s12849_s8 + $0x618] sm:$0xff] }
 0x428   : > { %9149 = vmatprep.subr.bf16.mxu1 %v10898_v32  ;;  %v2159_v32 = vld [vmem:[%s12849_s8 + $0x530] sm:$0xff]  ;;  %v2192_v1 = vld [vmem:[%s12849_s8 + $0x638] sm:$0xff] }
 0x429   : > { %v10943_v7 = vcombine.low %v2155_v37, %v2159_v32 }
 0x42a   : > { %8822 = vmatpush1.bf16.msra.mxu0 %v10895_v50  ;;  %v10944_v50 = vcombine.high %v2155_v37, %v2159_v32  ;;  %v2196_v37 = vld [vmem:[%s12849_s8 + $0x658] sm:$0xff] }
 0x42b   : > { %9150 = vmatpush1.bf16.msra.mxu1 %v10897_v56  ;;  %8823 = vmatprep.subr.bf16.mxu0 %v10904_v42  ;;  %v10946_v56 = vcombine.high %v2156_v22, %v2160_v35  ;;  %v2163_v42 = vld [vmem:[%s12849_s8 + $0x550] sm:$0xff]  ;;  %v2200_v32 = vld [vmem:[%s12849_s8 + $0x678] sm:$0xff]  ;;  %v10977_v35 = vcombine.low %v2188_v14, %v2192_v1 }
 0x42c   : > { %9151 = vmatprep.subr.bf16.mxu1 %v10906_v60  ;;  %v2167_v60 = vld [vmem:[%s12849_s8 + $0x570] sm:$0xff] }
 0x42e   : > { %8824 = vmatpush1.bf16.msra.mxu0 %v10903_v9  ;;  %v10952_v9 = vcombine.high %v2163_v42, %v2167_v60 }
 0x42f   : > { %9152 = vmatpush1.bf16.msra.mxu1 %v10905_v63  ;;  %8834 = vmatprep.subr.bf16.mxu0 %v10912_v40  ;;  %v10954_v63 = vcombine.high %v2164_v0, %v2168_v3  ;;  %v2171_v40 = vld [vmem:[%s12849_s8 + $0x590] sm:$0xff]  ;;  %v10985_v3 = vcombine.low %v2196_v37, %v2200_v32 }
 0x430   : > { %9162 = vmatprep.subr.bf16.mxu1 %v10914_v61  ;;  %v2175_v61 = vld [vmem:[%s12849_s8 + $0x5b0] sm:$0xff] }
 0x431   : > { %8826 = vmatmul.mubr.bf16.vlgmr.msra.gmra.mrb[20].mxu0 %v13196_v53  ;;  %v10960_v10 = vcombine.high %v2171_v40, %v2175_v61  ;;  %v10959_v8 = vcombine.low %v2171_v40, %v2175_v61  ;;  %v2212_v40 = vld [vmem:[%s12849_s8 + $0x6d8] sm:$0xff] }
 0x432   : > { %9154 = vmatmul.mubr.bf16.vlgmr.msra.gmra.mrb[20].mxu1 %v13196_v53  ;;  %8835 = vmatpush1.bf16.msra.mxu0 %v10911_v26  ;;  %v2152_v53 = vld [vmem:[%s12849_s8 + $0x4f8] sm:$0xff]  ;;  %v10951_v26 = vcombine.low %v2163_v42, %v2167_v60 }
 0x433   : > { %8866 = vmatprep.mubr.bf16.mxu0 %v13214_v18  ;;  %9163 = vmatpush1.bf16.msra.mxu1 %v10913_v59  ;;  %v10937_v33 = vcombine.low %v2148_v46, %v2152_v53  ;;  %v10962_v59 = vcombine.high %v2172_v34, %v2176_v19  ;;  %v2204_v42 = vld [vmem:[%s12849_s8 + $0x698] sm:$0xff] }
 0x434   : > { %9194 = vmatprep.mubr.bf16.mxu1 %v13214_v18  ;;  %8836 = vmatprep.subr.bf16.mxu0 %v10920_v49  ;;  %v10938_v18 = vcombine.high %v2148_v46, %v2152_v53  ;;  %v2179_v49 = vld [vmem:[%s12849_s8 + $0x5d0] sm:$0xff]  ;;  %v2208_v60 = vld [vmem:[%s12849_s8 + $0x6b8] sm:$0xff] }
 0x435   : > { %9164 = vmatprep.subr.bf16.mxu1 %v10922_v27  ;;  %v2184_v27 = vld [vmem:[%s12849_s8 + $0x5f8] sm:$0xff]  ;;  %v10967_v46 = vcombine.low %v2179_v49, %v2183_v55  ;;  %v10993_v19 = vcombine.low %v2204_v42, %v2208_v60 }
 0x436   : > { %8837 = vmatpush1.bf16.msra.mxu0 %v10919_v38  ;;  %v10968_v38 = vcombine.high %v2179_v49, %v2183_v55  ;;  %v10969_v53 = vcombine.low %v2180_v54, %v2184_v27  ;;  %v2216_v61 = vld [vmem:[%s12849_s8 + $0x6f8] sm:$0xff] }
 0x437   : > { %9165 = vmatpush1.bf16.msra.mxu1 %v10921_v51  ;;  %8838 = vmatprep.subr.bf16.mxu0 %v10928_v4  ;;  %v10970_v51 = vcombine.high %v2180_v54, %v2184_v27  ;;  %v2187_v4 = vld [vmem:[%s12849_s8 + $0x610] sm:$0xff]  ;;  %v2220_v49 = vld [vmem:[%s12849_s8 + $0x718] sm:$0xff]  ;;  %v11001_v27 = vcombine.low %v2212_v40, %v2216_v61 }
 0x438   : > { %9166 = vmatprep.subr.bf16.mxu1 %v10930_v23  ;;  %v2191_v23 = vld [vmem:[%s12849_s8 + $0x630] sm:$0xff]  ;;  %v2224_v55 = vld [vmem:[%s12849_s8 + $0x738] sm:$0xff] }
 0x439   : > { %v10975_v22 = vcombine.low %v2187_v4, %v2191_v23 }
 0x43a   : > { %8839 = vmatpush1.bf16.msra.mxu0 %v10927_v16  ;;  %v10976_v16 = vcombine.high %v2187_v4, %v2191_v23  ;;  %v2228_v4 = vld [vmem:[%s12849_s8 + $0x758] sm:$0xff] }
 0x43b   : > { %9167 = vmatpush1.bf16.msra.mxu1 %v10929_v57  ;;  %8840 = vmatprep.subr.bf16.mxu0 %v10936_v43  ;;  %v10978_v57 = vcombine.high %v2188_v14, %v2192_v1  ;;  %v2195_v43 = vld [vmem:[%s12849_s8 + $0x650] sm:$0xff]  ;;  %v2232_v23 = vld [vmem:[%s12849_s8 + $0x778] sm:$0xff]  ;;  %v11009_v1 = vcombine.low %v2220_v49, %v2224_v55 }
 0x43c   : > { %9168 = vmatprep.subr.bf16.mxu1 %v10938_v18  ;;  %v2199_v18 = vld [vmem:[%s12849_s8 + $0x670] sm:$0xff] }
 0x43d   : > { %v10983_v0 = vcombine.low %v2195_v43, %v2199_v18 }
 0x43e   : > { %8841 = vmatpush1.bf16.msra.mxu0 %v10935_v28  ;;  %v10984_v28 = vcombine.high %v2195_v43, %v2199_v18  ;;  %v2236_v43 = vld [vmem:[%s12849_s8 + $0x798] sm:$0xff] }
 0x43f   : > { %9169 = vmatpush1.bf16.msra.mxu1 %v10937_v33  ;;  %8842 = vmatprep.subr.bf16.mxu0 %v10944_v50  ;;  %v10986_v33 = vcombine.high %v2196_v37, %v2200_v32  ;;  %v2203_v50 = vld [vmem:[%s12849_s8 + $0x690] sm:$0xff]  ;;  %v2240_v18 = vld [vmem:[%s12849_s8 + $0x7b8] sm:$0xff]  ;;  %v11017_v32 = vcombine.low %v2228_v4, %v2232_v23 }
 0x440   : > { %9170 = vmatprep.subr.bf16.mxu1 %v10946_v56  ;;  %v2207_v56 = vld [vmem:[%s12849_s8 + $0x6b0] sm:$0xff] }
 0x441   : > { %v10991_v34 = vcombine.low %v2203_v50, %v2207_v56 }
 0x442   : > { %8843 = vmatpush1.bf16.msra.mxu0 %v10943_v7  ;;  %v10992_v7 = vcombine.high %v2203_v50, %v2207_v56  ;;  %v2244_v50 = vld [vmem:[%s12849_s8 + $0x7d8] sm:$0xff] }
 0x443   : > { %9171 = vmatpush1.bf16.msra.mxu1 %v10945_v45  ;;  %8844 = vmatprep.subr.bf16.mxu0 %v10952_v9  ;;  %v10994_v45 = vcombine.high %v2204_v42, %v2208_v60  ;;  %v2211_v9 = vld [vmem:[%s12849_s8 + $0x6d0] sm:$0xff]  ;;  %v2248_v56 = vld [vmem:[%s12849_s8 + $0x7f8] sm:$0xff]  ;;  %v11025_v60 = vcombine.low %v2236_v43, %v2240_v18 }
 0x444   : > { %9172 = vmatprep.subr.bf16.mxu1 %v10954_v63  ;;  %v2215_v63 = vld [vmem:[%s12849_s8 + $0x6f0] sm:$0xff] }
 0x445   : > { %v10999_v54 = vcombine.low %v2211_v9, %v2215_v63 }
 0x446   : > { %8845 = vmatpush1.bf16.msra.mxu0 %v10951_v26  ;;  %v11000_v26 = vcombine.high %v2211_v9, %v2215_v63  ;;  %v2252_v9 = vld [vmem:[%s12849_s8 + $0x818] sm:$0xff] }
 0x447   : > { %9173 = vmatpush1.bf16.msra.mxu1 %v10953_v13  ;;  %8846 = vmatprep.subr.bf16.mxu0 %v10960_v10  ;;  %v11002_v13 = vcombine.high %v2212_v40, %v2216_v61  ;;  %v2219_v10 = vld [vmem:[%s12849_s8 + $0x710] sm:$0xff]  ;;  %v2256_v63 = vld [vmem:[%s12849_s8 + $0x838] sm:$0xff]  ;;  %v11033_v61 = vcombine.low %v2244_v50, %v2248_v56 }
 0x448   : > { %9174 = vmatprep.subr.bf16.mxu1 %v10962_v59  ;;  %v2223_v59 = vld [vmem:[%s12849_s8 + $0x730] sm:$0xff] }
 0x449   : > { %v11007_v14 = vcombine.low %v2219_v10, %v2223_v59 }
 0x44a   : > { %8847 = vmatpush1.bf16.msra.mxu0 %v10959_v8  ;;  %v11008_v8 = vcombine.high %v2219_v10, %v2223_v59  ;;  %v2260_v59 = vld [vmem:[%s12849_s8 + $0x858] sm:$0xff] }
 0x44b   : > { %9175 = vmatpush1.bf16.msra.mxu1 %v10961_v48  ;;  %8848 = vmatprep.subr.bf16.mxu0 %v10968_v38  ;;  %v11010_v48 = vcombine.high %v2220_v49, %v2224_v55  ;;  %v2227_v38 = vld [vmem:[%s12849_s8 + $0x750] sm:$0xff]  ;;  %v2264_v49 = vld [vmem:[%s12849_s8 + $0x878] sm:$0xff]  ;;  %v11041_v55 = vcombine.low %v2252_v9, %v2256_v63 }
 0x44c   : > { %9176 = vmatprep.subr.bf16.mxu1 %v10970_v51  ;;  %v2231_v51 = vld [vmem:[%s12849_s8 + $0x770] sm:$0xff] }
 0x44d   : > { %v11015_v37 = vcombine.low %v2227_v38, %v2231_v51 }
 0x44e   : > { %8849 = vmatpush1.bf16.msra.mxu0 %v10967_v46  ;;  %v11016_v46 = vcombine.high %v2227_v38, %v2231_v51  ;;  %v2268_v38 = vld [vmem:[%s12849_s8 + $0x898] sm:$0xff] }
 0x44f   : > { %9177 = vmatpush1.bf16.msra.mxu1 %v10969_v53  ;;  %8850 = vmatprep.subr.bf16.mxu0 %v10976_v16  ;;  %v11018_v53 = vcombine.high %v2228_v4, %v2232_v23  ;;  %v2235_v16 = vld [vmem:[%s12849_s8 + $0x790] sm:$0xff]  ;;  %v2272_v51 = vld [vmem:[%s12849_s8 + $0x8b8] sm:$0xff]  ;;  %v11049_v23 = vcombine.low %v2260_v59, %v2264_v49 }
 0x450   : > { %9178 = vmatprep.subr.bf16.mxu1 %v10978_v57  ;;  %v2239_v57 = vld [vmem:[%s12849_s8 + $0x7b0] sm:$0xff] }
 0x451   : > { %v11023_v42 = vcombine.low %v2235_v16, %v2239_v57 }
 0x452   : > { %8851 = vmatpush1.bf16.msra.mxu0 %v10975_v22  ;;  %v11024_v22 = vcombine.high %v2235_v16, %v2239_v57  ;;  %v2276_v16 = vld [vmem:[%s12849_s8 + $0x8d8] sm:$0xff] }
 0x453   : > { %9179 = vmatpush1.bf16.msra.mxu1 %v10977_v35  ;;  %8852 = vmatprep.subr.bf16.mxu0 %v10984_v28  ;;  %v11026_v35 = vcombine.high %v2236_v43, %v2240_v18  ;;  %v2243_v28 = vld [vmem:[%s12849_s8 + $0x7d0] sm:$0xff]  ;;  %v11057_v43 = vcombine.low %v2268_v38, %v2272_v51 }
 0x454   : > { %9180 = vmatprep.subr.bf16.mxu1 %v10986_v33  ;;  %v2247_v33 = vld [vmem:[%s12849_s8 + $0x7f0] sm:$0xff] }
 0x455   : > { %v11031_v40 = vcombine.low %v2243_v28, %v2247_v33 }
 0x456   : > { %8853 = vmatpush1.bf16.msra.mxu0 %v10983_v0  ;;  %v11032_v0 = vcombine.high %v2243_v28, %v2247_v33 }
 0x457   : > { %9181 = vmatpush1.bf16.msra.mxu1 %v10985_v3  ;;  %8854 = vmatprep.subr.bf16.mxu0 %v10992_v7  ;;  %v11034_v3 = vcombine.high %v2244_v50, %v2248_v56  ;;  %v2251_v7 = vld [vmem:[%s12849_s8 + $0x810] sm:$0xff] }
 0x458   : > { %9182 = vmatprep.subr.bf16.mxu1 %v10994_v45  ;;  %v2255_v45 = vld [vmem:[%s12849_s8 + $0x830] sm:$0xff] }
 0x459   : > { %v11039_v10 = vcombine.low %v2251_v7, %v2255_v45 }
 0x45a   : > { %8855 = vmatpush1.bf16.msra.mxu0 %v10991_v34  ;;  %v11040_v34 = vcombine.high %v2251_v7, %v2255_v45 }
 0x45b   : > { %9183 = vmatpush1.bf16.msra.mxu1 %v10993_v19  ;;  %8856 = vmatprep.subr.bf16.mxu0 %v11000_v26  ;;  %v11042_v19 = vcombine.high %v2252_v9, %v2256_v63  ;;  %v2259_v26 = vld [vmem:[%s12849_s8 + $0x850] sm:$0xff] }
 0x45c   : > { %9184 = vmatprep.subr.bf16.mxu1 %v11002_v13  ;;  %v2263_v13 = vld [vmem:[%s12849_s8 + $0x870] sm:$0xff] }
 0x45d   : > { %v11047_v4 = vcombine.low %v2259_v26, %v2263_v13 }
 0x45e   : > { %8857 = vmatpush1.bf16.msra.mxu0 %v10999_v54  ;;  %v11048_v54 = vcombine.high %v2259_v26, %v2263_v13 }
 0x45f   : > { %9185 = vmatpush1.bf16.msra.mxu1 %v11001_v27  ;;  %8858 = vmatprep.subr.bf16.mxu0 %v11008_v8  ;;  %v2267_v27 = vld [vmem:[%s12849_s8 + $0x890] sm:$0xff] }
 0x460   : > { %9186 = vmatprep.subr.bf16.mxu1 %v11010_v48  ;;  %v2271_v8 = vld [vmem:[%s12849_s8 + $0x8b0] sm:$0xff]  ;;  %v11050_v48 = vcombine.high %v2260_v59, %v2264_v49 }
 0x461   : > { %v11055_v57 = vcombine.low %v2267_v27, %v2271_v8  ;;  %v2307_v49 = vld [vmem:[%s12849_s8 + $0x9d0] sm:$0xff] }
 0x462   : > { %8859 = vmatpush1.bf16.msra.mxu0 %v11007_v14  ;;  %v11056_v14 = vcombine.high %v2267_v27, %v2271_v8  ;;  %v2312_v27 = vld [vmem:[%s12849_s8 + $0x9f8] sm:$0xff] }
 0x463   : > { %9187 = vmatpush1.bf16.msra.mxu1 %v11009_v1  ;;  %8860 = vmatprep.subr.bf16.mxu0 %v11016_v46  ;;  %v11058_v1 = vcombine.high %v2268_v38, %v2272_v51  ;;  %v2275_v46 = vld [vmem:[%s12849_s8 + $0x8d0] sm:$0xff] }
 0x464   : > { %9188 = vmatprep.subr.bf16.mxu1 %v11018_v53  ;;  %v2279_v53 = vld [vmem:[%s12849_s8 + $0x8f0] sm:$0xff] }
 0x465   : > { %v11064_v18 = vcombine.high %v2275_v46, %v2279_v53  ;;  %v11063_v28 = vcombine.low %v2275_v46, %v2279_v53 }
 0x466   : > { %8861 = vmatpush1.bf16.msra.mxu0 %v11015_v37  ;;  %v2283_v37 = vld [vmem:[%s12849_s8 + $0x910] sm:$0xff] }
 0x467   : > { %9189 = vmatpush1.bf16.msra.mxu1 %v11017_v32  ;;  %8862 = vmatprep.subr.bf16.mxu0 %v11024_v22  ;;  %v2287_v32 = vld [vmem:[%s12849_s8 + $0x930] sm:$0xff]  ;;  %v2284_v22 = vld [vmem:[%s12849_s8 + $0x918] sm:$0xff] }
 0x468   : > { %9190 = vmatprep.subr.bf16.mxu1 %v11026_v35  ;;  %v2288_v35 = vld [vmem:[%s12849_s8 + $0x938] sm:$0xff]  ;;  %v11072_v50 = vcombine.high %v2283_v37, %v2287_v32  ;;  %v11071_v7 = vcombine.low %v2283_v37, %v2287_v32 }
 0x469   : > { %v11074_v56 = vcombine.high %v2284_v22, %v2288_v35  ;;  %v11073_v45 = vcombine.low %v2284_v22, %v2288_v35 }
 0x46a   : > { %8863 = vmatpush1.bf16.msra.mxu0 %v11023_v42  ;;  %v2291_v42 = vld [vmem:[%s12849_s8 + $0x950] sm:$0xff] }
 0x46b   : > { %9191 = vmatpush1.bf16.msra.mxu1 %v11025_v60  ;;  %8864 = vmatprep.subr.bf16.mxu0 %v11032_v0  ;;  %v2295_v60 = vld [vmem:[%s12849_s8 + $0x970] sm:$0xff]  ;;  %v2292_v0 = vld [vmem:[%s12849_s8 + $0x958] sm:$0xff] }
 0x46c   : > { %9192 = vmatprep.subr.bf16.mxu1 %v11034_v3  ;;  %v2296_v3 = vld [vmem:[%s12849_s8 + $0x978] sm:$0xff]  ;;  %v11080_v9 = vcombine.high %v2291_v42, %v2295_v60  ;;  %v11079_v26 = vcombine.low %v2291_v42, %v2295_v60 }
 0x46d   : > { %v11082_v63 = vcombine.high %v2292_v0, %v2296_v3  ;;  %v11081_v13 = vcombine.low %v2292_v0, %v2296_v3 }
 0x46e   : > { %8865 = vmatpush1.bf16.msra.mxu0 %v11031_v40  ;;  %v2299_v40 = vld [vmem:[%s12849_s8 + $0x990] sm:$0xff] }
 0x46f   : > { %9193 = vmatpush1.bf16.msra.mxu1 %v11033_v61  ;;  %8875 = vmatprep.subr.bf16.mxu0 %v11040_v34  ;;  %v2303_v61 = vld [vmem:[%s12849_s8 + $0x9b0] sm:$0xff]  ;;  %v2300_v34 = vld [vmem:[%s12849_s8 + $0x998] sm:$0xff] }
 0x470   : > { %9203 = vmatprep.subr.bf16.mxu1 %v11042_v19  ;;  %v2304_v19 = vld [vmem:[%s12849_s8 + $0x9b8] sm:$0xff]  ;;  %v11087_v8 = vcombine.low %v2299_v40, %v2303_v61 }
 0x471   : > { %8867 = vmatmul.mubr.bf16.vlgmr.msra.gmra.mrb[20].mxu0 %v13401_v52  ;;  %v11090_v59 = vcombine.high %v2300_v34, %v2304_v19 }
 0x472   : > { %9195 = vmatmul.mubr.bf16.vlgmr.msra.gmra.mrb[20].mxu1 %v13401_v52  ;;  %8876 = vmatpush1.bf16.msra.mxu0 %v11039_v10  ;;  %v2280_v52 = vld [vmem:[%s12849_s8 + $0x8f8] sm:$0xff]  ;;  %v11088_v10 = vcombine.high %v2299_v40, %v2303_v61 }
 0x473   : > { %8907 = vmatprep.mubr.bf16.mxu0 %v13403_v21  ;;  %9204 = vmatpush1.bf16.msra.mxu1 %v11041_v55  ;;  %v11065_v33 = vcombine.low %v2276_v16, %v2280_v52  ;;  %v2311_v55 = vld [vmem:[%s12849_s8 + $0x9f0] sm:$0xff] }
 0x474   : > { %9235 = vmatprep.mubr.bf16.mxu1 %v13403_v21  ;;  %8877 = vmatprep.subr.bf16.mxu0 %v11048_v54  ;;  %v11066_v21 = vcombine.high %v2276_v16, %v2280_v52  ;;  %v2308_v54 = vld [vmem:[%s12849_s8 + $0x9d8] sm:$0xff]  ;;  %v11096_v38 = vcombine.high %v2307_v49, %v2311_v55  ;;  %v11095_v46 = vcombine.low %v2307_v49, %v2311_v55 }
 0x475   : > { %9205 = vmatprep.subr.bf16.mxu1 %v11050_v48  ;;  %v11089_v48 = vcombine.low %v2300_v34, %v2304_v19  ;;  %v11098_v51 = vcombine.high %v2308_v54, %v2312_v27  ;;  %v11097_v53 = vcombine.low %v2308_v54, %v2312_v27 }
 0x476   : > { %8878 = vmatpush1.bf16.msra.mxu0 %v11047_v4  ;;  %v2315_v4 = vld [vmem:[%s12849_s8 + $0xa10] sm:$0xff] }
 0x477   : > { %9206 = vmatpush1.bf16.msra.mxu1 %v11049_v23  ;;  %8879 = vmatprep.subr.bf16.mxu0 %v11056_v14  ;;  %v2319_v23 = vld [vmem:[%s12849_s8 + $0xa30] sm:$0xff]  ;;  %v2316_v14 = vld [vmem:[%s12849_s8 + $0xa18] sm:$0xff] }
 0x478   : > { %9207 = vmatprep.subr.bf16.mxu1 %v11058_v1  ;;  %v2320_v1 = vld [vmem:[%s12849_s8 + $0xa38] sm:$0xff]  ;;  %v11104_v16 = vcombine.high %v2315_v4, %v2319_v23  ;;  %v11103_v37 = vcombine.low %v2315_v4, %v2319_v23 }
 0x479   : > { %v11106_v52 = vcombine.high %v2316_v14, %v2320_v1  ;;  %v11105_v32 = vcombine.low %v2316_v14, %v2320_v1 }
 0x47a   : > { %8880 = vmatpush1.bf16.msra.mxu0 %v11055_v57  ;;  %v2323_v57 = vld [vmem:[%s12849_s8 + $0xa50] sm:$0xff] }
 0x47b   : > { %9208 = vmatpush1.bf16.msra.mxu1 %v11057_v43  ;;  %8881 = vmatprep.subr.bf16.mxu0 %v11064_v18  ;;  %v2327_v43 = vld [vmem:[%s12849_s8 + $0xa70] sm:$0xff]  ;;  %v2324_v18 = vld [vmem:[%s12849_s8 + $0xa58] sm:$0xff] }
 0x47c   : > { %9209 = vmatprep.subr.bf16.mxu1 %v11066_v21  ;;  %v2328_v21 = vld [vmem:[%s12849_s8 + $0xa78] sm:$0xff]  ;;  %v11112_v22 = vcombine.high %v2323_v57, %v2327_v43  ;;  %v11111_v42 = vcombine.low %v2323_v57, %v2327_v43 }
 0x47d   : > { %v11114_v35 = vcombine.high %v2324_v18, %v2328_v21  ;;  %v11113_v60 = vcombine.low %v2324_v18, %v2328_v21 }
 0x47e   : > { %8882 = vmatpush1.bf16.msra.mxu0 %v11063_v28  ;;  %v2331_v28 = vld [vmem:[%s12849_s8 + $0xa90] sm:$0xff] }
 0x47f   : > { %9210 = vmatpush1.bf16.msra.mxu1 %v11065_v33  ;;  %8883 = vmatprep.subr.bf16.mxu0 %v11072_v50  ;;  %v2335_v33 = vld [vmem:[%s12849_s8 + $0xab0] sm:$0xff]  ;;  %v2332_v50 = vld [vmem:[%s12849_s8 + $0xa98] sm:$0xff] }
 0x480   : > { %9211 = vmatprep.subr.bf16.mxu1 %v11074_v56  ;;  %v2336_v56 = vld [vmem:[%s12849_s8 + $0xab8] sm:$0xff]  ;;  %v11120_v0 = vcombine.high %v2331_v28, %v2335_v33  ;;  %v11119_v40 = vcombine.low %v2331_v28, %v2335_v33 }
 0x481   : > { %v11122_v3 = vcombine.high %v2332_v50, %v2336_v56  ;;  %v11121_v61 = vcombine.low %v2332_v50, %v2336_v56 }
 0x482   : > { %8884 = vmatpush1.bf16.msra.mxu0 %v11071_v7  ;;  %v2339_v7 = vld [vmem:[%s12849_s8 + $0xad0] sm:$0xff] }
 0x483   : > { %9212 = vmatpush1.bf16.msra.mxu1 %v11073_v45  ;;  %8885 = vmatprep.subr.bf16.mxu0 %v11080_v9  ;;  %v2343_v45 = vld [vmem:[%s12849_s8 + $0xaf0] sm:$0xff]  ;;  %v2340_v9 = vld [vmem:[%s12849_s8 + $0xad8] sm:$0xff] }
 0x484   : > { %9213 = vmatprep.subr.bf16.mxu1 %v11082_v63  ;;  %v2344_v63 = vld [vmem:[%s12849_s8 + $0xaf8] sm:$0xff]  ;;  %v11128_v34 = vcombine.high %v2339_v7, %v2343_v45  ;;  %v11127_v49 = vcombine.low %v2339_v7, %v2343_v45 }
 0x485   : > { %v11130_v19 = vcombine.high %v2340_v9, %v2344_v63  ;;  %v11129_v55 = vcombine.low %v2340_v9, %v2344_v63 }
 0x486   : > { %8886 = vmatpush1.bf16.msra.mxu0 %v11079_v26  ;;  %v2347_v26 = vld [vmem:[%s12849_s8 + $0xb10] sm:$0xff] }
 0x487   : > { %9214 = vmatpush1.bf16.msra.mxu1 %v11081_v13  ;;  %8887 = vmatprep.subr.bf16.mxu0 %v11088_v10  ;;  %v2351_v13 = vld [vmem:[%s12849_s8 + $0xb30] sm:$0xff]  ;;  %v2348_v10 = vld [vmem:[%s12849_s8 + $0xb18] sm:$0xff] }
 0x488   : > { %9215 = vmatprep.subr.bf16.mxu1 %v11090_v59  ;;  %v2352_v59 = vld [vmem:[%s12849_s8 + $0xb38] sm:$0xff]  ;;  %v11136_v54 = vcombine.high %v2347_v26, %v2351_v13  ;;  %v11135_v4 = vcombine.low %v2347_v26, %v2351_v13 }
 0x489   : > { %v11138_v27 = vcombine.high %v2348_v10, %v2352_v59  ;;  %v11137_v23 = vcombine.low %v2348_v10, %v2352_v59  ;;  %v2392_v26 = vld [vmem:[%s12849_s8 + $0xc78] sm:$0xff]  ;;  %v2395_v59 = vld [vmem:[%s12849_s8 + $0xc90] sm:$0xff] }
 0x48a   : > { %8888 = vmatpush1.bf16.msra.mxu0 %v11087_v8  ;;  %v2355_v8 = vld [vmem:[%s12849_s8 + $0xb50] sm:$0xff] }
 0x48b   : > { %9216 = vmatpush1.bf16.msra.mxu1 %v11089_v48  ;;  %8889 = vmatprep.subr.bf16.mxu0 %v11096_v38  ;;  %v2359_v48 = vld [vmem:[%s12849_s8 + $0xb70] sm:$0xff]  ;;  %v2356_v38 = vld [vmem:[%s12849_s8 + $0xb58] sm:$0xff] }
 0x48c   : > { %9217 = vmatprep.subr.bf16.mxu1 %v11098_v51  ;;  %v2360_v51 = vld [vmem:[%s12849_s8 + $0xb78] sm:$0xff]  ;;  %v11144_v14 = vcombine.high %v2355_v8, %v2359_v48  ;;  %v11143_v57 = vcombine.low %v2355_v8, %v2359_v48 }
 0x48d   : > { %v11146_v1 = vcombine.high %v2356_v38, %v2360_v51  ;;  %v11145_v43 = vcombine.low %v2356_v38, %v2360_v51 }
 0x48e   : > { %8890 = vmatpush1.bf16.msra.mxu0 %v11095_v46  ;;  %v2363_v46 = vld [vmem:[%s12849_s8 + $0xb90] sm:$0xff] }
 0x48f   : > { %9218 = vmatpush1.bf16.msra.mxu1 %v11097_v53  ;;  %8891 = vmatprep.subr.bf16.mxu0 %v11104_v16  ;;  %v2367_v53 = vld [vmem:[%s12849_s8 + $0xbb0] sm:$0xff]  ;;  %v2364_v16 = vld [vmem:[%s12849_s8 + $0xb98] sm:$0xff] }
 0x490   : > { %9219 = vmatprep.subr.bf16.mxu1 %v11106_v52  ;;  %v2368_v52 = vld [vmem:[%s12849_s8 + $0xbb8] sm:$0xff]  ;;  %v11152_v18 = vcombine.high %v2363_v46, %v2367_v53  ;;  %v11151_v28 = vcombine.low %v2363_v46, %v2367_v53 }
 0x491   : > { %v11154_v21 = vcombine.high %v2364_v16, %v2368_v52  ;;  %v11153_v33 = vcombine.low %v2364_v16, %v2368_v52  ;;  %v2411_v16 = vld [vmem:[%s12849_s8 + $0xd10] sm:$0xff] }
 0x492   : > { %8892 = vmatpush1.bf16.msra.mxu0 %v11103_v37  ;;  %v2371_v37 = vld [vmem:[%s12849_s8 + $0xbd0] sm:$0xff] }
 0x493   : > { %9220 = vmatpush1.bf16.msra.mxu1 %v11105_v32  ;;  %8893 = vmatprep.subr.bf16.mxu0 %v11112_v22  ;;  %v2375_v32 = vld [vmem:[%s12849_s8 + $0xbf0] sm:$0xff]  ;;  %v2372_v22 = vld [vmem:[%s12849_s8 + $0xbd8] sm:$0xff] }
 0x494   : > { %9221 = vmatprep.subr.bf16.mxu1 %v11114_v35  ;;  %v2376_v35 = vld [vmem:[%s12849_s8 + $0xbf8] sm:$0xff]  ;;  %v11160_v50 = vcombine.high %v2371_v37, %v2375_v32  ;;  %v11159_v7 = vcombine.low %v2371_v37, %v2375_v32  ;;  %v2415_v52 = vld [vmem:[%s12849_s8 + $0xd30] sm:$0xff] }
 0x495   : > { %v11162_v56 = vcombine.high %v2372_v22, %v2376_v35  ;;  %v11161_v45 = vcombine.low %v2372_v22, %v2376_v35  ;;  %v11200_v37 = vcombine.high %v2411_v16, %v2415_v52  ;;  %v2419_v22 = vld [vmem:[%s12849_s8 + $0xd50] sm:$0xff] }
 0x496   : > { %8894 = vmatpush1.bf16.msra.mxu0 %v11111_v42  ;;  %v2379_v42 = vld [vmem:[%s12849_s8 + $0xc10] sm:$0xff] }
 0x497   : > { %9222 = vmatpush1.bf16.msra.mxu1 %v11113_v60  ;;  %8895 = vmatprep.subr.bf16.mxu0 %v11120_v0  ;;  %v2383_v60 = vld [vmem:[%s12849_s8 + $0xc30] sm:$0xff]  ;;  %v2380_v0 = vld [vmem:[%s12849_s8 + $0xc18] sm:$0xff] }
 0x498   : > { %9223 = vmatprep.subr.bf16.mxu1 %v11122_v3  ;;  %v2384_v3 = vld [vmem:[%s12849_s8 + $0xc38] sm:$0xff]  ;;  %v11168_v9 = vcombine.high %v2379_v42, %v2383_v60  ;;  %v2423_v35 = vld [vmem:[%s12849_s8 + $0xd70] sm:$0xff] }
 0x499   : > { %v11170_v63 = vcombine.high %v2380_v0, %v2384_v3  ;;  %v11169_v13 = vcombine.low %v2380_v0, %v2384_v3  ;;  %v2427_v0 = vld [vmem:[%s12849_s8 + $0xd90] sm:$0xff] }
 0x49a   : > { %8896 = vmatpush1.bf16.msra.mxu0 %v11119_v40  ;;  %v2387_v40 = vld [vmem:[%s12849_s8 + $0xc50] sm:$0xff] }
 0x49b   : > { %9224 = vmatpush1.bf16.msra.mxu1 %v11121_v61  ;;  %8897 = vmatprep.subr.bf16.mxu0 %v11128_v34  ;;  %v2391_v61 = vld [vmem:[%s12849_s8 + $0xc70] sm:$0xff]  ;;  %v11167_v34 = vcombine.low %v2379_v42, %v2383_v60  ;;  %v11208_v42 = vcombine.high %v2419_v22, %v2423_v35 }
 0x49c   : > { %9225 = vmatprep.subr.bf16.mxu1 %v11130_v19  ;;  %v2388_v19 = vld [vmem:[%s12849_s8 + $0xc58] sm:$0xff]  ;;  %v11176_v10 = vcombine.high %v2387_v40, %v2391_v61  ;;  %v11175_v8 = vcombine.low %v2387_v40, %v2391_v61  ;;  %v2431_v3 = vld [vmem:[%s12849_s8 + $0xdb0] sm:$0xff] }
 0x49d   : > { %v11177_v48 = vcombine.low %v2388_v19, %v2392_v26  ;;  %v11216_v40 = vcombine.high %v2427_v0, %v2431_v3 }
 0x49e   : > { %8898 = vmatpush1.bf16.msra.mxu0 %v11127_v49  ;;  %v2399_v49 = vld [vmem:[%s12849_s8 + $0xcb0] sm:$0xff] }
 0x49f   : > { %9226 = vmatpush1.bf16.msra.mxu1 %v11129_v55  ;;  %8899 = vmatprep.subr.bf16.mxu0 %v11136_v54  ;;  %v11178_v55 = vcombine.high %v2388_v19, %v2392_v26  ;;  %v2396_v54 = vld [vmem:[%s12849_s8 + $0xc98] sm:$0xff]  ;;  %v11184_v38 = vcombine.high %v2395_v59, %v2399_v49  ;;  %v2435_v19 = vld [vmem:[%s12849_s8 + $0xdd0] sm:$0xff] }
 0x4a0   : > { %9227 = vmatprep.subr.bf16.mxu1 %v11138_v27  ;;  %v2400_v27 = vld [vmem:[%s12849_s8 + $0xcb8] sm:$0xff]  ;;  %v2439_v26 = vld [vmem:[%s12849_s8 + $0xdf0] sm:$0xff] }
 0x4a1   : > { %v11186_v51 = vcombine.high %v2396_v54, %v2400_v27  ;;  %v11185_v46 = vcombine.low %v2396_v54, %v2400_v27 }
 0x4a2   : > { %8900 = vmatpush1.bf16.msra.mxu0 %v11135_v4  ;;  %v2403_v4 = vld [vmem:[%s12849_s8 + $0xcd0] sm:$0xff] }
 0x4a3   : > { %9228 = vmatpush1.bf16.msra.mxu1 %v11137_v23  ;;  %8901 = vmatprep.subr.bf16.mxu0 %v11144_v14  ;;  %v2407_v23 = vld [vmem:[%s12849_s8 + $0xcf0] sm:$0xff]  ;;  %v2404_v14 = vld [vmem:[%s12849_s8 + $0xcd8] sm:$0xff] }
 0x4a4   : > { %9229 = vmatprep.subr.bf16.mxu1 %v11146_v1  ;;  %v11183_v1 = vcombine.low %v2395_v59, %v2399_v49  ;;  %v11192_v53 = vcombine.high %v2403_v4, %v2407_v23  ;;  %v2436_v49 = vld [vmem:[%s12849_s8 + $0xdd8] sm:$0xff] }
 0x4a6   : > { %8902 = vmatpush1.bf16.msra.mxu0 %v11143_v57  ;;  %v2412_v57 = vld [vmem:[%s12849_s8 + $0xd18] sm:$0xff] }
 0x4a7   : > { %9230 = vmatpush1.bf16.msra.mxu1 %v11145_v43  ;;  %8903 = vmatprep.subr.bf16.mxu0 %v11152_v18  ;;  %v2416_v43 = vld [vmem:[%s12849_s8 + $0xd38] sm:$0xff]  ;;  %v11191_v18 = vcombine.low %v2403_v4, %v2407_v23 }
 0x4a8   : > { %9231 = vmatprep.subr.bf16.mxu1 %v11154_v21  ;;  %v11202_v32 = vcombine.high %v2412_v57, %v2416_v43 }
 0x4aa   : > { %8904 = vmatpush1.bf16.msra.mxu0 %v11151_v28  ;;  %v2420_v28 = vld [vmem:[%s12849_s8 + $0xd58] sm:$0xff] }
 0x4ab   : > { %9232 = vmatpush1.bf16.msra.mxu1 %v11153_v33  ;;  %8905 = vmatprep.subr.bf16.mxu0 %v11160_v50  ;;  %v2424_v33 = vld [vmem:[%s12849_s8 + $0xd78] sm:$0xff]  ;;  %v11199_v50 = vcombine.low %v2411_v16, %v2415_v52  ;;  %v2443_v52 = vld [vmem:[%s12849_s8 + $0xe10] sm:$0xff] }
 0x4ac   : > { %9233 = vmatprep.subr.bf16.mxu1 %v11162_v56  ;;  %v11201_v56 = vcombine.low %v2412_v57, %v2416_v43  ;;  %v11210_v60 = vcombine.high %v2420_v28, %v2424_v33  ;;  %v2447_v57 = vld [vmem:[%s12849_s8 + $0xe30] sm:$0xff] }
 0x4ae   : > { %8906 = vmatpush1.bf16.msra.mxu0 %v11159_v7  ;;  %v2428_v7 = vld [vmem:[%s12849_s8 + $0xd98] sm:$0xff] }
 0x4af   : > { %9234 = vmatpush1.bf16.msra.mxu1 %v11161_v45  ;;  %8916 = vmatprep.subr.bf16.mxu0 %v11168_v9  ;;  %v2432_v45 = vld [vmem:[%s12849_s8 + $0xdb8] sm:$0xff]  ;;  %v11207_v9 = vcombine.low %v2419_v22, %v2423_v35  ;;  %v11223_v35 = vcombine.low %v2435_v19, %v2439_v26 }
 0x4b0   : > { %9244 = vmatprep.subr.bf16.mxu1 %v11170_v63  ;;  %v11209_v63 = vcombine.low %v2420_v28, %v2424_v33 }
 0x4b1   : > { %8908 = vmatmul.mubr.bf16.vlgmr.msra.gmra.mrb[20].mxu0 %v13521_v41 }
 0x4b2   : > { %9236 = vmatmul.mubr.bf16.vlgmr.msra.gmra.mrb[20].mxu1 %v13521_v41  ;;  %8917 = vmatpush1.bf16.msra.mxu0 %v11167_v34  ;;  %v2408_v41 = vld [vmem:[%s12849_s8 + $0xcf8] sm:$0xff]  ;;  %v11218_v34 = vcombine.high %v2428_v7, %v2432_v45 }
 0x4b3   : > { %8948 = vmatprep.mubr.bf16.mxu0 %v13526_v47  ;;  %9245 = vmatpush1.bf16.msra.mxu1 %v11169_v13  ;;  %v11193_v21 = vcombine.low %v2404_v14, %v2408_v41 }
 0x4b4   : > { %9276 = vmatprep.mubr.bf16.mxu1 %v13526_v47  ;;  %8918 = vmatprep.subr.bf16.mxu0 %v11176_v10  ;;  %v11194_v47 = vcombine.high %v2404_v14, %v2408_v41  ;;  %v11217_v41 = vcombine.low %v2428_v7, %v2432_v45  ;;  %v2455_v7 = vld [vmem:[%s12849_s8 + $0xe70] sm:$0xff] }
 0x4b5   : > { %9246 = vmatprep.subr.bf16.mxu1 %v11178_v55  ;;  %v2440_v55 = vld [vmem:[%s12849_s8 + $0xdf8] sm:$0xff] }
 0x4b6   : > { %8919 = vmatpush1.bf16.msra.mxu0 %v11175_v8  ;;  %v11226_v16 = vcombine.high %v2436_v49, %v2440_v55 }
 0x4b7   : > { %9247 = vmatpush1.bf16.msra.mxu1 %v11177_v48  ;;  %8920 = vmatprep.subr.bf16.mxu0 %v11184_v38  ;;  %v11215_v38 = vcombine.low %v2427_v0, %v2431_v3  ;;  %v2451_v3 = vld [vmem:[%s12849_s8 + $0xe50] sm:$0xff] }
 0x4b8   : > { %9248 = vmatprep.subr.bf16.mxu1 %v11186_v51 }
 0x4ba   : > { %8921 = vmatpush1.bf16.msra.mxu0 %v11183_v1  ;;  %v11224_v1 = vcombine.high %v2435_v19, %v2439_v26  ;;  %v11231_v26 = vcombine.low %v2443_v52, %v2447_v57 }
 0x4bb   : > { %9249 = vmatpush1.bf16.msra.mxu1 %v11185_v46  ;;  %8922 = vmatprep.subr.bf16.mxu0 %v11192_v53 }
 0x4bc   : > { %9250 = vmatprep.subr.bf16.mxu1 %v11194_v47 }
 0x4be   : > { %8923 = vmatpush1.bf16.msra.mxu0 %v11191_v18 }
 0x4bf   : > { %9251 = vmatpush1.bf16.msra.mxu1 %v11193_v21  ;;  %8924 = vmatprep.subr.bf16.mxu0 %v11200_v37  ;;  %v2444_v21 = vld [vmem:[%s12849_s8 + $0xe18] sm:$0xff] }
 0x4c0   : > { %9252 = vmatprep.subr.bf16.mxu1 %v11202_v32  ;;  %v2448_v37 = vld [vmem:[%s12849_s8 + $0xe38] sm:$0xff] }
 0x4c1   : > { %v11234_v0 = vcombine.high %v2444_v21, %v2448_v37 }
 0x4c2   : > { %8925 = vmatpush1.bf16.msra.mxu0 %v11199_v50  ;;  %v11225_v50 = vcombine.low %v2436_v49, %v2440_v55  ;;  %v11233_v55 = vcombine.low %v2444_v21, %v2448_v37 }
 0x4c3   : > { %9253 = vmatpush1.bf16.msra.mxu1 %v11201_v56  ;;  %8926 = vmatprep.subr.bf16.mxu0 %v11208_v42  ;;  %v11232_v56 = vcombine.high %v2443_v52, %v2447_v57 }
 0x4c4   : > { %v14138_v61 = vpop.f32.mrb[16].mxu0  ;;  %9254 = vmatprep.subr.bf16.mxu1 %v11210_v60 }
 0x4c5   : > { %v9451_v13 = vrot.slane %v14138_v61, 4  ;;  %v14143_v10 = vpop.f32.mrb[16].mxu1  ;;  %v14145_v59 = vpop.f32.mrb[17].mxu0 }
 0x4c6   : > { %v9463_v54 = vrot.slane %v14143_v10, 4  ;;  %v9457_v27 = vrot.slane %v14145_v59, 4  ;;  %v14151_v8 = vpop.f32.mrb[17].mxu1  ;;  %v8462_v48 = vpop.f32.mrb[18].mxu0  ;;  %8927 = vmatpush1.bf16.msra.mxu0 %v11207_v9 }
 0x4c7   : > { %v9452_v51 = vadd.f32 %v9451_v13, %v14138_v61  ;;  %v9469_v4 = vrot.slane %v14151_v8, 4  ;;  %v8790_v23 = vpop.f32.mrb[18].mxu1  ;;  %9255 = vmatpush1.bf16.msra.mxu1 %v11209_v63  ;;  %v8463_v14 = vpop.f32.mrb[19].mxu0  ;;  %8928 = vmatprep.subr.bf16.mxu0 %v11216_v40  ;;  %v2452_v63 = vld [vmem:[%s12849_s8 + $0xe58] sm:$0xff] }
 0x4c8   : > { %v9464_v46 = vadd.f32 %v9463_v54, %v14143_v10  ;;  %v9458_v53 = vadd.f32 %v9457_v27, %v14145_v59  ;;  %v8791_v47 = vpop.f32.mrb[19].mxu1  ;;  %9256 = vmatprep.subr.bf16.mxu1 %v11218_v34  ;;  %v2456_v40 = vld [vmem:[%s12849_s8 + $0xe78] sm:$0xff]  ;;  %v11240_v54 = vcombine.high %v2451_v3, %v2455_v7 }
 0x4c9   : > { %v9453_v43 = vrot.slane %v9452_v51, 2  ;;  %v9470_v18 = vadd.f32 %v9469_v4, %v14151_v8  ;;  %v2463_v4 = vld [vmem:[%s12849_s8 + $0xeb0] sm:$0xff]  ;;  %v11239_v47 = vcombine.low %v2451_v3, %v2455_v7  ;;  %v11241_v57 = vcombine.low %v2452_v63, %v2456_v40 }
 0x4ca   : > { %v9465_v32 = vrot.slane %v9464_v46, 2  ;;  %v9459_v22 = vrot.slane %v9458_v53, 2  ;;  %8929 = vmatpush1.bf16.msra.mxu0 %v11215_v38  ;;  %v11242_v38 = vcombine.high %v2452_v63, %v2456_v40 }
 0x4cb   : > { %v9454_v28 = vadd.f32 %v9453_v43, %v9452_v51  ;;  %v9471_v33 = vrot.slane %v9470_v18, 2  ;;  %9257 = vmatpush1.bf16.msra.mxu1 %v11217_v41  ;;  %8930 = vmatprep.subr.bf16.mxu0 %v11224_v1  ;;  %v2459_v51 = vld [vmem:[%s12849_s8 + $0xe90] sm:$0xff]  ;;  %v2460_v41 = vld [vmem:[%s12849_s8 + $0xe98] sm:$0xff] }
 0x4cc   : > { %v9466_v42 = vadd.f32 %v9465_v32, %v9464_v46  ;;  %v9460_v60 = vadd.f32 %v9459_v22, %v9458_v53  ;;  %9258 = vmatprep.subr.bf16.mxu1 %v11226_v16  ;;  %v2464_v1 = vld [vmem:[%s12849_s8 + $0xeb8] sm:$0xff]  ;;  %v11248_v43 = vcombine.high %v2459_v51, %v2463_v4  ;;  %v2467_v32 = vld [vmem:[%s12849_s8 + $0xed0] sm:$0xff] }
 0x4cd   : > { %v9455_v45 = vrot.slane %v9454_v28, 1  ;;  %v9472_v9 = vadd.f32 %v9471_v33, %v9470_v18  ;;  %v11250_v37 = vcombine.high %v2460_v41, %v2464_v1  ;;  %v2471_v22 = vld [vmem:[%s12849_s8 + $0xef0] sm:$0xff]  ;;  %v2468_v33 = vld [vmem:[%s12849_s8 + $0xed8] sm:$0xff]  ;;  %v11249_v7 = vcombine.low %v2460_v41, %v2464_v1 }
 0x4ce   : > { %v9467_v34 = vrot.slane %v9466_v42, 1  ;;  %v9461_v19 = vrot.slane %v9460_v60, 1  ;;  %8931 = vmatpush1.bf16.msra.mxu0 %v11223_v35 }
 0x4cf   : > { %v9456_v13 = vadd.f32 %v9455_v45, %v9454_v28  ;;  %v9473_v49 = vrot.slane %v9472_v9, 1  ;;  %9259 = vmatpush1.bf16.msra.mxu1 %v11225_v50  ;;  %8932 = vmatprep.subr.bf16.mxu0 %v11232_v56  ;;  %v2472_v50 = vld [vmem:[%s12849_s8 + $0xef8] sm:$0xff]  ;;  %v11256_v45 = vcombine.high %v2467_v32, %v2471_v22 }
 0x4d0   : > { %v9468_v27 = vadd.f32 %v9467_v34, %v9466_v42  ;;  %v9462_v48 = vadd.f32 %v9461_v19, %v9460_v60  ;;  %9260 = vmatprep.subr.bf16.mxu1 %v11234_v0  ;;  %v11247_v60 = vcombine.low %v2459_v51, %v2463_v4  ;;  %v11258_v40 = vcombine.high %v2468_v33, %v2472_v50  ;;  %v2475_v34 = vld [vmem:[%s12849_s8 + $0xf10] sm:$0xff] }
 0x4d1   : > { %v14168_v23 = vmul.f32 0.125, %v9456_v13  ;;  %v9474_v14 = vadd.f32 %v9473_v49, %v9472_v9  ;;  %v2479_v19 = vld [vmem:[%s12849_s8 + $0xf30] sm:$0xff]  ;;  %v2476_v49 = vld [vmem:[%s12849_s8 + $0xf18] sm:$0xff]  ;;  %v11257_v4 = vcombine.low %v2468_v33, %v2472_v50 }
 0x4d2   : > { %v14172_v46 = vmul.f32 0.125, %v9468_v27  ;;  %v14174_v53 = vmul.f32 0.125, %v9462_v48  ;;  %8933 = vmatpush1.bf16.msra.mxu0 %v11231_v26  ;;  %v11255_v48 = vcombine.low %v2467_v32, %v2471_v22 }
 0x4d3   : > { %v9507_v16 = vsub.f32 %v14138_v61, %v14168_v23  ;;  %v14178_v52 = vmul.f32 0.125, %v9474_v14  ;;  %9261 = vmatpush1.bf16.msra.mxu1 %v11233_v55  ;;  %8934 = vmatprep.subr.bf16.mxu0 %v11240_v54  ;;  %v2480_v55 = vld [vmem:[%s12849_s8 + $0xf38] sm:$0xff]  ;;  %v11264_v14 = vcombine.high %v2475_v34, %v2479_v19 }
 0x4d4   : > { %v9509_v18 = vsub.f32 %v14143_v10, %v14172_v46  ;;  %v9508_v21 = vsub.f32 %v14145_v59, %v14174_v53  ;;  %9262 = vmatprep.subr.bf16.mxu1 %v11242_v38  ;;  %v11265_v50 = vcombine.low %v2476_v49, %v2480_v55 }
 0x4d5   : > { %v9515_v35 = vmul.f32 %v9507_v16, %v9507_v16  ;;  %v9510_v28 = vsub.f32 %v14151_v8, %v14178_v52  ;;  %v2483_v16 = vld [vmem:[%s12849_s8 + $0xf50] sm:$0xff] }
 0x4d6   : > { %v9517_v56 = vmul.f32 %v9509_v18, %v9509_v18  ;;  %v9516_v42 = vmul.f32 %v9508_v21, %v9508_v21  ;;  %8935 = vmatpush1.bf16.msra.mxu0 %v11239_v47  ;;  %v11266_v47 = vcombine.high %v2476_v49, %v2480_v55  ;;  %v2484_v21 = vld [vmem:[%s12849_s8 + $0xf58] sm:$0xff] }
 0x4d7   : > { %v9523_v0 = vrot.slane %v9515_v35, 4  ;;  %v9518_v3 = vmul.f32 %v9510_v28, %v9510_v28  ;;  %9263 = vmatpush1.bf16.msra.mxu1 %v11241_v57  ;;  %8936 = vmatprep.subr.bf16.mxu0 %v11248_v43  ;;  %v2487_v57 = vld [vmem:[%s12849_s8 + $0xf70] sm:$0xff] }
 0x4d8   : > { %v9535_v9 = vrot.slane %v9517_v56, 4  ;;  %v9529_v63 = vrot.slane %v9516_v42, 4  ;;  %9264 = vmatprep.subr.bf16.mxu1 %v11250_v37  ;;  %v2488_v37 = vld [vmem:[%s12849_s8 + $0xf78] sm:$0xff] }
 0x4d9   : > { %v9524_v26 = vadd.f32 %v9523_v0, %v9515_v35  ;;  %v9541_v13 = vrot.slane %v9518_v3, 4  ;;  %v11263_v35 = vcombine.low %v2475_v34, %v2479_v19  ;;  %v11274_v0 = vcombine.high %v2484_v21, %v2488_v37 }
 0x4da   : > { %v9536_v54 = vadd.f32 %v9535_v9, %v9517_v56  ;;  %v9530_v27 = vadd.f32 %v9529_v63, %v9516_v42  ;;  %8937 = vmatpush1.bf16.msra.mxu0 %v11247_v60  ;;  %v11272_v56 = vcombine.high %v2483_v16, %v2487_v57  ;;  %v2492_v63 = vld [vmem:[%s12849_s8 + $0xf98] sm:$0xff]  ;;  %v11273_v55 = vcombine.low %v2484_v21, %v2488_v37 }
 0x4db   : > { %v9525_v38 = vrot.slane %v9524_v26, 2  ;;  %v9542_v51 = vadd.f32 %v9541_v13, %v9518_v3  ;;  %9265 = vmatpush1.bf16.msra.mxu1 %v11249_v7  ;;  %8938 = vmatprep.subr.bf16.mxu0 %v11256_v45  ;;  %v2491_v3 = vld [vmem:[%s12849_s8 + $0xf90] sm:$0xff] }
 0x4dc   : > { %v9537_v41 = vrot.slane %v9536_v54, 2  ;;  %v9531_v1 = vrot.slane %v9530_v27, 2  ;;  %9266 = vmatprep.subr.bf16.mxu1 %v11258_v40  ;;  %v2495_v7 = vld [vmem:[%s12849_s8 + $0xfb0] sm:$0xff]  ;;  %v2496_v40 = vld [vmem:[%s12849_s8 + $0xfb8] sm:$0xff] }
 0x4dd   : > { %v9526_v43 = vadd.f32 %v9525_v38, %v9524_v26  ;;  %v9543_v18 = vrot.slane %v9542_v51, 2  ;;  %v11271_v26 = vcombine.low %v2483_v16, %v2487_v57  ;;  %v11282_v38 = vcombine.high %v2492_v63, %v2496_v40 }
 0x4de   : > { %v9538_v32 = vadd.f32 %v9537_v41, %v9536_v54  ;;  %v9532_v22 = vadd.f32 %v9531_v1, %v9530_v27  ;;  %8939 = vmatpush1.bf16.msra.mxu0 %v11255_v48  ;;  %v11280_v54 = vcombine.high %v2491_v3, %v2495_v7  ;;  %v2500_v1 = vld [vmem:[%s12849_s8 + $0xfd8] sm:$0xff]  ;;  %v11281_v21 = vcombine.low %v2492_v63, %v2496_v40 }
 0x4df   : > { %v9527_v28 = vrot.slane %v9526_v43, 1  ;;  %v9544_v33 = vadd.f32 %v9543_v18, %v9542_v51  ;;  %9267 = vmatpush1.bf16.msra.mxu1 %v11257_v4  ;;  %8940 = vmatprep.subr.bf16.mxu0 %v11264_v14  ;;  %v2499_v51 = vld [vmem:[%s12849_s8 + $0xfd0] sm:$0xff] }
 0x4e0   : > { %v9539_v42 = vrot.slane %v9538_v32, 1  ;;  %v9533_v60 = vrot.slane %v9532_v22, 1  ;;  %9268 = vmatprep.subr.bf16.mxu1 %v11266_v47  ;;  %v2503_v4 = vld [vmem:[%s12849_s8 + $0xff0] sm:$0xff]  ;;  %v2504_v47 = vld [vmem:[%s12849_s8 + $0xff8] sm:$0xff] }
 0x4e1   : > { %v9528_v45 = vadd.f32 %v9527_v28, %v9526_v43  ;;  %v9545_v9 = vrot.slane %v9544_v33, 1  ;;  %v11279_v43 = vcombine.low %v2491_v3, %v2495_v7  ;;  %v11288_v37 = vcombine.high %v2499_v51, %v2503_v4  ;;  %v2508_v28 = vld [vmem:[%s12849_s8 + $0x1018] sm:$0xff]  ;;  %v2519_v3 = vld [vmem:[%s12849_s8 + $0x1070] sm:$0xff] }
 0x4e2   : > { %v9540_v34 = vadd.f32 %v9539_v42, %v9538_v32  ;;  %v9534_v19 = vadd.f32 %v9533_v60, %v9532_v22  ;;  %8941 = vmatpush1.bf16.msra.mxu0 %v11263_v35  ;;  %v11290_v32 = vcombine.high %v2500_v1, %v2504_v47  ;;  %v2507_v22 = vld [vmem:[%s12849_s8 + $0x1010] sm:$0xff] }
 0x4e3   : > { %v9571_v13 = vmul.f32 0.125, %v9528_v45  ;;  %v9546_v49 = vadd.f32 %v9545_v9, %v9544_v33  ;;  %9269 = vmatpush1.bf16.msra.mxu1 %v11265_v50  ;;  %8942 = vmatprep.subr.bf16.mxu0 %v11272_v56  ;;  %v2511_v35 = vld [vmem:[%s12849_s8 + $0x1030] sm:$0xff]  ;;  %v2512_v33 = vld [vmem:[%s12849_s8 + $0x1038] sm:$0xff]  ;;  %v11287_v50 = vcombine.low %v2499_v51, %v2503_v4  ;;  %v11289_v56 = vcombine.low %v2500_v1, %v2504_v47 }
 0x4e4   : > { %v9573_v27 = vmul.f32 0.125, %v9540_v34  ;;  %v9572_v48 = vmul.f32 0.125, %v9534_v19  ;;  %9270 = vmatprep.subr.bf16.mxu1 %v11274_v0  ;;  %v11296_v42 = vcombine.high %v2507_v22, %v2511_v35  ;;  %v11298_v60 = vcombine.high %v2508_v28, %v2512_v33  ;;  %v2515_v0 = vld [vmem:[%s12849_s8 + $0x1050] sm:$0xff]  ;;  %v2516_v45 = vld [vmem:[%s12849_s8 + $0x1058] sm:$0xff] }
 0x4e5   : > { %v9579_v14 = vadd.f32 1e-05, %v9571_v13  ;;  %v9574_v41 = vmul.f32 0.125, %v9546_v49  ;;  %v11295_v7 = vcombine.low %v2507_v22, %v2511_v35  ;;  %v2520_v9 = vld [vmem:[%s12849_s8 + $0x1078] sm:$0xff]  ;;  %v11297_v63 = vcombine.low %v2508_v28, %v2512_v33  ;;  %v2523_v34 = vld [vmem:[%s12849_s8 + $0x1090] sm:$0xff] }
 0x4e6   : > { %v9581_v16 = vadd.f32 1e-05, %v9573_v27  ;;  %v9580_v57 = vadd.f32 1e-05, %v9572_v48  ;;  %8943 = vmatpush1.bf16.msra.mxu0 %v11271_v26  ;;  %v11304_v40 = vcombine.high %v2515_v0, %v2519_v3  ;;  %v2527_v19 = vld [vmem:[%s12849_s8 + $0x10b0] sm:$0xff]  ;;  %v11306_v13 = vcombine.high %v2516_v45, %v2520_v9  ;;  %v2524_v49 = vld [vmem:[%s12849_s8 + $0x1098] sm:$0xff] }
 0x4e7   : > { %12264 = vrsqrt.f32 %v9579_v14  ;;  %v9582_v18 = vadd.f32 1e-05, %v9574_v41  ;;  %9271 = vmatpush1.bf16.msra.mxu1 %v11273_v55  ;;  %8944 = vmatprep.subr.bf16.mxu0 %v11280_v54  ;;  %v2528_v55 = vld [vmem:[%s12849_s8 + $0x10b8] sm:$0xff]  ;;  %v11303_v27 = vcombine.low %v2515_v0, %v2519_v3  ;;  %v11312_v51 = vcombine.high %v2523_v34, %v2527_v19  ;;  %v2531_v1 = vld [vmem:[%s12849_s8 + $0x10d0] sm:$0xff] }
 0x4e8   : > { %12266 = vrsqrt.f32 %v9581_v16  ;;  %9272 = vmatprep.subr.bf16.mxu1 %v11282_v38  ;;  %v11305_v38 = vcombine.low %v2516_v45, %v2520_v9  ;;  %v11314_v41 = vcombine.high %v2524_v49, %v2528_v55  ;;  %v2535_v47 = vld [vmem:[%s12849_s8 + $0x10f0] sm:$0xff]  ;;  %v2532_v16 = vld [vmem:[%s12849_s8 + $0x10d8] sm:$0xff] }
 0x4e9   : > { %12268 = vrsqrt.f32 %v9580_v57  ;;  %v2536_v57 = vld [vmem:[%s12849_s8 + $0x10f8] sm:$0xff]  ;;  %v2539_v22 = vld [vmem:[%s12849_s8 + $0x1110] sm:$0xff] }
 0x4ea   : > { %12270 = vrsqrt.f32 %v9582_v18  ;;  %8945 = vmatpush1.bf16.msra.mxu0 %v11279_v43  ;;  %v11311_v18 = vcombine.low %v2523_v34, %v2527_v19  ;;  %v2543_v35 = vld [vmem:[%s12849_s8 + $0x1130] sm:$0xff]  ;;  %v2540_v33 = vld [vmem:[%s12849_s8 + $0x1118] sm:$0xff] }
 0x4eb   : > { %9273 = vmatpush1.bf16.msra.mxu1 %v11281_v21  ;;  %8946 = vmatprep.subr.bf16.mxu0 %v11288_v37  ;;  %v11320_v37 = vcombine.high %v2531_v1, %v2535_v47  ;;  %v2547_v3 = vld [vmem:[%s12849_s8 + $0x1150] sm:$0xff]  ;;  %v2548_v45 = vld [vmem:[%s12849_s8 + $0x1158] sm:$0xff] }
 0x4ec   : > { %9274 = vmatprep.subr.bf16.mxu1 %v11290_v32  ;;  %v11322_v32 = vcombine.high %v2532_v16, %v2536_v57  ;;  %v2552_v9 = vld [vmem:[%s12849_s8 + $0x1178] sm:$0xff] }
 0x4ed   : > { %v11338_v19 = vcombine.high %v2548_v45, %v2552_v9 }
 0x4ee   : > { %8947 = vmatpush1.bf16.msra.mxu0 %v11287_v50  ;;  %v2544_v50 = vld [vmem:[%s12849_s8 + $0x1138] sm:$0xff] }
 0x4ef   : > { %9275 = vmatpush1.bf16.msra.mxu1 %v11289_v56  ;;  %8957 = vmatprep.subr.bf16.mxu0 %v11296_v42  ;;  %v11319_v56 = vcombine.low %v2531_v1, %v2535_v47  ;;  %v11321_v42 = vcombine.low %v2532_v16, %v2536_v57  ;;  %v11330_v0 = vcombine.high %v2540_v33, %v2544_v50  ;;  %v2571_v57 = vld [vmem:[%s12849_s8 + $0x1210] sm:$0xff] }
 0x4f0   : > { %9285 = vmatprep.subr.bf16.mxu1 %v11298_v60  ;;  %v11328_v60 = vcombine.high %v2539_v22, %v2543_v35 }
 0x4f1   : > { %v12265_v26 = vpop.eup %12264  ;;  %8949 = vmatmul.mubr.bf16.vlgmr.msra.gmra.mrb[20].mxu0 %v13599_v15 }
 0x4f2   : > { %v12267_v54 = vpop.eup %12266  ;;  %9277 = vmatmul.mubr.bf16.vlgmr.msra.gmra.mrb[20].mxu1 %v13599_v15  ;;  %8958 = vmatpush1.bf16.msra.mxu0 %v11295_v7  ;;  %v2551_v7 = vld [vmem:[%s12849_s8 + $0x1170] sm:$0xff] }
 0x4f3   : > { %v12269_v48 = vpop.eup %12268  ;;  %8989 = vmatprep.mubr.bf16.mxu0 %v13604_v17  ;;  %9286 = vmatpush1.bf16.msra.mxu1 %v11297_v63  ;;  %v11327_v63 = vcombine.low %v2539_v22, %v2543_v35  ;;  %v11336_v34 = vcombine.high %v2547_v3, %v2551_v7 }
 0x4f4   : > { %v12271_v4 = vpop.eup %12270  ;;  %v9603_v14 = vcombine.low %v12265_v26, %v12269_v48  ;;  %9317 = vmatprep.mubr.bf16.mxu1 %v13604_v17  ;;  %8959 = vmatprep.subr.bf16.mxu0 %v11304_v40  ;;  %v11313_v17 = vcombine.low %v2524_v49, %v2528_v55  ;;  %v11329_v40 = vcombine.low %v2540_v33, %v2544_v50  ;;  %v2555_v26 = vld [vmem:[%s12849_s8 + $0x1190] sm:$0xff]  ;;  %v2556_v49 = vld [vmem:[%s12849_s8 + $0x1198] sm:$0xff] }
 0x4f5   : > { %v9604_v15 = vcombine.low %v12267_v54, %v12271_v4  ;;  %9287 = vmatprep.subr.bf16.mxu1 %v11306_v13  ;;  %v2559_v13 = vld [vmem:[%s12849_s8 + $0x11b0] sm:$0xff]  ;;  %v2560_v55 = vld [vmem:[%s12849_s8 + $0x11b8] sm:$0xff]  ;;  %v11335_v54 = vcombine.low %v2547_v3, %v2551_v7 }
 0x4f6   : > { %v14227_v43 = vrot.slane %v9603_v14, %v13046_v24  ;;  %8960 = vmatpush1.bf16.msra.mxu0 %v11303_v27  ;;  %v11337_v27 = vcombine.low %v2548_v45, %v2552_v9  ;;  %v11344_v48 = vcombine.high %v2555_v26, %v2559_v13  ;;  %v2567_v4 = vld [vmem:[%s12849_s8 + $0x11f0] sm:$0xff]  ;;  %v2564_v14 = vld [vmem:[%s12849_s8 + $0x11d8] sm:$0xff]  ;;  %v11343_v1 = vcombine.low %v2555_v26, %v2559_v13 }
 0x4f7   : > { %v14230_v21 = vrot.slane %v9604_v15, %v13046_v24  ;;  %9288 = vmatpush1.bf16.msra.mxu1 %v11305_v38  ;;  %8961 = vmatprep.subr.bf16.mxu0 %v11312_v51  ;;  %v11346_v38 = vcombine.high %v2556_v49, %v2560_v55  ;;  %v2563_v51 = vld [vmem:[%s12849_s8 + $0x11d0] sm:$0xff]  ;;  %v11345_v47 = vcombine.low %v2556_v49, %v2560_v55 }
 0x4f8   : > { %9289 = vmatprep.subr.bf16.mxu1 %v11314_v41  ;;  %v2568_v41 = vld [vmem:[%s12849_s8 + $0x11f8] sm:$0xff]  ;;  %v11352_v15 = vcombine.high %v2563_v51, %v2567_v4  ;;  %v2579_v50 = vld [vmem:[%s12849_s8 + $0x1250] sm:$0xff] }
 0x4f9   : > { %v9635_v28 = vcombine.low %v14227_v43, %v14230_v21  ;;  %v11354_v16 = vcombine.high %v2564_v14, %v2568_v41  ;;  %v11353_v22 = vcombine.low %v2564_v14, %v2568_v41  ;;  %v2587_v9 = vld [vmem:[%s12849_s8 + $0x1290] sm:$0xff] }
 0x4fa   : > { %8962 = vmatpush1.bf16.msra.mxu0 %v11311_v18  ;;  %v2575_v18 = vld [vmem:[%s12849_s8 + $0x1230] sm:$0xff] }
 0x4fb   : > { %9290 = vmatpush1.bf16.msra.mxu1 %v11313_v17  ;;  %8963 = vmatprep.subr.bf16.mxu0 %v11320_v37  ;;  %v2572_v17 = vld [vmem:[%s12849_s8 + $0x1218] sm:$0xff]  ;;  %v11360_v35 = vcombine.high %v2571_v57, %v2575_v18  ;;  %v2595_v55 = vld [vmem:[%s12849_s8 + $0x12d0] sm:$0xff] }
 0x4fc   : > { %9291 = vmatprep.subr.bf16.mxu1 %v11322_v32  ;;  %v2576_v37 = vld [vmem:[%s12849_s8 + $0x1238] sm:$0xff]  ;;  %v11351_v32 = vcombine.low %v2563_v51, %v2567_v4  ;;  %v2603_v41 = vld [vmem:[%s12849_s8 + $0x1310] sm:$0xff] }
 0x4fd   : > { %v11362_v33 = vcombine.high %v2572_v17, %v2576_v37  ;;  %v11361_v3 = vcombine.low %v2572_v17, %v2576_v37  ;;  %v2611_v37 = vld [vmem:[%s12849_s8 + $0x1350] sm:$0xff] }
 0x4fe   : > { %8964 = vmatpush1.bf16.msra.mxu0 %v11319_v56  ;;  %v2583_v56 = vld [vmem:[%s12849_s8 + $0x1270] sm:$0xff] }
 0x4ff   : > { %9292 = vmatpush1.bf16.msra.mxu1 %v11321_v42  ;;  %8965 = vmatprep.subr.bf16.mxu0 %v11328_v60  ;;  %v2580_v42 = vld [vmem:[%s12849_s8 + $0x1258] sm:$0xff]  ;;  %v11368_v7 = vcombine.high %v2579_v50, %v2583_v56 }
 0x500   : > { %9293 = vmatprep.subr.bf16.mxu1 %v11330_v0  ;;  %v2584_v60 = vld [vmem:[%s12849_s8 + $0x1278] sm:$0xff]  ;;  %v11359_v0 = vcombine.low %v2571_v57, %v2575_v18 }
 0x501   : > { %v11370_v45 = vcombine.high %v2580_v42, %v2584_v60  ;;  %v11369_v26 = vcombine.low %v2580_v42, %v2584_v60  ;;  %v2619_v60 = vld [vmem:[%s12849_s8 + $0x1390] sm:$0xff] }
 0x502   : > { %8966 = vmatpush1.bf16.msra.mxu0 %v11327_v63  ;;  %v2591_v63 = vld [vmem:[%s12849_s8 + $0x12b0] sm:$0xff] }
 0x503   : > { %9294 = vmatpush1.bf16.msra.mxu1 %v11329_v40  ;;  %8967 = vmatprep.subr.bf16.mxu0 %v11336_v34  ;;  %v2588_v40 = vld [vmem:[%s12849_s8 + $0x1298] sm:$0xff]  ;;  %v11376_v13 = vcombine.high %v2587_v9, %v2591_v63 }
 0x504   : > { %9295 = vmatprep.subr.bf16.mxu1 %v11338_v19  ;;  %v2592_v34 = vld [vmem:[%s12849_s8 + $0x12b8] sm:$0xff]  ;;  %v11367_v19 = vcombine.low %v2579_v50, %v2583_v56 }
 0x505   : > { %v11378_v49 = vcombine.high %v2588_v40, %v2592_v34  ;;  %v11377_v51 = vcombine.low %v2588_v40, %v2592_v34  ;;  %v2627_v34 = vld [vmem:[%s12849_s8 + $0x13d0] sm:$0xff] }
 0x506   : > { %8968 = vmatpush1.bf16.msra.mxu0 %v11335_v54  ;;  %v2599_v54 = vld [vmem:[%s12849_s8 + $0x12f0] sm:$0xff] }
 0x507   : > { %9296 = vmatpush1.bf16.msra.mxu1 %v11337_v27  ;;  %8969 = vmatprep.subr.bf16.mxu0 %v11344_v48  ;;  %v2596_v27 = vld [vmem:[%s12849_s8 + $0x12d8] sm:$0xff]  ;;  %v11384_v4 = vcombine.high %v2595_v55, %v2599_v54 }
 0x508   : > { %9297 = vmatprep.subr.bf16.mxu1 %v11346_v38  ;;  %v2600_v48 = vld [vmem:[%s12849_s8 + $0x12f8] sm:$0xff]  ;;  %v11375_v38 = vcombine.low %v2587_v9, %v2591_v63 }
 0x509   : > { %v11386_v14 = vcombine.high %v2596_v27, %v2600_v48  ;;  %v11385_v57 = vcombine.low %v2596_v27, %v2600_v48  ;;  %v2635_v48 = vld [vmem:[%s12849_s8 + $0x1410] sm:$0xff] }
 0x50a   : > { %8970 = vmatpush1.bf16.msra.mxu0 %v11343_v1  ;;  %v2607_v1 = vld [vmem:[%s12849_s8 + $0x1330] sm:$0xff] }
 0x50b   : > { %9298 = vmatpush1.bf16.msra.mxu1 %v11345_v47  ;;  %8971 = vmatprep.subr.bf16.mxu0 %v11352_v15  ;;  %v2604_v47 = vld [vmem:[%s12849_s8 + $0x1318] sm:$0xff]  ;;  %v11392_v18 = vcombine.high %v2603_v41, %v2607_v1 }
 0x50c   : > { %9299 = vmatprep.subr.bf16.mxu1 %v11354_v16  ;;  %v2608_v15 = vld [vmem:[%s12849_s8 + $0x1338] sm:$0xff]  ;;  %v11383_v16 = vcombine.low %v2595_v55, %v2599_v54 }
 0x50d   : > { %v11394_v17 = vcombine.high %v2604_v47, %v2608_v15  ;;  %v11393_v50 = vcombine.low %v2604_v47, %v2608_v15  ;;  %v2643_v15 = vld [vmem:[%s12849_s8 + $0x1450] sm:$0xff] }
 0x50e   : > { %8972 = vmatpush1.bf16.msra.mxu0 %v11351_v32  ;;  %v2615_v32 = vld [vmem:[%s12849_s8 + $0x1370] sm:$0xff] }
 0x50f   : > { %9300 = vmatpush1.bf16.msra.mxu1 %v11353_v22  ;;  %8973 = vmatprep.subr.bf16.mxu0 %v11360_v35  ;;  %v2612_v22 = vld [vmem:[%s12849_s8 + $0x1358] sm:$0xff]  ;;  %v11400_v56 = vcombine.high %v2611_v37, %v2615_v32 }
 0x510   : > { %9301 = vmatprep.subr.bf16.mxu1 %v11362_v33  ;;  %v2616_v35 = vld [vmem:[%s12849_s8 + $0x1378] sm:$0xff]  ;;  %v11391_v33 = vcombine.low %v2603_v41, %v2607_v1 }
 0x511   : > { %v11402_v42 = vcombine.high %v2612_v22, %v2616_v35  ;;  %v11401_v9 = vcombine.low %v2612_v22, %v2616_v35  ;;  %v2651_v22 = vld [vmem:[%s12849_s8 + $0x1490] sm:$0xff] }
 0x512   : > { %8974 = vmatpush1.bf16.msra.mxu0 %v11359_v0  ;;  %v2623_v0 = vld [vmem:[%s12849_s8 + $0x13b0] sm:$0xff] }
 0x513   : > { %9302 = vmatpush1.bf16.msra.mxu1 %v11361_v3  ;;  %8975 = vmatprep.subr.bf16.mxu0 %v11368_v7  ;;  %v2620_v3 = vld [vmem:[%s12849_s8 + $0x1398] sm:$0xff]  ;;  %v11408_v63 = vcombine.high %v2619_v60, %v2623_v0  ;;  %v2655_v35 = vld [vmem:[%s12849_s8 + $0x14b0] sm:$0xff] }
 0x514   : > { %9303 = vmatprep.subr.bf16.mxu1 %v11370_v45  ;;  %v2624_v7 = vld [vmem:[%s12849_s8 + $0x13b8] sm:$0xff]  ;;  %v11399_v45 = vcombine.low %v2611_v37, %v2615_v32 }
 0x515   : > { %v11410_v40 = vcombine.high %v2620_v3, %v2624_v7  ;;  %v11409_v55 = vcombine.low %v2620_v3, %v2624_v7  ;;  %v2659_v7 = vld [vmem:[%s12849_s8 + $0x14d0] sm:$0xff] }
 0x516   : > { %8976 = vmatpush1.bf16.msra.mxu0 %v11367_v19  ;;  %v2631_v19 = vld [vmem:[%s12849_s8 + $0x13f0] sm:$0xff] }
 0x517   : > { %9304 = vmatpush1.bf16.msra.mxu1 %v11369_v26  ;;  %8977 = vmatprep.subr.bf16.mxu0 %v11376_v13  ;;  %v2628_v26 = vld [vmem:[%s12849_s8 + $0x13d8] sm:$0xff]  ;;  %v11416_v54 = vcombine.high %v2627_v34, %v2631_v19 }
 0x518   : > { %9305 = vmatprep.subr.bf16.mxu1 %v11378_v49  ;;  %v2632_v13 = vld [vmem:[%s12849_s8 + $0x13f8] sm:$0xff]  ;;  %v11407_v49 = vcombine.low %v2619_v60, %v2623_v0  ;;  %v11440_v0 = vcombine.high %v2651_v22, %v2655_v35 }
 0x519   : > { %v11418_v27 = vcombine.high %v2628_v26, %v2632_v13  ;;  %v11417_v41 = vcombine.low %v2628_v26, %v2632_v13  ;;  %v2671_v26 = vld [vmem:[%s12849_s8 + $0x1530] sm:$0xff]  ;;  %v2668_v13 = vld [vmem:[%s12849_s8 + $0x1518] sm:$0xff] }
 0x51a   : > { %8978 = vmatpush1.bf16.msra.mxu0 %v11375_v38  ;;  %v2639_v38 = vld [vmem:[%s12849_s8 + $0x1430] sm:$0xff] }
 0x51b   : > { %9306 = vmatpush1.bf16.msra.mxu1 %v11377_v51  ;;  %8979 = vmatprep.subr.bf16.mxu0 %v11384_v4  ;;  %v2636_v51 = vld [vmem:[%s12849_s8 + $0x1418] sm:$0xff]  ;;  %v11424_v1 = vcombine.high %v2635_v48, %v2639_v38 }
 0x51c   : > { %9307 = vmatprep.subr.bf16.mxu1 %v11386_v14  ;;  %v2640_v4 = vld [vmem:[%s12849_s8 + $0x1438] sm:$0xff]  ;;  %v11415_v14 = vcombine.low %v2627_v34, %v2631_v19  ;;  %v2667_v19 = vld [vmem:[%s12849_s8 + $0x1510] sm:$0xff] }
 0x51d   : > { %v11426_v47 = vcombine.high %v2636_v51, %v2640_v4  ;;  %v11425_v37 = vcombine.low %v2636_v51, %v2640_v4  ;;  %v2679_v51 = vld [vmem:[%s12849_s8 + $0x1570] sm:$0xff]  ;;  %v2676_v4 = vld [vmem:[%s12849_s8 + $0x1558] sm:$0xff] }
 0x51e   : > { %8980 = vmatpush1.bf16.msra.mxu0 %v11383_v16  ;;  %v2647_v16 = vld [vmem:[%s12849_s8 + $0x1470] sm:$0xff] }
 0x51f   : > { %9308 = vmatpush1.bf16.msra.mxu1 %v11385_v57  ;;  %8981 = vmatprep.subr.bf16.mxu0 %v11392_v18  ;;  %v11423_v57 = vcombine.low %v2635_v48, %v2639_v38  ;;  %v2644_v18 = vld [vmem:[%s12849_s8 + $0x1458] sm:$0xff]  ;;  %v11432_v32 = vcombine.high %v2643_v15, %v2647_v16  ;;  %v2675_v38 = vld [vmem:[%s12849_s8 + $0x1550] sm:$0xff] }
 0x520   : > { %9309 = vmatprep.subr.bf16.mxu1 %v11394_v17  ;;  %v2648_v17 = vld [vmem:[%s12849_s8 + $0x1478] sm:$0xff] }
 0x521   : > { %v11433_v60 = vcombine.low %v2644_v18, %v2648_v17 }
 0x522   : > { %8982 = vmatpush1.bf16.msra.mxu0 %v11391_v33  ;;  %v11434_v33 = vcombine.high %v2644_v18, %v2648_v17  ;;  %v2684_v18 = vld [vmem:[%s12849_s8 + $0x1598] sm:$0xff] }
 0x523   : > { %9310 = vmatpush1.bf16.msra.mxu1 %v11393_v50  ;;  %8983 = vmatprep.subr.bf16.mxu0 %v11400_v56  ;;  %v2652_v50 = vld [vmem:[%s12849_s8 + $0x1498] sm:$0xff] }
 0x524   : > { %9311 = vmatprep.subr.bf16.mxu1 %v11402_v42  ;;  %v2656_v56 = vld [vmem:[%s12849_s8 + $0x14b8] sm:$0xff]  ;;  %v11431_v42 = vcombine.low %v2643_v15, %v2647_v16  ;;  %v2683_v16 = vld [vmem:[%s12849_s8 + $0x1590] sm:$0xff] }
 0x525   : > { %v11442_v3 = vcombine.high %v2652_v50, %v2656_v56  ;;  %v2688_v17 = vld [vmem:[%s12849_s8 + $0x15b8] sm:$0xff] }
 0x526   : > { %8984 = vmatpush1.bf16.msra.mxu0 %v11399_v45  ;;  %v2663_v45 = vld [vmem:[%s12849_s8 + $0x14f0] sm:$0xff] }
 0x527   : > { %9312 = vmatpush1.bf16.msra.mxu1 %v11401_v9  ;;  %8985 = vmatprep.subr.bf16.mxu0 %v11408_v63  ;;  %v2660_v9 = vld [vmem:[%s12849_s8 + $0x14d8] sm:$0xff]  ;;  %v11439_v63 = vcombine.low %v2651_v22, %v2655_v35  ;;  %v11448_v34 = vcombine.high %v2659_v7, %v2663_v45  ;;  %v11474_v35 = vcombine.high %v2684_v18, %v2688_v17 }
 0x528   : > { %9313 = vmatprep.subr.bf16.mxu1 %v11410_v40  ;;  %v11441_v40 = vcombine.low %v2652_v50, %v2656_v56  ;;  %v2695_v50 = vld [vmem:[%s12849_s8 + $0x15f0] sm:$0xff]  ;;  %v2692_v56 = vld [vmem:[%s12849_s8 + $0x15d8] sm:$0xff] }
 0x52a   : > { %8986 = vmatpush1.bf16.msra.mxu0 %v11407_v49  ;;  %v2672_v49 = vld [vmem:[%s12849_s8 + $0x1538] sm:$0xff] }
 0x52b   : > { %9314 = vmatpush1.bf16.msra.mxu1 %v11409_v55  ;;  %8987 = vmatprep.subr.bf16.mxu0 %v11416_v54  ;;  %v11447_v55 = vcombine.low %v2659_v7, %v2663_v45  ;;  %v11458_v48 = vcombine.high %v2668_v13, %v2672_v49  ;;  %v2699_v45 = vld [vmem:[%s12849_s8 + $0x1610] sm:$0xff] }
 0x52c   : > { %9315 = vmatprep.subr.bf16.mxu1 %v11418_v27  ;;  %v11456_v27 = vcombine.high %v2667_v19, %v2671_v26 }
 0x52e   : > { %8988 = vmatpush1.bf16.msra.mxu0 %v11415_v14  ;;  %v2680_v14 = vld [vmem:[%s12849_s8 + $0x1578] sm:$0xff] }
 0x52f   : > { %9316 = vmatpush1.bf16.msra.mxu1 %v11417_v41  ;;  %8998 = vmatprep.subr.bf16.mxu0 %v11424_v1  ;;  %v11455_v41 = vcombine.low %v2667_v19, %v2671_v26  ;;  %v11457_v1 = vcombine.low %v2668_v13, %v2672_v49  ;;  %v11466_v15 = vcombine.high %v2676_v4, %v2680_v14  ;;  %v2707_v26 = vld [vmem:[%s12849_s8 + $0x1650] sm:$0xff]  ;;  %v2708_v49 = vld [vmem:[%s12849_s8 + $0x1658] sm:$0xff] }
 0x530   : > { %9326 = vmatprep.subr.bf16.mxu1 %v11426_v47  ;;  %v11464_v47 = vcombine.high %v2675_v38, %v2679_v51  ;;  %v2711_v13 = vld [vmem:[%s12849_s8 + $0x1670] sm:$0xff] }
 0x531   : > { %8990 = vmatmul.mubr.bf16.vlgmr.msra.gmra.mrb[20].mxu0 %v13677_v6 }
 0x532   : > { %9318 = vmatmul.mubr.bf16.vlgmr.msra.gmra.mrb[20].mxu1 %v13677_v6  ;;  %8999 = vmatpush1.bf16.msra.mxu0 %v11423_v57  ;;  %v2664_v6 = vld [vmem:[%s12849_s8 + $0x14f8] sm:$0xff]  ;;  %v2687_v57 = vld [vmem:[%s12849_s8 + $0x15b0] sm:$0xff] }
 0x533   : > { %9030 = vmatprep.mubr.bf16.mxu0 %v13682_v44  ;;  %9327 = vmatpush1.bf16.msra.mxu1 %v11425_v37  ;;  %v11449_v54 = vcombine.low %v2660_v9, %v2664_v6  ;;  %v11463_v37 = vcombine.low %v2675_v38, %v2679_v51  ;;  %v11472_v22 = vcombine.high %v2683_v16, %v2687_v57  ;;  %v2715_v51 = vld [vmem:[%s12849_s8 + $0x1690] sm:$0xff] }
 0x534   : > { %9358 = vmatprep.mubr.bf16.mxu1 %v13682_v44  ;;  %9000 = vmatprep.subr.bf16.mxu0 %v11432_v32  ;;  %v11450_v44 = vcombine.high %v2660_v9, %v2664_v6  ;;  %v11465_v32 = vcombine.low %v2676_v4, %v2680_v14  ;;  %v2703_v9 = vld [vmem:[%s12849_s8 + $0x1630] sm:$0xff]  ;;  %v2700_v6 = vld [vmem:[%s12849_s8 + $0x1618] sm:$0xff] }
 0x535   : > { %9328 = vmatprep.subr.bf16.mxu1 %v11434_v33  ;;  %v2691_v33 = vld [vmem:[%s12849_s8 + $0x15d0] sm:$0xff]  ;;  %v2716_v14 = vld [vmem:[%s12849_s8 + $0x1698] sm:$0xff] }
 0x536   : > { %9001 = vmatpush1.bf16.msra.mxu0 %v11431_v42  ;;  %v2696_v42 = vld [vmem:[%s12849_s8 + $0x15f8] sm:$0xff]  ;;  %v2719_v4 = vld [vmem:[%s12849_s8 + $0x16b0] sm:$0xff] }
 0x537   : > { %9329 = vmatpush1.bf16.msra.mxu1 %v11433_v60  ;;  %9002 = vmatprep.subr.bf16.mxu0 %v11440_v0  ;;  %v11471_v60 = vcombine.low %v2683_v16, %v2687_v57  ;;  %v11473_v0 = vcombine.low %v2684_v18, %v2688_v17  ;;  %v11482_v7 = vcombine.high %v2692_v56, %v2696_v42  ;;  %v2723_v57 = vld [vmem:[%s12849_s8 + $0x16d0] sm:$0xff]  ;;  %v2724_v17 = vld [vmem:[%s12849_s8 + $0x16d8] sm:$0xff] }
 0x538   : > { %9330 = vmatprep.subr.bf16.mxu1 %v11442_v3  ;;  %v11480_v3 = vcombine.high %v2691_v33, %v2695_v50  ;;  %v2727_v18 = vld [vmem:[%s12849_s8 + $0x16f0] sm:$0xff] }
 0x53a   : > { %9003 = vmatpush1.bf16.msra.mxu0 %v11439_v63  ;;  %v2704_v63 = vld [vmem:[%s12849_s8 + $0x1638] sm:$0xff] }
 0x53b   : > { %9331 = vmatpush1.bf16.msra.mxu1 %v11441_v40  ;;  %9004 = vmatprep.subr.bf16.mxu0 %v11448_v34  ;;  %v11479_v40 = vcombine.low %v2691_v33, %v2695_v50  ;;  %v11481_v34 = vcombine.low %v2692_v56, %v2696_v42  ;;  %v11490_v19 = vcombine.high %v2700_v6, %v2704_v63  ;;  %v2731_v50 = vld [vmem:[%s12849_s8 + $0x1710] sm:$0xff]  ;;  %v2732_v42 = vld [vmem:[%s12849_s8 + $0x1718] sm:$0xff] }
 0x53c   : > { %9332 = vmatprep.subr.bf16.mxu1 %v11450_v44  ;;  %v11488_v44 = vcombine.high %v2699_v45, %v2703_v9  ;;  %v2735_v56 = vld [vmem:[%s12849_s8 + $0x1730] sm:$0xff] }
 0x53e   : > { %9005 = vmatpush1.bf16.msra.mxu0 %v11447_v55  ;;  %v2712_v55 = vld [vmem:[%s12849_s8 + $0x1678] sm:$0xff] }
 0x53f   : > { %9333 = vmatpush1.bf16.msra.mxu1 %v11449_v54  ;;  %9006 = vmatprep.subr.bf16.mxu0 %v11456_v27  ;;  %v11487_v54 = vcombine.low %v2699_v45, %v2703_v9  ;;  %v11489_v27 = vcombine.low %v2700_v6, %v2704_v63  ;;  %v11498_v38 = vcombine.high %v2708_v49, %v2712_v55  ;;  %v2739_v9 = vld [vmem:[%s12849_s8 + $0x1750] sm:$0xff]  ;;  %v2740_v63 = vld [vmem:[%s12849_s8 + $0x1758] sm:$0xff] }
 0x540   : > { %9334 = vmatprep.subr.bf16.mxu1 %v11458_v48  ;;  %v11496_v48 = vcombine.high %v2707_v26, %v2711_v13  ;;  %v2743_v6 = vld [vmem:[%s12849_s8 + $0x1770] sm:$0xff] }
 0x542   : > { %9007 = vmatpush1.bf16.msra.mxu0 %v11455_v41  ;;  %v2720_v41 = vld [vmem:[%s12849_s8 + $0x16b8] sm:$0xff] }
 0x543   : > { %9335 = vmatpush1.bf16.msra.mxu1 %v11457_v1  ;;  %9008 = vmatprep.subr.bf16.mxu0 %v11464_v47  ;;  %v11495_v1 = vcombine.low %v2707_v26, %v2711_v13  ;;  %v11497_v47 = vcombine.low %v2708_v49, %v2712_v55  ;;  %v11506_v16 = vcombine.high %v2716_v14, %v2720_v41  ;;  %v2747_v13 = vld [vmem:[%s12849_s8 + $0x1790] sm:$0xff]  ;;  %v2748_v55 = vld [vmem:[%s12849_s8 + $0x1798] sm:$0xff] }
 0x544   : > { %9336 = vmatprep.subr.bf16.mxu1 %v11466_v15  ;;  %v11504_v15 = vcombine.high %v2715_v51, %v2719_v4  ;;  %v2751_v49 = vld [vmem:[%s12849_s8 + $0x17b0] sm:$0xff] }
 0x546   : > { %9009 = vmatpush1.bf16.msra.mxu0 %v11463_v37  ;;  %v2728_v37 = vld [vmem:[%s12849_s8 + $0x16f8] sm:$0xff] }
 0x547   : > { %9337 = vmatpush1.bf16.msra.mxu1 %v11465_v32  ;;  %9010 = vmatprep.subr.bf16.mxu0 %v11472_v22  ;;  %v11503_v32 = vcombine.low %v2715_v51, %v2719_v4  ;;  %v11505_v22 = vcombine.low %v2716_v14, %v2720_v41  ;;  %v11514_v33 = vcombine.high %v2724_v17, %v2728_v37  ;;  %v2755_v4 = vld [vmem:[%s12849_s8 + $0x17d0] sm:$0xff]  ;;  %v2756_v41 = vld [vmem:[%s12849_s8 + $0x17d8] sm:$0xff] }
 0x548   : > { %9338 = vmatprep.subr.bf16.mxu1 %v11474_v35  ;;  %v11512_v35 = vcombine.high %v2723_v57, %v2727_v18  ;;  %v2759_v14 = vld [vmem:[%s12849_s8 + $0x17f0] sm:$0xff] }
 0x54a   : > { %9011 = vmatpush1.bf16.msra.mxu0 %v11471_v60  ;;  %v2736_v60 = vld [vmem:[%s12849_s8 + $0x1738] sm:$0xff] }
 0x54b   : > { %9339 = vmatpush1.bf16.msra.mxu1 %v11473_v0  ;;  %9012 = vmatprep.subr.bf16.mxu0 %v11480_v3  ;;  %v11511_v0 = vcombine.low %v2723_v57, %v2727_v18  ;;  %v11513_v3 = vcombine.low %v2724_v17, %v2728_v37  ;;  %v11522_v45 = vcombine.high %v2732_v42, %v2736_v60  ;;  %v2763_v18 = vld [vmem:[%s12849_s8 + $0x1810] sm:$0xff]  ;;  %v2764_v37 = vld [vmem:[%s12849_s8 + $0x1818] sm:$0xff] }
 0x54c   : > { %9340 = vmatprep.subr.bf16.mxu1 %v11482_v7  ;;  %v11520_v7 = vcombine.high %v2731_v50, %v2735_v56  ;;  %v2767_v17 = vld [vmem:[%s12849_s8 + $0x1830] sm:$0xff] }
 0x54e   : > { %9013 = vmatpush1.bf16.msra.mxu0 %v11479_v40  ;;  %v2744_v40 = vld [vmem:[%s12849_s8 + $0x1778] sm:$0xff] }
 0x54f   : > { %9341 = vmatpush1.bf16.msra.mxu1 %v11481_v34  ;;  %9014 = vmatprep.subr.bf16.mxu0 %v11488_v44  ;;  %v11519_v34 = vcombine.low %v2731_v50, %v2735_v56  ;;  %v11521_v44 = vcombine.low %v2732_v42, %v2736_v60  ;;  %v11530_v26 = vcombine.high %v2740_v63, %v2744_v40  ;;  %v2771_v56 = vld [vmem:[%s12849_s8 + $0x1850] sm:$0xff] }
 0x550   : > { %9342 = vmatprep.subr.bf16.mxu1 %v11490_v19  ;;  %v11528_v19 = vcombine.high %v2739_v9, %v2743_v6  ;;  %v2775_v42 = vld [vmem:[%s12849_s8 + $0x1870] sm:$0xff]  ;;  %v11551_v60 = vcombine.low %v2763_v18, %v2767_v17 }
 0x552   : > { %9015 = vmatpush1.bf16.msra.mxu0 %v11487_v54  ;;  %v2752_v54 = vld [vmem:[%s12849_s8 + $0x17b8] sm:$0xff] }
 0x553   : > { %9343 = vmatpush1.bf16.msra.mxu1 %v11489_v27  ;;  %9016 = vmatprep.subr.bf16.mxu0 %v11496_v48  ;;  %v11527_v27 = vcombine.low %v2739_v9, %v2743_v6  ;;  %v11529_v48 = vcombine.low %v2740_v63, %v2744_v40  ;;  %v11538_v51 = vcombine.high %v2748_v55, %v2752_v54  ;;  %v2779_v9 = vld [vmem:[%s12849_s8 + $0x1890] sm:$0xff]  ;;  %v2780_v40 = vld [vmem:[%s12849_s8 + $0x1898] sm:$0xff] }
 0x554   : > { %9344 = vmatprep.subr.bf16.mxu1 %v11498_v38  ;;  %v11536_v38 = vcombine.high %v2747_v13, %v2751_v49  ;;  %v2783_v6 = vld [vmem:[%s12849_s8 + $0x18b0] sm:$0xff] }
 0x556   : > { %9017 = vmatpush1.bf16.msra.mxu0 %v11495_v1  ;;  %v2760_v1 = vld [vmem:[%s12849_s8 + $0x17f8] sm:$0xff] }
 0x557   : > { %9345 = vmatpush1.bf16.msra.mxu1 %v11497_v47  ;;  %9018 = vmatprep.subr.bf16.mxu0 %v11504_v15  ;;  %v11535_v47 = vcombine.low %v2747_v13, %v2751_v49  ;;  %v11537_v15 = vcombine.low %v2748_v55, %v2752_v54  ;;  %v11546_v57 = vcombine.high %v2756_v41, %v2760_v1  ;;  %v2787_v49 = vld [vmem:[%s12849_s8 + $0x18d0] sm:$0xff]  ;;  %v2788_v54 = vld [vmem:[%s12849_s8 + $0x18d8] sm:$0xff] }
 0x558   : > { %9346 = vmatprep.subr.bf16.mxu1 %v11506_v16  ;;  %v11544_v16 = vcombine.high %v2755_v4, %v2759_v14  ;;  %v2791_v55 = vld [vmem:[%s12849_s8 + $0x18f0] sm:$0xff] }
 0x55a   : > { %9019 = vmatpush1.bf16.msra.mxu0 %v11503_v32  ;;  %v2768_v32 = vld [vmem:[%s12849_s8 + $0x1838] sm:$0xff] }
 0x55b   : > { %9347 = vmatpush1.bf16.msra.mxu1 %v11505_v22  ;;  %9020 = vmatprep.subr.bf16.mxu0 %v11512_v35  ;;  %v11543_v22 = vcombine.low %v2755_v4, %v2759_v14  ;;  %v11545_v35 = vcombine.low %v2756_v41, %v2760_v1  ;;  %v11554_v50 = vcombine.high %v2764_v37, %v2768_v32  ;;  %v2799_v4 = vld [vmem:[%s12849_s8 + $0x1930] sm:$0xff]  ;;  %v2796_v14 = vld [vmem:[%s12849_s8 + $0x1918] sm:$0xff] }
 0x55c   : > { %9348 = vmatprep.subr.bf16.mxu1 %v11514_v33  ;;  %v11552_v33 = vcombine.high %v2763_v18, %v2767_v17  ;;  %v2800_v41 = vld [vmem:[%s12849_s8 + $0x1938] sm:$0xff]  ;;  %v11575_v1 = vcombine.low %v2787_v49, %v2791_v55  ;;  %v2807_v18 = vld [vmem:[%s12849_s8 + $0x1970] sm:$0xff] }
 0x55d   : > { %v2804_v17 = vld [vmem:[%s12849_s8 + $0x1958] sm:$0xff] }
 0x55e   : > { %9021 = vmatpush1.bf16.msra.mxu0 %v11511_v0  ;;  %v2772_v0 = vld [vmem:[%s12849_s8 + $0x1858] sm:$0xff] }
 0x55f   : > { %9349 = vmatpush1.bf16.msra.mxu1 %v11513_v3  ;;  %9022 = vmatprep.subr.bf16.mxu0 %v11520_v7  ;;  %v2776_v3 = vld [vmem:[%s12849_s8 + $0x1878] sm:$0xff]  ;;  %v11553_v7 = vcombine.low %v2764_v37, %v2768_v32 }
 0x560   : > { %9350 = vmatprep.subr.bf16.mxu1 %v11522_v45  ;;  %v11560_v45 = vcombine.high %v2771_v56, %v2775_v42  ;;  %v11562_v63 = vcombine.high %v2772_v0, %v2776_v3  ;;  %v2808_v37 = vld [vmem:[%s12849_s8 + $0x1978] sm:$0xff] }
 0x562   : > { %9023 = vmatpush1.bf16.msra.mxu0 %v11519_v34  ;;  %v2784_v34 = vld [vmem:[%s12849_s8 + $0x18b8] sm:$0xff] }
 0x563   : > { %9351 = vmatpush1.bf16.msra.mxu1 %v11521_v44  ;;  %9024 = vmatprep.subr.bf16.mxu0 %v11528_v19  ;;  %v11559_v44 = vcombine.low %v2771_v56, %v2775_v42  ;;  %v11561_v19 = vcombine.low %v2772_v0, %v2776_v3  ;;  %v11570_v13 = vcombine.high %v2780_v40, %v2784_v34  ;;  %v2815_v56 = vld [vmem:[%s12849_s8 + $0x19b0] sm:$0xff]  ;;  %v2812_v42 = vld [vmem:[%s12849_s8 + $0x1998] sm:$0xff] }
 0x564   : > { %9352 = vmatprep.subr.bf16.mxu1 %v11530_v26  ;;  %v11568_v26 = vcombine.high %v2779_v9, %v2783_v6  ;;  %v11593_v3 = vcombine.low %v2804_v17, %v2808_v37 }
 0x566   : > { %9025 = vmatpush1.bf16.msra.mxu0 %v11527_v27  ;;  %v11567_v27 = vcombine.low %v2779_v9, %v2783_v6  ;;  %v2819_v9 = vld [vmem:[%s12849_s8 + $0x19d0] sm:$0xff] }
 0x567   : > { %9353 = vmatpush1.bf16.msra.mxu1 %v11529_v48  ;;  %9026 = vmatprep.subr.bf16.mxu0 %v11536_v38  ;;  %v11569_v48 = vcombine.low %v2780_v40, %v2784_v34  ;;  %v11576_v38 = vcombine.high %v2787_v49, %v2791_v55  ;;  %v2823_v6 = vld [vmem:[%s12849_s8 + $0x19f0] sm:$0xff]  ;;  %v2824_v40 = vld [vmem:[%s12849_s8 + $0x19f8] sm:$0xff] }
 0x568   : > { %9354 = vmatprep.subr.bf16.mxu1 %v11538_v51  ;;  %v2795_v51 = vld [vmem:[%s12849_s8 + $0x1910] sm:$0xff]  ;;  %v2828_v55 = vld [vmem:[%s12849_s8 + $0x1a18] sm:$0xff] }
 0x569   : > { %v11583_v32 = vcombine.low %v2795_v51, %v2799_v4  ;;  %v2831_v49 = vld [vmem:[%s12849_s8 + $0x1a30] sm:$0xff] }
 0x56a   : > { %9027 = vmatpush1.bf16.msra.mxu0 %v11535_v47 }
 0x56b   : > { %9355 = vmatpush1.bf16.msra.mxu1 %v11537_v15  ;;  %9028 = vmatprep.subr.bf16.mxu0 %v11544_v16  ;;  %v11584_v15 = vcombine.high %v2795_v51, %v2799_v4  ;;  %v11586_v16 = vcombine.high %v2796_v14, %v2800_v41  ;;  %v2839_v51 = vld [vmem:[%s12849_s8 + $0x1a70] sm:$0xff]  ;;  %v2836_v4 = vld [vmem:[%s12849_s8 + $0x1a58] sm:$0xff] }
 0x56c   : > { %9356 = vmatprep.subr.bf16.mxu1 %v11546_v57  ;;  %v2803_v57 = vld [vmem:[%s12849_s8 + $0x1950] sm:$0xff] }
 0x56d   : > { %v11591_v0 = vcombine.low %v2803_v57, %v2807_v18 }
 0x56e   : > { %9029 = vmatpush1.bf16.msra.mxu0 %v11543_v22  ;;  %v11585_v22 = vcombine.low %v2796_v14, %v2800_v41  ;;  %v2840_v14 = vld [vmem:[%s12849_s8 + $0x1a78] sm:$0xff] }
 0x56f   : > { %9357 = vmatpush1.bf16.msra.mxu1 %v11545_v35  ;;  %9039 = vmatprep.subr.bf16.mxu0 %v11552_v33  ;;  %v11592_v35 = vcombine.high %v2803_v57, %v2807_v18  ;;  %v11594_v33 = vcombine.high %v2804_v17, %v2808_v37  ;;  %v2847_v57 = vld [vmem:[%s12849_s8 + $0x1ab0] sm:$0xff]  ;;  %v2844_v18 = vld [vmem:[%s12849_s8 + $0x1a98] sm:$0xff] }
 0x570   : > { %9367 = vmatprep.subr.bf16.mxu1 %v11554_v50  ;;  %v2811_v50 = vld [vmem:[%s12849_s8 + $0x1990] sm:$0xff]  ;;  %v2848_v17 = vld [vmem:[%s12849_s8 + $0x1ab8] sm:$0xff] }
 0x571   : > { %9031 = vmatmul.mubr.bf16.vlgmr.msra.gmra.mrb[20].mxu0 %v13755_v5  ;;  %v11599_v34 = vcombine.low %v2811_v50, %v2815_v56 }
 0x572   : > { %9359 = vmatmul.mubr.bf16.vlgmr.msra.gmra.mrb[20].mxu1 %v13755_v5  ;;  %9040 = vmatpush1.bf16.msra.mxu0 %v11551_v60  ;;  %v2792_v5 = vld [vmem:[%s12849_s8 + $0x18f8] sm:$0xff] }
 0x573   : > { %9071 = vmatprep.mubr.bf16.mxu0 %v13760_v20  ;;  %9368 = vmatpush1.bf16.msra.mxu1 %v11553_v7  ;;  %v11577_v47 = vcombine.low %v2788_v54, %v2792_v5  ;;  %v2816_v60 = vld [vmem:[%s12849_s8 + $0x19b8] sm:$0xff]  ;;  %v11600_v7 = vcombine.high %v2811_v50, %v2815_v56  ;;  %v2855_v50 = vld [vmem:[%s12849_s8 + $0x1af0] sm:$0xff] }
 0x574   : > { %9399 = vmatprep.mubr.bf16.mxu1 %v13760_v20  ;;  %9041 = vmatprep.subr.bf16.mxu0 %v11560_v45  ;;  %v11578_v20 = vcombine.high %v2788_v54, %v2792_v5  ;;  %v11602_v45 = vcombine.high %v2812_v42, %v2816_v60  ;;  %v2832_v54 = vld [vmem:[%s12849_s8 + $0x1a38] sm:$0xff]  ;;  %v11607_v5 = vcombine.low %v2819_v9, %v2823_v6 }
 0x575   : > { %9369 = vmatprep.subr.bf16.mxu1 %v11562_v63  ;;  %v2820_v63 = vld [vmem:[%s12849_s8 + $0x19d8] sm:$0xff] }
 0x576   : > { %9042 = vmatpush1.bf16.msra.mxu0 %v11559_v44  ;;  %v11601_v44 = vcombine.low %v2812_v42, %v2816_v60  ;;  %v2852_v56 = vld [vmem:[%s12849_s8 + $0x1ad8] sm:$0xff] }
 0x577   : > { %9370 = vmatpush1.bf16.msra.mxu1 %v11561_v19  ;;  %9043 = vmatprep.subr.bf16.mxu0 %v11568_v26  ;;  %v11608_v19 = vcombine.high %v2819_v9, %v2823_v6  ;;  %v11610_v26 = vcombine.high %v2820_v63, %v2824_v40  ;;  %v2856_v42 = vld [vmem:[%s12849_s8 + $0x1af8] sm:$0xff]  ;;  %v2863_v9 = vld [vmem:[%s12849_s8 + $0x1b30] sm:$0xff] }
 0x578   : > { %9371 = vmatprep.subr.bf16.mxu1 %v11570_v13  ;;  %v2827_v13 = vld [vmem:[%s12849_s8 + $0x1a10] sm:$0xff]  ;;  %v2860_v6 = vld [vmem:[%s12849_s8 + $0x1b18] sm:$0xff] }
 0x579   : > { %v11615_v41 = vcombine.low %v2827_v13, %v2831_v49 }
 0x57a   : > { %9044 = vmatpush1.bf16.msra.mxu0 %v11567_v27  ;;  %v11609_v27 = vcombine.low %v2820_v63, %v2824_v40  ;;  %v2864_v63 = vld [vmem:[%s12849_s8 + $0x1b38] sm:$0xff] }
 0x57b   : > { %9372 = vmatpush1.bf16.msra.mxu1 %v11569_v48  ;;  %9045 = vmatprep.subr.bf16.mxu0 %v11576_v38  ;;  %v11616_v48 = vcombine.high %v2827_v13, %v2831_v49  ;;  %v11618_v38 = vcombine.high %v2828_v55, %v2832_v54  ;;  %v2871_v13 = vld [vmem:[%s12849_s8 + $0x1b70] sm:$0xff]  ;;  %v2868_v49 = vld [vmem:[%s12849_s8 + $0x1b58] sm:$0xff] }
 0x57c   : > { %9373 = vmatprep.subr.bf16.mxu1 %v11578_v20  ;;  %v2835_v20 = vld [vmem:[%s12849_s8 + $0x1a50] sm:$0xff] }
 0x57d   : > { %v11623_v37 = vcombine.low %v2835_v20, %v2839_v51 }
 0x57e   : > { %9046 = vmatpush1.bf16.msra.mxu0 %v11575_v1  ;;  %v11617_v1 = vcombine.low %v2828_v55, %v2832_v54  ;;  %v2872_v55 = vld [vmem:[%s12849_s8 + $0x1b78] sm:$0xff] }
 0x57f   : > { %9374 = vmatpush1.bf16.msra.mxu1 %v11577_v47  ;;  %9047 = vmatprep.subr.bf16.mxu0 %v11584_v15  ;;  %v11624_v47 = vcombine.high %v2835_v20, %v2839_v51  ;;  %v11626_v15 = vcombine.high %v2836_v4, %v2840_v14  ;;  %v2879_v20 = vld [vmem:[%s12849_s8 + $0x1bb0] sm:$0xff]  ;;  %v2876_v51 = vld [vmem:[%s12849_s8 + $0x1b98] sm:$0xff] }
 0x580   : > { %9375 = vmatprep.subr.bf16.mxu1 %v11586_v16  ;;  %v2843_v16 = vld [vmem:[%s12849_s8 + $0x1a90] sm:$0xff] }
 0x581   : > { %v11631_v60 = vcombine.low %v2843_v16, %v2847_v57 }
 0x582   : > { %9048 = vmatpush1.bf16.msra.mxu0 %v11583_v32  ;;  %v11625_v32 = vcombine.low %v2836_v4, %v2840_v14  ;;  %v2880_v4 = vld [vmem:[%s12849_s8 + $0x1bb8] sm:$0xff] }
 0x583   : > { %9376 = vmatpush1.bf16.msra.mxu1 %v11585_v22  ;;  %9049 = vmatprep.subr.bf16.mxu0 %v11592_v35  ;;  %v11632_v22 = vcombine.high %v2843_v16, %v2847_v57  ;;  %v11634_v35 = vcombine.high %v2844_v18, %v2848_v17  ;;  %v2887_v16 = vld [vmem:[%s12849_s8 + $0x1bf0] sm:$0xff]  ;;  %v2884_v57 = vld [vmem:[%s12849_s8 + $0x1bd8] sm:$0xff] }
 0x584   : > { %9377 = vmatprep.subr.bf16.mxu1 %v11594_v33  ;;  %v2851_v33 = vld [vmem:[%s12849_s8 + $0x1ad0] sm:$0xff] }
 0x585   : > { %v11639_v40 = vcombine.low %v2851_v33, %v2855_v50 }
 0x586   : > { %9050 = vmatpush1.bf16.msra.mxu0 %v11591_v0  ;;  %v11633_v0 = vcombine.low %v2844_v18, %v2848_v17  ;;  %v2888_v18 = vld [vmem:[%s12849_s8 + $0x1bf8] sm:$0xff] }
 0x587   : > { %9378 = vmatpush1.bf16.msra.mxu1 %v11593_v3  ;;  %9051 = vmatprep.subr.bf16.mxu0 %v11600_v7  ;;  %v11640_v3 = vcombine.high %v2851_v33, %v2855_v50  ;;  %v11642_v7 = vcombine.high %v2852_v56, %v2856_v42  ;;  %v2895_v33 = vld [vmem:[%s12849_s8 + $0x1c30] sm:$0xff]  ;;  %v2892_v50 = vld [vmem:[%s12849_s8 + $0x1c18] sm:$0xff] }
 0x588   : > { %9379 = vmatprep.subr.bf16.mxu1 %v11602_v45  ;;  %v2859_v45 = vld [vmem:[%s12849_s8 + $0x1b10] sm:$0xff] }
 0x589   : > { %v11647_v54 = vcombine.low %v2859_v45, %v2863_v9 }
 0x58a   : > { %9052 = vmatpush1.bf16.msra.mxu0 %v11599_v34  ;;  %v11641_v34 = vcombine.low %v2852_v56, %v2856_v42  ;;  %v2896_v56 = vld [vmem:[%s12849_s8 + $0x1c38] sm:$0xff] }
 0x58b   : > { %9380 = vmatpush1.bf16.msra.mxu1 %v11601_v44  ;;  %9053 = vmatprep.subr.bf16.mxu0 %v11608_v19  ;;  %v11648_v44 = vcombine.high %v2859_v45, %v2863_v9  ;;  %v11650_v19 = vcombine.high %v2860_v6, %v2864_v63  ;;  %v2903_v45 = vld [vmem:[%s12849_s8 + $0x1c70] sm:$0xff] }
 0x58c   : > { %9381 = vmatprep.subr.bf16.mxu1 %v11610_v26  ;;  %v2867_v26 = vld [vmem:[%s12849_s8 + $0x1b50] sm:$0xff] }
 0x58d   : > { %v11655_v14 = vcombine.low %v2867_v26, %v2871_v13 }
 0x58e   : > { %9054 = vmatpush1.bf16.msra.mxu0 %v11607_v5  ;;  %v11649_v5 = vcombine.low %v2860_v6, %v2864_v63  ;;  %v2900_v6 = vld [vmem:[%s12849_s8 + $0x1c58] sm:$0xff] }
 0x58f   : > { %9382 = vmatpush1.bf16.msra.mxu1 %v11609_v27  ;;  %9055 = vmatprep.subr.bf16.mxu0 %v11616_v48  ;;  %v11656_v27 = vcombine.high %v2867_v26, %v2871_v13  ;;  %v11658_v48 = vcombine.high %v2868_v49, %v2872_v55  ;;  %v2904_v63 = vld [vmem:[%s12849_s8 + $0x1c78] sm:$0xff] }
 0x590   : > { %9383 = vmatprep.subr.bf16.mxu1 %v11618_v38  ;;  %v2875_v38 = vld [vmem:[%s12849_s8 + $0x1b90] sm:$0xff]  ;;  %v11690_v26 = vcombine.high %v2900_v6, %v2904_v63  ;;  %v2908_v13 = vld [vmem:[%s12849_s8 + $0x1c98] sm:$0xff] }
 0x591   : > { %v11663_v17 = vcombine.low %v2875_v38, %v2879_v20 }
 0x592   : > { %9056 = vmatpush1.bf16.msra.mxu0 %v11615_v41  ;;  %v11657_v41 = vcombine.low %v2868_v49, %v2872_v55  ;;  %v2912_v49 = vld [vmem:[%s12849_s8 + $0x1cb8] sm:$0xff] }
 0x593   : > { %9384 = vmatpush1.bf16.msra.mxu1 %v11617_v1  ;;  %9057 = vmatprep.subr.bf16.mxu0 %v11624_v47  ;;  %v11664_v1 = vcombine.high %v2875_v38, %v2879_v20  ;;  %v11666_v47 = vcombine.high %v2876_v51, %v2880_v4  ;;  %v2919_v38 = vld [vmem:[%s12849_s8 + $0x1cf0] sm:$0xff]  ;;  %v2916_v20 = vld [vmem:[%s12849_s8 + $0x1cd8] sm:$0xff] }
 0x594   : > { %9385 = vmatprep.subr.bf16.mxu1 %v11626_v15  ;;  %v2883_v15 = vld [vmem:[%s12849_s8 + $0x1bd0] sm:$0xff] }
 0x595   : > { %v11671_v42 = vcombine.low %v2883_v15, %v2887_v16 }
 0x596   : > { %9058 = vmatpush1.bf16.msra.mxu0 %v11623_v37  ;;  %v11665_v37 = vcombine.low %v2876_v51, %v2880_v4  ;;  %v11697_v4 = vcombine.low %v2908_v13, %v2912_v49 }
 0x597   : > { %9386 = vmatpush1.bf16.msra.mxu1 %v11625_v32  ;;  %9059 = vmatprep.subr.bf16.mxu0 %v11632_v22  ;;  %v11672_v32 = vcombine.high %v2883_v15, %v2887_v16  ;;  %v11674_v22 = vcombine.high %v2884_v57, %v2888_v18  ;;  %v2928_v15 = vld [vmem:[%s12849_s8 + $0x1d38] sm:$0xff] }
 0x598   : > { %9387 = vmatprep.subr.bf16.mxu1 %v11634_v35  ;;  %v2891_v35 = vld [vmem:[%s12849_s8 + $0x1c10] sm:$0xff] }
 0x599   : > { %v11679_v9 = vcombine.low %v2891_v35, %v2895_v33 }
 0x59a   : > { %9060 = vmatpush1.bf16.msra.mxu0 %v11631_v60  ;;  %v11673_v60 = vcombine.low %v2884_v57, %v2888_v18 }
 0x59b   : > { %9388 = vmatpush1.bf16.msra.mxu1 %v11633_v0  ;;  %9061 = vmatprep.subr.bf16.mxu0 %v11640_v3  ;;  %v11680_v0 = vcombine.high %v2891_v35, %v2895_v33  ;;  %v11682_v3 = vcombine.high %v2892_v50, %v2896_v56  ;;  %v2936_v35 = vld [vmem:[%s12849_s8 + $0x1d78] sm:$0xff] }
 0x59c   : > { %9389 = vmatprep.subr.bf16.mxu1 %v11642_v7  ;;  %v2899_v7 = vld [vmem:[%s12849_s8 + $0x1c50] sm:$0xff] }
 0x59d   : > { %v11687_v55 = vcombine.low %v2899_v7, %v2903_v45 }
 0x59e   : > { %9062 = vmatpush1.bf16.msra.mxu0 %v11639_v40  ;;  %v11681_v40 = vcombine.low %v2892_v50, %v2896_v56 }
 0x59f   : > { %9390 = vmatpush1.bf16.msra.mxu1 %v11641_v34  ;;  %9063 = vmatprep.subr.bf16.mxu0 %v11648_v44  ;;  %v11688_v34 = vcombine.high %v2899_v7, %v2903_v45  ;;  %v2907_v44 = vld [vmem:[%s12849_s8 + $0x1c90] sm:$0xff]  ;;  %v2944_v7 = vld [vmem:[%s12849_s8 + $0x1db8] sm:$0xff] }
 0x5a0   : > { %9391 = vmatprep.subr.bf16.mxu1 %v11650_v19  ;;  %v2911_v19 = vld [vmem:[%s12849_s8 + $0x1cb0] sm:$0xff] }
 0x5a1   : > { %v11695_v51 = vcombine.low %v2907_v44, %v2911_v19 }
 0x5a2   : > { %9064 = vmatpush1.bf16.msra.mxu0 %v11647_v54  ;;  %v11689_v54 = vcombine.low %v2900_v6, %v2904_v63 }
 0x5a3   : > { %9392 = vmatpush1.bf16.msra.mxu1 %v11649_v5  ;;  %9065 = vmatprep.subr.bf16.mxu0 %v11656_v27  ;;  %v11696_v5 = vcombine.high %v2907_v44, %v2911_v19  ;;  %v11698_v27 = vcombine.high %v2908_v13, %v2912_v49  ;;  %v2948_v44 = vld [vmem:[%s12849_s8 + $0x1dd8] sm:$0xff] }
 0x5a4   : > { %9393 = vmatprep.subr.bf16.mxu1 %v11658_v48  ;;  %v2915_v48 = vld [vmem:[%s12849_s8 + $0x1cd0] sm:$0xff]  ;;  %v2952_v19 = vld [vmem:[%s12849_s8 + $0x1df8] sm:$0xff] }
 0x5a5   : > { %v11703_v16 = vcombine.low %v2915_v48, %v2919_v38 }
 0x5a6   : > { %9066 = vmatpush1.bf16.msra.mxu0 %v11655_v14  ;;  %v11704_v14 = vcombine.high %v2915_v48, %v2919_v38  ;;  %v2960_v48 = vld [vmem:[%s12849_s8 + $0x1e38] sm:$0xff] }
 0x5a7   : > { %9394 = vmatpush1.bf16.msra.mxu1 %v11657_v41  ;;  %9067 = vmatprep.subr.bf16.mxu0 %v11664_v1  ;;  %v2923_v41 = vld [vmem:[%s12849_s8 + $0x1d10] sm:$0xff] }
 0x5a8   : > { %9395 = vmatprep.subr.bf16.mxu1 %v11666_v47  ;;  %v2927_v1 = vld [vmem:[%s12849_s8 + $0x1d30] sm:$0xff]  ;;  %v2924_v47 = vld [vmem:[%s12849_s8 + $0x1d18] sm:$0xff] }
 0x5a9   : > { %v11712_v18 = vcombine.high %v2923_v41, %v2927_v1  ;;  %v11711_v33 = vcombine.low %v2923_v41, %v2927_v1  ;;  %v11713_v50 = vcombine.low %v2924_v47, %v2928_v15  ;;  %v2968_v41 = vld [vmem:[%s12849_s8 + $0x1e78] sm:$0xff] }
 0x5aa   : > { %9068 = vmatpush1.bf16.msra.mxu0 %v11663_v17  ;;  %v11714_v17 = vcombine.high %v2924_v47, %v2928_v15 }
 0x5ab   : > { %9396 = vmatpush1.bf16.msra.mxu1 %v11665_v37  ;;  %9069 = vmatprep.subr.bf16.mxu0 %v11672_v32  ;;  %v2931_v37 = vld [vmem:[%s12849_s8 + $0x1d50] sm:$0xff] }
 0x5ac   : > { %9397 = vmatprep.subr.bf16.mxu1 %v11674_v22  ;;  %v2935_v32 = vld [vmem:[%s12849_s8 + $0x1d70] sm:$0xff]  ;;  %v2932_v22 = vld [vmem:[%s12849_s8 + $0x1d58] sm:$0xff] }
 0x5ad   : > { %v11720_v56 = vcombine.high %v2931_v37, %v2935_v32  ;;  %v11719_v45 = vcombine.low %v2931_v37, %v2935_v32  ;;  %v2976_v37 = vld [vmem:[%s12849_s8 + $0x1eb8] sm:$0xff] }
 0x5ae   : > { %9070 = vmatpush1.bf16.msra.mxu0 %v11671_v42  ;;  %v11722_v42 = vcombine.high %v2932_v22, %v2936_v35 }
 0x5af   : > { %9398 = vmatpush1.bf16.msra.mxu1 %v11673_v60  ;;  %9080 = vmatprep.subr.bf16.mxu0 %v11680_v0  ;;  %v2939_v60 = vld [vmem:[%s12849_s8 + $0x1d90] sm:$0xff] }
 0x5b0   : > { %9408 = vmatprep.subr.bf16.mxu1 %v11682_v3  ;;  %v2943_v0 = vld [vmem:[%s12849_s8 + $0x1db0] sm:$0xff]  ;;  %v2940_v3 = vld [vmem:[%s12849_s8 + $0x1d98] sm:$0xff] }
 0x5b1   : > { %9072 = vmatmul.mubr.bf16.vlgmr.msra.gmra.mrb[20].mxu0 %v13833_v11  ;;  %v11728_v6 = vcombine.high %v2939_v60, %v2943_v0  ;;  %v11730_v63 = vcombine.high %v2940_v3, %v2944_v7  ;;  %v11729_v13 = vcombine.low %v2940_v3, %v2944_v7 }
 0x5b2   : > { %9400 = vmatmul.mubr.bf16.vlgmr.msra.gmra.mrb[20].mxu1 %v13833_v11  ;;  %9081 = vmatpush1.bf16.msra.mxu0 %v11679_v9  ;;  %v2920_v11 = vld [vmem:[%s12849_s8 + $0x1cf8] sm:$0xff]  ;;  %v11721_v9 = vcombine.low %v2932_v22, %v2936_v35 }
 0x5b3   : > { %9112 = vmatprep.mubr.bf16.mxu0 %v13838_v2  ;;  %9409 = vmatpush1.bf16.msra.mxu1 %v11681_v40  ;;  %v11705_v57 = vcombine.low %v2916_v20, %v2920_v11  ;;  %v2947_v40 = vld [vmem:[%s12849_s8 + $0x1dd0] sm:$0xff] }
 0x5b4   : > { %9440 = vmatprep.mubr.bf16.mxu1 %v13838_v2  ;;  %9082 = vmatprep.subr.bf16.mxu0 %v11688_v34  ;;  %v11706_v2 = vcombine.high %v2916_v20, %v2920_v11  ;;  %v2951_v34 = vld [vmem:[%s12849_s8 + $0x1df0] sm:$0xff]  ;;  %v11737_v20 = vcombine.low %v2948_v44, %v2952_v19 }
 0x5b5   : > { %9410 = vmatprep.subr.bf16.mxu1 %v11690_v26  ;;  %v11727_v26 = vcombine.low %v2939_v60, %v2943_v0  ;;  %v11736_v49 = vcombine.high %v2947_v40, %v2951_v34  ;;  %v11735_v38 = vcombine.low %v2947_v40, %v2951_v34  ;;  %v2984_v60 = vld [vmem:[%s12849_s8 + $0x1ef8] sm:$0xff] }
 0x5b6   : > { %9083 = vmatpush1.bf16.msra.mxu0 %v11687_v55  ;;  %v11738_v55 = vcombine.high %v2948_v44, %v2952_v19  ;;  %v2992_v40 = vld [vmem:[%s12849_s8 + $0x1f38] sm:$0xff] }
 0x5b7   : > { %9411 = vmatpush1.bf16.msra.mxu1 %v11689_v54  ;;  %9084 = vmatprep.subr.bf16.mxu0 %v11696_v5  ;;  %v2955_v54 = vld [vmem:[%s12849_s8 + $0x1e10] sm:$0xff] }
 0x5b8   : > { %9412 = vmatprep.subr.bf16.mxu1 %v11698_v27  ;;  %v2959_v5 = vld [vmem:[%s12849_s8 + $0x1e30] sm:$0xff]  ;;  %v2956_v27 = vld [vmem:[%s12849_s8 + $0x1e18] sm:$0xff] }
 0x5b9   : > { %v11744_v11 = vcombine.high %v2955_v54, %v2959_v5  ;;  %v11743_v1 = vcombine.low %v2955_v54, %v2959_v5  ;;  %v11745_v47 = vcombine.low %v2956_v27, %v2960_v48  ;;  %v3000_v54 = vld [vmem:[%s12849_s8 + $0x1f78] sm:$0xff] }
 0x5ba   : > { %9085 = vmatpush1.bf16.msra.mxu0 %v11695_v51  ;;  %v11746_v51 = vcombine.high %v2956_v27, %v2960_v48 }
 0x5bb   : > { %9413 = vmatpush1.bf16.msra.mxu1 %v11697_v4  ;;  %9086 = vmatprep.subr.bf16.mxu0 %v11704_v14  ;;  %v2963_v4 = vld [vmem:[%s12849_s8 + $0x1e50] sm:$0xff] }
 0x5bc   : > { %9414 = vmatprep.subr.bf16.mxu1 %v11706_v2  ;;  %v2967_v14 = vld [vmem:[%s12849_s8 + $0x1e70] sm:$0xff]  ;;  %v2964_v2 = vld [vmem:[%s12849_s8 + $0x1e58] sm:$0xff] }
 0x5bd   : > { %v11752_v15 = vcombine.high %v2963_v4, %v2967_v14  ;;  %v11751_v32 = vcombine.low %v2963_v4, %v2967_v14  ;;  %v11753_v22 = vcombine.low %v2964_v2, %v2968_v41  ;;  %v3008_v4 = vld [vmem:[%s12849_s8 + $0x1fb8] sm:$0xff] }
 0x5be   : > { %9087 = vmatpush1.bf16.msra.mxu0 %v11703_v16  ;;  %v11754_v16 = vcombine.high %v2964_v2, %v2968_v41 }
 0x5bf   : > { %9415 = vmatpush1.bf16.msra.mxu1 %v11705_v57  ;;  %9088 = vmatprep.subr.bf16.mxu0 %v11712_v18  ;;  %v2971_v57 = vld [vmem:[%s12849_s8 + $0x1e90] sm:$0xff] }
 0x5c0   : > { %9416 = vmatprep.subr.bf16.mxu1 %v11714_v17  ;;  %v2975_v18 = vld [vmem:[%s12849_s8 + $0x1eb0] sm:$0xff]  ;;  %v2972_v17 = vld [vmem:[%s12849_s8 + $0x1e98] sm:$0xff] }
 0x5c1   : > { %v11760_v35 = vcombine.high %v2971_v57, %v2975_v18  ;;  %v11759_v0 = vcombine.low %v2971_v57, %v2975_v18  ;;  %v11761_v3 = vcombine.low %v2972_v17, %v2976_v37  ;;  %v3016_v57 = vld [vmem:[%s12849_s8 + $0x1ff8] sm:$0xff] }
 0x5c2   : > { %9089 = vmatpush1.bf16.msra.mxu0 %v11711_v33  ;;  %v11762_v33 = vcombine.high %v2972_v17, %v2976_v37 }
 0x5c3   : > { %9417 = vmatpush1.bf16.msra.mxu1 %v11713_v50  ;;  %9090 = vmatprep.subr.bf16.mxu0 %v11720_v56  ;;  %v2979_v50 = vld [vmem:[%s12849_s8 + $0x1ed0] sm:$0xff] }
 0x5c4   : > { %9418 = vmatprep.subr.bf16.mxu1 %v11722_v42  ;;  %v2983_v56 = vld [vmem:[%s12849_s8 + $0x1ef0] sm:$0xff]  ;;  %v2980_v42 = vld [vmem:[%s12849_s8 + $0x1ed8] sm:$0xff] }
 0x5c5   : > { %v11768_v7 = vcombine.high %v2979_v50, %v2983_v56  ;;  %v11767_v34 = vcombine.low %v2979_v50, %v2983_v56  ;;  %v11769_v44 = vcombine.low %v2980_v42, %v2984_v60  ;;  %v12170_v50 = vld [vmem:[%s14492_s7] sm:$0xff]  }
 0x5c6   : > { %9091 = vmatpush1.bf16.msra.mxu0 %v11719_v45  ;;  %v11770_v45 = vcombine.high %v2980_v42, %v2984_v60  ;;  %v12171_v56 = vld [vmem:[%s14492_s7 + $0x80] sm:$0xff]   ;;  %v12172_v42 = vld [vmem:[%s14492_s7 + $0x48] sm:$0xff]  }
 0x5c7   : > { %9419 = vmatpush1.bf16.msra.mxu1 %v11721_v9  ;;  %9092 = vmatprep.subr.bf16.mxu0 %v11728_v6  ;;  %v2987_v9 = vld [vmem:[%s12849_s8 + $0x1f10] sm:$0xff]  ;;  %v12173_v60 = vld [vmem:[%s14492_s7 + $0xc8] sm:$0xff]  }
 0x5c8   : > { %9420 = vmatprep.subr.bf16.mxu1 %v11730_v63  ;;  %v2991_v6 = vld [vmem:[%s12849_s8 + $0x1f30] sm:$0xff]  ;;  %v2988_v63 = vld [vmem:[%s12849_s8 + $0x1f18] sm:$0xff] }
 0x5c9   : > { %v11776_v19 = vcombine.high %v2987_v9, %v2991_v6  ;;  %v11775_v5 = vcombine.low %v2987_v9, %v2991_v6  ;;  %v11777_v27 = vcombine.low %v2988_v63, %v2992_v40  ;;  %v12178_v9 = vld [vmem:[%s14492_s7 + $0x10] sm:$0xff]  }
 0x5ca   : > { %9093 = vmatpush1.bf16.msra.mxu0 %v11727_v26  ;;  %v11778_v26 = vcombine.high %v2988_v63, %v2992_v40  ;;  %v12179_v6 = vld [vmem:[%s14492_s7 + $0x90] sm:$0xff]   ;;  %v12180_v63 = vld [vmem:[%s14492_s7 + $0x58] sm:$0xff]  }
 0x5cb   : > { %9421 = vmatpush1.bf16.msra.mxu1 %v11729_v13  ;;  %9094 = vmatprep.subr.bf16.mxu0 %v11736_v49  ;;  %v2995_v13 = vld [vmem:[%s12849_s8 + $0x1f50] sm:$0xff] }
 0x5cc   : > { %9422 = vmatprep.subr.bf16.mxu1 %v11738_v55  ;;  %v2999_v49 = vld [vmem:[%s12849_s8 + $0x1f70] sm:$0xff]  ;;  %v2996_v55 = vld [vmem:[%s12849_s8 + $0x1f58] sm:$0xff] }
 0x5cd   : > { %v11784_v48 = vcombine.high %v2995_v13, %v2999_v49  ;;  %v11783_v14 = vcombine.low %v2995_v13, %v2999_v49  ;;  %v11785_v2 = vcombine.low %v2996_v55, %v3000_v54  ;;  %v12181_v40 = vld [vmem:[%s14492_s7 + $0xd8] sm:$0xff]   ;;  %v12186_v13 = vld [vmem:[%s14492_s7 + $0x20] sm:$0xff]  }
 0x5ce   : > { %9095 = vmatpush1.bf16.msra.mxu0 %v11735_v38  ;;  %v11786_v38 = vcombine.high %v2996_v55, %v3000_v54  ;;  %v12187_v49 = vld [vmem:[%s14492_s7 + $0xa0] sm:$0xff]   ;;  %v12188_v55 = vld [vmem:[%s14492_s7 + $0x68] sm:$0xff]  }
 0x5cf   : > { %9423 = vmatpush1.bf16.msra.mxu1 %v11737_v20  ;;  %9096 = vmatprep.subr.bf16.mxu0 %v11744_v11  ;;  %v3003_v20 = vld [vmem:[%s12849_s8 + $0x1f90] sm:$0xff]  ;;  %v12189_v54 = vld [vmem:[%s14492_s7 + $0xe8] sm:$0xff]  }
 0x5d0   : > { %9424 = vmatprep.subr.bf16.mxu1 %v11746_v51  ;;  %v3007_v11 = vld [vmem:[%s12849_s8 + $0x1fb0] sm:$0xff]  ;;  %v3004_v51 = vld [vmem:[%s12849_s8 + $0x1f98] sm:$0xff] }
 0x5d1   : > { %v11792_v41 = vcombine.high %v3003_v20, %v3007_v11  ;;  %v11791_v18 = vcombine.low %v3003_v20, %v3007_v11  ;;  %v11793_v17 = vcombine.low %v3004_v51, %v3008_v4  ;;  %v12194_v20 = vld [vmem:[%s14492_s7 + $0x30] sm:$0xff]  }
 0x5d2   : > { %9097 = vmatpush1.bf16.msra.mxu0 %v11743_v1  ;;  %v11794_v1 = vcombine.high %v3004_v51, %v3008_v4  ;;  %v12195_v11 = vld [vmem:[%s14492_s7 + $0xb0] sm:$0xff]   ;;  %v12196_v51 = vld [vmem:[%s14492_s7 + $0x78] sm:$0xff]  }
 0x5d3   : > { %9425 = vmatpush1.bf16.msra.mxu1 %v11745_v47  ;;  %9098 = vmatprep.subr.bf16.mxu0 %v11752_v15  ;;  %v3011_v47 = vld [vmem:[%s12849_s8 + $0x1fd0] sm:$0xff] }
 0x5d4   : > { %9426 = vmatprep.subr.bf16.mxu1 %v11754_v16  ;;  %v3015_v15 = vld [vmem:[%s12849_s8 + $0x1ff0] sm:$0xff]  ;;  %v3012_v16 = vld [vmem:[%s12849_s8 + $0x1fd8] sm:$0xff] }
 0x5d5   : > { %v11800_v37 = vcombine.high %v3011_v47, %v3015_v15  ;;  %v12197_v4 = vld [vmem:[%s14492_s7 + $0xf8] sm:$0xff]  }
 0x5d6   : > { %9099 = vmatpush1.bf16.msra.mxu0 %v11751_v32  ;;  %v11802_v32 = vcombine.high %v3012_v16, %v3016_v57 }
 0x5d7   : > { %9427 = vmatpush1.bf16.msra.mxu1 %v11753_v22  ;;  %9100 = vmatprep.subr.bf16.mxu0 %v11760_v35  ;;  %v11799_v22 = vcombine.low %v3011_v47, %v3015_v15  ;;  %v11801_v35 = vcombine.low %v3012_v16, %v3016_v57 }
 0x5d8   : > { %9428 = vmatprep.subr.bf16.mxu1 %v11762_v33  ;;  %v12168_v33 = vld [vmem:[%s14492_s7 + $0x40] sm:$0xff]  }
 0x5da   : > { %9101 = vmatpush1.bf16.msra.mxu0 %v11759_v0  ;;  %v12174_v0 = vld [vmem:[%s14492_s7 + $0x8] sm:$0xff]  }
 0x5db   : > { %9429 = vmatpush1.bf16.msra.mxu1 %v11761_v3  ;;  %9102 = vmatprep.subr.bf16.mxu0 %v11768_v7  ;;  %v12175_v3 = vld [vmem:[%s14492_s7 + $0x88] sm:$0xff]   ;;  %v12176_v7 = vld [vmem:[%s14492_s7 + $0x50] sm:$0xff]  }
 0x5dc   : > { %9430 = vmatprep.subr.bf16.mxu1 %v11770_v45  ;;  %v12177_v45 = vld [vmem:[%s14492_s7 + $0xd0] sm:$0xff]  }
 0x5de   : > { %9103 = vmatpush1.bf16.msra.mxu0 %v11767_v34  ;;  %v12182_v34 = vld [vmem:[%s14492_s7 + $0x18] sm:$0xff]  }
 0x5df   : > { %9431 = vmatpush1.bf16.msra.mxu1 %v11769_v44  ;;  %9104 = vmatprep.subr.bf16.mxu0 %v11776_v19  ;;  %v12183_v44 = vld [vmem:[%s14492_s7 + $0x98] sm:$0xff]   ;;  %v12184_v19 = vld [vmem:[%s14492_s7 + $0x60] sm:$0xff]  }
 0x5e0   : > { %9432 = vmatprep.subr.bf16.mxu1 %v11778_v26  ;;  %v12185_v26 = vld [vmem:[%s14492_s7 + $0xe0] sm:$0xff]  }
 0x5e2   : > { %9105 = vmatpush1.bf16.msra.mxu0 %v11775_v5  ;;  %v12190_v5 = vld [vmem:[%s14492_s7 + $0x28] sm:$0xff]  }
 0x5e3   : > { %9433 = vmatpush1.bf16.msra.mxu1 %v11777_v27  ;;  %9106 = vmatprep.subr.bf16.mxu0 %v11784_v48  ;;  %v12191_v27 = vld [vmem:[%s14492_s7 + $0xa8] sm:$0xff]   ;;  %v12192_v48 = vld [vmem:[%s14492_s7 + $0x70] sm:$0xff]  }
 0x5e4   : > { %9434 = vmatprep.subr.bf16.mxu1 %v11786_v38  ;;  %v12193_v38 = vld [vmem:[%s14492_s7 + $0xf0] sm:$0xff]  }
 0x5e6   : > { %9107 = vmatpush1.bf16.msra.mxu0 %v11783_v14  ;;  %v12198_v14 = vld [vmem:[%s14492_s7 + $0x38] sm:$0xff]  }
 0x5e7   : > { %9435 = vmatpush1.bf16.msra.mxu1 %v11785_v2  ;;  %9108 = vmatprep.subr.bf16.mxu0 %v11792_v41  ;;  %v12199_v2 = vld [vmem:[%s14492_s7 + $0xb8] sm:$0xff]   ;;  %v12200_v41 = vld [vmem:[%s14492_s7 + $0x140] sm:$0xff]  }
 0x5e8   : > { %9436 = vmatprep.subr.bf16.mxu1 %v11794_v1  ;;  %v12201_v1 = vld [vmem:[%s14492_s7 + $0x1c0] sm:$0xff]  }
 0x5ea   : > { %9109 = vmatpush1.bf16.msra.mxu0 %v11791_v18 }
 0x5eb   : > { %9437 = vmatpush1.bf16.msra.mxu1 %v11793_v17  ;;  %9110 = vmatprep.subr.bf16.mxu0 %v11800_v37 }
 0x5ec   : > { %9438 = vmatprep.subr.bf16.mxu1 %v11802_v32 }
 0x5ee   : > { %9111 = vmatpush1.bf16.msra.mxu0 %v11799_v22 }
 0x5ef   : > { %9439 = vmatpush1.bf16.msra.mxu1 %v11801_v35  ;;  %11872 = vmatprep.subr.bf16.mxu0 %v12168_v33 }
 0x5f1   : > { %9113 = vmatmul.mubr.bf16.vlgmr.msra.gmra.mrb[20].mxu0 %v13908_v39 }
 0x5f2   : > { %9441 = vmatmul.mubr.bf16.vlgmr.msra.gmra.mrb[20].mxu1 %v13908_v39  ;;  %v12169_v39 = vld [vmem:[%s14492_s7 + $0xc0] sm:$0xff]   ;;  %11873 = vmatpush3.bf16.msra.mxu0 %v12170_v50 }
 0x5f3   : > { %11894 = vmatprep.subr.bf16.mxu1 %v12169_v39  ;;  %11874 = vmatprep.subr.bf16.mxu0 %v12172_v42 }
 0x5f4   : > { %11895 = vmatpush3.bf16.msra.mxu1 %v12171_v56 }
 0x5f5   : > { %11896 = vmatprep.subr.bf16.mxu1 %v12173_v60 }
 0x5f6   : > { %11875 = vmatpush3.bf16.msra.mxu0 %v12174_v0 }
 0x5f7   : > { %11876 = vmatprep.subr.bf16.mxu0 %v12176_v7 }
 0x5f8   : > { %11897 = vmatpush3.bf16.msra.mxu1 %v12175_v3 }
 0x5f9   : > { %11898 = vmatprep.subr.bf16.mxu1 %v12177_v45 }
 0x5fa   : > { %11877 = vmatpush3.bf16.msra.mxu0 %v12178_v9 }
 0x5fb   : > { %11878 = vmatprep.subr.bf16.mxu0 %v12180_v63 }
 0x5fc   : > { %11899 = vmatpush3.bf16.msra.mxu1 %v12179_v6 }
 0x5fd   : > { %11900 = vmatprep.subr.bf16.mxu1 %v12181_v40 }
 0x5fe   : > { %11879 = vmatpush3.bf16.msra.mxu0 %v12182_v34 }
 0x5ff   : > { %11880 = vmatprep.subr.bf16.mxu0 %v12184_v19 }
 0x600   : > { %11901 = vmatpush3.bf16.msra.mxu1 %v12183_v44 }
 0x601   : > { %11902 = vmatprep.subr.bf16.mxu1 %v12185_v26 }
 0x602   : > { %11881 = vmatpush3.bf16.msra.mxu0 %v12186_v13 }
 0x603   : > { %11882 = vmatprep.subr.bf16.mxu0 %v12188_v55 }
 0x604   : > { %11903 = vmatpush3.bf16.msra.mxu1 %v12187_v49 }
 0x605   : > { %11904 = vmatprep.subr.bf16.mxu1 %v12189_v54 }
 0x606   : > { %11883 = vmatpush3.bf16.msra.mxu0 %v12190_v5 }
 0x607   : > { %11884 = vmatprep.subr.bf16.mxu0 %v12192_v48 }
 0x608   : > { %11905 = vmatpush3.bf16.msra.mxu1 %v12191_v27 }
 0x609   : > { %11906 = vmatprep.subr.bf16.mxu1 %v12193_v38 }
 0x60a   : > { %11885 = vmatpush3.bf16.msra.mxu0 %v12194_v20 }
 0x60b   : > { %11886 = vmatprep.subr.bf16.mxu0 %v12196_v51 }
 0x60c   : > { %11907 = vmatpush3.bf16.msra.mxu1 %v12195_v11 }
 0x60d   : > { %11908 = vmatprep.subr.bf16.mxu1 %v12197_v4 }
 0x60e   : > { %11887 = vmatpush3.bf16.msra.mxu0 %v12198_v14 }
 0x60f   : > { %11916 = vmatprep.subr.bf16.mxu0 %v12200_v41 }
 0x610   : > { %11909 = vmatpush3.bf16.msra.mxu1 %v12199_v2 }
 0x611   : > { %11938 = vmatprep.subr.bf16.mxu1 %v12201_v1 }
 0x6c4   : > { %v14528_v47 = vpop.f32.mrb[20].mxu0 }
 0x6c5   : > { %v9475_v15 = vrot.slane %v14528_v47, 4  ;;  %v14531_v16 = vpop.f32.mrb[20].mxu1  ;;  %v14533_v57 = vpop.f32.mrb[21].mxu0 }
 0x6c6   : > { %v9487_v18 = vrot.slane %v14531_v16, 4  ;;  %v9481_v17 = vrot.slane %v14533_v57, 4  ;;  %v14537_v37 = vpop.f32.mrb[21].mxu1  ;;  %v9118_v32 = vpop.f32.mrb[22].mxu0 }
 0x6c7   : > { %v9476_v22 = vadd.f32 %v9475_v15, %v14528_v47  ;;  %v9493_v35 = vrot.slane %v14537_v37, 4  ;;  %v9446_v33 = vpop.f32.mrb[22].mxu1  ;;  %v9119_v39 = vpop.f32.mrb[23].mxu0 }
 0x6c8   : > { %v9488_v50 = vadd.f32 %v9487_v18, %v14531_v16  ;;  %v9482_v56 = vadd.f32 %v9481_v17, %v14533_v57  ;;  %v9447_v42 = vpop.f32.mrb[23].mxu1 }
 0x6c9   : > { %v9477_v60 = vrot.slane %v9476_v22, 2  ;;  %v9494_v0 = vadd.f32 %v9493_v35, %v14537_v37 }
 0x6ca   : > { %v9489_v3 = vrot.slane %v9488_v50, 2  ;;  %v9483_v7 = vrot.slane %v9482_v56, 2 }
 0x6cb   : > { %v9478_v45 = vadd.f32 %v9477_v60, %v9476_v22  ;;  %v9495_v9 = vrot.slane %v9494_v0, 2 }
 0x6cc   : > { %v9490_v6 = vadd.f32 %v9489_v3, %v9488_v50  ;;  %v9484_v63 = vadd.f32 %v9483_v7, %v9482_v56 }
 0x6cd   : > { %v9479_v40 = vrot.slane %v9478_v45, 1  ;;  %v9496_v34 = vadd.f32 %v9495_v9, %v9494_v0 }
 0x6ce   : > { %v9491_v44 = vrot.slane %v9490_v6, 1  ;;  %v9485_v19 = vrot.slane %v9484_v63, 1 }
 0x6cf   : > { %v9480_v26 = vadd.f32 %v9479_v40, %v9478_v45  ;;  %v9497_v13 = vrot.slane %v9496_v34, 1 }
 0x6d0   : > { %v9492_v49 = vadd.f32 %v9491_v44, %v9490_v6  ;;  %v9486_v55 = vadd.f32 %v9485_v19, %v9484_v63 }
 0x6d1   : > { %v14544_v54 = vmul.f32 0.125, %v9480_v26  ;;  %v9498_v5 = vadd.f32 %v9497_v13, %v9496_v34 }
 0x6d2   : > { %v14546_v27 = vmul.f32 0.125, %v9492_v49  ;;  %v14548_v48 = vmul.f32 0.125, %v9486_v55 }
 0x6d3   : > { %v9511_v38 = vsub.f32 %v14528_v47, %v14544_v54  ;;  %v14552_v20 = vmul.f32 0.125, %v9498_v5 }
 0x6d4   : > { %v9513_v11 = vsub.f32 %v14531_v16, %v14546_v27  ;;  %v9512_v51 = vsub.f32 %v14533_v57, %v14548_v48 }
 0x6d5   : > { %v9519_v4 = vmul.f32 %v9511_v38, %v9511_v38  ;;  %v9514_v14 = vsub.f32 %v14537_v37, %v14552_v20 }
 0x6d6   : > { %v9521_v2 = vmul.f32 %v9513_v11, %v9513_v11  ;;  %v9520_v41 = vmul.f32 %v9512_v51, %v9512_v51 }
 0x6d7   : > { %v9547_v1 = vrot.slane %v9519_v4, 4  ;;  %v9522_v15 = vmul.f32 %v9514_v14, %v9514_v14 }
 0x6d8   : > { %v9559_v18 = vrot.slane %v9521_v2, 4  ;;  %v9553_v17 = vrot.slane %v9520_v41, 4 }
 0x6d9   : > { %v9548_v32 = vadd.f32 %v9547_v1, %v9519_v4  ;;  %v9565_v22 = vrot.slane %v9522_v15, 4 }
 0x6da   : > { %v9560_v35 = vadd.f32 %v9559_v18, %v9521_v2  ;;  %v9554_v33 = vadd.f32 %v9553_v17, %v9520_v41 }
 0x6db   : > { %v9549_v39 = vrot.slane %v9548_v32, 2  ;;  %v9566_v50 = vadd.f32 %v9565_v22, %v9522_v15 }
 0x6dc   : > { %v9561_v56 = vrot.slane %v9560_v35, 2  ;;  %v9555_v42 = vrot.slane %v9554_v33, 2 }
 0x6dd   : > { %v9550_v60 = vadd.f32 %v9549_v39, %v9548_v32  ;;  %v9567_v0 = vrot.slane %v9566_v50, 2  ;;  %v9449_v39 = vld [vmem:[%s400_s19] sm:$0xff] }
 0x6de   : > { %v9562_v3 = vadd.f32 %v9561_v56, %v9560_v35  ;;  %v9556_v7 = vadd.f32 %v9555_v42, %v9554_v33  ;;  %v9643_v35 = vrot.slane %v9635_v28, %v13046_v24 }
 0x6df   : > { %v9551_v45 = vrot.slane %v9550_v60, 1  ;;  %v9568_v9 = vadd.f32 %v9567_v0, %v9566_v50 }
 0x6e0   : > { %v9563_v6 = vrot.slane %v9562_v3, 1  ;;  %v9557_v63 = vrot.slane %v9556_v7, 1 }
 0x6e1   : > { %v9552_v40 = vadd.f32 %v9551_v45, %v9550_v60  ;;  %v9569_v34 = vrot.slane %v9568_v9, 1 }
 0x6e2   : > { %v9564_v44 = vadd.f32 %v9563_v6, %v9562_v3  ;;  %v9558_v19 = vadd.f32 %v9557_v63, %v9556_v7 }
 0x6e3   : > { %v9575_v26 = vmul.f32 0.125, %v9552_v40  ;;  %v9570_v13 = vadd.f32 %v9569_v34, %v9568_v9 }
 0x6e4   : > { %v9577_v49 = vmul.f32 0.125, %v9564_v44  ;;  %v9576_v55 = vmul.f32 0.125, %v9558_v19 }
 0x6e5   : > { %v9583_v5 = vadd.f32 1e-05, %v9575_v26  ;;  %v9578_v38 = vmul.f32 0.125, %v9570_v13 }
 0x6e6   : > { %v9585_v11 = vadd.f32 1e-05, %v9577_v49  ;;  %v9584_v51 = vadd.f32 1e-05, %v9576_v55 }
 0x6e7   : > { %12272 = vrsqrt.f32 %v9583_v5  ;;  %v9586_v4 = vadd.f32 1e-05, %v9578_v38 }
 0x6e8   : > { %12274 = vrsqrt.f32 %v9585_v11 }
 0x6e9   : > { %12276 = vrsqrt.f32 %v9584_v51 }
 0x6ea   : > { %12278 = vrsqrt.f32 %v9586_v4  ;;  %v9450_v4 = vld [vmem:[%s409_s17] sm:$0xff] }
 0x6f1   : > { %v12273_v14 = vpop.eup %12272 }
 0x6f2   : > { %v12275_v2 = vpop.eup %12274 }
 0x6f3   : > { %v12277_v41 = vpop.eup %12276 }
 0x6f4   : > { %v12279_v1 = vpop.eup %12278  ;;  %v9605_v15 = vcombine.low %v12273_v14, %v12277_v41 }
 0x6f5   : > { %v9606_v18 = vcombine.low %v12275_v2, %v12279_v1 }
 0x6f6   : > { %v9627_v17 = vrot.slane %v9605_v15, %v13046_v24 }
 0x6f7   : > { %v9634_v32 = vrot.slane %v9606_v18, %v13046_v24 }
 0x6f9   : > { %v9636_v22 = vcombine.low %v9627_v17, %v9634_v32 }
 0x6fb   : > { %v9650_v33 = vrot.slane %v9636_v22, %v13046_v24 }
 0x6fd   : > { %v9651_v50 = vcombine.low %v9643_v35, %v9650_v33 }
 0x6ff   : > { %v9653_v56 = vmul.f32 %v9651_v50, %v9449_v39 }
 0x701   : > { %v9658_v42 = vrot.slane %v9653_v56, %v13050_v29  ;;  %v9662_v60 = vrot.slane %v9653_v56, %v13054_v36  ;;  %v9666_v0 = vrot.slane %v9653_v56, %v13076_v58  ;;  %v9670_v3 = vrot.slane %v9653_v56, %v13083_v62 }
 0x702   : > { %v9674_v7 = vrot.slane %v9653_v56, %v13088_v12  ;;  %v9678_v45 = vrot.slane %v9653_v56, %v13092_v25  ;;  %v9682_v43 = vrot.slane %v9653_v56, %v13095_v30  ;;  %v9686_v21 = vrot.slane %v9653_v56, %v13121_v31 }
 0x703   : > { %v9695_v28 = vmul.f32 %v9658_v42, %v14168_v23  ;;  %v9696_v9 = vmul.f32 %v9662_v60, %v14174_v53  ;;  %v9697_v6 = vmul.f32 %v9666_v0, %v14172_v46  ;;  %v9698_v63 = vmul.f32 %v9670_v3, %v14178_v52 }
 0x704   : > { %v9699_v40 = vmul.f32 %v9674_v7, %v14544_v54  ;;  %v9700_v34 = vmul.f32 %v9678_v45, %v14548_v48  ;;  %v9701_v44 = vmul.f32 %v9682_v43, %v14546_v27  ;;  %v9702_v19 = vmul.f32 %v9686_v21, %v14552_v20 }
 0x705   : > { %v9711_v26 = vcombine.low %v9695_v28, %v9696_v9  ;;  %v9712_v13 = vcombine.low %v9697_v6, %v9698_v63  ;;  %v9769_v49 = vmul.f32 %v9686_v21, %v14537_v37  ;;  %v9763_v23 = vmul.f32 %v9662_v60, %v14145_v59  ;;  %v12204_v21 = vld [vmem:[%s14492_s7 + $0x148] sm:$0xff]  }
 0x706   : > { %v9713_v55 = vcombine.low %v9699_v40, %v9700_v34  ;;  %v9714_v53 = vcombine.low %v9701_v44, %v9702_v19  ;;  %v9765_v46 = vmul.f32 %v9670_v3, %v14151_v8  ;;  %v9762_v52 = vmul.f32 %v9658_v42, %v14138_v61  ;;  %v12203_v3 = vld [vmem:[%s14492_s7 + $0x180] sm:$0xff]   ;;  %v12205_v9 = vld [vmem:[%s14492_s7 + $0x1c8] sm:$0xff]   ;;  %v12208_v19 = vld [vmem:[%s14492_s7 + $0x150] sm:$0xff]  }
 0x707   : > { %v9721_v54 = vrot.slane %v9711_v26, %v13046_v24  ;;  %v9728_v48 = vrot.slane %v9712_v13, %v13046_v24  ;;  %v9764_v27 = vmul.f32 %v9666_v0, %v14143_v10  ;;  %v9767_v20 = vmul.f32 %v9678_v45, %v14533_v57  ;;  %v12202_v0 = vld [vmem:[%s14492_s7 + $0x100] sm:$0xff]   ;;  %v12206_v40 = vld [vmem:[%s14492_s7 + $0x108] sm:$0xff]   ;;  %v12209_v26 = vld [vmem:[%s14492_s7 + $0x1d0] sm:$0xff]  }
 0x708   : > { %v9735_v5 = vrot.slane %v9713_v55, %v13046_v24  ;;  %v9742_v37 = vrot.slane %v9714_v53, %v13046_v24  ;;  %v9766_v59 = vmul.f32 %v9674_v7, %v14528_v47  ;;  %v9768_v38 = vmul.f32 %v9682_v43, %v14531_v16  ;;  %v12207_v34 = vld [vmem:[%s14492_s7 + $0x188] sm:$0xff]   ;;  %v12210_v13 = vld [vmem:[%s14492_s7 + $0x110] sm:$0xff]   ;;  %v12213_v55 = vld [vmem:[%s14492_s7 + $0x1d8] sm:$0xff]  }
 0x709   : > { %v9743_v11 = vcombine.low %v9721_v54, %v9728_v48  ;;  %v12214_v53 = vld [vmem:[%s14492_s7 + $0x118] sm:$0xff]   ;;  %v12217_v54 = vld [vmem:[%s14492_s7 + $0x1e0] sm:$0xff]  }
 0x70a   : > { %v9744_v8 = vcombine.low %v9735_v5, %v9742_v37  ;;  %v12218_v48 = vld [vmem:[%s14492_s7 + $0x120] sm:$0xff]   ;;  %v12221_v5 = vld [vmem:[%s14492_s7 + $0x1e8] sm:$0xff]  }
 0x70b   : > { %v9751_v61 = vrot.slane %v9743_v11, %v13046_v24  ;;  %v12222_v37 = vld [vmem:[%s14492_s7 + $0x128] sm:$0xff]   ;;  %v12225_v11 = vld [vmem:[%s14492_s7 + $0x1f0] sm:$0xff]  }
 0x70c   : > { %v9758_v51 = vrot.slane %v9744_v8, %v13046_v24  ;;  %v12226_v8 = vld [vmem:[%s14492_s7 + $0x130] sm:$0xff]  }
 0x70e   : > { %v9759_v14 = vcombine.low %v9751_v61, %v9758_v51  ;;  %v12227_v61 = vld [vmem:[%s14492_s7 + $0x1b0] sm:$0xff]   ;;  %v12228_v51 = vld [vmem:[%s14492_s7 + $0x178] sm:$0xff]  }
 0x710   : > { %v9761_v10 = vsub.f32 %v9450_v4, %v9759_v14  ;;  %v12229_v4 = vld [vmem:[%s14492_s7 + $0x1f8] sm:$0xff]  }
 0x712   : > { %v9802_v57 = vrot.slane %v9761_v10, %v13121_v31  ;;  %v9778_v2 = vrot.slane %v9761_v10, %v13054_v36  ;;  %v9786_v41 = vrot.slane %v9761_v10, %v13083_v62  ;;  %v9774_v47 = vrot.slane %v9761_v10, %v13050_v29 }
 0x713   : > { %v9782_v16 = vrot.slane %v9761_v10, %v13076_v58  ;;  %v9794_v1 = vrot.slane %v9761_v10, %v13092_v25  ;;  %v9790_v15 = vrot.slane %v9761_v10, %v13088_v12  ;;  %v9798_v24 = vrot.slane %v9761_v10, %v13095_v30 }
 0x714   : > { %v9818_v18 = vadd.f32 %v9802_v57, %v9769_v49  ;;  %v9812_v17 = vadd.f32 %v9778_v2, %v9763_v23  ;;  %v9814_v32 = vadd.f32 %v9786_v41, %v9765_v46  ;;  %v9811_v22 = vadd.f32 %v9774_v47, %v9762_v52  ;;  %v12211_v49 = vld [vmem:[%s14492_s7 + $0x190] sm:$0xff]   ;;  %v12212_v23 = vld [vmem:[%s14492_s7 + $0x158] sm:$0xff]   ;;  %v12216_v52 = vld [vmem:[%s14492_s7 + $0x160] sm:$0xff]  }
 0x715   : > { %v9813_v35 = vadd.f32 %v9782_v16, %v9764_v27  ;;  %v9816_v31 = vadd.f32 %v9794_v1, %v9767_v20  ;;  %v14611_v33 = vadd.f32 %v9790_v15, %v9766_v59  ;;  %v14613_v36 = vadd.f32 %v9798_v24, %v9768_v38  ;;  %v12215_v46 = vld [vmem:[%s14492_s7 + $0x198] sm:$0xff]   ;;  %v12219_v27 = vld [vmem:[%s14492_s7 + $0x1a0] sm:$0xff]   ;;  %v12220_v20 = vld [vmem:[%s14492_s7 + $0x168] sm:$0xff]  }
 0x716   : > { %vm9820_vm1 = vcmp.gt.f32.partialorder %v9812_v17, 0.0  ;;  %v9828_v29 = vmul.f32 0.02, %v9812_v17  ;;  %vm9822_vm2 = vcmp.gt.f32.partialorder %v9814_v32, 0.0  ;;  %v9830_v58 = vmul.f32 0.02, %v9814_v32 }
 0x717   : > { %vm9819_vm3 = vcmp.gt.f32.partialorder %v9811_v22, 0.0  ;;  %v9827_v62 = vmul.f32 0.02, %v9811_v22  ;;  %vm9821_vm4 = vcmp.gt.f32.partialorder %v9813_v35, 0.0  ;;  %v9829_v12 = vmul.f32 0.02, %v9813_v35 }
 0x718   : > { %v9836_v25 = vsel %vm9820_vm1, %v9812_v17, %v9828_v29  ;;  %v9838_v30 = vsel %vm9822_vm2, %v9814_v32, %v9830_v58  ;;  %vm9824_vm5 = vcmp.gt.f32.partialorder %v9816_v31, 0.0  ;;  %v9832_v39 = vmul.f32 0.02, %v9816_v31  ;;  %v12223_v59 = vld [vmem:[%s14492_s7 + $0x1a8] sm:$0xff]   ;;  %v12224_v38 = vld [vmem:[%s14492_s7 + $0x170] sm:$0xff]   ;;  %v12230_v57 = vld [vmem:[%s14492_s7 + $0x138] sm:$0xff]  }
 0x719   : > { %v9844_v50 = vpack.c.bf16 %v9836_v25, %v9836_v25  ;;  %v9846_v56 = vpack.c.bf16 %v9838_v30, %v9838_v30  ;;  %v9835_v42 = vsel %vm9819_vm3, %v9811_v22, %v9827_v62  ;;  %v9837_v60 = vsel %vm9821_vm4, %v9813_v35, %v9829_v12  ;;  %v12231_v2 = vld [vmem:[%s14492_s7 + $0x1b8] sm:$0xff]  }
 0x71a   : > { %v9843_v7 = vpack.c.bf16 %v9835_v42, %v9835_v42  ;;  %v9845_v45 = vpack.c.bf16 %v9837_v60, %v9837_v60  ;;  %v9840_v43 = vsel %vm9824_vm5, %v9816_v31, %v9832_v39  ;;  %vm9826_vm6 = vcmp.gt.f32.partialorder %v9818_v18, 0.0 }
 0x71b   : > { %10395 = vmatprep.mubr.bf16.mxu0 %v9844_v50  ;;  %10435 = vmatprep.mubr.bf16.mxu1 %v9846_v56  ;;  %v9834_v28 = vmul.f32 0.02, %v9818_v18  ;;  %v9848_v6 = vpack.c.bf16 %v9840_v43, %v9840_v43  ;;  %v9831_v14 = vmul.f32 0.02, %v14611_v33  ;;  %v9833_v10 = vmul.f32 0.02, %v14613_v36 }
 0x71c   : > { %10396 = vmatmul.mubr.bf16.vlgmr.msra.gmra.mrb[24].mxu0 %v9843_v7  ;;  %10436 = vmatmul.mubr.bf16.vlgmr.msra.gmra.mrb[24].mxu1 %v9845_v45  ;;  %vm9823_vm7 = vcmp.gt.f32.partialorder %v14611_v33, 0.0  ;;  %vm9825_vm8 = vcmp.gt.f32.partialorder %v14613_v36, 0.0 }
 0x71d   : > { %11917 = vmatpush3.bf16.msra.mxu0 %v12202_v0  ;;  %11939 = vmatpush3.bf16.msra.mxu1 %v12203_v3  ;;  %v9842_v63 = vsel %vm9826_vm6, %v9818_v18, %v9834_v28  ;;  %v9839_v41 = vsel %vm9823_vm7, %v14611_v33, %v9831_v14  ;;  %v9841_v47 = vsel %vm9825_vm8, %v14613_v36, %v9833_v10 }
 0x71e   : > { %10475 = vmatprep.mubr.bf16.mxu0 %v9848_v6  ;;  %v9850_v44 = vpack.c.bf16 %v9842_v63, %v9842_v63  ;;  %11918 = vmatprep.subr.bf16.mxu0 %v12204_v21  ;;  %v9847_v16 = vpack.c.bf16 %v9839_v41, %v9839_v41  ;;  %v9849_v1 = vpack.c.bf16 %v9841_v47, %v9841_v47 }
 0x71f   : > { %11940 = vmatprep.subr.bf16.mxu1 %v12205_v9 }
 0x720   : > { %10515 = vmatprep.mubr.bf16.mxu1 %v9850_v44 }
 0x721   : > { %11919 = vmatpush3.bf16.msra.mxu0 %v12206_v40  ;;  %11941 = vmatpush3.bf16.msra.mxu1 %v12207_v34 }
 0x722   : > { %11920 = vmatprep.subr.bf16.mxu0 %v12208_v19  ;;  %11942 = vmatprep.subr.bf16.mxu1 %v12209_v26 }
 0x725   : > { %11921 = vmatpush3.bf16.msra.mxu0 %v12210_v13  ;;  %11943 = vmatpush3.bf16.msra.mxu1 %v12211_v49 }
 0x726   : > { %11922 = vmatprep.subr.bf16.mxu0 %v12212_v23  ;;  %11944 = vmatprep.subr.bf16.mxu1 %v12213_v55 }
 0x729   : > { %11923 = vmatpush3.bf16.msra.mxu0 %v12214_v53  ;;  %11945 = vmatpush3.bf16.msra.mxu1 %v12215_v46 }
 0x72a   : > { %11924 = vmatprep.subr.bf16.mxu0 %v12216_v52  ;;  %11946 = vmatprep.subr.bf16.mxu1 %v12217_v54 }
 0x72d   : > { %11925 = vmatpush3.bf16.msra.mxu0 %v12218_v48  ;;  %11947 = vmatpush3.bf16.msra.mxu1 %v12219_v27 }
 0x72e   : > { %11926 = vmatprep.subr.bf16.mxu0 %v12220_v20  ;;  %11948 = vmatprep.subr.bf16.mxu1 %v12221_v5 }
 0x731   : > { %11927 = vmatpush3.bf16.msra.mxu0 %v12222_v37  ;;  %11949 = vmatpush3.bf16.msra.mxu1 %v12223_v59 }
 0x732   : > { %11928 = vmatprep.subr.bf16.mxu0 %v12224_v38  ;;  %11950 = vmatprep.subr.bf16.mxu1 %v12225_v11 }
 0x735   : > { %11929 = vmatpush3.bf16.msra.mxu0 %v12226_v8  ;;  %11951 = vmatpush3.bf16.msra.mxu1 %v12227_v61 }
 0x736   : > { %11930 = vmatprep.subr.bf16.mxu0 %v12228_v51  ;;  %11952 = vmatprep.subr.bf16.mxu1 %v12229_v4 }
 0x739   : > { %11931 = vmatpush3.bf16.msra.mxu0 %v12230_v57  ;;  %11953 = vmatpush3.bf16.msra.mxu1 %v12231_v2 }
 0x73c   : > { %10476 = vmatmul.mubr.bf16.vlgmr.msra.gmra.mrb[28].mxu0 %v9847_v16  ;;  %10516 = vmatmul.mubr.bf16.vlgmr.msra.gmra.mrb[28].mxu1 %v9849_v1 }
 0x7ef   : > { %v11888_v15 = vpop.f32.mrb[24].mxu0  ;;  %v11910_v24 = vpop.f32.mrb[24].mxu1 }
 0x7f0   : > { %v11889_v18 = vpop.f32.mrb[25].mxu0  ;;  %v11911_v17 = vpop.f32.mrb[25].mxu1 }
 0x7f1   : > { %v11890_v32 = vadd.f32 %v11889_v18, %v11888_v15  ;;  %v11912_v22 = vadd.f32 %v11911_v17, %v11910_v24  ;;  %v11891_v35 = vpop.f32.mrb[26].mxu0  ;;  %v11913_v31 = vpop.f32.mrb[26].mxu1 }
 0x7f2   : > { %v11892_v29 = vpop.f32.mrb[27].mxu0  ;;  %v11914_v33 = vpop.f32.mrb[27].mxu1 }
 0x7f3   : > { %v10438_v58 = vadd.f32 %v11912_v22, %v11890_v32 }
 0x80f   : > { %v11932_v36 = vpop.f32.mrb[28].mxu0  ;;  %v11954_v62 = vpop.f32.mrb[28].mxu1 }
 0x810   : > { %v11933_v12 = vpop.f32.mrb[29].mxu0  ;;  %v11955_v25 = vpop.f32.mrb[29].mxu1 }
 0x811   : > { %v11934_v30 = vadd.f32 %v11933_v12, %v11932_v36  ;;  %v11956_v39 = vadd.f32 %v11955_v25, %v11954_v62  ;;  %v11935_v50 = vpop.f32.mrb[30].mxu0  ;;  %v11957_v56 = vpop.f32.mrb[30].mxu1 }
 0x812   : > { %v11936_v42 = vpop.f32.mrb[31].mxu0  ;;  %v11958_v60 = vpop.f32.mrb[31].mxu1 }
 0x813   : > { %v10478_v0 = vadd.f32 %v11934_v30, %v10438_v58 }
 0x815   : > { %v10518_v3 = vadd.f32 %v11956_v39, %v10478_v0 }
 0x817   : > { %10524 = vst.msk [vmem:[%s468_s27] sm:$0xff] %vm10523_vm9, %v10518_v3 }
 0x818 PF: > { %s14766_s30 = sld [smem:[#allocation16_spill]]  ;;  %s14767_s4 = sld [smem:[#allocation17_spill]] }
 0x819   : > { %s14768_s27 = smov %s12520_s28  ;;  %s14769_s28 = smov %s12524_s29 }
 0x81e   : > { %p18_p9 = scmp.ge.s32.totalorder %s14766_s30, 4   ;;  %s14770_s29 = smov %s14767_s4 }
 0x820   :  { %20 = sbr.rel (!%p18_p9) target bundleno = 9 (0x9), region = 132 }
 0x827   :  { %10544 = vsyncpa [#allocation3], 1 }
 0x828   :  { %10546 = vsyncpa [#allocation3 + $0x1], 1 }
 0x829   :  { %10547 = vsyncpa [#allocation5], 1 }
 0x82a   :  { %10548 = vsyncpa [#allocation8], 1 }

</bundles_post_ra>
